<compile_context>
chip_gen: v7x
topology: tpu7x:2x2x1
jax: 0.10.0
libtpu: 0.0.40
codegen_flags: <defaults>
</compile_context>

<pallas_src>
import jax
import jax.numpy as jnp
from jax.experimental import pallas as pl
from jax.experimental.pallas import tpu as pltpu

F32 = jnp.float32
EPS = 1e-5


def _out_size(n, k, s, p):
    return (n + 2 * p - k) // s + 1


def _even_row_selector(n_out, n_in):
    """(n_out, n_in) 0/1 matrix with sel[j, p] = 1 iff p == 2*j.

    Left-multiplying a (n_in, C) value by this picks every other row with one
    tiny MXU matmul — no strided loads / gathers needed anywhere."""
    r = jax.lax.broadcasted_iota(jnp.int32, (n_out, n_in), 0)
    c = jax.lax.broadcasted_iota(jnp.int32, (n_out, n_in), 1)
    return (c == 2 * r).astype(F32)


def _make_kernel(H, W, C1, C2, C3):
    H1, W1 = _out_size(H, 3, 2, 0), _out_size(W, 3, 2, 0)
    H2, W2 = _out_size(H1, 3, 2, 1), _out_size(W1, 3, 2, 1)
    H3, W3 = _out_size(H2, 3, 2, 1), _out_size(W2, 3, 2, 1)
    WF1 = W - 2                      # stride-1 valid width of stage 1

    def kernel(x_ref, w1_ref, b1_ref, dw1_ref, b2_ref, pw1_ref, b3_ref,
               dw2_ref, b4_ref, pw2_ref, b5_ref, o_ref, buf1, buf2):
        # ---- hoist all weight / bias loads out of the spatial loops --------
        w1 = w1_ref[...].astype(F32)          # (27, C1)  [(ki,kj,ci) -> co]
        dw1 = dw1_ref[...].astype(F32)        # (9, C1)
        dw2 = dw2_ref[...].astype(F32)        # (9, C2)
        pw1 = pw1_ref[...].astype(F32)        # (C1, C2)
        pw2 = pw2_ref[...].astype(F32)        # (C2, C3)
        b1 = b1_ref[...].astype(F32)          # (1, C1)
        b2 = b2_ref[...].astype(F32)          # (1, C1)
        b3 = b3_ref[...].astype(F32)          # (1, C2)
        b4 = b4_ref[...].astype(F32)          # (1, C2)
        b5 = b5_ref[...].astype(F32)          # (1, C3)

        sel1 = _even_row_selector(W1, WF1)    # stride-2 column sub-sampling
        sel2 = _even_row_selector(W2, W1)
        sel3 = _even_row_selector(W3, W2)

        # Zero the zero-padded staging buffers every grid step (tens of KiB).
        buf1[...] = jnp.zeros((H1 + 2, W1 + 2, C1), F32)
        buf2[...] = jnp.zeros((H2 + 2, W2 + 2, C2), F32)

        # ---- stage 1: Conv2d(3 -> C1, 3x3, s2, p0) + BN + ReLU -------------
        for i in range(H1):
            acc = jnp.zeros((WF1, C1), F32)
            for ki in range(3):
                rowv = x_ref[0, 2 * i + ki, :, :].astype(F32)        # (W, 3)
                for kj in range(3):
                    t = 3 * ki + kj
                    acc = acc + jnp.dot(rowv[kj:kj + WF1, :],
                                        w1[3 * t:3 * t + 3, :],
                                        preferred_element_type=F32)
            row1 = jnp.dot(sel1, acc, preferred_element_type=F32)    # (W1, C1)
            row1 = jnp.maximum(row1 + b1, 0.0)
            buf1[1 + i, 1:1 + W1, :] = row1

        # ---- stage 2: dw 3x3 s2 p1 + BN + ReLU, then 1x1 -> C2 + BN + ReLU -
        for i in range(H2):
            acc = jnp.zeros((W1, C1), F32)
            for ki in range(3):
                rowv = buf1[2 * i + ki, :, :]                        # (W1+2, C1)
                for kj in range(3):
                    t = 3 * ki + kj
                    acc = acc + rowv[kj:kj + W1, :] * dw1[t:t + 1, :]
            h = jnp.maximum(acc + b2, 0.0)                           # (W1, C1)
            hs = jnp.dot(sel2, h, preferred_element_type=F32)        # (W2, C1)
            p = jnp.dot(hs, pw1, preferred_element_type=F32) + b3    # (W2, C2)
            buf2[1 + i, 1:1 + W2, :] = jnp.maximum(p, 0.0)

        # ---- stage 3: dw 3x3 s2 p1 + BN + ReLU, then 1x1 -> C3 + BN + ReLU -
        for i in range(H3):
            acc = jnp.zeros((W2, C2), F32)
            for ki in range(3):
                rowv = buf2[2 * i + ki, :, :]                        # (W2+2, C2)
                for kj in range(3):
                    t = 3 * ki + kj
                    acc = acc + rowv[kj:kj + W2, :] * dw2[t:t + 1, :]
            h = jnp.maximum(acc + b4, 0.0)                           # (W2, C2)
            hs = jnp.dot(sel3, h, preferred_element_type=F32)        # (W3, C2)
            p = jnp.dot(hs, pw2, preferred_element_type=F32) + b5    # (W3, C3)
            o_ref[0, i, :, :] = jnp.maximum(p, 0.0).astype(o_ref.dtype)

    return kernel, (H1, W1, H2, W2, H3, W3)


def _fold_bn(w_oihw, bn):
    """Fold eval-mode BatchNorm into a conv weight (per-out-channel scale) + bias."""
    gamma, beta, mean, var = bn
    scale = gamma / jnp.sqrt(var + EPS)
    bias = beta - mean * scale
    return w_oihw * scale[:, None, None, None], bias


@jax.jit
def learning_to_downsample(x_nchw, params):
    N, Cin, H, W = x_nchw.shape
    assert Cin == 3, "LearningToDownsample expects 3 input channels"

    w1, b1 = _fold_bn(params["conv1_w"], params["bn1"])
    dw1, b2 = _fold_bn(params["dw1_w"], params["bn2"])
    pw1, b3 = _fold_bn(params["pw1_w"], params["bn3"])
    dw2, b4 = _fold_bn(params["dw2_w"], params["bn4"])
    pw2, b5 = _fold_bn(params["pw2_w"], params["bn5"])

    C1, C2, C3 = w1.shape[0], pw1.shape[0], pw2.shape[0]

    # Kernel-friendly layouts: channels last (lanes), 3x3 taps flattened.
    w1_k = jnp.transpose(w1, (2, 3, 1, 0)).reshape(27, C1)       # [(ki,kj,ci), co]
    dw1_k = jnp.transpose(dw1[:, 0], (1, 2, 0)).reshape(9, C1)   # [(ki,kj), c]
    pw1_k = jnp.transpose(pw1[:, :, 0, 0], (1, 0))               # (C1, C2)
    dw2_k = jnp.transpose(dw2[:, 0], (1, 2, 0)).reshape(9, C2)   # [(ki,kj), c]
    pw2_k = jnp.transpose(pw2[:, :, 0, 0], (1, 0))               # (C2, C3)
    b1, b2, b3, b4, b5 = (b.reshape(1, -1) for b in (b1, b2, b3, b4, b5))

    x_nhwc = jnp.transpose(x_nchw, (0, 2, 3, 1))

    kernel, (H1, W1, H2, W2, H3, W3) = _make_kernel(H, W, C1, C2, C3)

    def full_spec(*shape):
        nd = len(shape)
        return pl.BlockSpec(shape, lambda n: (0,) * nd)

    out_nhwc = pl.pallas_call(
        kernel,
        out_shape=jax.ShapeDtypeStruct((N, H3, W3, C3), x_nchw.dtype),
        grid=(N,),
        in_specs=[
            pl.BlockSpec((1, H, W, 3), lambda n: (n, 0, 0, 0)),   # one image (NHWC)
            full_spec(27, C1), full_spec(1, C1),                  # conv1 w, bias
            full_spec(9, C1), full_spec(1, C1),                   # dw1 w, bias
            full_spec(C1, C2), full_spec(1, C2),                  # pw1 w, bias
            full_spec(9, C2), full_spec(1, C2),                   # dw2 w, bias
            full_spec(C2, C3), full_spec(1, C3),                  # pw2 w, bias
        ],
        out_specs=pl.BlockSpec((1, H3, W3, C3), lambda n: (n, 0, 0, 0)),
        scratch_shapes=[
            pltpu.VMEM((H1 + 2, W1 + 2, C1), jnp.float32),  # stage-1 out (zero-padded)
            pltpu.VMEM((H2 + 2, W2 + 2, C2), jnp.float32),  # stage-2 out (zero-padded)
        ],
        compiler_params=pltpu.CompilerParams(
            dimension_semantics=("parallel",)),
    )(x_nhwc, w1_k, b1, dw1_k, b2, pw1_k, b3, dw2_k, b4, pw2_k, b5)

    return jnp.transpose(out_nhwc, (0, 3, 1, 2))   # back to NCHW


if __name__ == "__main__":
    key = jax.random.PRNGKey(0)
    ks = jax.random.split(key, 11)

    N, H, W = 2, 32, 32
    C1, C2, C3 = 32, 48, 64   # module defaults: dw_channels1, dw_channels2, out_channels

    def conv_init(k, shape):
        fan_in = shape[1] * shape[2] * shape[3]
        bound = 1.0 / (fan_in ** 0.5)
        return jax.random.uniform(k, shape, jnp.float32, -bound, bound)

    def bn_init(k, c):
        k1, k2, k3, k4 = jax.random.split(k, 4)
        return (jax.random.uniform(k1, (c,), jnp.float32, 0.5, 1.5),    # gamma
                jax.random.uniform(k2, (c,), jnp.float32, -0.5, 0.5),   # beta
                jax.random.uniform(k3, (c,), jnp.float32, -0.5, 0.5),   # running_mean
                jax.random.uniform(k4, (c,), jnp.float32, 0.5, 1.5))    # running_var

    x = jax.random.normal(ks[0], (N, 3, H, W), jnp.float32)
    params = {
        "conv1_w": conv_init(ks[1], (C1, 3, 3, 3)),   "bn1": bn_init(ks[2], C1),
        "dw1_w":   conv_init(ks[3], (C1, 1, 3, 3)),   "bn2": bn_init(ks[4], C1),
        "pw1_w":   conv_init(ks[5], (C2, C1, 1, 1)),  "bn3": bn_init(ks[6], C2),
        "dw2_w":   conv_init(ks[7], (C2, 1, 3, 3)),   "bn4": bn_init(ks[8], C2),
        "pw2_w":   conv_init(ks[9], (C3, C2, 1, 1)),  "bn5": bn_init(ks[10], C3),
    }

    out = jax.block_until_ready(learning_to_downsample(x, params))

    # ---- pure-JAX reference mirroring the PyTorch module (eval-mode BN) ----
    def conv(y, w, stride, pad, groups=1):
        return jax.lax.conv_general_dilated(
            y, w, (stride, stride), [(pad, pad), (pad, pad)],
            dimension_numbers=("NCHW", "OIHW", "NCHW"),
            feature_group_count=groups,
            precision=jax.lax.Precision.HIGHEST)

    def bn_relu(y, bn):
        g, b, m, v = bn
        y = (y - m[None, :, None, None]) * (g / jnp.sqrt(v + EPS))[None, :, None, None] \
            + b[None, :, None, None]
        return jnp.maximum(y, 0.0)

    r = bn_relu(conv(x, params["conv1_w"], 2, 0), params["bn1"])
    r = bn_relu(conv(r, params["dw1_w"], 2, 1, groups=C1), params["bn2"])
    r = bn_relu(conv(r, params["pw1_w"], 1, 0), params["bn3"])
    r = bn_relu(conv(r, params["dw2_w"], 2, 1, groups=C2), params["bn4"])
    r = bn_relu(conv(r, params["pw2_w"], 1, 0), params["bn5"])

    H1 = _out_size(H, 3, 2, 0)
    H2 = _out_size(H1, 3, 2, 1)
    H3 = _out_size(H2, 3, 2, 1)
    assert out.shape == r.shape == (N, C3, H3, H3), (out.shape, r.shape)
    err = float(jnp.max(jnp.abs(out - r)))
    assert jnp.allclose(out, r, atol=2e-3, rtol=2e-3), f"mismatch vs reference: {err}"
    print("KERNEL_OK")
</pallas_src>

<mosaic_0001>
module attributes {stable_mosaic.version = 11 : i64} {
  func.func @kernel(%arg0: i32, %arg1: memref<1x32x32x3xf32, #tpu.memory_space<vmem>>, %arg2: memref<27x32xf32, #tpu.memory_space<vmem>>, %arg3: memref<1x32xf32, #tpu.memory_space<vmem>>, %arg4: memref<9x32xf32, #tpu.memory_space<vmem>>, %arg5: memref<1x32xf32, #tpu.memory_space<vmem>>, %arg6: memref<32x48xf32, #tpu.memory_space<vmem>>, %arg7: memref<1x48xf32, #tpu.memory_space<vmem>>, %arg8: memref<9x48xf32, #tpu.memory_space<vmem>>, %arg9: memref<1x48xf32, #tpu.memory_space<vmem>>, %arg10: memref<48x64xf32, #tpu.memory_space<vmem>>, %arg11: memref<1x64xf32, #tpu.memory_space<vmem>>, %arg12: memref<1x4x4x64xf32, #tpu.memory_space<vmem>>, %arg13: memref<17x17x32xf32, #tpu.memory_space<vmem>>, %arg14: memref<10x10x48xf32, #tpu.memory_space<vmem>>) attributes {dimension_semantics = [#tpu.dimension_semantics<parallel>], iteration_bounds = array<i64: 2>, scalar_prefetch = 0 : i64, scratch_operands = 2 : i64, tpu.core_type = #tpu.core_type<tc>, window_params = [{transform_indices = @transform_0, window_bounds = array<i64: 1, 32, 32, 3>}, {pipeline_mode = #tpu.pipeline_mode<synchronous>, transform_indices = @transform_1, window_bounds = array<i64: 27, 32>}, {pipeline_mode = #tpu.pipeline_mode<synchronous>, transform_indices = @transform_2, window_bounds = array<i64: 1, 32>}, {pipeline_mode = #tpu.pipeline_mode<synchronous>, transform_indices = @transform_3, window_bounds = array<i64: 9, 32>}, {pipeline_mode = #tpu.pipeline_mode<synchronous>, transform_indices = @transform_4, window_bounds = array<i64: 1, 32>}, {pipeline_mode = #tpu.pipeline_mode<synchronous>, transform_indices = @transform_5, window_bounds = array<i64: 32, 48>}, {pipeline_mode = #tpu.pipeline_mode<synchronous>, transform_indices = @transform_6, window_bounds = array<i64: 1, 48>}, {pipeline_mode = #tpu.pipeline_mode<synchronous>, transform_indices = @transform_7, window_bounds = array<i64: 9, 48>}, {pipeline_mode = #tpu.pipeline_mode<synchronous>, transform_indices = @transform_8, window_bounds = array<i64: 1, 48>}, {pipeline_mode = #tpu.pipeline_mode<synchronous>, transform_indices = @transform_9, window_bounds = array<i64: 48, 64>}, {pipeline_mode = #tpu.pipeline_mode<synchronous>, transform_indices = @transform_10, window_bounds = array<i64: 1, 64>}, {transform_indices = @transform_11, window_bounds = array<i64: 1, 4, 4, 64>}]} {
    %c0 = arith.constant 0 : index
    %c0_0 = arith.constant 0 : index
    %0 = vector.load %arg2[%c0, %c0_0] : memref<27x32xf32, #tpu.memory_space<vmem>>, vector<27x32xf32>
    %c0_1 = arith.constant 0 : index
    %c0_2 = arith.constant 0 : index
    %1 = vector.load %arg4[%c0_1, %c0_2] : memref<9x32xf32, #tpu.memory_space<vmem>>, vector<9x32xf32>
    %c0_3 = arith.constant 0 : index
    %c0_4 = arith.constant 0 : index
    %2 = vector.load %arg8[%c0_3, %c0_4] : memref<9x48xf32, #tpu.memory_space<vmem>>, vector<9x48xf32>
    %c0_5 = arith.constant 0 : index
    %c0_6 = arith.constant 0 : index
    %3 = vector.load %arg6[%c0_5, %c0_6] : memref<32x48xf32, #tpu.memory_space<vmem>>, vector<32x48xf32>
    %c0_7 = arith.constant 0 : index
    %c0_8 = arith.constant 0 : index
    %4 = vector.load %arg10[%c0_7, %c0_8] : memref<48x64xf32, #tpu.memory_space<vmem>>, vector<48x64xf32>
    %c0_9 = arith.constant 0 : index
    %c0_10 = arith.constant 0 : index
    %5 = vector.load %arg3[%c0_9, %c0_10] : memref<1x32xf32, #tpu.memory_space<vmem>>, vector<1x32xf32>
    %c0_11 = arith.constant 0 : index
    %c0_12 = arith.constant 0 : index
    %6 = vector.load %arg5[%c0_11, %c0_12] : memref<1x32xf32, #tpu.memory_space<vmem>>, vector<1x32xf32>
    %c0_13 = arith.constant 0 : index
    %c0_14 = arith.constant 0 : index
    %7 = vector.load %arg7[%c0_13, %c0_14] : memref<1x48xf32, #tpu.memory_space<vmem>>, vector<1x48xf32>
    %c0_15 = arith.constant 0 : index
    %c0_16 = arith.constant 0 : index
    %8 = vector.load %arg9[%c0_15, %c0_16] : memref<1x48xf32, #tpu.memory_space<vmem>>, vector<1x48xf32>
    %c0_17 = arith.constant 0 : index
    %c0_18 = arith.constant 0 : index
    %9 = vector.load %arg11[%c0_17, %c0_18] : memref<1x64xf32, #tpu.memory_space<vmem>>, vector<1x64xf32>
    %10 = tpu.iota {dimensions = array<i32: 0>} : vector<15x30xi32>
    %11 = tpu.iota {dimensions = array<i32: 1>} : vector<15x30xi32>
    %c2_i32 = arith.constant 2 : i32
    %12 = vector.broadcast %c2_i32 : i32 to vector<15x30xi32>
    %13 = arith.muli %12, %10 : vector<15x30xi32>
    %14 = arith.cmpi eq, %11, %13 : vector<15x30xi32>
    %15 = arith.extui %14 : vector<15x30xi1> to vector<15x30xi32>
    %16 = arith.sitofp %15 : vector<15x30xi32> to vector<15x30xf32>
    %17 = tpu.iota {dimensions = array<i32: 0>} : vector<8x15xi32>
    %18 = tpu.iota {dimensions = array<i32: 1>} : vector<8x15xi32>
    %c2_i32_19 = arith.constant 2 : i32
    %19 = vector.broadcast %c2_i32_19 : i32 to vector<8x15xi32>
    %20 = arith.muli %19, %17 : vector<8x15xi32>
    %21 = arith.cmpi eq, %18, %20 : vector<8x15xi32>
    %22 = arith.extui %21 : vector<8x15xi1> to vector<8x15xi32>
    %23 = arith.sitofp %22 : vector<8x15xi32> to vector<8x15xf32>
    %24 = tpu.iota {dimensions = array<i32: 0>} : vector<4x8xi32>
    %25 = tpu.iota {dimensions = array<i32: 1>} : vector<4x8xi32>
    %c2_i32_20 = arith.constant 2 : i32
    %26 = vector.broadcast %c2_i32_20 : i32 to vector<4x8xi32>
    %27 = arith.muli %26, %24 : vector<4x8xi32>
    %28 = arith.cmpi eq, %25, %27 : vector<4x8xi32>
    %29 = arith.extui %28 : vector<4x8xi1> to vector<4x8xi32>
    %30 = arith.sitofp %29 : vector<4x8xi32> to vector<4x8xf32>
    %cst = arith.constant 0.000000e+00 : f32
    %31 = vector.broadcast %cst : f32 to vector<17x17x32xf32>
    %c0_21 = arith.constant 0 : index
    %c0_22 = arith.constant 0 : index
    %c0_23 = arith.constant 0 : index
    %32 = vector.load %arg13[%c0_21, %c0_22, %c0_23] : memref<17x17x32xf32, #tpu.memory_space<vmem>>, vector<17x17x32xf32>
    tpu.vector_store %arg13[%c0_21, %c0_22, %c0_23], %31 {strides = array<i32>} : memref<17x17x32xf32, #tpu.memory_space<vmem>>, vector<17x17x32xf32>,
    %cst_24 = arith.constant 0.000000e+00 : f32
    %33 = vector.broadcast %cst_24 : f32 to vector<10x10x48xf32>
    %c0_25 = arith.constant 0 : index
    %c0_26 = arith.constant 0 : index
    %c0_27 = arith.constant 0 : index
    %34 = vector.load %arg14[%c0_25, %c0_26, %c0_27] : memref<10x10x48xf32, #tpu.memory_space<vmem>>, vector<10x10x48xf32>
    tpu.vector_store %arg14[%c0_25, %c0_26, %c0_27], %33 {strides = array<i32>} : memref<10x10x48xf32, #tpu.memory_space<vmem>>, vector<10x10x48xf32>,
    %cst_28 = arith.constant 0.000000e+00 : f32
    %35 = vector.broadcast %cst_28 : f32 to vector<30x32xf32>
    %c0_29 = arith.constant 0 : index
    %c0_30 = arith.constant 0 : index
    %c0_31 = arith.constant 0 : index
    %c0_32 = arith.constant 0 : index
    %36 = vector.load %arg1[%c0_29, %c0_30, %c0_31, %c0_32] : memref<1x32x32x3xf32, #tpu.memory_space<vmem>>, vector<1x1x32x3xf32>
    %37 = vector.shape_cast %36 : vector<1x1x32x3xf32> to vector<32x3xf32>
    %38 = vector.extract_strided_slice %37 {offsets = [0, 0], sizes = [30, 3], strides = [1, 1]} : vector<32x3xf32> to vector<30x3xf32>
    %39 = vector.extract_strided_slice %0 {offsets = [0, 0], sizes = [3, 32], strides = [1, 1]} : vector<27x32xf32> to vector<3x32xf32>
    %cst_33 = arith.constant dense<0.000000e+00> : vector<30x32xf32>
    %40 = tpu.matmul %38, %39, %cst_33 {dimension_numbers = #tpu.dot_dimension_numbers<[1], [0], [0], [1], [0, 0, 1, 1], [], []>} : vector<30x3xf32>, vector<3x32xf32>, vector<30x32xf32> -> vector<30x32xf32>
    %41 = arith.addf %35, %40 : vector<30x32xf32>
    %42 = vector.extract_strided_slice %37 {offsets = [1, 0], sizes = [30, 3], strides = [1, 1]} : vector<32x3xf32> to vector<30x3xf32>
    %43 = vector.extract_strided_slice %0 {offsets = [3, 0], sizes = [3, 32], strides = [1, 1]} : vector<27x32xf32> to vector<3x32xf32>
    %cst_34 = arith.constant dense<0.000000e+00> : vector<30x32xf32>
    %44 = tpu.matmul %42, %43, %cst_34 {dimension_numbers = #tpu.dot_dimension_numbers<[1], [0], [0], [1], [0, 0, 1, 1], [], []>} : vector<30x3xf32>, vector<3x32xf32>, vector<30x32xf32> -> vector<30x32xf32>
    %45 = arith.addf %41, %44 : vector<30x32xf32>
    %46 = vector.extract_strided_slice %37 {offsets = [2, 0], sizes = [30, 3], strides = [1, 1]} : vector<32x3xf32> to vector<30x3xf32>
    %47 = vector.extract_strided_slice %0 {offsets = [6, 0], sizes = [3, 32], strides = [1, 1]} : vector<27x32xf32> to vector<3x32xf32>
    %cst_35 = arith.constant dense<0.000000e+00> : vector<30x32xf32>
    %48 = tpu.matmul %46, %47, %cst_35 {dimension_numbers = #tpu.dot_dimension_numbers<[1], [0], [0], [1], [0, 0, 1, 1], [], []>} : vector<30x3xf32>, vector<3x32xf32>, vector<30x32xf32> -> vector<30x32xf32>
    %49 = arith.addf %45, %48 : vector<30x32xf32>
    %c0_36 = arith.constant 0 : index
    %c1 = arith.constant 1 : index
    %c0_37 = arith.constant 0 : index
    %c0_38 = arith.constant 0 : index
    %50 = vector.load %arg1[%c0_36, %c1, %c0_37, %c0_38] : memref<1x32x32x3xf32, #tpu.memory_space<vmem>>, vector<1x1x32x3xf32>
    %51 = vector.shape_cast %50 : vector<1x1x32x3xf32> to vector<32x3xf32>
    %52 = vector.extract_strided_slice %51 {offsets = [0, 0], sizes = [30, 3], strides = [1, 1]} : vector<32x3xf32> to vector<30x3xf32>
    %53 = vector.extract_strided_slice %0 {offsets = [9, 0], sizes = [3, 32], strides = [1, 1]} : vector<27x32xf32> to vector<3x32xf32>
    %cst_39 = arith.constant dense<0.000000e+00> : vector<30x32xf32>
    %54 = tpu.matmul %52, %53, %cst_39 {dimension_numbers = #tpu.dot_dimension_numbers<[1], [0], [0], [1], [0, 0, 1, 1], [], []>} : vector<30x3xf32>, vector<3x32xf32>, vector<30x32xf32> -> vector<30x32xf32>
    %55 = arith.addf %49, %54 : vector<30x32xf32>
    %56 = vector.extract_strided_slice %51 {offsets = [1, 0], sizes = [30, 3], strides = [1, 1]} : vector<32x3xf32> to vector<30x3xf32>
    %57 = vector.extract_strided_slice %0 {offsets = [12, 0], sizes = [3, 32], strides = [1, 1]} : vector<27x32xf32> to vector<3x32xf32>
    %cst_40 = arith.constant dense<0.000000e+00> : vector<30x32xf32>
    %58 = tpu.matmul %56, %57, %cst_40 {dimension_numbers = #tpu.dot_dimension_numbers<[1], [0], [0], [1], [0, 0, 1, 1], [], []>} : vector<30x3xf32>, vector<3x32xf32>, vector<30x32xf32> -> vector<30x32xf32>
    %59 = arith.addf %55, %58 : vector<30x32xf32>
    %60 = vector.extract_strided_slice %51 {offsets = [2, 0], sizes = [30, 3], strides = [1, 1]} : vector<32x3xf32> to vector<30x3xf32>
    %61 = vector.extract_strided_slice %0 {offsets = [15, 0], sizes = [3, 32], strides = [1, 1]} : vector<27x32xf32> to vector<3x32xf32>
    %cst_41 = arith.constant dense<0.000000e+00> : vector<30x32xf32>
    %62 = tpu.matmul %60, %61, %cst_41 {dimension_numbers = #tpu.dot_dimension_numbers<[1], [0], [0], [1], [0, 0, 1, 1], [], []>} : vector<30x3xf32>, vector<3x32xf32>, vector<30x32xf32> -> vector<30x32xf32>
    %63 = arith.addf %59, %62 : vector<30x32xf32>
    %c0_42 = arith.constant 0 : index
    %c2 = arith.constant 2 : index
    %c0_43 = arith.constant 0 : index
    %c0_44 = arith.constant 0 : index
    %64 = vector.load %arg1[%c0_42, %c2, %c0_43, %c0_44] : memref<1x32x32x3xf32, #tpu.memory_space<vmem>>, vector<1x1x32x3xf32>
    %65 = vector.shape_cast %64 : vector<1x1x32x3xf32> to vector<32x3xf32>
    %66 = vector.extract_strided_slice %65 {offsets = [0, 0], sizes = [30, 3], strides = [1, 1]} : vector<32x3xf32> to vector<30x3xf32>
    %67 = vector.extract_strided_slice %0 {offsets = [18, 0], sizes = [3, 32], strides = [1, 1]} : vector<27x32xf32> to vector<3x32xf32>
    %cst_45 = arith.constant dense<0.000000e+00> : vector<30x32xf32>
    %68 = tpu.matmul %66, %67, %cst_45 {dimension_numbers = #tpu.dot_dimension_numbers<[1], [0], [0], [1], [0, 0, 1, 1], [], []>} : vector<30x3xf32>, vector<3x32xf32>, vector<30x32xf32> -> vector<30x32xf32>
    %69 = arith.addf %63, %68 : vector<30x32xf32>
    %70 = vector.extract_strided_slice %65 {offsets = [1, 0], sizes = [30, 3], strides = [1, 1]} : vector<32x3xf32> to vector<30x3xf32>
    %71 = vector.extract_strided_slice %0 {offsets = [21, 0], sizes = [3, 32], strides = [1, 1]} : vector<27x32xf32> to vector<3x32xf32>
    %cst_46 = arith.constant dense<0.000000e+00> : vector<30x32xf32>
    %72 = tpu.matmul %70, %71, %cst_46 {dimension_numbers = #tpu.dot_dimension_numbers<[1], [0], [0], [1], [0, 0, 1, 1], [], []>} : vector<30x3xf32>, vector<3x32xf32>, vector<30x32xf32> -> vector<30x32xf32>
    %73 = arith.addf %69, %72 : vector<30x32xf32>
    %74 = vector.extract_strided_slice %65 {offsets = [2, 0], sizes = [30, 3], strides = [1, 1]} : vector<32x3xf32> to vector<30x3xf32>
    %75 = vector.extract_strided_slice %0 {offsets = [24, 0], sizes = [3, 32], strides = [1, 1]} : vector<27x32xf32> to vector<3x32xf32>
    %cst_47 = arith.constant dense<0.000000e+00> : vector<30x32xf32>
    %76 = tpu.matmul %74, %75, %cst_47 {dimension_numbers = #tpu.dot_dimension_numbers<[1], [0], [0], [1], [0, 0, 1, 1], [], []>} : vector<30x3xf32>, vector<3x32xf32>, vector<30x32xf32> -> vector<30x32xf32>
    %77 = arith.addf %73, %76 : vector<30x32xf32>
    %cst_48 = arith.constant dense<0.000000e+00> : vector<15x32xf32>
    %78 = tpu.matmul %16, %77, %cst_48 {dimension_numbers = #tpu.dot_dimension_numbers<[1], [0], [0], [1], [0, 0, 1, 1], [], []>} : vector<15x30xf32>, vector<30x32xf32>, vector<15x32xf32> -> vector<15x32xf32>
    %79 = vector.broadcast %5 : vector<1x32xf32> to vector<15x32xf32>
    %80 = arith.addf %78, %79 : vector<15x32xf32>
    %cst_49 = arith.constant 0.000000e+00 : f32
    %81 = vector.broadcast %cst_49 : f32 to vector<15x32xf32>
    %82 = arith.maximumf %80, %81 : vector<15x32xf32>
    %c1_50 = arith.constant 1 : index
    %c1_51 = arith.constant 1 : index
    %c0_52 = arith.constant 0 : index
    %83 = vector.load %arg13[%c1_50, %c1_51, %c0_52] : memref<17x17x32xf32, #tpu.memory_space<vmem>>, vector<1x15x32xf32>
    %84 = vector.shape_cast %83 : vector<1x15x32xf32> to vector<15x32xf32>
    %85 = vector.shape_cast %82 : vector<15x32xf32> to vector<1x15x32xf32>
    tpu.vector_store %arg13[%c1_50, %c1_51, %c0_52], %85 {strides = array<i32>} : memref<17x17x32xf32, #tpu.memory_space<vmem>>, vector<1x15x32xf32>,
    %cst_53 = arith.constant 0.000000e+00 : f32
    %86 = vector.broadcast %cst_53 : f32 to vector<30x32xf32>
    %c0_54 = arith.constant 0 : index
    %c2_55 = arith.constant 2 : index
    %c0_56 = arith.constant 0 : index
    %c0_57 = arith.constant 0 : index
    %87 = vector.load %arg1[%c0_54, %c2_55, %c0_56, %c0_57] : memref<1x32x32x3xf32, #tpu.memory_space<vmem>>, vector<1x1x32x3xf32>
    %88 = vector.shape_cast %87 : vector<1x1x32x3xf32> to vector<32x3xf32>
    %89 = vector.extract_strided_slice %88 {offsets = [0, 0], sizes = [30, 3], strides = [1, 1]} : vector<32x3xf32> to vector<30x3xf32>
    %90 = vector.extract_strided_slice %0 {offsets = [0, 0], sizes = [3, 32], strides = [1, 1]} : vector<27x32xf32> to vector<3x32xf32>
    %cst_58 = arith.constant dense<0.000000e+00> : vector<30x32xf32>
    %91 = tpu.matmul %89, %90, %cst_58 {dimension_numbers = #tpu.dot_dimension_numbers<[1], [0], [0], [1], [0, 0, 1, 1], [], []>} : vector<30x3xf32>, vector<3x32xf32>, vector<30x32xf32> -> vector<30x32xf32>
    %92 = arith.addf %86, %91 : vector<30x32xf32>
    %93 = vector.extract_strided_slice %88 {offsets = [1, 0], sizes = [30, 3], strides = [1, 1]} : vector<32x3xf32> to vector<30x3xf32>
    %94 = vector.extract_strided_slice %0 {offsets = [3, 0], sizes = [3, 32], strides = [1, 1]} : vector<27x32xf32> to vector<3x32xf32>
    %cst_59 = arith.constant dense<0.000000e+00> : vector<30x32xf32>
    %95 = tpu.matmul %93, %94, %cst_59 {dimension_numbers = #tpu.dot_dimension_numbers<[1], [0], [0], [1], [0, 0, 1, 1], [], []>} : vector<30x3xf32>, vector<3x32xf32>, vector<30x32xf32> -> vector<30x32xf32>
    %96 = arith.addf %92, %95 : vector<30x32xf32>
    %97 = vector.extract_strided_slice %88 {offsets = [2, 0], sizes = [30, 3], strides = [1, 1]} : vector<32x3xf32> to vector<30x3xf32>
    %98 = vector.extract_strided_slice %0 {offsets = [6, 0], sizes = [3, 32], strides = [1, 1]} : vector<27x32xf32> to vector<3x32xf32>
    %cst_60 = arith.constant dense<0.000000e+00> : vector<30x32xf32>
    %99 = tpu.matmul %97, %98, %cst_60 {dimension_numbers = #tpu.dot_dimension_numbers<[1], [0], [0], [1], [0, 0, 1, 1], [], []>} : vector<30x3xf32>, vector<3x32xf32>, vector<30x32xf32> -> vector<30x32xf32>
    %100 = arith.addf %96, %99 : vector<30x32xf32>
    %c0_61 = arith.constant 0 : index
    %c3 = arith.constant 3 : index
    %c0_62 = arith.constant 0 : index
    %c0_63 = arith.constant 0 : index
    %101 = vector.load %arg1[%c0_61, %c3, %c0_62, %c0_63] : memref<1x32x32x3xf32, #tpu.memory_space<vmem>>, vector<1x1x32x3xf32>
    %102 = vector.shape_cast %101 : vector<1x1x32x3xf32> to vector<32x3xf32>
    %103 = vector.extract_strided_slice %102 {offsets = [0, 0], sizes = [30, 3], strides = [1, 1]} : vector<32x3xf32> to vector<30x3xf32>
    %104 = vector.extract_strided_slice %0 {offsets = [9, 0], sizes = [3, 32], strides = [1, 1]} : vector<27x32xf32> to vector<3x32xf32>
    %cst_64 = arith.constant dense<0.000000e+00> : vector<30x32xf32>
    %105 = tpu.matmul %103, %104, %cst_64 {dimension_numbers = #tpu.dot_dimension_numbers<[1], [0], [0], [1], [0, 0, 1, 1], [], []>} : vector<30x3xf32>, vector<3x32xf32>, vector<30x32xf32> -> vector<30x32xf32>
    %106 = arith.addf %100, %105 : vector<30x32xf32>
    %107 = vector.extract_strided_slice %102 {offsets = [1, 0], sizes = [30, 3], strides = [1, 1]} : vector<32x3xf32> to vector<30x3xf32>
    %108 = vector.extract_strided_slice %0 {offsets = [12, 0], sizes = [3, 32], strides = [1, 1]} : vector<27x32xf32> to vector<3x32xf32>
    %cst_65 = arith.constant dense<0.000000e+00> : vector<30x32xf32>
    %109 = tpu.matmul %107, %108, %cst_65 {dimension_numbers = #tpu.dot_dimension_numbers<[1], [0], [0], [1], [0, 0, 1, 1], [], []>} : vector<30x3xf32>, vector<3x32xf32>, vector<30x32xf32> -> vector<30x32xf32>
    %110 = arith.addf %106, %109 : vector<30x32xf32>
    %111 = vector.extract_strided_slice %102 {offsets = [2, 0], sizes = [30, 3], strides = [1, 1]} : vector<32x3xf32> to vector<30x3xf32>
    %112 = vector.extract_strided_slice %0 {offsets = [15, 0], sizes = [3, 32], strides = [1, 1]} : vector<27x32xf32> to vector<3x32xf32>
    %cst_66 = arith.constant dense<0.000000e+00> : vector<30x32xf32>
    %113 = tpu.matmul %111, %112, %cst_66 {dimension_numbers = #tpu.dot_dimension_numbers<[1], [0], [0], [1], [0, 0, 1, 1], [], []>} : vector<30x3xf32>, vector<3x32xf32>, vector<30x32xf32> -> vector<30x32xf32>
    %114 = arith.addf %110, %113 : vector<30x32xf32>
    %c0_67 = arith.constant 0 : index
    %c4 = arith.constant 4 : index
    %c0_68 = arith.constant 0 : index
    %c0_69 = arith.constant 0 : index
    %115 = vector.load %arg1[%c0_67, %c4, %c0_68, %c0_69] : memref<1x32x32x3xf32, #tpu.memory_space<vmem>>, vector<1x1x32x3xf32>
    %116 = vector.shape_cast %115 : vector<1x1x32x3xf32> to vector<32x3xf32>
    %117 = vector.extract_strided_slice %116 {offsets = [0, 0], sizes = [30, 3], strides = [1, 1]} : vector<32x3xf32> to vector<30x3xf32>
    %118 = vector.extract_strided_slice %0 {offsets = [18, 0], sizes = [3, 32], strides = [1, 1]} : vector<27x32xf32> to vector<3x32xf32>
    %cst_70 = arith.constant dense<0.000000e+00> : vector<30x32xf32>
    %119 = tpu.matmul %117, %118, %cst_70 {dimension_numbers = #tpu.dot_dimension_numbers<[1], [0], [0], [1], [0, 0, 1, 1], [], []>} : vector<30x3xf32>, vector<3x32xf32>, vector<30x32xf32> -> vector<30x32xf32>
    %120 = arith.addf %114, %119 : vector<30x32xf32>
    %121 = vector.extract_strided_slice %116 {offsets = [1, 0], sizes = [30, 3], strides = [1, 1]} : vector<32x3xf32> to vector<30x3xf32>
    %122 = vector.extract_strided_slice %0 {offsets = [21, 0], sizes = [3, 32], strides = [1, 1]} : vector<27x32xf32> to vector<3x32xf32>
    %cst_71 = arith.constant dense<0.000000e+00> : vector<30x32xf32>
    %123 = tpu.matmul %121, %122, %cst_71 {dimension_numbers = #tpu.dot_dimension_numbers<[1], [0], [0], [1], [0, 0, 1, 1], [], []>} : vector<30x3xf32>, vector<3x32xf32>, vector<30x32xf32> -> vector<30x32xf32>
    %124 = arith.addf %120, %123 : vector<30x32xf32>
    %125 = vector.extract_strided_slice %116 {offsets = [2, 0], sizes = [30, 3], strides = [1, 1]} : vector<32x3xf32> to vector<30x3xf32>
    %126 = vector.extract_strided_slice %0 {offsets = [24, 0], sizes = [3, 32], strides = [1, 1]} : vector<27x32xf32> to vector<3x32xf32>
    %cst_72 = arith.constant dense<0.000000e+00> : vector<30x32xf32>
    %127 = tpu.matmul %125, %126, %cst_72 {dimension_numbers = #tpu.dot_dimension_numbers<[1], [0], [0], [1], [0, 0, 1, 1], [], []>} : vector<30x3xf32>, vector<3x32xf32>, vector<30x32xf32> -> vector<30x32xf32>
    %128 = arith.addf %124, %127 : vector<30x32xf32>
    %cst_73 = arith.constant dense<0.000000e+00> : vector<15x32xf32>
    %129 = tpu.matmul %16, %128, %cst_73 {dimension_numbers = #tpu.dot_dimension_numbers<[1], [0], [0], [1], [0, 0, 1, 1], [], []>} : vector<15x30xf32>, vector<30x32xf32>, vector<15x32xf32> -> vector<15x32xf32>
    %130 = vector.broadcast %5 : vector<1x32xf32> to vector<15x32xf32>
    %131 = arith.addf %129, %130 : vector<15x32xf32>
    %cst_74 = arith.constant 0.000000e+00 : f32
    %132 = vector.broadcast %cst_74 : f32 to vector<15x32xf32>
    %133 = arith.maximumf %131, %132 : vector<15x32xf32>
    %c2_75 = arith.constant 2 : index
    %c1_76 = arith.constant 1 : index
    %c0_77 = arith.constant 0 : index
    %134 = vector.load %arg13[%c2_75, %c1_76, %c0_77] : memref<17x17x32xf32, #tpu.memory_space<vmem>>, vector<1x15x32xf32>
    %135 = vector.shape_cast %134 : vector<1x15x32xf32> to vector<15x32xf32>
    %136 = vector.shape_cast %133 : vector<15x32xf32> to vector<1x15x32xf32>
    tpu.vector_store %arg13[%c2_75, %c1_76, %c0_77], %136 {strides = array<i32>} : memref<17x17x32xf32, #tpu.memory_space<vmem>>, vector<1x15x32xf32>,
    %cst_78 = arith.constant 0.000000e+00 : f32
    %137 = vector.broadcast %cst_78 : f32 to vector<30x32xf32>
    %c0_79 = arith.constant 0 : index
    %c4_80 = arith.constant 4 : index
    %c0_81 = arith.constant 0 : index
    %c0_82 = arith.constant 0 : index
    %138 = vector.load %arg1[%c0_79, %c4_80, %c0_81, %c0_82] : memref<1x32x32x3xf32, #tpu.memory_space<vmem>>, vector<1x1x32x3xf32>
    %139 = vector.shape_cast %138 : vector<1x1x32x3xf32> to vector<32x3xf32>
    %140 = vector.extract_strided_slice %139 {offsets = [0, 0], sizes = [30, 3], strides = [1, 1]} : vector<32x3xf32> to vector<30x3xf32>
    %141 = vector.extract_strided_slice %0 {offsets = [0, 0], sizes = [3, 32], strides = [1, 1]} : vector<27x32xf32> to vector<3x32xf32>
    %cst_83 = arith.constant dense<0.000000e+00> : vector<30x32xf32>
    %142 = tpu.matmul %140, %141, %cst_83 {dimension_numbers = #tpu.dot_dimension_numbers<[1], [0], [0], [1], [0, 0, 1, 1], [], []>} : vector<30x3xf32>, vector<3x32xf32>, vector<30x32xf32> -> vector<30x32xf32>
    %143 = arith.addf %137, %142 : vector<30x32xf32>
    %144 = vector.extract_strided_slice %139 {offsets = [1, 0], sizes = [30, 3], strides = [1, 1]} : vector<32x3xf32> to vector<30x3xf32>
    %145 = vector.extract_strided_slice %0 {offsets = [3, 0], sizes = [3, 32], strides = [1, 1]} : vector<27x32xf32> to vector<3x32xf32>
    %cst_84 = arith.constant dense<0.000000e+00> : vector<30x32xf32>
    %146 = tpu.matmul %144, %145, %cst_84 {dimension_numbers = #tpu.dot_dimension_numbers<[1], [0], [0], [1], [0, 0, 1, 1], [], []>} : vector<30x3xf32>, vector<3x32xf32>, vector<30x32xf32> -> vector<30x32xf32>
    %147 = arith.addf %143, %146 : vector<30x32xf32>
    %148 = vector.extract_strided_slice %139 {offsets = [2, 0], sizes = [30, 3], strides = [1, 1]} : vector<32x3xf32> to vector<30x3xf32>
    %149 = vector.extract_strided_slice %0 {offsets = [6, 0], sizes = [3, 32], strides = [1, 1]} : vector<27x32xf32> to vector<3x32xf32>
    %cst_85 = arith.constant dense<0.000000e+00> : vector<30x32xf32>
    %150 = tpu.matmul %148, %149, %cst_85 {dimension_numbers = #tpu.dot_dimension_numbers<[1], [0], [0], [1], [0, 0, 1, 1], [], []>} : vector<30x3xf32>, vector<3x32xf32>, vector<30x32xf32> -> vector<30x32xf32>
    %151 = arith.addf %147, %150 : vector<30x32xf32>
    %c0_86 = arith.constant 0 : index
    %c5 = arith.constant 5 : index
    %c0_87 = arith.constant 0 : index
    %c0_88 = arith.constant 0 : index
    %152 = vector.load %arg1[%c0_86, %c5, %c0_87, %c0_88] : memref<1x32x32x3xf32, #tpu.memory_space<vmem>>, vector<1x1x32x3xf32>
    %153 = vector.shape_cast %152 : vector<1x1x32x3xf32> to vector<32x3xf32>
    %154 = vector.extract_strided_slice %153 {offsets = [0, 0], sizes = [30, 3], strides = [1, 1]} : vector<32x3xf32> to vector<30x3xf32>
    %155 = vector.extract_strided_slice %0 {offsets = [9, 0], sizes = [3, 32], strides = [1, 1]} : vector<27x32xf32> to vector<3x32xf32>
    %cst_89 = arith.constant dense<0.000000e+00> : vector<30x32xf32>
    %156 = tpu.matmul %154, %155, %cst_89 {dimension_numbers = #tpu.dot_dimension_numbers<[1], [0], [0], [1], [0, 0, 1, 1], [], []>} : vector<30x3xf32>, vector<3x32xf32>, vector<30x32xf32> -> vector<30x32xf32>
    %157 = arith.addf %151, %156 : vector<30x32xf32>
    %158 = vector.extract_strided_slice %153 {offsets = [1, 0], sizes = [30, 3], strides = [1, 1]} : vector<32x3xf32> to vector<30x3xf32>
    %159 = vector.extract_strided_slice %0 {offsets = [12, 0], sizes = [3, 32], strides = [1, 1]} : vector<27x32xf32> to vector<3x32xf32>
    %cst_90 = arith.constant dense<0.000000e+00> : vector<30x32xf32>
    %160 = tpu.matmul %158, %159, %cst_90 {dimension_numbers = #tpu.dot_dimension_numbers<[1], [0], [0], [1], [0, 0, 1, 1], [], []>} : vector<30x3xf32>, vector<3x32xf32>, vector<30x32xf32> -> vector<30x32xf32>
    %161 = arith.addf %157, %160 : vector<30x32xf32>
    %162 = vector.extract_strided_slice %153 {offsets = [2, 0], sizes = [30, 3], strides = [1, 1]} : vector<32x3xf32> to vector<30x3xf32>
    %163 = vector.extract_strided_slice %0 {offsets = [15, 0], sizes = [3, 32], strides = [1, 1]} : vector<27x32xf32> to vector<3x32xf32>
    %cst_91 = arith.constant dense<0.000000e+00> : vector<30x32xf32>
    %164 = tpu.matmul %162, %163, %cst_91 {dimension_numbers = #tpu.dot_dimension_numbers<[1], [0], [0], [1], [0, 0, 1, 1], [], []>} : vector<30x3xf32>, vector<3x32xf32>, vector<30x32xf32> -> vector<30x32xf32>
    %165 = arith.addf %161, %164 : vector<30x32xf32>
    %c0_92 = arith.constant 0 : index
    %c6 = arith.constant 6 : index
    %c0_93 = arith.constant 0 : index
    %c0_94 = arith.constant 0 : index
    %166 = vector.load %arg1[%c0_92, %c6, %c0_93, %c0_94] : memref<1x32x32x3xf32, #tpu.memory_space<vmem>>, vector<1x1x32x3xf32>
    %167 = vector.shape_cast %166 : vector<1x1x32x3xf32> to vector<32x3xf32>
    %168 = vector.extract_strided_slice %167 {offsets = [0, 0], sizes = [30, 3], strides = [1, 1]} : vector<32x3xf32> to vector<30x3xf32>
    %169 = vector.extract_strided_slice %0 {offsets = [18, 0], sizes = [3, 32], strides = [1, 1]} : vector<27x32xf32> to vector<3x32xf32>
    %cst_95 = arith.constant dense<0.000000e+00> : vector<30x32xf32>
    %170 = tpu.matmul %168, %169, %cst_95 {dimension_numbers = #tpu.dot_dimension_numbers<[1], [0], [0], [1], [0, 0, 1, 1], [], []>} : vector<30x3xf32>, vector<3x32xf32>, vector<30x32xf32> -> vector<30x32xf32>
    %171 = arith.addf %165, %170 : vector<30x32xf32>
    %172 = vector.extract_strided_slice %167 {offsets = [1, 0], sizes = [30, 3], strides = [1, 1]} : vector<32x3xf32> to vector<30x3xf32>
    %173 = vector.extract_strided_slice %0 {offsets = [21, 0], sizes = [3, 32], strides = [1, 1]} : vector<27x32xf32> to vector<3x32xf32>
    %cst_96 = arith.constant dense<0.000000e+00> : vector<30x32xf32>
    %174 = tpu.matmul %172, %173, %cst_96 {dimension_numbers = #tpu.dot_dimension_numbers<[1], [0], [0], [1], [0, 0, 1, 1], [], []>} : vector<30x3xf32>, vector<3x32xf32>, vector<30x32xf32> -> vector<30x32xf32>
    %175 = arith.addf %171, %174 : vector<30x32xf32>
    %176 = vector.extract_strided_slice %167 {offsets = [2, 0], sizes = [30, 3], strides = [1, 1]} : vector<32x3xf32> to vector<30x3xf32>
    %177 = vector.extract_strided_slice %0 {offsets = [24, 0], sizes = [3, 32], strides = [1, 1]} : vector<27x32xf32> to vector<3x32xf32>
    %cst_97 = arith.constant dense<0.000000e+00> : vector<30x32xf32>
    %178 = tpu.matmul %176, %177, %cst_97 {dimension_numbers = #tpu.dot_dimension_numbers<[1], [0], [0], [1], [0, 0, 1, 1], [], []>} : vector<30x3xf32>, vector<3x32xf32>, vector<30x32xf32> -> vector<30x32xf32>
    %179 = arith.addf %175, %178 : vector<30x32xf32>
    %cst_98 = arith.constant dense<0.000000e+00> : vector<15x32xf32>
    %180 = tpu.matmul %16, %179, %cst_98 {dimension_numbers = #tpu.dot_dimension_numbers<[1], [0], [0], [1], [0, 0, 1, 1], [], []>} : vector<15x30xf32>, vector<30x32xf32>, vector<15x32xf32> -> vector<15x32xf32>
    %181 = vector.broadcast %5 : vector<1x32xf32> to vector<15x32xf32>
    %182 = arith.addf %180, %181 : vector<15x32xf32>
    %cst_99 = arith.constant 0.000000e+00 : f32
    %183 = vector.broadcast %cst_99 : f32 to vector<15x32xf32>
    %184 = arith.maximumf %182, %183 : vector<15x32xf32>
    %c3_100 = arith.constant 3 : index
    %c1_101 = arith.constant 1 : index
    %c0_102 = arith.constant 0 : index
    %185 = vector.load %arg13[%c3_100, %c1_101, %c0_102] : memref<17x17x32xf32, #tpu.memory_space<vmem>>, vector<1x15x32xf32>
    %186 = vector.shape_cast %185 : vector<1x15x32xf32> to vector<15x32xf32>
    %187 = vector.shape_cast %184 : vector<15x32xf32> to vector<1x15x32xf32>
    tpu.vector_store %arg13[%c3_100, %c1_101, %c0_102], %187 {strides = array<i32>} : memref<17x17x32xf32, #tpu.memory_space<vmem>>, vector<1x15x32xf32>,
    %cst_103 = arith.constant 0.000000e+00 : f32
    %188 = vector.broadcast %cst_103 : f32 to vector<30x32xf32>
    %c0_104 = arith.constant 0 : index
    %c6_105 = arith.constant 6 : index
    %c0_106 = arith.constant 0 : index
    %c0_107 = arith.constant 0 : index
    %189 = vector.load %arg1[%c0_104, %c6_105, %c0_106, %c0_107] : memref<1x32x32x3xf32, #tpu.memory_space<vmem>>, vector<1x1x32x3xf32>
    %190 = vector.shape_cast %189 : vector<1x1x32x3xf32> to vector<32x3xf32>
    %191 = vector.extract_strided_slice %190 {offsets = [0, 0], sizes = [30, 3], strides = [1, 1]} : vector<32x3xf32> to vector<30x3xf32>
    %192 = vector.extract_strided_slice %0 {offsets = [0, 0], sizes = [3, 32], strides = [1, 1]} : vector<27x32xf32> to vector<3x32xf32>
    %cst_108 = arith.constant dense<0.000000e+00> : vector<30x32xf32>
    %193 = tpu.matmul %191, %192, %cst_108 {dimension_numbers = #tpu.dot_dimension_numbers<[1], [0], [0], [1], [0, 0, 1, 1], [], []>} : vector<30x3xf32>, vector<3x32xf32>, vector<30x32xf32> -> vector<30x32xf32>
    %194 = arith.addf %188, %193 : vector<30x32xf32>
    %195 = vector.extract_strided_slice %190 {offsets = [1, 0], sizes = [30, 3], strides = [1, 1]} : vector<32x3xf32> to vector<30x3xf32>
    %196 = vector.extract_strided_slice %0 {offsets = [3, 0], sizes = [3, 32], strides = [1, 1]} : vector<27x32xf32> to vector<3x32xf32>
    %cst_109 = arith.constant dense<0.000000e+00> : vector<30x32xf32>
    %197 = tpu.matmul %195, %196, %cst_109 {dimension_numbers = #tpu.dot_dimension_numbers<[1], [0], [0], [1], [0, 0, 1, 1], [], []>} : vector<30x3xf32>, vector<3x32xf32>, vector<30x32xf32> -> vector<30x32xf32>
    %198 = arith.addf %194, %197 : vector<30x32xf32>
    %199 = vector.extract_strided_slice %190 {offsets = [2, 0], sizes = [30, 3], strides = [1, 1]} : vector<32x3xf32> to vector<30x3xf32>
    %200 = vector.extract_strided_slice %0 {offsets = [6, 0], sizes = [3, 32], strides = [1, 1]} : vector<27x32xf32> to vector<3x32xf32>
    %cst_110 = arith.constant dense<0.000000e+00> : vector<30x32xf32>
    %201 = tpu.matmul %199, %200, %cst_110 {dimension_numbers = #tpu.dot_dimension_numbers<[1], [0], [0], [1], [0, 0, 1, 1], [], []>} : vector<30x3xf32>, vector<3x32xf32>, vector<30x32xf32> -> vector<30x32xf32>
    %202 = arith.addf %198, %201 : vector<30x32xf32>
    %c0_111 = arith.constant 0 : index
    %c7 = arith.constant 7 : index
    %c0_112 = arith.constant 0 : index
    %c0_113 = arith.constant 0 : index
    %203 = vector.load %arg1[%c0_111, %c7, %c0_112, %c0_113] : memref<1x32x32x3xf32, #tpu.memory_space<vmem>>, vector<1x1x32x3xf32>
    %204 = vector.shape_cast %203 : vector<1x1x32x3xf32> to vector<32x3xf32>
    %205 = vector.extract_strided_slice %204 {offsets = [0, 0], sizes = [30, 3], strides = [1, 1]} : vector<32x3xf32> to vector<30x3xf32>
    %206 = vector.extract_strided_slice %0 {offsets = [9, 0], sizes = [3, 32], strides = [1, 1]} : vector<27x32xf32> to vector<3x32xf32>
    %cst_114 = arith.constant dense<0.000000e+00> : vector<30x32xf32>
    %207 = tpu.matmul %205, %206, %cst_114 {dimension_numbers = #tpu.dot_dimension_numbers<[1], [0], [0], [1], [0, 0, 1, 1], [], []>} : vector<30x3xf32>, vector<3x32xf32>, vector<30x32xf32> -> vector<30x32xf32>
    %208 = arith.addf %202, %207 : vector<30x32xf32>
    %209 = vector.extract_strided_slice %204 {offsets = [1, 0], sizes = [30, 3], strides = [1, 1]} : vector<32x3xf32> to vector<30x3xf32>
    %210 = vector.extract_strided_slice %0 {offsets = [12, 0], sizes = [3, 32], strides = [1, 1]} : vector<27x32xf32> to vector<3x32xf32>
    %cst_115 = arith.constant dense<0.000000e+00> : vector<30x32xf32>
    %211 = tpu.matmul %209, %210, %cst_115 {dimension_numbers = #tpu.dot_dimension_numbers<[1], [0], [0], [1], [0, 0, 1, 1], [], []>} : vector<30x3xf32>, vector<3x32xf32>, vector<30x32xf32> -> vector<30x32xf32>
    %212 = arith.addf %208, %211 : vector<30x32xf32>
    %213 = vector.extract_strided_slice %204 {offsets = [2, 0], sizes = [30, 3], strides = [1, 1]} : vector<32x3xf32> to vector<30x3xf32>
    %214 = vector.extract_strided_slice %0 {offsets = [15, 0], sizes = [3, 32], strides = [1, 1]} : vector<27x32xf32> to vector<3x32xf32>
    %cst_116 = arith.constant dense<0.000000e+00> : vector<30x32xf32>
    %215 = tpu.matmul %213, %214, %cst_116 {dimension_numbers = #tpu.dot_dimension_numbers<[1], [0], [0], [1], [0, 0, 1, 1], [], []>} : vector<30x3xf32>, vector<3x32xf32>, vector<30x32xf32> -> vector<30x32xf32>
    %216 = arith.addf %212, %215 : vector<30x32xf32>
    %c0_117 = arith.constant 0 : index
    %c8 = arith.constant 8 : index
    %c0_118 = arith.constant 0 : index
    %c0_119 = arith.constant 0 : index
    %217 = vector.load %arg1[%c0_117, %c8, %c0_118, %c0_119] : memref<1x32x32x3xf32, #tpu.memory_space<vmem>>, vector<1x1x32x3xf32>
    %218 = vector.shape_cast %217 : vector<1x1x32x3xf32> to vector<32x3xf32>
    %219 = vector.extract_strided_slice %218 {offsets = [0, 0], sizes = [30, 3], strides = [1, 1]} : vector<32x3xf32> to vector<30x3xf32>
    %220 = vector.extract_strided_slice %0 {offsets = [18, 0], sizes = [3, 32], strides = [1, 1]} : vector<27x32xf32> to vector<3x32xf32>
    %cst_120 = arith.constant dense<0.000000e+00> : vector<30x32xf32>
    %221 = tpu.matmul %219, %220, %cst_120 {dimension_numbers = #tpu.dot_dimension_numbers<[1], [0], [0], [1], [0, 0, 1, 1], [], []>} : vector<30x3xf32>, vector<3x32xf32>, vector<30x32xf32> -> vector<30x32xf32>
    %222 = arith.addf %216, %221 : vector<30x32xf32>
    %223 = vector.extract_strided_slice %218 {offsets = [1, 0], sizes = [30, 3], strides = [1, 1]} : vector<32x3xf32> to vector<30x3xf32>
    %224 = vector.extract_strided_slice %0 {offsets = [21, 0], sizes = [3, 32], strides = [1, 1]} : vector<27x32xf32> to vector<3x32xf32>
    %cst_121 = arith.constant dense<0.000000e+00> : vector<30x32xf32>
    %225 = tpu.matmul %223, %224, %cst_121 {dimension_numbers = #tpu.dot_dimension_numbers<[1], [0], [0], [1], [0, 0, 1, 1], [], []>} : vector<30x3xf32>, vector<3x32xf32>, vector<30x32xf32> -> vector<30x32xf32>
    %226 = arith.addf %222, %225 : vector<30x32xf32>
    %227 = vector.extract_strided_slice %218 {offsets = [2, 0], sizes = [30, 3], strides = [1, 1]} : vector<32x3xf32> to vector<30x3xf32>
    %228 = vector.extract_strided_slice %0 {offsets = [24, 0], sizes = [3, 32], strides = [1, 1]} : vector<27x32xf32> to vector<3x32xf32>
    %cst_122 = arith.constant dense<0.000000e+00> : vector<30x32xf32>
    %229 = tpu.matmul %227, %228, %cst_122 {dimension_numbers = #tpu.dot_dimension_numbers<[1], [0], [0], [1], [0, 0, 1, 1], [], []>} : vector<30x3xf32>, vector<3x32xf32>, vector<30x32xf32> -> vector<30x32xf32>
    %230 = arith.addf %226, %229 : vector<30x32xf32>
    %cst_123 = arith.constant dense<0.000000e+00> : vector<15x32xf32>
    %231 = tpu.matmul %16, %230, %cst_123 {dimension_numbers = #tpu.dot_dimension_numbers<[1], [0], [0], [1], [0, 0, 1, 1], [], []>} : vector<15x30xf32>, vector<30x32xf32>, vector<15x32xf32> -> vector<15x32xf32>
    %232 = vector.broadcast %5 : vector<1x32xf32> to vector<15x32xf32>
    %233 = arith.addf %231, %232 : vector<15x32xf32>
    %cst_124 = arith.constant 0.000000e+00 : f32
    %234 = vector.broadcast %cst_124 : f32 to vector<15x32xf32>
    %235 = arith.maximumf %233, %234 : vector<15x32xf32>
    %c4_125 = arith.constant 4 : index
    %c1_126 = arith.constant 1 : index
    %c0_127 = arith.constant 0 : index
    %236 = vector.load %arg13[%c4_125, %c1_126, %c0_127] : memref<17x17x32xf32, #tpu.memory_space<vmem>>, vector<1x15x32xf32>
    %237 = vector.shape_cast %236 : vector<1x15x32xf32> to vector<15x32xf32>
    %238 = vector.shape_cast %235 : vector<15x32xf32> to vector<1x15x32xf32>
    tpu.vector_store %arg13[%c4_125, %c1_126, %c0_127], %238 {strides = array<i32>} : memref<17x17x32xf32, #tpu.memory_space<vmem>>, vector<1x15x32xf32>,
    %cst_128 = arith.constant 0.000000e+00 : f32
    %239 = vector.broadcast %cst_128 : f32 to vector<30x32xf32>
    %c0_129 = arith.constant 0 : index
    %c8_130 = arith.constant 8 : index
    %c0_131 = arith.constant 0 : index
    %c0_132 = arith.constant 0 : index
    %240 = vector.load %arg1[%c0_129, %c8_130, %c0_131, %c0_132] : memref<1x32x32x3xf32, #tpu.memory_space<vmem>>, vector<1x1x32x3xf32>
    %241 = vector.shape_cast %240 : vector<1x1x32x3xf32> to vector<32x3xf32>
    %242 = vector.extract_strided_slice %241 {offsets = [0, 0], sizes = [30, 3], strides = [1, 1]} : vector<32x3xf32> to vector<30x3xf32>
    %243 = vector.extract_strided_slice %0 {offsets = [0, 0], sizes = [3, 32], strides = [1, 1]} : vector<27x32xf32> to vector<3x32xf32>
    %cst_133 = arith.constant dense<0.000000e+00> : vector<30x32xf32>
    %244 = tpu.matmul %242, %243, %cst_133 {dimension_numbers = #tpu.dot_dimension_numbers<[1], [0], [0], [1], [0, 0, 1, 1], [], []>} : vector<30x3xf32>, vector<3x32xf32>, vector<30x32xf32> -> vector<30x32xf32>
    %245 = arith.addf %239, %244 : vector<30x32xf32>
    %246 = vector.extract_strided_slice %241 {offsets = [1, 0], sizes = [30, 3], strides = [1, 1]} : vector<32x3xf32> to vector<30x3xf32>
    %247 = vector.extract_strided_slice %0 {offsets = [3, 0], sizes = [3, 32], strides = [1, 1]} : vector<27x32xf32> to vector<3x32xf32>
    %cst_134 = arith.constant dense<0.000000e+00> : vector<30x32xf32>
    %248 = tpu.matmul %246, %247, %cst_134 {dimension_numbers = #tpu.dot_dimension_numbers<[1], [0], [0], [1], [0, 0, 1, 1], [], []>} : vector<30x3xf32>, vector<3x32xf32>, vector<30x32xf32> -> vector<30x32xf32>
    %249 = arith.addf %245, %248 : vector<30x32xf32>
    %250 = vector.extract_strided_slice %241 {offsets = [2, 0], sizes = [30, 3], strides = [1, 1]} : vector<32x3xf32> to vector<30x3xf32>
    %251 = vector.extract_strided_slice %0 {offsets = [6, 0], sizes = [3, 32], strides = [1, 1]} : vector<27x32xf32> to vector<3x32xf32>
    %cst_135 = arith.constant dense<0.000000e+00> : vector<30x32xf32>
    %252 = tpu.matmul %250, %251, %cst_135 {dimension_numbers = #tpu.dot_dimension_numbers<[1], [0], [0], [1], [0, 0, 1, 1], [], []>} : vector<30x3xf32>, vector<3x32xf32>, vector<30x32xf32> -> vector<30x32xf32>
    %253 = arith.addf %249, %252 : vector<30x32xf32>
    %c0_136 = arith.constant 0 : index
    %c9 = arith.constant 9 : index
    %c0_137 = arith.constant 0 : index
    %c0_138 = arith.constant 0 : index
    %254 = vector.load %arg1[%c0_136, %c9, %c0_137, %c0_138] : memref<1x32x32x3xf32, #tpu.memory_space<vmem>>, vector<1x1x32x3xf32>
    %255 = vector.shape_cast %254 : vector<1x1x32x3xf32> to vector<32x3xf32>
    %256 = vector.extract_strided_slice %255 {offsets = [0, 0], sizes = [30, 3], strides = [1, 1]} : vector<32x3xf32> to vector<30x3xf32>
    %257 = vector.extract_strided_slice %0 {offsets = [9, 0], sizes = [3, 32], strides = [1, 1]} : vector<27x32xf32> to vector<3x32xf32>
    %cst_139 = arith.constant dense<0.000000e+00> : vector<30x32xf32>
    %258 = tpu.matmul %256, %257, %cst_139 {dimension_numbers = #tpu.dot_dimension_numbers<[1], [0], [0], [1], [0, 0, 1, 1], [], []>} : vector<30x3xf32>, vector<3x32xf32>, vector<30x32xf32> -> vector<30x32xf32>
    %259 = arith.addf %253, %258 : vector<30x32xf32>
    %260 = vector.extract_strided_slice %255 {offsets = [1, 0], sizes = [30, 3], strides = [1, 1]} : vector<32x3xf32> to vector<30x3xf32>
    %261 = vector.extract_strided_slice %0 {offsets = [12, 0], sizes = [3, 32], strides = [1, 1]} : vector<27x32xf32> to vector<3x32xf32>
    %cst_140 = arith.constant dense<0.000000e+00> : vector<30x32xf32>
    %262 = tpu.matmul %260, %261, %cst_140 {dimension_numbers = #tpu.dot_dimension_numbers<[1], [0], [0], [1], [0, 0, 1, 1], [], []>} : vector<30x3xf32>, vector<3x32xf32>, vector<30x32xf32> -> vector<30x32xf32>
    %263 = arith.addf %259, %262 : vector<30x32xf32>
    %264 = vector.extract_strided_slice %255 {offsets = [2, 0], sizes = [30, 3], strides = [1, 1]} : vector<32x3xf32> to vector<30x3xf32>
    %265 = vector.extract_strided_slice %0 {offsets = [15, 0], sizes = [3, 32], strides = [1, 1]} : vector<27x32xf32> to vector<3x32xf32>
    %cst_141 = arith.constant dense<0.000000e+00> : vector<30x32xf32>
    %266 = tpu.matmul %264, %265, %cst_141 {dimension_numbers = #tpu.dot_dimension_numbers<[1], [0], [0], [1], [0, 0, 1, 1], [], []>} : vector<30x3xf32>, vector<3x32xf32>, vector<30x32xf32> -> vector<30x32xf32>
    %267 = arith.addf %263, %266 : vector<30x32xf32>
    %c0_142 = arith.constant 0 : index
    %c10 = arith.constant 10 : index
    %c0_143 = arith.constant 0 : index
    %c0_144 = arith.constant 0 : index
    %268 = vector.load %arg1[%c0_142, %c10, %c0_143, %c0_144] : memref<1x32x32x3xf32, #tpu.memory_space<vmem>>, vector<1x1x32x3xf32>
    %269 = vector.shape_cast %268 : vector<1x1x32x3xf32> to vector<32x3xf32>
    %270 = vector.extract_strided_slice %269 {offsets = [0, 0], sizes = [30, 3], strides = [1, 1]} : vector<32x3xf32> to vector<30x3xf32>
    %271 = vector.extract_strided_slice %0 {offsets = [18, 0], sizes = [3, 32], strides = [1, 1]} : vector<27x32xf32> to vector<3x32xf32>
    %cst_145 = arith.constant dense<0.000000e+00> : vector<30x32xf32>
    %272 = tpu.matmul %270, %271, %cst_145 {dimension_numbers = #tpu.dot_dimension_numbers<[1], [0], [0], [1], [0, 0, 1, 1], [], []>} : vector<30x3xf32>, vector<3x32xf32>, vector<30x32xf32> -> vector<30x32xf32>
    %273 = arith.addf %267, %272 : vector<30x32xf32>
    %274 = vector.extract_strided_slice %269 {offsets = [1, 0], sizes = [30, 3], strides = [1, 1]} : vector<32x3xf32> to vector<30x3xf32>
    %275 = vector.extract_strided_slice %0 {offsets = [21, 0], sizes = [3, 32], strides = [1, 1]} : vector<27x32xf32> to vector<3x32xf32>
    %cst_146 = arith.constant dense<0.000000e+00> : vector<30x32xf32>
    %276 = tpu.matmul %274, %275, %cst_146 {dimension_numbers = #tpu.dot_dimension_numbers<[1], [0], [0], [1], [0, 0, 1, 1], [], []>} : vector<30x3xf32>, vector<3x32xf32>, vector<30x32xf32> -> vector<30x32xf32>
    %277 = arith.addf %273, %276 : vector<30x32xf32>
    %278 = vector.extract_strided_slice %269 {offsets = [2, 0], sizes = [30, 3], strides = [1, 1]} : vector<32x3xf32> to vector<30x3xf32>
    %279 = vector.extract_strided_slice %0 {offsets = [24, 0], sizes = [3, 32], strides = [1, 1]} : vector<27x32xf32> to vector<3x32xf32>
    %cst_147 = arith.constant dense<0.000000e+00> : vector<30x32xf32>
    %280 = tpu.matmul %278, %279, %cst_147 {dimension_numbers = #tpu.dot_dimension_numbers<[1], [0], [0], [1], [0, 0, 1, 1], [], []>} : vector<30x3xf32>, vector<3x32xf32>, vector<30x32xf32> -> vector<30x32xf32>
    %281 = arith.addf %277, %280 : vector<30x32xf32>
    %cst_148 = arith.constant dense<0.000000e+00> : vector<15x32xf32>
    %282 = tpu.matmul %16, %281, %cst_148 {dimension_numbers = #tpu.dot_dimension_numbers<[1], [0], [0], [1], [0, 0, 1, 1], [], []>} : vector<15x30xf32>, vector<30x32xf32>, vector<15x32xf32> -> vector<15x32xf32>
    %283 = vector.broadcast %5 : vector<1x32xf32> to vector<15x32xf32>
    %284 = arith.addf %282, %283 : vector<15x32xf32>
    %cst_149 = arith.constant 0.000000e+00 : f32
    %285 = vector.broadcast %cst_149 : f32 to vector<15x32xf32>
    %286 = arith.maximumf %284, %285 : vector<15x32xf32>
    %c5_150 = arith.constant 5 : index
    %c1_151 = arith.constant 1 : index
    %c0_152 = arith.constant 0 : index
    %287 = vector.load %arg13[%c5_150, %c1_151, %c0_152] : memref<17x17x32xf32, #tpu.memory_space<vmem>>, vector<1x15x32xf32>
    %288 = vector.shape_cast %287 : vector<1x15x32xf32> to vector<15x32xf32>
    %289 = vector.shape_cast %286 : vector<15x32xf32> to vector<1x15x32xf32>
    tpu.vector_store %arg13[%c5_150, %c1_151, %c0_152], %289 {strides = array<i32>} : memref<17x17x32xf32, #tpu.memory_space<vmem>>, vector<1x15x32xf32>,
    %cst_153 = arith.constant 0.000000e+00 : f32
    %290 = vector.broadcast %cst_153 : f32 to vector<30x32xf32>
    %c0_154 = arith.constant 0 : index
    %c10_155 = arith.constant 10 : index
    %c0_156 = arith.constant 0 : index
    %c0_157 = arith.constant 0 : index
    %291 = vector.load %arg1[%c0_154, %c10_155, %c0_156, %c0_157] : memref<1x32x32x3xf32, #tpu.memory_space<vmem>>, vector<1x1x32x3xf32>
    %292 = vector.shape_cast %291 : vector<1x1x32x3xf32> to vector<32x3xf32>
    %293 = vector.extract_strided_slice %292 {offsets = [0, 0], sizes = [30, 3], strides = [1, 1]} : vector<32x3xf32> to vector<30x3xf32>
    %294 = vector.extract_strided_slice %0 {offsets = [0, 0], sizes = [3, 32], strides = [1, 1]} : vector<27x32xf32> to vector<3x32xf32>
    %cst_158 = arith.constant dense<0.000000e+00> : vector<30x32xf32>
    %295 = tpu.matmul %293, %294, %cst_158 {dimension_numbers = #tpu.dot_dimension_numbers<[1], [0], [0], [1], [0, 0, 1, 1], [], []>} : vector<30x3xf32>, vector<3x32xf32>, vector<30x32xf32> -> vector<30x32xf32>
    %296 = arith.addf %290, %295 : vector<30x32xf32>
    %297 = vector.extract_strided_slice %292 {offsets = [1, 0], sizes = [30, 3], strides = [1, 1]} : vector<32x3xf32> to vector<30x3xf32>
    %298 = vector.extract_strided_slice %0 {offsets = [3, 0], sizes = [3, 32], strides = [1, 1]} : vector<27x32xf32> to vector<3x32xf32>
    %cst_159 = arith.constant dense<0.000000e+00> : vector<30x32xf32>
    %299 = tpu.matmul %297, %298, %cst_159 {dimension_numbers = #tpu.dot_dimension_numbers<[1], [0], [0], [1], [0, 0, 1, 1], [], []>} : vector<30x3xf32>, vector<3x32xf32>, vector<30x32xf32> -> vector<30x32xf32>
    %300 = arith.addf %296, %299 : vector<30x32xf32>
    %301 = vector.extract_strided_slice %292 {offsets = [2, 0], sizes = [30, 3], strides = [1, 1]} : vector<32x3xf32> to vector<30x3xf32>
    %302 = vector.extract_strided_slice %0 {offsets = [6, 0], sizes = [3, 32], strides = [1, 1]} : vector<27x32xf32> to vector<3x32xf32>
    %cst_160 = arith.constant dense<0.000000e+00> : vector<30x32xf32>
    %303 = tpu.matmul %301, %302, %cst_160 {dimension_numbers = #tpu.dot_dimension_numbers<[1], [0], [0], [1], [0, 0, 1, 1], [], []>} : vector<30x3xf32>, vector<3x32xf32>, vector<30x32xf32> -> vector<30x32xf32>
    %304 = arith.addf %300, %303 : vector<30x32xf32>
    %c0_161 = arith.constant 0 : index
    %c11 = arith.constant 11 : index
    %c0_162 = arith.constant 0 : index
    %c0_163 = arith.constant 0 : index
    %305 = vector.load %arg1[%c0_161, %c11, %c0_162, %c0_163] : memref<1x32x32x3xf32, #tpu.memory_space<vmem>>, vector<1x1x32x3xf32>
    %306 = vector.shape_cast %305 : vector<1x1x32x3xf32> to vector<32x3xf32>
    %307 = vector.extract_strided_slice %306 {offsets = [0, 0], sizes = [30, 3], strides = [1, 1]} : vector<32x3xf32> to vector<30x3xf32>
    %308 = vector.extract_strided_slice %0 {offsets = [9, 0], sizes = [3, 32], strides = [1, 1]} : vector<27x32xf32> to vector<3x32xf32>
    %cst_164 = arith.constant dense<0.000000e+00> : vector<30x32xf32>
    %309 = tpu.matmul %307, %308, %cst_164 {dimension_numbers = #tpu.dot_dimension_numbers<[1], [0], [0], [1], [0, 0, 1, 1], [], []>} : vector<30x3xf32>, vector<3x32xf32>, vector<30x32xf32> -> vector<30x32xf32>
    %310 = arith.addf %304, %309 : vector<30x32xf32>
    %311 = vector.extract_strided_slice %306 {offsets = [1, 0], sizes = [30, 3], strides = [1, 1]} : vector<32x3xf32> to vector<30x3xf32>
    %312 = vector.extract_strided_slice %0 {offsets = [12, 0], sizes = [3, 32], strides = [1, 1]} : vector<27x32xf32> to vector<3x32xf32>
    %cst_165 = arith.constant dense<0.000000e+00> : vector<30x32xf32>
    %313 = tpu.matmul %311, %312, %cst_165 {dimension_numbers = #tpu.dot_dimension_numbers<[1], [0], [0], [1], [0, 0, 1, 1], [], []>} : vector<30x3xf32>, vector<3x32xf32>, vector<30x32xf32> -> vector<30x32xf32>
    %314 = arith.addf %310, %313 : vector<30x32xf32>
    %315 = vector.extract_strided_slice %306 {offsets = [2, 0], sizes = [30, 3], strides = [1, 1]} : vector<32x3xf32> to vector<30x3xf32>
    %316 = vector.extract_strided_slice %0 {offsets = [15, 0], sizes = [3, 32], strides = [1, 1]} : vector<27x32xf32> to vector<3x32xf32>
    %cst_166 = arith.constant dense<0.000000e+00> : vector<30x32xf32>
    %317 = tpu.matmul %315, %316, %cst_166 {dimension_numbers = #tpu.dot_dimension_numbers<[1], [0], [0], [1], [0, 0, 1, 1], [], []>} : vector<30x3xf32>, vector<3x32xf32>, vector<30x32xf32> -> vector<30x32xf32>
    %318 = arith.addf %314, %317 : vector<30x32xf32>
    %c0_167 = arith.constant 0 : index
    %c12 = arith.constant 12 : index
    %c0_168 = arith.constant 0 : index
    %c0_169 = arith.constant 0 : index
    %319 = vector.load %arg1[%c0_167, %c12, %c0_168, %c0_169] : memref<1x32x32x3xf32, #tpu.memory_space<vmem>>, vector<1x1x32x3xf32>
    %320 = vector.shape_cast %319 : vector<1x1x32x3xf32> to vector<32x3xf32>
    %321 = vector.extract_strided_slice %320 {offsets = [0, 0], sizes = [30, 3], strides = [1, 1]} : vector<32x3xf32> to vector<30x3xf32>
    %322 = vector.extract_strided_slice %0 {offsets = [18, 0], sizes = [3, 32], strides = [1, 1]} : vector<27x32xf32> to vector<3x32xf32>
    %cst_170 = arith.constant dense<0.000000e+00> : vector<30x32xf32>
    %323 = tpu.matmul %321, %322, %cst_170 {dimension_numbers = #tpu.dot_dimension_numbers<[1], [0], [0], [1], [0, 0, 1, 1], [], []>} : vector<30x3xf32>, vector<3x32xf32>, vector<30x32xf32> -> vector<30x32xf32>
    %324 = arith.addf %318, %323 : vector<30x32xf32>
    %325 = vector.extract_strided_slice %320 {offsets = [1, 0], sizes = [30, 3], strides = [1, 1]} : vector<32x3xf32> to vector<30x3xf32>
    %326 = vector.extract_strided_slice %0 {offsets = [21, 0], sizes = [3, 32], strides = [1, 1]} : vector<27x32xf32> to vector<3x32xf32>
    %cst_171 = arith.constant dense<0.000000e+00> : vector<30x32xf32>
    %327 = tpu.matmul %325, %326, %cst_171 {dimension_numbers = #tpu.dot_dimension_numbers<[1], [0], [0], [1], [0, 0, 1, 1], [], []>} : vector<30x3xf32>, vector<3x32xf32>, vector<30x32xf32> -> vector<30x32xf32>
    %328 = arith.addf %324, %327 : vector<30x32xf32>
    %329 = vector.extract_strided_slice %320 {offsets = [2, 0], sizes = [30, 3], strides = [1, 1]} : vector<32x3xf32> to vector<30x3xf32>
    %330 = vector.extract_strided_slice %0 {offsets = [24, 0], sizes = [3, 32], strides = [1, 1]} : vector<27x32xf32> to vector<3x32xf32>
    %cst_172 = arith.constant dense<0.000000e+00> : vector<30x32xf32>
    %331 = tpu.matmul %329, %330, %cst_172 {dimension_numbers = #tpu.dot_dimension_numbers<[1], [0], [0], [1], [0, 0, 1, 1], [], []>} : vector<30x3xf32>, vector<3x32xf32>, vector<30x32xf32> -> vector<30x32xf32>
    %332 = arith.addf %328, %331 : vector<30x32xf32>
    %cst_173 = arith.constant dense<0.000000e+00> : vector<15x32xf32>
    %333 = tpu.matmul %16, %332, %cst_173 {dimension_numbers = #tpu.dot_dimension_numbers<[1], [0], [0], [1], [0, 0, 1, 1], [], []>} : vector<15x30xf32>, vector<30x32xf32>, vector<15x32xf32> -> vector<15x32xf32>
    %334 = vector.broadcast %5 : vector<1x32xf32> to vector<15x32xf32>
    %335 = arith.addf %333, %334 : vector<15x32xf32>
    %cst_174 = arith.constant 0.000000e+00 : f32
    %336 = vector.broadcast %cst_174 : f32 to vector<15x32xf32>
    %337 = arith.maximumf %335, %336 : vector<15x32xf32>
    %c6_175 = arith.constant 6 : index
    %c1_176 = arith.constant 1 : index
    %c0_177 = arith.constant 0 : index
    %338 = vector.load %arg13[%c6_175, %c1_176, %c0_177] : memref<17x17x32xf32, #tpu.memory_space<vmem>>, vector<1x15x32xf32>
    %339 = vector.shape_cast %338 : vector<1x15x32xf32> to vector<15x32xf32>
    %340 = vector.shape_cast %337 : vector<15x32xf32> to vector<1x15x32xf32>
    tpu.vector_store %arg13[%c6_175, %c1_176, %c0_177], %340 {strides = array<i32>} : memref<17x17x32xf32, #tpu.memory_space<vmem>>, vector<1x15x32xf32>,
    %cst_178 = arith.constant 0.000000e+00 : f32
    %341 = vector.broadcast %cst_178 : f32 to vector<30x32xf32>
    %c0_179 = arith.constant 0 : index
    %c12_180 = arith.constant 12 : index
    %c0_181 = arith.constant 0 : index
    %c0_182 = arith.constant 0 : index
    %342 = vector.load %arg1[%c0_179, %c12_180, %c0_181, %c0_182] : memref<1x32x32x3xf32, #tpu.memory_space<vmem>>, vector<1x1x32x3xf32>
    %343 = vector.shape_cast %342 : vector<1x1x32x3xf32> to vector<32x3xf32>
    %344 = vector.extract_strided_slice %343 {offsets = [0, 0], sizes = [30, 3], strides = [1, 1]} : vector<32x3xf32> to vector<30x3xf32>
    %345 = vector.extract_strided_slice %0 {offsets = [0, 0], sizes = [3, 32], strides = [1, 1]} : vector<27x32xf32> to vector<3x32xf32>
    %cst_183 = arith.constant dense<0.000000e+00> : vector<30x32xf32>
    %346 = tpu.matmul %344, %345, %cst_183 {dimension_numbers = #tpu.dot_dimension_numbers<[1], [0], [0], [1], [0, 0, 1, 1], [], []>} : vector<30x3xf32>, vector<3x32xf32>, vector<30x32xf32> -> vector<30x32xf32>
    %347 = arith.addf %341, %346 : vector<30x32xf32>
    %348 = vector.extract_strided_slice %343 {offsets = [1, 0], sizes = [30, 3], strides = [1, 1]} : vector<32x3xf32> to vector<30x3xf32>
    %349 = vector.extract_strided_slice %0 {offsets = [3, 0], sizes = [3, 32], strides = [1, 1]} : vector<27x32xf32> to vector<3x32xf32>
    %cst_184 = arith.constant dense<0.000000e+00> : vector<30x32xf32>
    %350 = tpu.matmul %348, %349, %cst_184 {dimension_numbers = #tpu.dot_dimension_numbers<[1], [0], [0], [1], [0, 0, 1, 1], [], []>} : vector<30x3xf32>, vector<3x32xf32>, vector<30x32xf32> -> vector<30x32xf32>
    %351 = arith.addf %347, %350 : vector<30x32xf32>
    %352 = vector.extract_strided_slice %343 {offsets = [2, 0], sizes = [30, 3], strides = [1, 1]} : vector<32x3xf32> to vector<30x3xf32>
    %353 = vector.extract_strided_slice %0 {offsets = [6, 0], sizes = [3, 32], strides = [1, 1]} : vector<27x32xf32> to vector<3x32xf32>
    %cst_185 = arith.constant dense<0.000000e+00> : vector<30x32xf32>
    %354 = tpu.matmul %352, %353, %cst_185 {dimension_numbers = #tpu.dot_dimension_numbers<[1], [0], [0], [1], [0, 0, 1, 1], [], []>} : vector<30x3xf32>, vector<3x32xf32>, vector<30x32xf32> -> vector<30x32xf32>
    %355 = arith.addf %351, %354 : vector<30x32xf32>
    %c0_186 = arith.constant 0 : index
    %c13 = arith.constant 13 : index
    %c0_187 = arith.constant 0 : index
    %c0_188 = arith.constant 0 : index
    %356 = vector.load %arg1[%c0_186, %c13, %c0_187, %c0_188] : memref<1x32x32x3xf32, #tpu.memory_space<vmem>>, vector<1x1x32x3xf32>
    %357 = vector.shape_cast %356 : vector<1x1x32x3xf32> to vector<32x3xf32>
    %358 = vector.extract_strided_slice %357 {offsets = [0, 0], sizes = [30, 3], strides = [1, 1]} : vector<32x3xf32> to vector<30x3xf32>
    %359 = vector.extract_strided_slice %0 {offsets = [9, 0], sizes = [3, 32], strides = [1, 1]} : vector<27x32xf32> to vector<3x32xf32>
    %cst_189 = arith.constant dense<0.000000e+00> : vector<30x32xf32>
    %360 = tpu.matmul %358, %359, %cst_189 {dimension_numbers = #tpu.dot_dimension_numbers<[1], [0], [0], [1], [0, 0, 1, 1], [], []>} : vector<30x3xf32>, vector<3x32xf32>, vector<30x32xf32> -> vector<30x32xf32>
    %361 = arith.addf %355, %360 : vector<30x32xf32>
    %362 = vector.extract_strided_slice %357 {offsets = [1, 0], sizes = [30, 3], strides = [1, 1]} : vector<32x3xf32> to vector<30x3xf32>
    %363 = vector.extract_strided_slice %0 {offsets = [12, 0], sizes = [3, 32], strides = [1, 1]} : vector<27x32xf32> to vector<3x32xf32>
    %cst_190 = arith.constant dense<0.000000e+00> : vector<30x32xf32>
    %364 = tpu.matmul %362, %363, %cst_190 {dimension_numbers = #tpu.dot_dimension_numbers<[1], [0], [0], [1], [0, 0, 1, 1], [], []>} : vector<30x3xf32>, vector<3x32xf32>, vector<30x32xf32> -> vector<30x32xf32>
    %365 = arith.addf %361, %364 : vector<30x32xf32>
    %366 = vector.extract_strided_slice %357 {offsets = [2, 0], sizes = [30, 3], strides = [1, 1]} : vector<32x3xf32> to vector<30x3xf32>
    %367 = vector.extract_strided_slice %0 {offsets = [15, 0], sizes = [3, 32], strides = [1, 1]} : vector<27x32xf32> to vector<3x32xf32>
    %cst_191 = arith.constant dense<0.000000e+00> : vector<30x32xf32>
    %368 = tpu.matmul %366, %367, %cst_191 {dimension_numbers = #tpu.dot_dimension_numbers<[1], [0], [0], [1], [0, 0, 1, 1], [], []>} : vector<30x3xf32>, vector<3x32xf32>, vector<30x32xf32> -> vector<30x32xf32>
    %369 = arith.addf %365, %368 : vector<30x32xf32>
    %c0_192 = arith.constant 0 : index
    %c14 = arith.constant 14 : index
    %c0_193 = arith.constant 0 : index
    %c0_194 = arith.constant 0 : index
    %370 = vector.load %arg1[%c0_192, %c14, %c0_193, %c0_194] : memref<1x32x32x3xf32, #tpu.memory_space<vmem>>, vector<1x1x32x3xf32>
    %371 = vector.shape_cast %370 : vector<1x1x32x3xf32> to vector<32x3xf32>
    %372 = vector.extract_strided_slice %371 {offsets = [0, 0], sizes = [30, 3], strides = [1, 1]} : vector<32x3xf32> to vector<30x3xf32>
    %373 = vector.extract_strided_slice %0 {offsets = [18, 0], sizes = [3, 32], strides = [1, 1]} : vector<27x32xf32> to vector<3x32xf32>
    %cst_195 = arith.constant dense<0.000000e+00> : vector<30x32xf32>
    %374 = tpu.matmul %372, %373, %cst_195 {dimension_numbers = #tpu.dot_dimension_numbers<[1], [0], [0], [1], [0, 0, 1, 1], [], []>} : vector<30x3xf32>, vector<3x32xf32>, vector<30x32xf32> -> vector<30x32xf32>
    %375 = arith.addf %369, %374 : vector<30x32xf32>
    %376 = vector.extract_strided_slice %371 {offsets = [1, 0], sizes = [30, 3], strides = [1, 1]} : vector<32x3xf32> to vector<30x3xf32>
    %377 = vector.extract_strided_slice %0 {offsets = [21, 0], sizes = [3, 32], strides = [1, 1]} : vector<27x32xf32> to vector<3x32xf32>
    %cst_196 = arith.constant dense<0.000000e+00> : vector<30x32xf32>
    %378 = tpu.matmul %376, %377, %cst_196 {dimension_numbers = #tpu.dot_dimension_numbers<[1], [0], [0], [1], [0, 0, 1, 1], [], []>} : vector<30x3xf32>, vector<3x32xf32>, vector<30x32xf32> -> vector<30x32xf32>
    %379 = arith.addf %375, %378 : vector<30x32xf32>
    %380 = vector.extract_strided_slice %371 {offsets = [2, 0], sizes = [30, 3], strides = [1, 1]} : vector<32x3xf32> to vector<30x3xf32>
    %381 = vector.extract_strided_slice %0 {offsets = [24, 0], sizes = [3, 32], strides = [1, 1]} : vector<27x32xf32> to vector<3x32xf32>
    %cst_197 = arith.constant dense<0.000000e+00> : vector<30x32xf32>
    %382 = tpu.matmul %380, %381, %cst_197 {dimension_numbers = #tpu.dot_dimension_numbers<[1], [0], [0], [1], [0, 0, 1, 1], [], []>} : vector<30x3xf32>, vector<3x32xf32>, vector<30x32xf32> -> vector<30x32xf32>
    %383 = arith.addf %379, %382 : vector<30x32xf32>
    %cst_198 = arith.constant dense<0.000000e+00> : vector<15x32xf32>
    %384 = tpu.matmul %16, %383, %cst_198 {dimension_numbers = #tpu.dot_dimension_numbers<[1], [0], [0], [1], [0, 0, 1, 1], [], []>} : vector<15x30xf32>, vector<30x32xf32>, vector<15x32xf32> -> vector<15x32xf32>
    %385 = vector.broadcast %5 : vector<1x32xf32> to vector<15x32xf32>
    %386 = arith.addf %384, %385 : vector<15x32xf32>
    %cst_199 = arith.constant 0.000000e+00 : f32
    %387 = vector.broadcast %cst_199 : f32 to vector<15x32xf32>
    %388 = arith.maximumf %386, %387 : vector<15x32xf32>
    %c7_200 = arith.constant 7 : index
    %c1_201 = arith.constant 1 : index
    %c0_202 = arith.constant 0 : index
    %389 = vector.load %arg13[%c7_200, %c1_201, %c0_202] : memref<17x17x32xf32, #tpu.memory_space<vmem>>, vector<1x15x32xf32>
    %390 = vector.shape_cast %389 : vector<1x15x32xf32> to vector<15x32xf32>
    %391 = vector.shape_cast %388 : vector<15x32xf32> to vector<1x15x32xf32>
    tpu.vector_store %arg13[%c7_200, %c1_201, %c0_202], %391 {strides = array<i32>} : memref<17x17x32xf32, #tpu.memory_space<vmem>>, vector<1x15x32xf32>,
    %cst_203 = arith.constant 0.000000e+00 : f32
    %392 = vector.broadcast %cst_203 : f32 to vector<30x32xf32>
    %c0_204 = arith.constant 0 : index
    %c14_205 = arith.constant 14 : index
    %c0_206 = arith.constant 0 : index
    %c0_207 = arith.constant 0 : index
    %393 = vector.load %arg1[%c0_204, %c14_205, %c0_206, %c0_207] : memref<1x32x32x3xf32, #tpu.memory_space<vmem>>, vector<1x1x32x3xf32>
    %394 = vector.shape_cast %393 : vector<1x1x32x3xf32> to vector<32x3xf32>
    %395 = vector.extract_strided_slice %394 {offsets = [0, 0], sizes = [30, 3], strides = [1, 1]} : vector<32x3xf32> to vector<30x3xf32>
    %396 = vector.extract_strided_slice %0 {offsets = [0, 0], sizes = [3, 32], strides = [1, 1]} : vector<27x32xf32> to vector<3x32xf32>
    %cst_208 = arith.constant dense<0.000000e+00> : vector<30x32xf32>
    %397 = tpu.matmul %395, %396, %cst_208 {dimension_numbers = #tpu.dot_dimension_numbers<[1], [0], [0], [1], [0, 0, 1, 1], [], []>} : vector<30x3xf32>, vector<3x32xf32>, vector<30x32xf32> -> vector<30x32xf32>
    %398 = arith.addf %392, %397 : vector<30x32xf32>
    %399 = vector.extract_strided_slice %394 {offsets = [1, 0], sizes = [30, 3], strides = [1, 1]} : vector<32x3xf32> to vector<30x3xf32>
    %400 = vector.extract_strided_slice %0 {offsets = [3, 0], sizes = [3, 32], strides = [1, 1]} : vector<27x32xf32> to vector<3x32xf32>
    %cst_209 = arith.constant dense<0.000000e+00> : vector<30x32xf32>
    %401 = tpu.matmul %399, %400, %cst_209 {dimension_numbers = #tpu.dot_dimension_numbers<[1], [0], [0], [1], [0, 0, 1, 1], [], []>} : vector<30x3xf32>, vector<3x32xf32>, vector<30x32xf32> -> vector<30x32xf32>
    %402 = arith.addf %398, %401 : vector<30x32xf32>
    %403 = vector.extract_strided_slice %394 {offsets = [2, 0], sizes = [30, 3], strides = [1, 1]} : vector<32x3xf32> to vector<30x3xf32>
    %404 = vector.extract_strided_slice %0 {offsets = [6, 0], sizes = [3, 32], strides = [1, 1]} : vector<27x32xf32> to vector<3x32xf32>
    %cst_210 = arith.constant dense<0.000000e+00> : vector<30x32xf32>
    %405 = tpu.matmul %403, %404, %cst_210 {dimension_numbers = #tpu.dot_dimension_numbers<[1], [0], [0], [1], [0, 0, 1, 1], [], []>} : vector<30x3xf32>, vector<3x32xf32>, vector<30x32xf32> -> vector<30x32xf32>
    %406 = arith.addf %402, %405 : vector<30x32xf32>
    %c0_211 = arith.constant 0 : index
    %c15 = arith.constant 15 : index
    %c0_212 = arith.constant 0 : index
    %c0_213 = arith.constant 0 : index
    %407 = vector.load %arg1[%c0_211, %c15, %c0_212, %c0_213] : memref<1x32x32x3xf32, #tpu.memory_space<vmem>>, vector<1x1x32x3xf32>
    %408 = vector.shape_cast %407 : vector<1x1x32x3xf32> to vector<32x3xf32>
    %409 = vector.extract_strided_slice %408 {offsets = [0, 0], sizes = [30, 3], strides = [1, 1]} : vector<32x3xf32> to vector<30x3xf32>
    %410 = vector.extract_strided_slice %0 {offsets = [9, 0], sizes = [3, 32], strides = [1, 1]} : vector<27x32xf32> to vector<3x32xf32>
    %cst_214 = arith.constant dense<0.000000e+00> : vector<30x32xf32>
    %411 = tpu.matmul %409, %410, %cst_214 {dimension_numbers = #tpu.dot_dimension_numbers<[1], [0], [0], [1], [0, 0, 1, 1], [], []>} : vector<30x3xf32>, vector<3x32xf32>, vector<30x32xf32> -> vector<30x32xf32>
    %412 = arith.addf %406, %411 : vector<30x32xf32>
    %413 = vector.extract_strided_slice %408 {offsets = [1, 0], sizes = [30, 3], strides = [1, 1]} : vector<32x3xf32> to vector<30x3xf32>
    %414 = vector.extract_strided_slice %0 {offsets = [12, 0], sizes = [3, 32], strides = [1, 1]} : vector<27x32xf32> to vector<3x32xf32>
    %cst_215 = arith.constant dense<0.000000e+00> : vector<30x32xf32>
    %415 = tpu.matmul %413, %414, %cst_215 {dimension_numbers = #tpu.dot_dimension_numbers<[1], [0], [0], [1], [0, 0, 1, 1], [], []>} : vector<30x3xf32>, vector<3x32xf32>, vector<30x32xf32> -> vector<30x32xf32>
    %416 = arith.addf %412, %415 : vector<30x32xf32>
    %417 = vector.extract_strided_slice %408 {offsets = [2, 0], sizes = [30, 3], strides = [1, 1]} : vector<32x3xf32> to vector<30x3xf32>
    %418 = vector.extract_strided_slice %0 {offsets = [15, 0], sizes = [3, 32], strides = [1, 1]} : vector<27x32xf32> to vector<3x32xf32>
    %cst_216 = arith.constant dense<0.000000e+00> : vector<30x32xf32>
    %419 = tpu.matmul %417, %418, %cst_216 {dimension_numbers = #tpu.dot_dimension_numbers<[1], [0], [0], [1], [0, 0, 1, 1], [], []>} : vector<30x3xf32>, vector<3x32xf32>, vector<30x32xf32> -> vector<30x32xf32>
    %420 = arith.addf %416, %419 : vector<30x32xf32>
    %c0_217 = arith.constant 0 : index
    %c16 = arith.constant 16 : index
    %c0_218 = arith.constant 0 : index
    %c0_219 = arith.constant 0 : index
    %421 = vector.load %arg1[%c0_217, %c16, %c0_218, %c0_219] : memref<1x32x32x3xf32, #tpu.memory_space<vmem>>, vector<1x1x32x3xf32>
    %422 = vector.shape_cast %421 : vector<1x1x32x3xf32> to vector<32x3xf32>
    %423 = vector.extract_strided_slice %422 {offsets = [0, 0], sizes = [30, 3], strides = [1, 1]} : vector<32x3xf32> to vector<30x3xf32>
    %424 = vector.extract_strided_slice %0 {offsets = [18, 0], sizes = [3, 32], strides = [1, 1]} : vector<27x32xf32> to vector<3x32xf32>
    %cst_220 = arith.constant dense<0.000000e+00> : vector<30x32xf32>
    %425 = tpu.matmul %423, %424, %cst_220 {dimension_numbers = #tpu.dot_dimension_numbers<[1], [0], [0], [1], [0, 0, 1, 1], [], []>} : vector<30x3xf32>, vector<3x32xf32>, vector<30x32xf32> -> vector<30x32xf32>
    %426 = arith.addf %420, %425 : vector<30x32xf32>
    %427 = vector.extract_strided_slice %422 {offsets = [1, 0], sizes = [30, 3], strides = [1, 1]} : vector<32x3xf32> to vector<30x3xf32>
    %428 = vector.extract_strided_slice %0 {offsets = [21, 0], sizes = [3, 32], strides = [1, 1]} : vector<27x32xf32> to vector<3x32xf32>
    %cst_221 = arith.constant dense<0.000000e+00> : vector<30x32xf32>
    %429 = tpu.matmul %427, %428, %cst_221 {dimension_numbers = #tpu.dot_dimension_numbers<[1], [0], [0], [1], [0, 0, 1, 1], [], []>} : vector<30x3xf32>, vector<3x32xf32>, vector<30x32xf32> -> vector<30x32xf32>
    %430 = arith.addf %426, %429 : vector<30x32xf32>
    %431 = vector.extract_strided_slice %422 {offsets = [2, 0], sizes = [30, 3], strides = [1, 1]} : vector<32x3xf32> to vector<30x3xf32>
    %432 = vector.extract_strided_slice %0 {offsets = [24, 0], sizes = [3, 32], strides = [1, 1]} : vector<27x32xf32> to vector<3x32xf32>
    %cst_222 = arith.constant dense<0.000000e+00> : vector<30x32xf32>
    %433 = tpu.matmul %431, %432, %cst_222 {dimension_numbers = #tpu.dot_dimension_numbers<[1], [0], [0], [1], [0, 0, 1, 1], [], []>} : vector<30x3xf32>, vector<3x32xf32>, vector<30x32xf32> -> vector<30x32xf32>
    %434 = arith.addf %430, %433 : vector<30x32xf32>
    %cst_223 = arith.constant dense<0.000000e+00> : vector<15x32xf32>
    %435 = tpu.matmul %16, %434, %cst_223 {dimension_numbers = #tpu.dot_dimension_numbers<[1], [0], [0], [1], [0, 0, 1, 1], [], []>} : vector<15x30xf32>, vector<30x32xf32>, vector<15x32xf32> -> vector<15x32xf32>
    %436 = vector.broadcast %5 : vector<1x32xf32> to vector<15x32xf32>
    %437 = arith.addf %435, %436 : vector<15x32xf32>
    %cst_224 = arith.constant 0.000000e+00 : f32
    %438 = vector.broadcast %cst_224 : f32 to vector<15x32xf32>
    %439 = arith.maximumf %437, %438 : vector<15x32xf32>
    %c8_225 = arith.constant 8 : index
    %c1_226 = arith.constant 1 : index
    %c0_227 = arith.constant 0 : index
    %440 = vector.load %arg13[%c8_225, %c1_226, %c0_227] : memref<17x17x32xf32, #tpu.memory_space<vmem>>, vector<1x15x32xf32>
    %441 = vector.shape_cast %440 : vector<1x15x32xf32> to vector<15x32xf32>
    %442 = vector.shape_cast %439 : vector<15x32xf32> to vector<1x15x32xf32>
    tpu.vector_store %arg13[%c8_225, %c1_226, %c0_227], %442 {strides = array<i32>} : memref<17x17x32xf32, #tpu.memory_space<vmem>>, vector<1x15x32xf32>,
    %cst_228 = arith.constant 0.000000e+00 : f32
    %443 = vector.broadcast %cst_228 : f32 to vector<30x32xf32>
    %c0_229 = arith.constant 0 : index
    %c16_230 = arith.constant 16 : index
    %c0_231 = arith.constant 0 : index
    %c0_232 = arith.constant 0 : index
    %444 = vector.load %arg1[%c0_229, %c16_230, %c0_231, %c0_232] : memref<1x32x32x3xf32, #tpu.memory_space<vmem>>, vector<1x1x32x3xf32>
    %445 = vector.shape_cast %444 : vector<1x1x32x3xf32> to vector<32x3xf32>
    %446 = vector.extract_strided_slice %445 {offsets = [0, 0], sizes = [30, 3], strides = [1, 1]} : vector<32x3xf32> to vector<30x3xf32>
    %447 = vector.extract_strided_slice %0 {offsets = [0, 0], sizes = [3, 32], strides = [1, 1]} : vector<27x32xf32> to vector<3x32xf32>
    %cst_233 = arith.constant dense<0.000000e+00> : vector<30x32xf32>
    %448 = tpu.matmul %446, %447, %cst_233 {dimension_numbers = #tpu.dot_dimension_numbers<[1], [0], [0], [1], [0, 0, 1, 1], [], []>} : vector<30x3xf32>, vector<3x32xf32>, vector<30x32xf32> -> vector<30x32xf32>
    %449 = arith.addf %443, %448 : vector<30x32xf32>
    %450 = vector.extract_strided_slice %445 {offsets = [1, 0], sizes = [30, 3], strides = [1, 1]} : vector<32x3xf32> to vector<30x3xf32>
    %451 = vector.extract_strided_slice %0 {offsets = [3, 0], sizes = [3, 32], strides = [1, 1]} : vector<27x32xf32> to vector<3x32xf32>
    %cst_234 = arith.constant dense<0.000000e+00> : vector<30x32xf32>
    %452 = tpu.matmul %450, %451, %cst_234 {dimension_numbers = #tpu.dot_dimension_numbers<[1], [0], [0], [1], [0, 0, 1, 1], [], []>} : vector<30x3xf32>, vector<3x32xf32>, vector<30x32xf32> -> vector<30x32xf32>
    %453 = arith.addf %449, %452 : vector<30x32xf32>
    %454 = vector.extract_strided_slice %445 {offsets = [2, 0], sizes = [30, 3], strides = [1, 1]} : vector<32x3xf32> to vector<30x3xf32>
    %455 = vector.extract_strided_slice %0 {offsets = [6, 0], sizes = [3, 32], strides = [1, 1]} : vector<27x32xf32> to vector<3x32xf32>
    %cst_235 = arith.constant dense<0.000000e+00> : vector<30x32xf32>
    %456 = tpu.matmul %454, %455, %cst_235 {dimension_numbers = #tpu.dot_dimension_numbers<[1], [0], [0], [1], [0, 0, 1, 1], [], []>} : vector<30x3xf32>, vector<3x32xf32>, vector<30x32xf32> -> vector<30x32xf32>
    %457 = arith.addf %453, %456 : vector<30x32xf32>
    %c0_236 = arith.constant 0 : index
    %c17 = arith.constant 17 : index
    %c0_237 = arith.constant 0 : index
    %c0_238 = arith.constant 0 : index
    %458 = vector.load %arg1[%c0_236, %c17, %c0_237, %c0_238] : memref<1x32x32x3xf32, #tpu.memory_space<vmem>>, vector<1x1x32x3xf32>
    %459 = vector.shape_cast %458 : vector<1x1x32x3xf32> to vector<32x3xf32>
    %460 = vector.extract_strided_slice %459 {offsets = [0, 0], sizes = [30, 3], strides = [1, 1]} : vector<32x3xf32> to vector<30x3xf32>
    %461 = vector.extract_strided_slice %0 {offsets = [9, 0], sizes = [3, 32], strides = [1, 1]} : vector<27x32xf32> to vector<3x32xf32>
    %cst_239 = arith.constant dense<0.000000e+00> : vector<30x32xf32>
    %462 = tpu.matmul %460, %461, %cst_239 {dimension_numbers = #tpu.dot_dimension_numbers<[1], [0], [0], [1], [0, 0, 1, 1], [], []>} : vector<30x3xf32>, vector<3x32xf32>, vector<30x32xf32> -> vector<30x32xf32>
    %463 = arith.addf %457, %462 : vector<30x32xf32>
    %464 = vector.extract_strided_slice %459 {offsets = [1, 0], sizes = [30, 3], strides = [1, 1]} : vector<32x3xf32> to vector<30x3xf32>
    %465 = vector.extract_strided_slice %0 {offsets = [12, 0], sizes = [3, 32], strides = [1, 1]} : vector<27x32xf32> to vector<3x32xf32>
    %cst_240 = arith.constant dense<0.000000e+00> : vector<30x32xf32>
    %466 = tpu.matmul %464, %465, %cst_240 {dimension_numbers = #tpu.dot_dimension_numbers<[1], [0], [0], [1], [0, 0, 1, 1], [], []>} : vector<30x3xf32>, vector<3x32xf32>, vector<30x32xf32> -> vector<30x32xf32>
    %467 = arith.addf %463, %466 : vector<30x32xf32>
    %468 = vector.extract_strided_slice %459 {offsets = [2, 0], sizes = [30, 3], strides = [1, 1]} : vector<32x3xf32> to vector<30x3xf32>
    %469 = vector.extract_strided_slice %0 {offsets = [15, 0], sizes = [3, 32], strides = [1, 1]} : vector<27x32xf32> to vector<3x32xf32>
    %cst_241 = arith.constant dense<0.000000e+00> : vector<30x32xf32>
    %470 = tpu.matmul %468, %469, %cst_241 {dimension_numbers = #tpu.dot_dimension_numbers<[1], [0], [0], [1], [0, 0, 1, 1], [], []>} : vector<30x3xf32>, vector<3x32xf32>, vector<30x32xf32> -> vector<30x32xf32>
    %471 = arith.addf %467, %470 : vector<30x32xf32>
    %c0_242 = arith.constant 0 : index
    %c18 = arith.constant 18 : index
    %c0_243 = arith.constant 0 : index
    %c0_244 = arith.constant 0 : index
    %472 = vector.load %arg1[%c0_242, %c18, %c0_243, %c0_244] : memref<1x32x32x3xf32, #tpu.memory_space<vmem>>, vector<1x1x32x3xf32>
    %473 = vector.shape_cast %472 : vector<1x1x32x3xf32> to vector<32x3xf32>
    %474 = vector.extract_strided_slice %473 {offsets = [0, 0], sizes = [30, 3], strides = [1, 1]} : vector<32x3xf32> to vector<30x3xf32>
    %475 = vector.extract_strided_slice %0 {offsets = [18, 0], sizes = [3, 32], strides = [1, 1]} : vector<27x32xf32> to vector<3x32xf32>
    %cst_245 = arith.constant dense<0.000000e+00> : vector<30x32xf32>
    %476 = tpu.matmul %474, %475, %cst_245 {dimension_numbers = #tpu.dot_dimension_numbers<[1], [0], [0], [1], [0, 0, 1, 1], [], []>} : vector<30x3xf32>, vector<3x32xf32>, vector<30x32xf32> -> vector<30x32xf32>
    %477 = arith.addf %471, %476 : vector<30x32xf32>
    %478 = vector.extract_strided_slice %473 {offsets = [1, 0], sizes = [30, 3], strides = [1, 1]} : vector<32x3xf32> to vector<30x3xf32>
    %479 = vector.extract_strided_slice %0 {offsets = [21, 0], sizes = [3, 32], strides = [1, 1]} : vector<27x32xf32> to vector<3x32xf32>
    %cst_246 = arith.constant dense<0.000000e+00> : vector<30x32xf32>
    %480 = tpu.matmul %478, %479, %cst_246 {dimension_numbers = #tpu.dot_dimension_numbers<[1], [0], [0], [1], [0, 0, 1, 1], [], []>} : vector<30x3xf32>, vector<3x32xf32>, vector<30x32xf32> -> vector<30x32xf32>
    %481 = arith.addf %477, %480 : vector<30x32xf32>
    %482 = vector.extract_strided_slice %473 {offsets = [2, 0], sizes = [30, 3], strides = [1, 1]} : vector<32x3xf32> to vector<30x3xf32>
    %483 = vector.extract_strided_slice %0 {offsets = [24, 0], sizes = [3, 32], strides = [1, 1]} : vector<27x32xf32> to vector<3x32xf32>
    %cst_247 = arith.constant dense<0.000000e+00> : vector<30x32xf32>
    %484 = tpu.matmul %482, %483, %cst_247 {dimension_numbers = #tpu.dot_dimension_numbers<[1], [0], [0], [1], [0, 0, 1, 1], [], []>} : vector<30x3xf32>, vector<3x32xf32>, vector<30x32xf32> -> vector<30x32xf32>
    %485 = arith.addf %481, %484 : vector<30x32xf32>
    %cst_248 = arith.constant dense<0.000000e+00> : vector<15x32xf32>
    %486 = tpu.matmul %16, %485, %cst_248 {dimension_numbers = #tpu.dot_dimension_numbers<[1], [0], [0], [1], [0, 0, 1, 1], [], []>} : vector<15x30xf32>, vector<30x32xf32>, vector<15x32xf32> -> vector<15x32xf32>
    %487 = vector.broadcast %5 : vector<1x32xf32> to vector<15x32xf32>
    %488 = arith.addf %486, %487 : vector<15x32xf32>
    %cst_249 = arith.constant 0.000000e+00 : f32
    %489 = vector.broadcast %cst_249 : f32 to vector<15x32xf32>
    %490 = arith.maximumf %488, %489 : vector<15x32xf32>
    %c9_250 = arith.constant 9 : index
    %c1_251 = arith.constant 1 : index
    %c0_252 = arith.constant 0 : index
    %491 = vector.load %arg13[%c9_250, %c1_251, %c0_252] : memref<17x17x32xf32, #tpu.memory_space<vmem>>, vector<1x15x32xf32>
    %492 = vector.shape_cast %491 : vector<1x15x32xf32> to vector<15x32xf32>
    %493 = vector.shape_cast %490 : vector<15x32xf32> to vector<1x15x32xf32>
    tpu.vector_store %arg13[%c9_250, %c1_251, %c0_252], %493 {strides = array<i32>} : memref<17x17x32xf32, #tpu.memory_space<vmem>>, vector<1x15x32xf32>,
    %cst_253 = arith.constant 0.000000e+00 : f32
    %494 = vector.broadcast %cst_253 : f32 to vector<30x32xf32>
    %c0_254 = arith.constant 0 : index
    %c18_255 = arith.constant 18 : index
    %c0_256 = arith.constant 0 : index
    %c0_257 = arith.constant 0 : index
    %495 = vector.load %arg1[%c0_254, %c18_255, %c0_256, %c0_257] : memref<1x32x32x3xf32, #tpu.memory_space<vmem>>, vector<1x1x32x3xf32>
    %496 = vector.shape_cast %495 : vector<1x1x32x3xf32> to vector<32x3xf32>
    %497 = vector.extract_strided_slice %496 {offsets = [0, 0], sizes = [30, 3], strides = [1, 1]} : vector<32x3xf32> to vector<30x3xf32>
    %498 = vector.extract_strided_slice %0 {offsets = [0, 0], sizes = [3, 32], strides = [1, 1]} : vector<27x32xf32> to vector<3x32xf32>
    %cst_258 = arith.constant dense<0.000000e+00> : vector<30x32xf32>
    %499 = tpu.matmul %497, %498, %cst_258 {dimension_numbers = #tpu.dot_dimension_numbers<[1], [0], [0], [1], [0, 0, 1, 1], [], []>} : vector<30x3xf32>, vector<3x32xf32>, vector<30x32xf32> -> vector<30x32xf32>
    %500 = arith.addf %494, %499 : vector<30x32xf32>
    %501 = vector.extract_strided_slice %496 {offsets = [1, 0], sizes = [30, 3], strides = [1, 1]} : vector<32x3xf32> to vector<30x3xf32>
    %502 = vector.extract_strided_slice %0 {offsets = [3, 0], sizes = [3, 32], strides = [1, 1]} : vector<27x32xf32> to vector<3x32xf32>
    %cst_259 = arith.constant dense<0.000000e+00> : vector<30x32xf32>
    %503 = tpu.matmul %501, %502, %cst_259 {dimension_numbers = #tpu.dot_dimension_numbers<[1], [0], [0], [1], [0, 0, 1, 1], [], []>} : vector<30x3xf32>, vector<3x32xf32>, vector<30x32xf32> -> vector<30x32xf32>
    %504 = arith.addf %500, %503 : vector<30x32xf32>
    %505 = vector.extract_strided_slice %496 {offsets = [2, 0], sizes = [30, 3], strides = [1, 1]} : vector<32x3xf32> to vector<30x3xf32>
    %506 = vector.extract_strided_slice %0 {offsets = [6, 0], sizes = [3, 32], strides = [1, 1]} : vector<27x32xf32> to vector<3x32xf32>
    %cst_260 = arith.constant dense<0.000000e+00> : vector<30x32xf32>
    %507 = tpu.matmul %505, %506, %cst_260 {dimension_numbers = #tpu.dot_dimension_numbers<[1], [0], [0], [1], [0, 0, 1, 1], [], []>} : vector<30x3xf32>, vector<3x32xf32>, vector<30x32xf32> -> vector<30x32xf32>
    %508 = arith.addf %504, %507 : vector<30x32xf32>
    %c0_261 = arith.constant 0 : index
    %c19 = arith.constant 19 : index
    %c0_262 = arith.constant 0 : index
    %c0_263 = arith.constant 0 : index
    %509 = vector.load %arg1[%c0_261, %c19, %c0_262, %c0_263] : memref<1x32x32x3xf32, #tpu.memory_space<vmem>>, vector<1x1x32x3xf32>
    %510 = vector.shape_cast %509 : vector<1x1x32x3xf32> to vector<32x3xf32>
    %511 = vector.extract_strided_slice %510 {offsets = [0, 0], sizes = [30, 3], strides = [1, 1]} : vector<32x3xf32> to vector<30x3xf32>
    %512 = vector.extract_strided_slice %0 {offsets = [9, 0], sizes = [3, 32], strides = [1, 1]} : vector<27x32xf32> to vector<3x32xf32>
    %cst_264 = arith.constant dense<0.000000e+00> : vector<30x32xf32>
    %513 = tpu.matmul %511, %512, %cst_264 {dimension_numbers = #tpu.dot_dimension_numbers<[1], [0], [0], [1], [0, 0, 1, 1], [], []>} : vector<30x3xf32>, vector<3x32xf32>, vector<30x32xf32> -> vector<30x32xf32>
    %514 = arith.addf %508, %513 : vector<30x32xf32>
    %515 = vector.extract_strided_slice %510 {offsets = [1, 0], sizes = [30, 3], strides = [1, 1]} : vector<32x3xf32> to vector<30x3xf32>
    %516 = vector.extract_strided_slice %0 {offsets = [12, 0], sizes = [3, 32], strides = [1, 1]} : vector<27x32xf32> to vector<3x32xf32>
    %cst_265 = arith.constant dense<0.000000e+00> : vector<30x32xf32>
    %517 = tpu.matmul %515, %516, %cst_265 {dimension_numbers = #tpu.dot_dimension_numbers<[1], [0], [0], [1], [0, 0, 1, 1], [], []>} : vector<30x3xf32>, vector<3x32xf32>, vector<30x32xf32> -> vector<30x32xf32>
    %518 = arith.addf %514, %517 : vector<30x32xf32>
    %519 = vector.extract_strided_slice %510 {offsets = [2, 0], sizes = [30, 3], strides = [1, 1]} : vector<32x3xf32> to vector<30x3xf32>
    %520 = vector.extract_strided_slice %0 {offsets = [15, 0], sizes = [3, 32], strides = [1, 1]} : vector<27x32xf32> to vector<3x32xf32>
    %cst_266 = arith.constant dense<0.000000e+00> : vector<30x32xf32>
    %521 = tpu.matmul %519, %520, %cst_266 {dimension_numbers = #tpu.dot_dimension_numbers<[1], [0], [0], [1], [0, 0, 1, 1], [], []>} : vector<30x3xf32>, vector<3x32xf32>, vector<30x32xf32> -> vector<30x32xf32>
    %522 = arith.addf %518, %521 : vector<30x32xf32>
    %c0_267 = arith.constant 0 : index
    %c20 = arith.constant 20 : index
    %c0_268 = arith.constant 0 : index
    %c0_269 = arith.constant 0 : index
    %523 = vector.load %arg1[%c0_267, %c20, %c0_268, %c0_269] : memref<1x32x32x3xf32, #tpu.memory_space<vmem>>, vector<1x1x32x3xf32>
    %524 = vector.shape_cast %523 : vector<1x1x32x3xf32> to vector<32x3xf32>
    %525 = vector.extract_strided_slice %524 {offsets = [0, 0], sizes = [30, 3], strides = [1, 1]} : vector<32x3xf32> to vector<30x3xf32>
    %526 = vector.extract_strided_slice %0 {offsets = [18, 0], sizes = [3, 32], strides = [1, 1]} : vector<27x32xf32> to vector<3x32xf32>
    %cst_270 = arith.constant dense<0.000000e+00> : vector<30x32xf32>
    %527 = tpu.matmul %525, %526, %cst_270 {dimension_numbers = #tpu.dot_dimension_numbers<[1], [0], [0], [1], [0, 0, 1, 1], [], []>} : vector<30x3xf32>, vector<3x32xf32>, vector<30x32xf32> -> vector<30x32xf32>
    %528 = arith.addf %522, %527 : vector<30x32xf32>
    %529 = vector.extract_strided_slice %524 {offsets = [1, 0], sizes = [30, 3], strides = [1, 1]} : vector<32x3xf32> to vector<30x3xf32>
    %530 = vector.extract_strided_slice %0 {offsets = [21, 0], sizes = [3, 32], strides = [1, 1]} : vector<27x32xf32> to vector<3x32xf32>
    %cst_271 = arith.constant dense<0.000000e+00> : vector<30x32xf32>
    %531 = tpu.matmul %529, %530, %cst_271 {dimension_numbers = #tpu.dot_dimension_numbers<[1], [0], [0], [1], [0, 0, 1, 1], [], []>} : vector<30x3xf32>, vector<3x32xf32>, vector<30x32xf32> -> vector<30x32xf32>
    %532 = arith.addf %528, %531 : vector<30x32xf32>
    %533 = vector.extract_strided_slice %524 {offsets = [2, 0], sizes = [30, 3], strides = [1, 1]} : vector<32x3xf32> to vector<30x3xf32>
    %534 = vector.extract_strided_slice %0 {offsets = [24, 0], sizes = [3, 32], strides = [1, 1]} : vector<27x32xf32> to vector<3x32xf32>
    %cst_272 = arith.constant dense<0.000000e+00> : vector<30x32xf32>
    %535 = tpu.matmul %533, %534, %cst_272 {dimension_numbers = #tpu.dot_dimension_numbers<[1], [0], [0], [1], [0, 0, 1, 1], [], []>} : vector<30x3xf32>, vector<3x32xf32>, vector<30x32xf32> -> vector<30x32xf32>
    %536 = arith.addf %532, %535 : vector<30x32xf32>
    %cst_273 = arith.constant dense<0.000000e+00> : vector<15x32xf32>
    %537 = tpu.matmul %16, %536, %cst_273 {dimension_numbers = #tpu.dot_dimension_numbers<[1], [0], [0], [1], [0, 0, 1, 1], [], []>} : vector<15x30xf32>, vector<30x32xf32>, vector<15x32xf32> -> vector<15x32xf32>
    %538 = vector.broadcast %5 : vector<1x32xf32> to vector<15x32xf32>
    %539 = arith.addf %537, %538 : vector<15x32xf32>
    %cst_274 = arith.constant 0.000000e+00 : f32
    %540 = vector.broadcast %cst_274 : f32 to vector<15x32xf32>
    %541 = arith.maximumf %539, %540 : vector<15x32xf32>
    %c10_275 = arith.constant 10 : index
    %c1_276 = arith.constant 1 : index
    %c0_277 = arith.constant 0 : index
    %542 = vector.load %arg13[%c10_275, %c1_276, %c0_277] : memref<17x17x32xf32, #tpu.memory_space<vmem>>, vector<1x15x32xf32>
    %543 = vector.shape_cast %542 : vector<1x15x32xf32> to vector<15x32xf32>
    %544 = vector.shape_cast %541 : vector<15x32xf32> to vector<1x15x32xf32>
    tpu.vector_store %arg13[%c10_275, %c1_276, %c0_277], %544 {strides = array<i32>} : memref<17x17x32xf32, #tpu.memory_space<vmem>>, vector<1x15x32xf32>,
    %cst_278 = arith.constant 0.000000e+00 : f32
    %545 = vector.broadcast %cst_278 : f32 to vector<30x32xf32>
    %c0_279 = arith.constant 0 : index
    %c20_280 = arith.constant 20 : index
    %c0_281 = arith.constant 0 : index
    %c0_282 = arith.constant 0 : index
    %546 = vector.load %arg1[%c0_279, %c20_280, %c0_281, %c0_282] : memref<1x32x32x3xf32, #tpu.memory_space<vmem>>, vector<1x1x32x3xf32>
    %547 = vector.shape_cast %546 : vector<1x1x32x3xf32> to vector<32x3xf32>
    %548 = vector.extract_strided_slice %547 {offsets = [0, 0], sizes = [30, 3], strides = [1, 1]} : vector<32x3xf32> to vector<30x3xf32>
    %549 = vector.extract_strided_slice %0 {offsets = [0, 0], sizes = [3, 32], strides = [1, 1]} : vector<27x32xf32> to vector<3x32xf32>
    %cst_283 = arith.constant dense<0.000000e+00> : vector<30x32xf32>
    %550 = tpu.matmul %548, %549, %cst_283 {dimension_numbers = #tpu.dot_dimension_numbers<[1], [0], [0], [1], [0, 0, 1, 1], [], []>} : vector<30x3xf32>, vector<3x32xf32>, vector<30x32xf32> -> vector<30x32xf32>
    %551 = arith.addf %545, %550 : vector<30x32xf32>
    %552 = vector.extract_strided_slice %547 {offsets = [1, 0], sizes = [30, 3], strides = [1, 1]} : vector<32x3xf32> to vector<30x3xf32>
    %553 = vector.extract_strided_slice %0 {offsets = [3, 0], sizes = [3, 32], strides = [1, 1]} : vector<27x32xf32> to vector<3x32xf32>
    %cst_284 = arith.constant dense<0.000000e+00> : vector<30x32xf32>
    %554 = tpu.matmul %552, %553, %cst_284 {dimension_numbers = #tpu.dot_dimension_numbers<[1], [0], [0], [1], [0, 0, 1, 1], [], []>} : vector<30x3xf32>, vector<3x32xf32>, vector<30x32xf32> -> vector<30x32xf32>
    %555 = arith.addf %551, %554 : vector<30x32xf32>
    %556 = vector.extract_strided_slice %547 {offsets = [2, 0], sizes = [30, 3], strides = [1, 1]} : vector<32x3xf32> to vector<30x3xf32>
    %557 = vector.extract_strided_slice %0 {offsets = [6, 0], sizes = [3, 32], strides = [1, 1]} : vector<27x32xf32> to vector<3x32xf32>
    %cst_285 = arith.constant dense<0.000000e+00> : vector<30x32xf32>
    %558 = tpu.matmul %556, %557, %cst_285 {dimension_numbers = #tpu.dot_dimension_numbers<[1], [0], [0], [1], [0, 0, 1, 1], [], []>} : vector<30x3xf32>, vector<3x32xf32>, vector<30x32xf32> -> vector<30x32xf32>
    %559 = arith.addf %555, %558 : vector<30x32xf32>
    %c0_286 = arith.constant 0 : index
    %c21 = arith.constant 21 : index
    %c0_287 = arith.constant 0 : index
    %c0_288 = arith.constant 0 : index
    %560 = vector.load %arg1[%c0_286, %c21, %c0_287, %c0_288] : memref<1x32x32x3xf32, #tpu.memory_space<vmem>>, vector<1x1x32x3xf32>
    %561 = vector.shape_cast %560 : vector<1x1x32x3xf32> to vector<32x3xf32>
    %562 = vector.extract_strided_slice %561 {offsets = [0, 0], sizes = [30, 3], strides = [1, 1]} : vector<32x3xf32> to vector<30x3xf32>
    %563 = vector.extract_strided_slice %0 {offsets = [9, 0], sizes = [3, 32], strides = [1, 1]} : vector<27x32xf32> to vector<3x32xf32>
    %cst_289 = arith.constant dense<0.000000e+00> : vector<30x32xf32>
    %564 = tpu.matmul %562, %563, %cst_289 {dimension_numbers = #tpu.dot_dimension_numbers<[1], [0], [0], [1], [0, 0, 1, 1], [], []>} : vector<30x3xf32>, vector<3x32xf32>, vector<30x32xf32> -> vector<30x32xf32>
    %565 = arith.addf %559, %564 : vector<30x32xf32>
    %566 = vector.extract_strided_slice %561 {offsets = [1, 0], sizes = [30, 3], strides = [1, 1]} : vector<32x3xf32> to vector<30x3xf32>
    %567 = vector.extract_strided_slice %0 {offsets = [12, 0], sizes = [3, 32], strides = [1, 1]} : vector<27x32xf32> to vector<3x32xf32>
    %cst_290 = arith.constant dense<0.000000e+00> : vector<30x32xf32>
    %568 = tpu.matmul %566, %567, %cst_290 {dimension_numbers = #tpu.dot_dimension_numbers<[1], [0], [0], [1], [0, 0, 1, 1], [], []>} : vector<30x3xf32>, vector<3x32xf32>, vector<30x32xf32> -> vector<30x32xf32>
    %569 = arith.addf %565, %568 : vector<30x32xf32>
    %570 = vector.extract_strided_slice %561 {offsets = [2, 0], sizes = [30, 3], strides = [1, 1]} : vector<32x3xf32> to vector<30x3xf32>
    %571 = vector.extract_strided_slice %0 {offsets = [15, 0], sizes = [3, 32], strides = [1, 1]} : vector<27x32xf32> to vector<3x32xf32>
    %cst_291 = arith.constant dense<0.000000e+00> : vector<30x32xf32>
    %572 = tpu.matmul %570, %571, %cst_291 {dimension_numbers = #tpu.dot_dimension_numbers<[1], [0], [0], [1], [0, 0, 1, 1], [], []>} : vector<30x3xf32>, vector<3x32xf32>, vector<30x32xf32> -> vector<30x32xf32>
    %573 = arith.addf %569, %572 : vector<30x32xf32>
    %c0_292 = arith.constant 0 : index
    %c22 = arith.constant 22 : index
    %c0_293 = arith.constant 0 : index
    %c0_294 = arith.constant 0 : index
    %574 = vector.load %arg1[%c0_292, %c22, %c0_293, %c0_294] : memref<1x32x32x3xf32, #tpu.memory_space<vmem>>, vector<1x1x32x3xf32>
    %575 = vector.shape_cast %574 : vector<1x1x32x3xf32> to vector<32x3xf32>
    %576 = vector.extract_strided_slice %575 {offsets = [0, 0], sizes = [30, 3], strides = [1, 1]} : vector<32x3xf32> to vector<30x3xf32>
    %577 = vector.extract_strided_slice %0 {offsets = [18, 0], sizes = [3, 32], strides = [1, 1]} : vector<27x32xf32> to vector<3x32xf32>
    %cst_295 = arith.constant dense<0.000000e+00> : vector<30x32xf32>
    %578 = tpu.matmul %576, %577, %cst_295 {dimension_numbers = #tpu.dot_dimension_numbers<[1], [0], [0], [1], [0, 0, 1, 1], [], []>} : vector<30x3xf32>, vector<3x32xf32>, vector<30x32xf32> -> vector<30x32xf32>
    %579 = arith.addf %573, %578 : vector<30x32xf32>
    %580 = vector.extract_strided_slice %575 {offsets = [1, 0], sizes = [30, 3], strides = [1, 1]} : vector<32x3xf32> to vector<30x3xf32>
    %581 = vector.extract_strided_slice %0 {offsets = [21, 0], sizes = [3, 32], strides = [1, 1]} : vector<27x32xf32> to vector<3x32xf32>
    %cst_296 = arith.constant dense<0.000000e+00> : vector<30x32xf32>
    %582 = tpu.matmul %580, %581, %cst_296 {dimension_numbers = #tpu.dot_dimension_numbers<[1], [0], [0], [1], [0, 0, 1, 1], [], []>} : vector<30x3xf32>, vector<3x32xf32>, vector<30x32xf32> -> vector<30x32xf32>
    %583 = arith.addf %579, %582 : vector<30x32xf32>
    %584 = vector.extract_strided_slice %575 {offsets = [2, 0], sizes = [30, 3], strides = [1, 1]} : vector<32x3xf32> to vector<30x3xf32>
    %585 = vector.extract_strided_slice %0 {offsets = [24, 0], sizes = [3, 32], strides = [1, 1]} : vector<27x32xf32> to vector<3x32xf32>
    %cst_297 = arith.constant dense<0.000000e+00> : vector<30x32xf32>
    %586 = tpu.matmul %584, %585, %cst_297 {dimension_numbers = #tpu.dot_dimension_numbers<[1], [0], [0], [1], [0, 0, 1, 1], [], []>} : vector<30x3xf32>, vector<3x32xf32>, vector<30x32xf32> -> vector<30x32xf32>
    %587 = arith.addf %583, %586 : vector<30x32xf32>
    %cst_298 = arith.constant dense<0.000000e+00> : vector<15x32xf32>
    %588 = tpu.matmul %16, %587, %cst_298 {dimension_numbers = #tpu.dot_dimension_numbers<[1], [0], [0], [1], [0, 0, 1, 1], [], []>} : vector<15x30xf32>, vector<30x32xf32>, vector<15x32xf32> -> vector<15x32xf32>
    %589 = vector.broadcast %5 : vector<1x32xf32> to vector<15x32xf32>
    %590 = arith.addf %588, %589 : vector<15x32xf32>
    %cst_299 = arith.constant 0.000000e+00 : f32
    %591 = vector.broadcast %cst_299 : f32 to vector<15x32xf32>
    %592 = arith.maximumf %590, %591 : vector<15x32xf32>
    %c11_300 = arith.constant 11 : index
    %c1_301 = arith.constant 1 : index
    %c0_302 = arith.constant 0 : index
    %593 = vector.load %arg13[%c11_300, %c1_301, %c0_302] : memref<17x17x32xf32, #tpu.memory_space<vmem>>, vector<1x15x32xf32>
    %594 = vector.shape_cast %593 : vector<1x15x32xf32> to vector<15x32xf32>
    %595 = vector.shape_cast %592 : vector<15x32xf32> to vector<1x15x32xf32>
    tpu.vector_store %arg13[%c11_300, %c1_301, %c0_302], %595 {strides = array<i32>} : memref<17x17x32xf32, #tpu.memory_space<vmem>>, vector<1x15x32xf32>,
    %cst_303 = arith.constant 0.000000e+00 : f32
    %596 = vector.broadcast %cst_303 : f32 to vector<30x32xf32>
    %c0_304 = arith.constant 0 : index
    %c22_305 = arith.constant 22 : index
    %c0_306 = arith.constant 0 : index
    %c0_307 = arith.constant 0 : index
    %597 = vector.load %arg1[%c0_304, %c22_305, %c0_306, %c0_307] : memref<1x32x32x3xf32, #tpu.memory_space<vmem>>, vector<1x1x32x3xf32>
    %598 = vector.shape_cast %597 : vector<1x1x32x3xf32> to vector<32x3xf32>
    %599 = vector.extract_strided_slice %598 {offsets = [0, 0], sizes = [30, 3], strides = [1, 1]} : vector<32x3xf32> to vector<30x3xf32>
    %600 = vector.extract_strided_slice %0 {offsets = [0, 0], sizes = [3, 32], strides = [1, 1]} : vector<27x32xf32> to vector<3x32xf32>
    %cst_308 = arith.constant dense<0.000000e+00> : vector<30x32xf32>
    %601 = tpu.matmul %599, %600, %cst_308 {dimension_numbers = #tpu.dot_dimension_numbers<[1], [0], [0], [1], [0, 0, 1, 1], [], []>} : vector<30x3xf32>, vector<3x32xf32>, vector<30x32xf32> -> vector<30x32xf32>
    %602 = arith.addf %596, %601 : vector<30x32xf32>
    %603 = vector.extract_strided_slice %598 {offsets = [1, 0], sizes = [30, 3], strides = [1, 1]} : vector<32x3xf32> to vector<30x3xf32>
    %604 = vector.extract_strided_slice %0 {offsets = [3, 0], sizes = [3, 32], strides = [1, 1]} : vector<27x32xf32> to vector<3x32xf32>
    %cst_309 = arith.constant dense<0.000000e+00> : vector<30x32xf32>
    %605 = tpu.matmul %603, %604, %cst_309 {dimension_numbers = #tpu.dot_dimension_numbers<[1], [0], [0], [1], [0, 0, 1, 1], [], []>} : vector<30x3xf32>, vector<3x32xf32>, vector<30x32xf32> -> vector<30x32xf32>
    %606 = arith.addf %602, %605 : vector<30x32xf32>
    %607 = vector.extract_strided_slice %598 {offsets = [2, 0], sizes = [30, 3], strides = [1, 1]} : vector<32x3xf32> to vector<30x3xf32>
    %608 = vector.extract_strided_slice %0 {offsets = [6, 0], sizes = [3, 32], strides = [1, 1]} : vector<27x32xf32> to vector<3x32xf32>
    %cst_310 = arith.constant dense<0.000000e+00> : vector<30x32xf32>
    %609 = tpu.matmul %607, %608, %cst_310 {dimension_numbers = #tpu.dot_dimension_numbers<[1], [0], [0], [1], [0, 0, 1, 1], [], []>} : vector<30x3xf32>, vector<3x32xf32>, vector<30x32xf32> -> vector<30x32xf32>
    %610 = arith.addf %606, %609 : vector<30x32xf32>
    %c0_311 = arith.constant 0 : index
    %c23 = arith.constant 23 : index
    %c0_312 = arith.constant 0 : index
    %c0_313 = arith.constant 0 : index
    %611 = vector.load %arg1[%c0_311, %c23, %c0_312, %c0_313] : memref<1x32x32x3xf32, #tpu.memory_space<vmem>>, vector<1x1x32x3xf32>
    %612 = vector.shape_cast %611 : vector<1x1x32x3xf32> to vector<32x3xf32>
    %613 = vector.extract_strided_slice %612 {offsets = [0, 0], sizes = [30, 3], strides = [1, 1]} : vector<32x3xf32> to vector<30x3xf32>
    %614 = vector.extract_strided_slice %0 {offsets = [9, 0], sizes = [3, 32], strides = [1, 1]} : vector<27x32xf32> to vector<3x32xf32>
    %cst_314 = arith.constant dense<0.000000e+00> : vector<30x32xf32>
    %615 = tpu.matmul %613, %614, %cst_314 {dimension_numbers = #tpu.dot_dimension_numbers<[1], [0], [0], [1], [0, 0, 1, 1], [], []>} : vector<30x3xf32>, vector<3x32xf32>, vector<30x32xf32> -> vector<30x32xf32>
    %616 = arith.addf %610, %615 : vector<30x32xf32>
    %617 = vector.extract_strided_slice %612 {offsets = [1, 0], sizes = [30, 3], strides = [1, 1]} : vector<32x3xf32> to vector<30x3xf32>
    %618 = vector.extract_strided_slice %0 {offsets = [12, 0], sizes = [3, 32], strides = [1, 1]} : vector<27x32xf32> to vector<3x32xf32>
    %cst_315 = arith.constant dense<0.000000e+00> : vector<30x32xf32>
    %619 = tpu.matmul %617, %618, %cst_315 {dimension_numbers = #tpu.dot_dimension_numbers<[1], [0], [0], [1], [0, 0, 1, 1], [], []>} : vector<30x3xf32>, vector<3x32xf32>, vector<30x32xf32> -> vector<30x32xf32>
    %620 = arith.addf %616, %619 : vector<30x32xf32>
    %621 = vector.extract_strided_slice %612 {offsets = [2, 0], sizes = [30, 3], strides = [1, 1]} : vector<32x3xf32> to vector<30x3xf32>
    %622 = vector.extract_strided_slice %0 {offsets = [15, 0], sizes = [3, 32], strides = [1, 1]} : vector<27x32xf32> to vector<3x32xf32>
    %cst_316 = arith.constant dense<0.000000e+00> : vector<30x32xf32>
    %623 = tpu.matmul %621, %622, %cst_316 {dimension_numbers = #tpu.dot_dimension_numbers<[1], [0], [0], [1], [0, 0, 1, 1], [], []>} : vector<30x3xf32>, vector<3x32xf32>, vector<30x32xf32> -> vector<30x32xf32>
    %624 = arith.addf %620, %623 : vector<30x32xf32>
    %c0_317 = arith.constant 0 : index
    %c24 = arith.constant 24 : index
    %c0_318 = arith.constant 0 : index
    %c0_319 = arith.constant 0 : index
    %625 = vector.load %arg1[%c0_317, %c24, %c0_318, %c0_319] : memref<1x32x32x3xf32, #tpu.memory_space<vmem>>, vector<1x1x32x3xf32>
    %626 = vector.shape_cast %625 : vector<1x1x32x3xf32> to vector<32x3xf32>
    %627 = vector.extract_strided_slice %626 {offsets = [0, 0], sizes = [30, 3], strides = [1, 1]} : vector<32x3xf32> to vector<30x3xf32>
    %628 = vector.extract_strided_slice %0 {offsets = [18, 0], sizes = [3, 32], strides = [1, 1]} : vector<27x32xf32> to vector<3x32xf32>
    %cst_320 = arith.constant dense<0.000000e+00> : vector<30x32xf32>
    %629 = tpu.matmul %627, %628, %cst_320 {dimension_numbers = #tpu.dot_dimension_numbers<[1], [0], [0], [1], [0, 0, 1, 1], [], []>} : vector<30x3xf32>, vector<3x32xf32>, vector<30x32xf32> -> vector<30x32xf32>
    %630 = arith.addf %624, %629 : vector<30x32xf32>
    %631 = vector.extract_strided_slice %626 {offsets = [1, 0], sizes = [30, 3], strides = [1, 1]} : vector<32x3xf32> to vector<30x3xf32>
    %632 = vector.extract_strided_slice %0 {offsets = [21, 0], sizes = [3, 32], strides = [1, 1]} : vector<27x32xf32> to vector<3x32xf32>
    %cst_321 = arith.constant dense<0.000000e+00> : vector<30x32xf32>
    %633 = tpu.matmul %631, %632, %cst_321 {dimension_numbers = #tpu.dot_dimension_numbers<[1], [0], [0], [1], [0, 0, 1, 1], [], []>} : vector<30x3xf32>, vector<3x32xf32>, vector<30x32xf32> -> vector<30x32xf32>
    %634 = arith.addf %630, %633 : vector<30x32xf32>
    %635 = vector.extract_strided_slice %626 {offsets = [2, 0], sizes = [30, 3], strides = [1, 1]} : vector<32x3xf32> to vector<30x3xf32>
    %636 = vector.extract_strided_slice %0 {offsets = [24, 0], sizes = [3, 32], strides = [1, 1]} : vector<27x32xf32> to vector<3x32xf32>
    %cst_322 = arith.constant dense<0.000000e+00> : vector<30x32xf32>
    %637 = tpu.matmul %635, %636, %cst_322 {dimension_numbers = #tpu.dot_dimension_numbers<[1], [0], [0], [1], [0, 0, 1, 1], [], []>} : vector<30x3xf32>, vector<3x32xf32>, vector<30x32xf32> -> vector<30x32xf32>
    %638 = arith.addf %634, %637 : vector<30x32xf32>
    %cst_323 = arith.constant dense<0.000000e+00> : vector<15x32xf32>
    %639 = tpu.matmul %16, %638, %cst_323 {dimension_numbers = #tpu.dot_dimension_numbers<[1], [0], [0], [1], [0, 0, 1, 1], [], []>} : vector<15x30xf32>, vector<30x32xf32>, vector<15x32xf32> -> vector<15x32xf32>
    %640 = vector.broadcast %5 : vector<1x32xf32> to vector<15x32xf32>
    %641 = arith.addf %639, %640 : vector<15x32xf32>
    %cst_324 = arith.constant 0.000000e+00 : f32
    %642 = vector.broadcast %cst_324 : f32 to vector<15x32xf32>
    %643 = arith.maximumf %641, %642 : vector<15x32xf32>
    %c12_325 = arith.constant 12 : index
    %c1_326 = arith.constant 1 : index
    %c0_327 = arith.constant 0 : index
    %644 = vector.load %arg13[%c12_325, %c1_326, %c0_327] : memref<17x17x32xf32, #tpu.memory_space<vmem>>, vector<1x15x32xf32>
    %645 = vector.shape_cast %644 : vector<1x15x32xf32> to vector<15x32xf32>
    %646 = vector.shape_cast %643 : vector<15x32xf32> to vector<1x15x32xf32>
    tpu.vector_store %arg13[%c12_325, %c1_326, %c0_327], %646 {strides = array<i32>} : memref<17x17x32xf32, #tpu.memory_space<vmem>>, vector<1x15x32xf32>,
    %cst_328 = arith.constant 0.000000e+00 : f32
    %647 = vector.broadcast %cst_328 : f32 to vector<30x32xf32>
    %c0_329 = arith.constant 0 : index
    %c24_330 = arith.constant 24 : index
    %c0_331 = arith.constant 0 : index
    %c0_332 = arith.constant 0 : index
    %648 = vector.load %arg1[%c0_329, %c24_330, %c0_331, %c0_332] : memref<1x32x32x3xf32, #tpu.memory_space<vmem>>, vector<1x1x32x3xf32>
    %649 = vector.shape_cast %648 : vector<1x1x32x3xf32> to vector<32x3xf32>
    %650 = vector.extract_strided_slice %649 {offsets = [0, 0], sizes = [30, 3], strides = [1, 1]} : vector<32x3xf32> to vector<30x3xf32>
    %651 = vector.extract_strided_slice %0 {offsets = [0, 0], sizes = [3, 32], strides = [1, 1]} : vector<27x32xf32> to vector<3x32xf32>
    %cst_333 = arith.constant dense<0.000000e+00> : vector<30x32xf32>
    %652 = tpu.matmul %650, %651, %cst_333 {dimension_numbers = #tpu.dot_dimension_numbers<[1], [0], [0], [1], [0, 0, 1, 1], [], []>} : vector<30x3xf32>, vector<3x32xf32>, vector<30x32xf32> -> vector<30x32xf32>
    %653 = arith.addf %647, %652 : vector<30x32xf32>
    %654 = vector.extract_strided_slice %649 {offsets = [1, 0], sizes = [30, 3], strides = [1, 1]} : vector<32x3xf32> to vector<30x3xf32>
    %655 = vector.extract_strided_slice %0 {offsets = [3, 0], sizes = [3, 32], strides = [1, 1]} : vector<27x32xf32> to vector<3x32xf32>
    %cst_334 = arith.constant dense<0.000000e+00> : vector<30x32xf32>
    %656 = tpu.matmul %654, %655, %cst_334 {dimension_numbers = #tpu.dot_dimension_numbers<[1], [0], [0], [1], [0, 0, 1, 1], [], []>} : vector<30x3xf32>, vector<3x32xf32>, vector<30x32xf32> -> vector<30x32xf32>
    %657 = arith.addf %653, %656 : vector<30x32xf32>
    %658 = vector.extract_strided_slice %649 {offsets = [2, 0], sizes = [30, 3], strides = [1, 1]} : vector<32x3xf32> to vector<30x3xf32>
    %659 = vector.extract_strided_slice %0 {offsets = [6, 0], sizes = [3, 32], strides = [1, 1]} : vector<27x32xf32> to vector<3x32xf32>
    %cst_335 = arith.constant dense<0.000000e+00> : vector<30x32xf32>
    %660 = tpu.matmul %658, %659, %cst_335 {dimension_numbers = #tpu.dot_dimension_numbers<[1], [0], [0], [1], [0, 0, 1, 1], [], []>} : vector<30x3xf32>, vector<3x32xf32>, vector<30x32xf32> -> vector<30x32xf32>
    %661 = arith.addf %657, %660 : vector<30x32xf32>
    %c0_336 = arith.constant 0 : index
    %c25 = arith.constant 25 : index
    %c0_337 = arith.constant 0 : index
    %c0_338 = arith.constant 0 : index
    %662 = vector.load %arg1[%c0_336, %c25, %c0_337, %c0_338] : memref<1x32x32x3xf32, #tpu.memory_space<vmem>>, vector<1x1x32x3xf32>
    %663 = vector.shape_cast %662 : vector<1x1x32x3xf32> to vector<32x3xf32>
    %664 = vector.extract_strided_slice %663 {offsets = [0, 0], sizes = [30, 3], strides = [1, 1]} : vector<32x3xf32> to vector<30x3xf32>
    %665 = vector.extract_strided_slice %0 {offsets = [9, 0], sizes = [3, 32], strides = [1, 1]} : vector<27x32xf32> to vector<3x32xf32>
    %cst_339 = arith.constant dense<0.000000e+00> : vector<30x32xf32>
    %666 = tpu.matmul %664, %665, %cst_339 {dimension_numbers = #tpu.dot_dimension_numbers<[1], [0], [0], [1], [0, 0, 1, 1], [], []>} : vector<30x3xf32>, vector<3x32xf32>, vector<30x32xf32> -> vector<30x32xf32>
    %667 = arith.addf %661, %666 : vector<30x32xf32>
    %668 = vector.extract_strided_slice %663 {offsets = [1, 0], sizes = [30, 3], strides = [1, 1]} : vector<32x3xf32> to vector<30x3xf32>
    %669 = vector.extract_strided_slice %0 {offsets = [12, 0], sizes = [3, 32], strides = [1, 1]} : vector<27x32xf32> to vector<3x32xf32>
    %cst_340 = arith.constant dense<0.000000e+00> : vector<30x32xf32>
    %670 = tpu.matmul %668, %669, %cst_340 {dimension_numbers = #tpu.dot_dimension_numbers<[1], [0], [0], [1], [0, 0, 1, 1], [], []>} : vector<30x3xf32>, vector<3x32xf32>, vector<30x32xf32> -> vector<30x32xf32>
    %671 = arith.addf %667, %670 : vector<30x32xf32>
    %672 = vector.extract_strided_slice %663 {offsets = [2, 0], sizes = [30, 3], strides = [1, 1]} : vector<32x3xf32> to vector<30x3xf32>
    %673 = vector.extract_strided_slice %0 {offsets = [15, 0], sizes = [3, 32], strides = [1, 1]} : vector<27x32xf32> to vector<3x32xf32>
    %cst_341 = arith.constant dense<0.000000e+00> : vector<30x32xf32>
    %674 = tpu.matmul %672, %673, %cst_341 {dimension_numbers = #tpu.dot_dimension_numbers<[1], [0], [0], [1], [0, 0, 1, 1], [], []>} : vector<30x3xf32>, vector<3x32xf32>, vector<30x32xf32> -> vector<30x32xf32>
    %675 = arith.addf %671, %674 : vector<30x32xf32>
    %c0_342 = arith.constant 0 : index
    %c26 = arith.constant 26 : index
    %c0_343 = arith.constant 0 : index
    %c0_344 = arith.constant 0 : index
    %676 = vector.load %arg1[%c0_342, %c26, %c0_343, %c0_344] : memref<1x32x32x3xf32, #tpu.memory_space<vmem>>, vector<1x1x32x3xf32>
    %677 = vector.shape_cast %676 : vector<1x1x32x3xf32> to vector<32x3xf32>
    %678 = vector.extract_strided_slice %677 {offsets = [0, 0], sizes = [30, 3], strides = [1, 1]} : vector<32x3xf32> to vector<30x3xf32>
    %679 = vector.extract_strided_slice %0 {offsets = [18, 0], sizes = [3, 32], strides = [1, 1]} : vector<27x32xf32> to vector<3x32xf32>
    %cst_345 = arith.constant dense<0.000000e+00> : vector<30x32xf32>
    %680 = tpu.matmul %678, %679, %cst_345 {dimension_numbers = #tpu.dot_dimension_numbers<[1], [0], [0], [1], [0, 0, 1, 1], [], []>} : vector<30x3xf32>, vector<3x32xf32>, vector<30x32xf32> -> vector<30x32xf32>
    %681 = arith.addf %675, %680 : vector<30x32xf32>
    %682 = vector.extract_strided_slice %677 {offsets = [1, 0], sizes = [30, 3], strides = [1, 1]} : vector<32x3xf32> to vector<30x3xf32>
    %683 = vector.extract_strided_slice %0 {offsets = [21, 0], sizes = [3, 32], strides = [1, 1]} : vector<27x32xf32> to vector<3x32xf32>
    %cst_346 = arith.constant dense<0.000000e+00> : vector<30x32xf32>
    %684 = tpu.matmul %682, %683, %cst_346 {dimension_numbers = #tpu.dot_dimension_numbers<[1], [0], [0], [1], [0, 0, 1, 1], [], []>} : vector<30x3xf32>, vector<3x32xf32>, vector<30x32xf32> -> vector<30x32xf32>
    %685 = arith.addf %681, %684 : vector<30x32xf32>
    %686 = vector.extract_strided_slice %677 {offsets = [2, 0], sizes = [30, 3], strides = [1, 1]} : vector<32x3xf32> to vector<30x3xf32>
    %687 = vector.extract_strided_slice %0 {offsets = [24, 0], sizes = [3, 32], strides = [1, 1]} : vector<27x32xf32> to vector<3x32xf32>
    %cst_347 = arith.constant dense<0.000000e+00> : vector<30x32xf32>
    %688 = tpu.matmul %686, %687, %cst_347 {dimension_numbers = #tpu.dot_dimension_numbers<[1], [0], [0], [1], [0, 0, 1, 1], [], []>} : vector<30x3xf32>, vector<3x32xf32>, vector<30x32xf32> -> vector<30x32xf32>
    %689 = arith.addf %685, %688 : vector<30x32xf32>
    %cst_348 = arith.constant dense<0.000000e+00> : vector<15x32xf32>
    %690 = tpu.matmul %16, %689, %cst_348 {dimension_numbers = #tpu.dot_dimension_numbers<[1], [0], [0], [1], [0, 0, 1, 1], [], []>} : vector<15x30xf32>, vector<30x32xf32>, vector<15x32xf32> -> vector<15x32xf32>
    %691 = vector.broadcast %5 : vector<1x32xf32> to vector<15x32xf32>
    %692 = arith.addf %690, %691 : vector<15x32xf32>
    %cst_349 = arith.constant 0.000000e+00 : f32
    %693 = vector.broadcast %cst_349 : f32 to vector<15x32xf32>
    %694 = arith.maximumf %692, %693 : vector<15x32xf32>
    %c13_350 = arith.constant 13 : index
    %c1_351 = arith.constant 1 : index
    %c0_352 = arith.constant 0 : index
    %695 = vector.load %arg13[%c13_350, %c1_351, %c0_352] : memref<17x17x32xf32, #tpu.memory_space<vmem>>, vector<1x15x32xf32>
    %696 = vector.shape_cast %695 : vector<1x15x32xf32> to vector<15x32xf32>
    %697 = vector.shape_cast %694 : vector<15x32xf32> to vector<1x15x32xf32>
    tpu.vector_store %arg13[%c13_350, %c1_351, %c0_352], %697 {strides = array<i32>} : memref<17x17x32xf32, #tpu.memory_space<vmem>>, vector<1x15x32xf32>,
    %cst_353 = arith.constant 0.000000e+00 : f32
    %698 = vector.broadcast %cst_353 : f32 to vector<30x32xf32>
    %c0_354 = arith.constant 0 : index
    %c26_355 = arith.constant 26 : index
    %c0_356 = arith.constant 0 : index
    %c0_357 = arith.constant 0 : index
    %699 = vector.load %arg1[%c0_354, %c26_355, %c0_356, %c0_357] : memref<1x32x32x3xf32, #tpu.memory_space<vmem>>, vector<1x1x32x3xf32>
    %700 = vector.shape_cast %699 : vector<1x1x32x3xf32> to vector<32x3xf32>
    %701 = vector.extract_strided_slice %700 {offsets = [0, 0], sizes = [30, 3], strides = [1, 1]} : vector<32x3xf32> to vector<30x3xf32>
    %702 = vector.extract_strided_slice %0 {offsets = [0, 0], sizes = [3, 32], strides = [1, 1]} : vector<27x32xf32> to vector<3x32xf32>
    %cst_358 = arith.constant dense<0.000000e+00> : vector<30x32xf32>
    %703 = tpu.matmul %701, %702, %cst_358 {dimension_numbers = #tpu.dot_dimension_numbers<[1], [0], [0], [1], [0, 0, 1, 1], [], []>} : vector<30x3xf32>, vector<3x32xf32>, vector<30x32xf32> -> vector<30x32xf32>
    %704 = arith.addf %698, %703 : vector<30x32xf32>
    %705 = vector.extract_strided_slice %700 {offsets = [1, 0], sizes = [30, 3], strides = [1, 1]} : vector<32x3xf32> to vector<30x3xf32>
    %706 = vector.extract_strided_slice %0 {offsets = [3, 0], sizes = [3, 32], strides = [1, 1]} : vector<27x32xf32> to vector<3x32xf32>
    %cst_359 = arith.constant dense<0.000000e+00> : vector<30x32xf32>
    %707 = tpu.matmul %705, %706, %cst_359 {dimension_numbers = #tpu.dot_dimension_numbers<[1], [0], [0], [1], [0, 0, 1, 1], [], []>} : vector<30x3xf32>, vector<3x32xf32>, vector<30x32xf32> -> vector<30x32xf32>
    %708 = arith.addf %704, %707 : vector<30x32xf32>
    %709 = vector.extract_strided_slice %700 {offsets = [2, 0], sizes = [30, 3], strides = [1, 1]} : vector<32x3xf32> to vector<30x3xf32>
    %710 = vector.extract_strided_slice %0 {offsets = [6, 0], sizes = [3, 32], strides = [1, 1]} : vector<27x32xf32> to vector<3x32xf32>
    %cst_360 = arith.constant dense<0.000000e+00> : vector<30x32xf32>
    %711 = tpu.matmul %709, %710, %cst_360 {dimension_numbers = #tpu.dot_dimension_numbers<[1], [0], [0], [1], [0, 0, 1, 1], [], []>} : vector<30x3xf32>, vector<3x32xf32>, vector<30x32xf32> -> vector<30x32xf32>
    %712 = arith.addf %708, %711 : vector<30x32xf32>
    %c0_361 = arith.constant 0 : index
    %c27 = arith.constant 27 : index
    %c0_362 = arith.constant 0 : index
    %c0_363 = arith.constant 0 : index
    %713 = vector.load %arg1[%c0_361, %c27, %c0_362, %c0_363] : memref<1x32x32x3xf32, #tpu.memory_space<vmem>>, vector<1x1x32x3xf32>
    %714 = vector.shape_cast %713 : vector<1x1x32x3xf32> to vector<32x3xf32>
    %715 = vector.extract_strided_slice %714 {offsets = [0, 0], sizes = [30, 3], strides = [1, 1]} : vector<32x3xf32> to vector<30x3xf32>
    %716 = vector.extract_strided_slice %0 {offsets = [9, 0], sizes = [3, 32], strides = [1, 1]} : vector<27x32xf32> to vector<3x32xf32>
    %cst_364 = arith.constant dense<0.000000e+00> : vector<30x32xf32>
    %717 = tpu.matmul %715, %716, %cst_364 {dimension_numbers = #tpu.dot_dimension_numbers<[1], [0], [0], [1], [0, 0, 1, 1], [], []>} : vector<30x3xf32>, vector<3x32xf32>, vector<30x32xf32> -> vector<30x32xf32>
    %718 = arith.addf %712, %717 : vector<30x32xf32>
    %719 = vector.extract_strided_slice %714 {offsets = [1, 0], sizes = [30, 3], strides = [1, 1]} : vector<32x3xf32> to vector<30x3xf32>
    %720 = vector.extract_strided_slice %0 {offsets = [12, 0], sizes = [3, 32], strides = [1, 1]} : vector<27x32xf32> to vector<3x32xf32>
    %cst_365 = arith.constant dense<0.000000e+00> : vector<30x32xf32>
    %721 = tpu.matmul %719, %720, %cst_365 {dimension_numbers = #tpu.dot_dimension_numbers<[1], [0], [0], [1], [0, 0, 1, 1], [], []>} : vector<30x3xf32>, vector<3x32xf32>, vector<30x32xf32> -> vector<30x32xf32>
    %722 = arith.addf %718, %721 : vector<30x32xf32>
    %723 = vector.extract_strided_slice %714 {offsets = [2, 0], sizes = [30, 3], strides = [1, 1]} : vector<32x3xf32> to vector<30x3xf32>
    %724 = vector.extract_strided_slice %0 {offsets = [15, 0], sizes = [3, 32], strides = [1, 1]} : vector<27x32xf32> to vector<3x32xf32>
    %cst_366 = arith.constant dense<0.000000e+00> : vector<30x32xf32>
    %725 = tpu.matmul %723, %724, %cst_366 {dimension_numbers = #tpu.dot_dimension_numbers<[1], [0], [0], [1], [0, 0, 1, 1], [], []>} : vector<30x3xf32>, vector<3x32xf32>, vector<30x32xf32> -> vector<30x32xf32>
    %726 = arith.addf %722, %725 : vector<30x32xf32>
    %c0_367 = arith.constant 0 : index
    %c28 = arith.constant 28 : index
    %c0_368 = arith.constant 0 : index
    %c0_369 = arith.constant 0 : index
    %727 = vector.load %arg1[%c0_367, %c28, %c0_368, %c0_369] : memref<1x32x32x3xf32, #tpu.memory_space<vmem>>, vector<1x1x32x3xf32>
    %728 = vector.shape_cast %727 : vector<1x1x32x3xf32> to vector<32x3xf32>
    %729 = vector.extract_strided_slice %728 {offsets = [0, 0], sizes = [30, 3], strides = [1, 1]} : vector<32x3xf32> to vector<30x3xf32>
    %730 = vector.extract_strided_slice %0 {offsets = [18, 0], sizes = [3, 32], strides = [1, 1]} : vector<27x32xf32> to vector<3x32xf32>
    %cst_370 = arith.constant dense<0.000000e+00> : vector<30x32xf32>
    %731 = tpu.matmul %729, %730, %cst_370 {dimension_numbers = #tpu.dot_dimension_numbers<[1], [0], [0], [1], [0, 0, 1, 1], [], []>} : vector<30x3xf32>, vector<3x32xf32>, vector<30x32xf32> -> vector<30x32xf32>
    %732 = arith.addf %726, %731 : vector<30x32xf32>
    %733 = vector.extract_strided_slice %728 {offsets = [1, 0], sizes = [30, 3], strides = [1, 1]} : vector<32x3xf32> to vector<30x3xf32>
    %734 = vector.extract_strided_slice %0 {offsets = [21, 0], sizes = [3, 32], strides = [1, 1]} : vector<27x32xf32> to vector<3x32xf32>
    %cst_371 = arith.constant dense<0.000000e+00> : vector<30x32xf32>
    %735 = tpu.matmul %733, %734, %cst_371 {dimension_numbers = #tpu.dot_dimension_numbers<[1], [0], [0], [1], [0, 0, 1, 1], [], []>} : vector<30x3xf32>, vector<3x32xf32>, vector<30x32xf32> -> vector<30x32xf32>
    %736 = arith.addf %732, %735 : vector<30x32xf32>
    %737 = vector.extract_strided_slice %728 {offsets = [2, 0], sizes = [30, 3], strides = [1, 1]} : vector<32x3xf32> to vector<30x3xf32>
    %738 = vector.extract_strided_slice %0 {offsets = [24, 0], sizes = [3, 32], strides = [1, 1]} : vector<27x32xf32> to vector<3x32xf32>
    %cst_372 = arith.constant dense<0.000000e+00> : vector<30x32xf32>
    %739 = tpu.matmul %737, %738, %cst_372 {dimension_numbers = #tpu.dot_dimension_numbers<[1], [0], [0], [1], [0, 0, 1, 1], [], []>} : vector<30x3xf32>, vector<3x32xf32>, vector<30x32xf32> -> vector<30x32xf32>
    %740 = arith.addf %736, %739 : vector<30x32xf32>
    %cst_373 = arith.constant dense<0.000000e+00> : vector<15x32xf32>
    %741 = tpu.matmul %16, %740, %cst_373 {dimension_numbers = #tpu.dot_dimension_numbers<[1], [0], [0], [1], [0, 0, 1, 1], [], []>} : vector<15x30xf32>, vector<30x32xf32>, vector<15x32xf32> -> vector<15x32xf32>
    %742 = vector.broadcast %5 : vector<1x32xf32> to vector<15x32xf32>
    %743 = arith.addf %741, %742 : vector<15x32xf32>
    %cst_374 = arith.constant 0.000000e+00 : f32
    %744 = vector.broadcast %cst_374 : f32 to vector<15x32xf32>
    %745 = arith.maximumf %743, %744 : vector<15x32xf32>
    %c14_375 = arith.constant 14 : index
    %c1_376 = arith.constant 1 : index
    %c0_377 = arith.constant 0 : index
    %746 = vector.load %arg13[%c14_375, %c1_376, %c0_377] : memref<17x17x32xf32, #tpu.memory_space<vmem>>, vector<1x15x32xf32>
    %747 = vector.shape_cast %746 : vector<1x15x32xf32> to vector<15x32xf32>
    %748 = vector.shape_cast %745 : vector<15x32xf32> to vector<1x15x32xf32>
    tpu.vector_store %arg13[%c14_375, %c1_376, %c0_377], %748 {strides = array<i32>} : memref<17x17x32xf32, #tpu.memory_space<vmem>>, vector<1x15x32xf32>,
    %cst_378 = arith.constant 0.000000e+00 : f32
    %749 = vector.broadcast %cst_378 : f32 to vector<30x32xf32>
    %c0_379 = arith.constant 0 : index
    %c28_380 = arith.constant 28 : index
    %c0_381 = arith.constant 0 : index
    %c0_382 = arith.constant 0 : index
    %750 = vector.load %arg1[%c0_379, %c28_380, %c0_381, %c0_382] : memref<1x32x32x3xf32, #tpu.memory_space<vmem>>, vector<1x1x32x3xf32>
    %751 = vector.shape_cast %750 : vector<1x1x32x3xf32> to vector<32x3xf32>
    %752 = vector.extract_strided_slice %751 {offsets = [0, 0], sizes = [30, 3], strides = [1, 1]} : vector<32x3xf32> to vector<30x3xf32>
    %753 = vector.extract_strided_slice %0 {offsets = [0, 0], sizes = [3, 32], strides = [1, 1]} : vector<27x32xf32> to vector<3x32xf32>
    %cst_383 = arith.constant dense<0.000000e+00> : vector<30x32xf32>
    %754 = tpu.matmul %752, %753, %cst_383 {dimension_numbers = #tpu.dot_dimension_numbers<[1], [0], [0], [1], [0, 0, 1, 1], [], []>} : vector<30x3xf32>, vector<3x32xf32>, vector<30x32xf32> -> vector<30x32xf32>
    %755 = arith.addf %749, %754 : vector<30x32xf32>
    %756 = vector.extract_strided_slice %751 {offsets = [1, 0], sizes = [30, 3], strides = [1, 1]} : vector<32x3xf32> to vector<30x3xf32>
    %757 = vector.extract_strided_slice %0 {offsets = [3, 0], sizes = [3, 32], strides = [1, 1]} : vector<27x32xf32> to vector<3x32xf32>
    %cst_384 = arith.constant dense<0.000000e+00> : vector<30x32xf32>
    %758 = tpu.matmul %756, %757, %cst_384 {dimension_numbers = #tpu.dot_dimension_numbers<[1], [0], [0], [1], [0, 0, 1, 1], [], []>} : vector<30x3xf32>, vector<3x32xf32>, vector<30x32xf32> -> vector<30x32xf32>
    %759 = arith.addf %755, %758 : vector<30x32xf32>
    %760 = vector.extract_strided_slice %751 {offsets = [2, 0], sizes = [30, 3], strides = [1, 1]} : vector<32x3xf32> to vector<30x3xf32>
    %761 = vector.extract_strided_slice %0 {offsets = [6, 0], sizes = [3, 32], strides = [1, 1]} : vector<27x32xf32> to vector<3x32xf32>
    %cst_385 = arith.constant dense<0.000000e+00> : vector<30x32xf32>
    %762 = tpu.matmul %760, %761, %cst_385 {dimension_numbers = #tpu.dot_dimension_numbers<[1], [0], [0], [1], [0, 0, 1, 1], [], []>} : vector<30x3xf32>, vector<3x32xf32>, vector<30x32xf32> -> vector<30x32xf32>
    %763 = arith.addf %759, %762 : vector<30x32xf32>
    %c0_386 = arith.constant 0 : index
    %c29 = arith.constant 29 : index
    %c0_387 = arith.constant 0 : index
    %c0_388 = arith.constant 0 : index
    %764 = vector.load %arg1[%c0_386, %c29, %c0_387, %c0_388] : memref<1x32x32x3xf32, #tpu.memory_space<vmem>>, vector<1x1x32x3xf32>
    %765 = vector.shape_cast %764 : vector<1x1x32x3xf32> to vector<32x3xf32>
    %766 = vector.extract_strided_slice %765 {offsets = [0, 0], sizes = [30, 3], strides = [1, 1]} : vector<32x3xf32> to vector<30x3xf32>
    %767 = vector.extract_strided_slice %0 {offsets = [9, 0], sizes = [3, 32], strides = [1, 1]} : vector<27x32xf32> to vector<3x32xf32>
    %cst_389 = arith.constant dense<0.000000e+00> : vector<30x32xf32>
    %768 = tpu.matmul %766, %767, %cst_389 {dimension_numbers = #tpu.dot_dimension_numbers<[1], [0], [0], [1], [0, 0, 1, 1], [], []>} : vector<30x3xf32>, vector<3x32xf32>, vector<30x32xf32> -> vector<30x32xf32>
    %769 = arith.addf %763, %768 : vector<30x32xf32>
    %770 = vector.extract_strided_slice %765 {offsets = [1, 0], sizes = [30, 3], strides = [1, 1]} : vector<32x3xf32> to vector<30x3xf32>
    %771 = vector.extract_strided_slice %0 {offsets = [12, 0], sizes = [3, 32], strides = [1, 1]} : vector<27x32xf32> to vector<3x32xf32>
    %cst_390 = arith.constant dense<0.000000e+00> : vector<30x32xf32>
    %772 = tpu.matmul %770, %771, %cst_390 {dimension_numbers = #tpu.dot_dimension_numbers<[1], [0], [0], [1], [0, 0, 1, 1], [], []>} : vector<30x3xf32>, vector<3x32xf32>, vector<30x32xf32> -> vector<30x32xf32>
    %773 = arith.addf %769, %772 : vector<30x32xf32>
    %774 = vector.extract_strided_slice %765 {offsets = [2, 0], sizes = [30, 3], strides = [1, 1]} : vector<32x3xf32> to vector<30x3xf32>
    %775 = vector.extract_strided_slice %0 {offsets = [15, 0], sizes = [3, 32], strides = [1, 1]} : vector<27x32xf32> to vector<3x32xf32>
    %cst_391 = arith.constant dense<0.000000e+00> : vector<30x32xf32>
    %776 = tpu.matmul %774, %775, %cst_391 {dimension_numbers = #tpu.dot_dimension_numbers<[1], [0], [0], [1], [0, 0, 1, 1], [], []>} : vector<30x3xf32>, vector<3x32xf32>, vector<30x32xf32> -> vector<30x32xf32>
    %777 = arith.addf %773, %776 : vector<30x32xf32>
    %c0_392 = arith.constant 0 : index
    %c30 = arith.constant 30 : index
    %c0_393 = arith.constant 0 : index
    %c0_394 = arith.constant 0 : index
    %778 = vector.load %arg1[%c0_392, %c30, %c0_393, %c0_394] : memref<1x32x32x3xf32, #tpu.memory_space<vmem>>, vector<1x1x32x3xf32>
    %779 = vector.shape_cast %778 : vector<1x1x32x3xf32> to vector<32x3xf32>
    %780 = vector.extract_strided_slice %779 {offsets = [0, 0], sizes = [30, 3], strides = [1, 1]} : vector<32x3xf32> to vector<30x3xf32>
    %781 = vector.extract_strided_slice %0 {offsets = [18, 0], sizes = [3, 32], strides = [1, 1]} : vector<27x32xf32> to vector<3x32xf32>
    %cst_395 = arith.constant dense<0.000000e+00> : vector<30x32xf32>
    %782 = tpu.matmul %780, %781, %cst_395 {dimension_numbers = #tpu.dot_dimension_numbers<[1], [0], [0], [1], [0, 0, 1, 1], [], []>} : vector<30x3xf32>, vector<3x32xf32>, vector<30x32xf32> -> vector<30x32xf32>
    %783 = arith.addf %777, %782 : vector<30x32xf32>
    %784 = vector.extract_strided_slice %779 {offsets = [1, 0], sizes = [30, 3], strides = [1, 1]} : vector<32x3xf32> to vector<30x3xf32>
    %785 = vector.extract_strided_slice %0 {offsets = [21, 0], sizes = [3, 32], strides = [1, 1]} : vector<27x32xf32> to vector<3x32xf32>
    %cst_396 = arith.constant dense<0.000000e+00> : vector<30x32xf32>
    %786 = tpu.matmul %784, %785, %cst_396 {dimension_numbers = #tpu.dot_dimension_numbers<[1], [0], [0], [1], [0, 0, 1, 1], [], []>} : vector<30x3xf32>, vector<3x32xf32>, vector<30x32xf32> -> vector<30x32xf32>
    %787 = arith.addf %783, %786 : vector<30x32xf32>
    %788 = vector.extract_strided_slice %779 {offsets = [2, 0], sizes = [30, 3], strides = [1, 1]} : vector<32x3xf32> to vector<30x3xf32>
    %789 = vector.extract_strided_slice %0 {offsets = [24, 0], sizes = [3, 32], strides = [1, 1]} : vector<27x32xf32> to vector<3x32xf32>
    %cst_397 = arith.constant dense<0.000000e+00> : vector<30x32xf32>
    %790 = tpu.matmul %788, %789, %cst_397 {dimension_numbers = #tpu.dot_dimension_numbers<[1], [0], [0], [1], [0, 0, 1, 1], [], []>} : vector<30x3xf32>, vector<3x32xf32>, vector<30x32xf32> -> vector<30x32xf32>
    %791 = arith.addf %787, %790 : vector<30x32xf32>
    %cst_398 = arith.constant dense<0.000000e+00> : vector<15x32xf32>
    %792 = tpu.matmul %16, %791, %cst_398 {dimension_numbers = #tpu.dot_dimension_numbers<[1], [0], [0], [1], [0, 0, 1, 1], [], []>} : vector<15x30xf32>, vector<30x32xf32>, vector<15x32xf32> -> vector<15x32xf32>
    %793 = vector.broadcast %5 : vector<1x32xf32> to vector<15x32xf32>
    %794 = arith.addf %792, %793 : vector<15x32xf32>
    %cst_399 = arith.constant 0.000000e+00 : f32
    %795 = vector.broadcast %cst_399 : f32 to vector<15x32xf32>
    %796 = arith.maximumf %794, %795 : vector<15x32xf32>
    %c15_400 = arith.constant 15 : index
    %c1_401 = arith.constant 1 : index
    %c0_402 = arith.constant 0 : index
    %797 = vector.load %arg13[%c15_400, %c1_401, %c0_402] : memref<17x17x32xf32, #tpu.memory_space<vmem>>, vector<1x15x32xf32>
    %798 = vector.shape_cast %797 : vector<1x15x32xf32> to vector<15x32xf32>
    %799 = vector.shape_cast %796 : vector<15x32xf32> to vector<1x15x32xf32>
    tpu.vector_store %arg13[%c15_400, %c1_401, %c0_402], %799 {strides = array<i32>} : memref<17x17x32xf32, #tpu.memory_space<vmem>>, vector<1x15x32xf32>,
    %cst_403 = arith.constant 0.000000e+00 : f32
    %800 = vector.broadcast %cst_403 : f32 to vector<15x32xf32>
    %c0_404 = arith.constant 0 : index
    %c0_405 = arith.constant 0 : index
    %c0_406 = arith.constant 0 : index
    %801 = vector.load %arg13[%c0_404, %c0_405, %c0_406] : memref<17x17x32xf32, #tpu.memory_space<vmem>>, vector<1x17x32xf32>
    %802 = vector.shape_cast %801 : vector<1x17x32xf32> to vector<17x32xf32>
    %803 = vector.extract_strided_slice %802 {offsets = [0, 0], sizes = [15, 32], strides = [1, 1]} : vector<17x32xf32> to vector<15x32xf32>
    %804 = vector.extract_strided_slice %1 {offsets = [0, 0], sizes = [1, 32], strides = [1, 1]} : vector<9x32xf32> to vector<1x32xf32>
    %805 = vector.broadcast %804 : vector<1x32xf32> to vector<15x32xf32>
    %806 = arith.mulf %803, %805 : vector<15x32xf32>
    %807 = arith.addf %800, %806 : vector<15x32xf32>
    %808 = vector.extract_strided_slice %802 {offsets = [1, 0], sizes = [15, 32], strides = [1, 1]} : vector<17x32xf32> to vector<15x32xf32>
    %809 = vector.extract_strided_slice %1 {offsets = [1, 0], sizes = [1, 32], strides = [1, 1]} : vector<9x32xf32> to vector<1x32xf32>
    %810 = vector.broadcast %809 : vector<1x32xf32> to vector<15x32xf32>
    %811 = arith.mulf %808, %810 : vector<15x32xf32>
    %812 = arith.addf %807, %811 : vector<15x32xf32>
    %813 = vector.extract_strided_slice %802 {offsets = [2, 0], sizes = [15, 32], strides = [1, 1]} : vector<17x32xf32> to vector<15x32xf32>
    %814 = vector.extract_strided_slice %1 {offsets = [2, 0], sizes = [1, 32], strides = [1, 1]} : vector<9x32xf32> to vector<1x32xf32>
    %815 = vector.broadcast %814 : vector<1x32xf32> to vector<15x32xf32>
    %816 = arith.mulf %813, %815 : vector<15x32xf32>
    %817 = arith.addf %812, %816 : vector<15x32xf32>
    %c1_407 = arith.constant 1 : index
    %c0_408 = arith.constant 0 : index
    %c0_409 = arith.constant 0 : index
    %818 = vector.load %arg13[%c1_407, %c0_408, %c0_409] : memref<17x17x32xf32, #tpu.memory_space<vmem>>, vector<1x17x32xf32>
    %819 = vector.shape_cast %818 : vector<1x17x32xf32> to vector<17x32xf32>
    %820 = vector.extract_strided_slice %819 {offsets = [0, 0], sizes = [15, 32], strides = [1, 1]} : vector<17x32xf32> to vector<15x32xf32>
    %821 = vector.extract_strided_slice %1 {offsets = [3, 0], sizes = [1, 32], strides = [1, 1]} : vector<9x32xf32> to vector<1x32xf32>
    %822 = vector.broadcast %821 : vector<1x32xf32> to vector<15x32xf32>
    %823 = arith.mulf %820, %822 : vector<15x32xf32>
    %824 = arith.addf %817, %823 : vector<15x32xf32>
    %825 = vector.extract_strided_slice %819 {offsets = [1, 0], sizes = [15, 32], strides = [1, 1]} : vector<17x32xf32> to vector<15x32xf32>
    %826 = vector.extract_strided_slice %1 {offsets = [4, 0], sizes = [1, 32], strides = [1, 1]} : vector<9x32xf32> to vector<1x32xf32>
    %827 = vector.broadcast %826 : vector<1x32xf32> to vector<15x32xf32>
    %828 = arith.mulf %825, %827 : vector<15x32xf32>
    %829 = arith.addf %824, %828 : vector<15x32xf32>
    %830 = vector.extract_strided_slice %819 {offsets = [2, 0], sizes = [15, 32], strides = [1, 1]} : vector<17x32xf32> to vector<15x32xf32>
    %831 = vector.extract_strided_slice %1 {offsets = [5, 0], sizes = [1, 32], strides = [1, 1]} : vector<9x32xf32> to vector<1x32xf32>
    %832 = vector.broadcast %831 : vector<1x32xf32> to vector<15x32xf32>
    %833 = arith.mulf %830, %832 : vector<15x32xf32>
    %834 = arith.addf %829, %833 : vector<15x32xf32>
    %c2_410 = arith.constant 2 : index
    %c0_411 = arith.constant 0 : index
    %c0_412 = arith.constant 0 : index
    %835 = vector.load %arg13[%c2_410, %c0_411, %c0_412] : memref<17x17x32xf32, #tpu.memory_space<vmem>>, vector<1x17x32xf32>
    %836 = vector.shape_cast %835 : vector<1x17x32xf32> to vector<17x32xf32>
    %837 = vector.extract_strided_slice %836 {offsets = [0, 0], sizes = [15, 32], strides = [1, 1]} : vector<17x32xf32> to vector<15x32xf32>
    %838 = vector.extract_strided_slice %1 {offsets = [6, 0], sizes = [1, 32], strides = [1, 1]} : vector<9x32xf32> to vector<1x32xf32>
    %839 = vector.broadcast %838 : vector<1x32xf32> to vector<15x32xf32>
    %840 = arith.mulf %837, %839 : vector<15x32xf32>
    %841 = arith.addf %834, %840 : vector<15x32xf32>
    %842 = vector.extract_strided_slice %836 {offsets = [1, 0], sizes = [15, 32], strides = [1, 1]} : vector<17x32xf32> to vector<15x32xf32>
    %843 = vector.extract_strided_slice %1 {offsets = [7, 0], sizes = [1, 32], strides = [1, 1]} : vector<9x32xf32> to vector<1x32xf32>
    %844 = vector.broadcast %843 : vector<1x32xf32> to vector<15x32xf32>
    %845 = arith.mulf %842, %844 : vector<15x32xf32>
    %846 = arith.addf %841, %845 : vector<15x32xf32>
    %847 = vector.extract_strided_slice %836 {offsets = [2, 0], sizes = [15, 32], strides = [1, 1]} : vector<17x32xf32> to vector<15x32xf32>
    %848 = vector.extract_strided_slice %1 {offsets = [8, 0], sizes = [1, 32], strides = [1, 1]} : vector<9x32xf32> to vector<1x32xf32>
    %849 = vector.broadcast %848 : vector<1x32xf32> to vector<15x32xf32>
    %850 = arith.mulf %847, %849 : vector<15x32xf32>
    %851 = arith.addf %846, %850 : vector<15x32xf32>
    %852 = vector.broadcast %6 : vector<1x32xf32> to vector<15x32xf32>
    %853 = arith.addf %851, %852 : vector<15x32xf32>
    %cst_413 = arith.constant 0.000000e+00 : f32
    %854 = vector.broadcast %cst_413 : f32 to vector<15x32xf32>
    %855 = arith.maximumf %853, %854 : vector<15x32xf32>
    %cst_414 = arith.constant dense<0.000000e+00> : vector<8x32xf32>
    %856 = tpu.matmul %23, %855, %cst_414 {dimension_numbers = #tpu.dot_dimension_numbers<[1], [0], [0], [1], [0, 0, 1, 1], [], []>} : vector<8x15xf32>, vector<15x32xf32>, vector<8x32xf32> -> vector<8x32xf32>
    %cst_415 = arith.constant dense<0.000000e+00> : vector<8x48xf32>
    %857 = tpu.matmul %856, %3, %cst_415 {dimension_numbers = #tpu.dot_dimension_numbers<[1], [0], [0], [1], [0, 0, 1, 1], [], []>} : vector<8x32xf32>, vector<32x48xf32>, vector<8x48xf32> -> vector<8x48xf32>
    %858 = vector.broadcast %7 : vector<1x48xf32> to vector<8x48xf32>
    %859 = arith.addf %857, %858 : vector<8x48xf32>
    %cst_416 = arith.constant 0.000000e+00 : f32
    %860 = vector.broadcast %cst_416 : f32 to vector<8x48xf32>
    %861 = arith.maximumf %859, %860 : vector<8x48xf32>
    %c1_417 = arith.constant 1 : index
    %c1_418 = arith.constant 1 : index
    %c0_419 = arith.constant 0 : index
    %862 = vector.load %arg14[%c1_417, %c1_418, %c0_419] : memref<10x10x48xf32, #tpu.memory_space<vmem>>, vector<1x8x48xf32>
    %863 = vector.shape_cast %862 : vector<1x8x48xf32> to vector<8x48xf32>
    %864 = vector.shape_cast %861 : vector<8x48xf32> to vector<1x8x48xf32>
    tpu.vector_store %arg14[%c1_417, %c1_418, %c0_419], %864 {strides = array<i32>} : memref<10x10x48xf32, #tpu.memory_space<vmem>>, vector<1x8x48xf32>,
    %cst_420 = arith.constant 0.000000e+00 : f32
    %865 = vector.broadcast %cst_420 : f32 to vector<15x32xf32>
    %c2_421 = arith.constant 2 : index
    %c0_422 = arith.constant 0 : index
    %c0_423 = arith.constant 0 : index
    %866 = vector.load %arg13[%c2_421, %c0_422, %c0_423] : memref<17x17x32xf32, #tpu.memory_space<vmem>>, vector<1x17x32xf32>
    %867 = vector.shape_cast %866 : vector<1x17x32xf32> to vector<17x32xf32>
    %868 = vector.extract_strided_slice %867 {offsets = [0, 0], sizes = [15, 32], strides = [1, 1]} : vector<17x32xf32> to vector<15x32xf32>
    %869 = vector.extract_strided_slice %1 {offsets = [0, 0], sizes = [1, 32], strides = [1, 1]} : vector<9x32xf32> to vector<1x32xf32>
    %870 = vector.broadcast %869 : vector<1x32xf32> to vector<15x32xf32>
    %871 = arith.mulf %868, %870 : vector<15x32xf32>
    %872 = arith.addf %865, %871 : vector<15x32xf32>
    %873 = vector.extract_strided_slice %867 {offsets = [1, 0], sizes = [15, 32], strides = [1, 1]} : vector<17x32xf32> to vector<15x32xf32>
    %874 = vector.extract_strided_slice %1 {offsets = [1, 0], sizes = [1, 32], strides = [1, 1]} : vector<9x32xf32> to vector<1x32xf32>
    %875 = vector.broadcast %874 : vector<1x32xf32> to vector<15x32xf32>
    %876 = arith.mulf %873, %875 : vector<15x32xf32>
    %877 = arith.addf %872, %876 : vector<15x32xf32>
    %878 = vector.extract_strided_slice %867 {offsets = [2, 0], sizes = [15, 32], strides = [1, 1]} : vector<17x32xf32> to vector<15x32xf32>
    %879 = vector.extract_strided_slice %1 {offsets = [2, 0], sizes = [1, 32], strides = [1, 1]} : vector<9x32xf32> to vector<1x32xf32>
    %880 = vector.broadcast %879 : vector<1x32xf32> to vector<15x32xf32>
    %881 = arith.mulf %878, %880 : vector<15x32xf32>
    %882 = arith.addf %877, %881 : vector<15x32xf32>
    %c3_424 = arith.constant 3 : index
    %c0_425 = arith.constant 0 : index
    %c0_426 = arith.constant 0 : index
    %883 = vector.load %arg13[%c3_424, %c0_425, %c0_426] : memref<17x17x32xf32, #tpu.memory_space<vmem>>, vector<1x17x32xf32>
    %884 = vector.shape_cast %883 : vector<1x17x32xf32> to vector<17x32xf32>
    %885 = vector.extract_strided_slice %884 {offsets = [0, 0], sizes = [15, 32], strides = [1, 1]} : vector<17x32xf32> to vector<15x32xf32>
    %886 = vector.extract_strided_slice %1 {offsets = [3, 0], sizes = [1, 32], strides = [1, 1]} : vector<9x32xf32> to vector<1x32xf32>
    %887 = vector.broadcast %886 : vector<1x32xf32> to vector<15x32xf32>
    %888 = arith.mulf %885, %887 : vector<15x32xf32>
    %889 = arith.addf %882, %888 : vector<15x32xf32>
    %890 = vector.extract_strided_slice %884 {offsets = [1, 0], sizes = [15, 32], strides = [1, 1]} : vector<17x32xf32> to vector<15x32xf32>
    %891 = vector.extract_strided_slice %1 {offsets = [4, 0], sizes = [1, 32], strides = [1, 1]} : vector<9x32xf32> to vector<1x32xf32>
    %892 = vector.broadcast %891 : vector<1x32xf32> to vector<15x32xf32>
    %893 = arith.mulf %890, %892 : vector<15x32xf32>
    %894 = arith.addf %889, %893 : vector<15x32xf32>
    %895 = vector.extract_strided_slice %884 {offsets = [2, 0], sizes = [15, 32], strides = [1, 1]} : vector<17x32xf32> to vector<15x32xf32>
    %896 = vector.extract_strided_slice %1 {offsets = [5, 0], sizes = [1, 32], strides = [1, 1]} : vector<9x32xf32> to vector<1x32xf32>
    %897 = vector.broadcast %896 : vector<1x32xf32> to vector<15x32xf32>
    %898 = arith.mulf %895, %897 : vector<15x32xf32>
    %899 = arith.addf %894, %898 : vector<15x32xf32>
    %c4_427 = arith.constant 4 : index
    %c0_428 = arith.constant 0 : index
    %c0_429 = arith.constant 0 : index
    %900 = vector.load %arg13[%c4_427, %c0_428, %c0_429] : memref<17x17x32xf32, #tpu.memory_space<vmem>>, vector<1x17x32xf32>
    %901 = vector.shape_cast %900 : vector<1x17x32xf32> to vector<17x32xf32>
    %902 = vector.extract_strided_slice %901 {offsets = [0, 0], sizes = [15, 32], strides = [1, 1]} : vector<17x32xf32> to vector<15x32xf32>
    %903 = vector.extract_strided_slice %1 {offsets = [6, 0], sizes = [1, 32], strides = [1, 1]} : vector<9x32xf32> to vector<1x32xf32>
    %904 = vector.broadcast %903 : vector<1x32xf32> to vector<15x32xf32>
    %905 = arith.mulf %902, %904 : vector<15x32xf32>
    %906 = arith.addf %899, %905 : vector<15x32xf32>
    %907 = vector.extract_strided_slice %901 {offsets = [1, 0], sizes = [15, 32], strides = [1, 1]} : vector<17x32xf32> to vector<15x32xf32>
    %908 = vector.extract_strided_slice %1 {offsets = [7, 0], sizes = [1, 32], strides = [1, 1]} : vector<9x32xf32> to vector<1x32xf32>
    %909 = vector.broadcast %908 : vector<1x32xf32> to vector<15x32xf32>
    %910 = arith.mulf %907, %909 : vector<15x32xf32>
    %911 = arith.addf %906, %910 : vector<15x32xf32>
    %912 = vector.extract_strided_slice %901 {offsets = [2, 0], sizes = [15, 32], strides = [1, 1]} : vector<17x32xf32> to vector<15x32xf32>
    %913 = vector.extract_strided_slice %1 {offsets = [8, 0], sizes = [1, 32], strides = [1, 1]} : vector<9x32xf32> to vector<1x32xf32>
    %914 = vector.broadcast %913 : vector<1x32xf32> to vector<15x32xf32>
    %915 = arith.mulf %912, %914 : vector<15x32xf32>
    %916 = arith.addf %911, %915 : vector<15x32xf32>
    %917 = vector.broadcast %6 : vector<1x32xf32> to vector<15x32xf32>
    %918 = arith.addf %916, %917 : vector<15x32xf32>
    %cst_430 = arith.constant 0.000000e+00 : f32
    %919 = vector.broadcast %cst_430 : f32 to vector<15x32xf32>
    %920 = arith.maximumf %918, %919 : vector<15x32xf32>
    %cst_431 = arith.constant dense<0.000000e+00> : vector<8x32xf32>
    %921 = tpu.matmul %23, %920, %cst_431 {dimension_numbers = #tpu.dot_dimension_numbers<[1], [0], [0], [1], [0, 0, 1, 1], [], []>} : vector<8x15xf32>, vector<15x32xf32>, vector<8x32xf32> -> vector<8x32xf32>
    %cst_432 = arith.constant dense<0.000000e+00> : vector<8x48xf32>
    %922 = tpu.matmul %921, %3, %cst_432 {dimension_numbers = #tpu.dot_dimension_numbers<[1], [0], [0], [1], [0, 0, 1, 1], [], []>} : vector<8x32xf32>, vector<32x48xf32>, vector<8x48xf32> -> vector<8x48xf32>
    %923 = vector.broadcast %7 : vector<1x48xf32> to vector<8x48xf32>
    %924 = arith.addf %922, %923 : vector<8x48xf32>
    %cst_433 = arith.constant 0.000000e+00 : f32
    %925 = vector.broadcast %cst_433 : f32 to vector<8x48xf32>
    %926 = arith.maximumf %924, %925 : vector<8x48xf32>
    %c2_434 = arith.constant 2 : index
    %c1_435 = arith.constant 1 : index
    %c0_436 = arith.constant 0 : index
    %927 = vector.load %arg14[%c2_434, %c1_435, %c0_436] : memref<10x10x48xf32, #tpu.memory_space<vmem>>, vector<1x8x48xf32>
    %928 = vector.shape_cast %927 : vector<1x8x48xf32> to vector<8x48xf32>
    %929 = vector.shape_cast %926 : vector<8x48xf32> to vector<1x8x48xf32>
    tpu.vector_store %arg14[%c2_434, %c1_435, %c0_436], %929 {strides = array<i32>} : memref<10x10x48xf32, #tpu.memory_space<vmem>>, vector<1x8x48xf32>,
    %cst_437 = arith.constant 0.000000e+00 : f32
    %930 = vector.broadcast %cst_437 : f32 to vector<15x32xf32>
    %c4_438 = arith.constant 4 : index
    %c0_439 = arith.constant 0 : index
    %c0_440 = arith.constant 0 : index
    %931 = vector.load %arg13[%c4_438, %c0_439, %c0_440] : memref<17x17x32xf32, #tpu.memory_space<vmem>>, vector<1x17x32xf32>
    %932 = vector.shape_cast %931 : vector<1x17x32xf32> to vector<17x32xf32>
    %933 = vector.extract_strided_slice %932 {offsets = [0, 0], sizes = [15, 32], strides = [1, 1]} : vector<17x32xf32> to vector<15x32xf32>
    %934 = vector.extract_strided_slice %1 {offsets = [0, 0], sizes = [1, 32], strides = [1, 1]} : vector<9x32xf32> to vector<1x32xf32>
    %935 = vector.broadcast %934 : vector<1x32xf32> to vector<15x32xf32>
    %936 = arith.mulf %933, %935 : vector<15x32xf32>
    %937 = arith.addf %930, %936 : vector<15x32xf32>
    %938 = vector.extract_strided_slice %932 {offsets = [1, 0], sizes = [15, 32], strides = [1, 1]} : vector<17x32xf32> to vector<15x32xf32>
    %939 = vector.extract_strided_slice %1 {offsets = [1, 0], sizes = [1, 32], strides = [1, 1]} : vector<9x32xf32> to vector<1x32xf32>
    %940 = vector.broadcast %939 : vector<1x32xf32> to vector<15x32xf32>
    %941 = arith.mulf %938, %940 : vector<15x32xf32>
    %942 = arith.addf %937, %941 : vector<15x32xf32>
    %943 = vector.extract_strided_slice %932 {offsets = [2, 0], sizes = [15, 32], strides = [1, 1]} : vector<17x32xf32> to vector<15x32xf32>
    %944 = vector.extract_strided_slice %1 {offsets = [2, 0], sizes = [1, 32], strides = [1, 1]} : vector<9x32xf32> to vector<1x32xf32>
    %945 = vector.broadcast %944 : vector<1x32xf32> to vector<15x32xf32>
    %946 = arith.mulf %943, %945 : vector<15x32xf32>
    %947 = arith.addf %942, %946 : vector<15x32xf32>
    %c5_441 = arith.constant 5 : index
    %c0_442 = arith.constant 0 : index
    %c0_443 = arith.constant 0 : index
    %948 = vector.load %arg13[%c5_441, %c0_442, %c0_443] : memref<17x17x32xf32, #tpu.memory_space<vmem>>, vector<1x17x32xf32>
    %949 = vector.shape_cast %948 : vector<1x17x32xf32> to vector<17x32xf32>
    %950 = vector.extract_strided_slice %949 {offsets = [0, 0], sizes = [15, 32], strides = [1, 1]} : vector<17x32xf32> to vector<15x32xf32>
    %951 = vector.extract_strided_slice %1 {offsets = [3, 0], sizes = [1, 32], strides = [1, 1]} : vector<9x32xf32> to vector<1x32xf32>
    %952 = vector.broadcast %951 : vector<1x32xf32> to vector<15x32xf32>
    %953 = arith.mulf %950, %952 : vector<15x32xf32>
    %954 = arith.addf %947, %953 : vector<15x32xf32>
    %955 = vector.extract_strided_slice %949 {offsets = [1, 0], sizes = [15, 32], strides = [1, 1]} : vector<17x32xf32> to vector<15x32xf32>
    %956 = vector.extract_strided_slice %1 {offsets = [4, 0], sizes = [1, 32], strides = [1, 1]} : vector<9x32xf32> to vector<1x32xf32>
    %957 = vector.broadcast %956 : vector<1x32xf32> to vector<15x32xf32>
    %958 = arith.mulf %955, %957 : vector<15x32xf32>
    %959 = arith.addf %954, %958 : vector<15x32xf32>
    %960 = vector.extract_strided_slice %949 {offsets = [2, 0], sizes = [15, 32], strides = [1, 1]} : vector<17x32xf32> to vector<15x32xf32>
    %961 = vector.extract_strided_slice %1 {offsets = [5, 0], sizes = [1, 32], strides = [1, 1]} : vector<9x32xf32> to vector<1x32xf32>
    %962 = vector.broadcast %961 : vector<1x32xf32> to vector<15x32xf32>
    %963 = arith.mulf %960, %962 : vector<15x32xf32>
    %964 = arith.addf %959, %963 : vector<15x32xf32>
    %c6_444 = arith.constant 6 : index
    %c0_445 = arith.constant 0 : index
    %c0_446 = arith.constant 0 : index
    %965 = vector.load %arg13[%c6_444, %c0_445, %c0_446] : memref<17x17x32xf32, #tpu.memory_space<vmem>>, vector<1x17x32xf32>
    %966 = vector.shape_cast %965 : vector<1x17x32xf32> to vector<17x32xf32>
    %967 = vector.extract_strided_slice %966 {offsets = [0, 0], sizes = [15, 32], strides = [1, 1]} : vector<17x32xf32> to vector<15x32xf32>
    %968 = vector.extract_strided_slice %1 {offsets = [6, 0], sizes = [1, 32], strides = [1, 1]} : vector<9x32xf32> to vector<1x32xf32>
    %969 = vector.broadcast %968 : vector<1x32xf32> to vector<15x32xf32>
    %970 = arith.mulf %967, %969 : vector<15x32xf32>
    %971 = arith.addf %964, %970 : vector<15x32xf32>
    %972 = vector.extract_strided_slice %966 {offsets = [1, 0], sizes = [15, 32], strides = [1, 1]} : vector<17x32xf32> to vector<15x32xf32>
    %973 = vector.extract_strided_slice %1 {offsets = [7, 0], sizes = [1, 32], strides = [1, 1]} : vector<9x32xf32> to vector<1x32xf32>
    %974 = vector.broadcast %973 : vector<1x32xf32> to vector<15x32xf32>
    %975 = arith.mulf %972, %974 : vector<15x32xf32>
    %976 = arith.addf %971, %975 : vector<15x32xf32>
    %977 = vector.extract_strided_slice %966 {offsets = [2, 0], sizes = [15, 32], strides = [1, 1]} : vector<17x32xf32> to vector<15x32xf32>
    %978 = vector.extract_strided_slice %1 {offsets = [8, 0], sizes = [1, 32], strides = [1, 1]} : vector<9x32xf32> to vector<1x32xf32>
    %979 = vector.broadcast %978 : vector<1x32xf32> to vector<15x32xf32>
    %980 = arith.mulf %977, %979 : vector<15x32xf32>
    %981 = arith.addf %976, %980 : vector<15x32xf32>
    %982 = vector.broadcast %6 : vector<1x32xf32> to vector<15x32xf32>
    %983 = arith.addf %981, %982 : vector<15x32xf32>
    %cst_447 = arith.constant 0.000000e+00 : f32
    %984 = vector.broadcast %cst_447 : f32 to vector<15x32xf32>
    %985 = arith.maximumf %983, %984 : vector<15x32xf32>
    %cst_448 = arith.constant dense<0.000000e+00> : vector<8x32xf32>
    %986 = tpu.matmul %23, %985, %cst_448 {dimension_numbers = #tpu.dot_dimension_numbers<[1], [0], [0], [1], [0, 0, 1, 1], [], []>} : vector<8x15xf32>, vector<15x32xf32>, vector<8x32xf32> -> vector<8x32xf32>
    %cst_449 = arith.constant dense<0.000000e+00> : vector<8x48xf32>
    %987 = tpu.matmul %986, %3, %cst_449 {dimension_numbers = #tpu.dot_dimension_numbers<[1], [0], [0], [1], [0, 0, 1, 1], [], []>} : vector<8x32xf32>, vector<32x48xf32>, vector<8x48xf32> -> vector<8x48xf32>
    %988 = vector.broadcast %7 : vector<1x48xf32> to vector<8x48xf32>
    %989 = arith.addf %987, %988 : vector<8x48xf32>
    %cst_450 = arith.constant 0.000000e+00 : f32
    %990 = vector.broadcast %cst_450 : f32 to vector<8x48xf32>
    %991 = arith.maximumf %989, %990 : vector<8x48xf32>
    %c3_451 = arith.constant 3 : index
    %c1_452 = arith.constant 1 : index
    %c0_453 = arith.constant 0 : index
    %992 = vector.load %arg14[%c3_451, %c1_452, %c0_453] : memref<10x10x48xf32, #tpu.memory_space<vmem>>, vector<1x8x48xf32>
    %993 = vector.shape_cast %992 : vector<1x8x48xf32> to vector<8x48xf32>
    %994 = vector.shape_cast %991 : vector<8x48xf32> to vector<1x8x48xf32>
    tpu.vector_store %arg14[%c3_451, %c1_452, %c0_453], %994 {strides = array<i32>} : memref<10x10x48xf32, #tpu.memory_space<vmem>>, vector<1x8x48xf32>,
    %cst_454 = arith.constant 0.000000e+00 : f32
    %995 = vector.broadcast %cst_454 : f32 to vector<15x32xf32>
    %c6_455 = arith.constant 6 : index
    %c0_456 = arith.constant 0 : index
    %c0_457 = arith.constant 0 : index
    %996 = vector.load %arg13[%c6_455, %c0_456, %c0_457] : memref<17x17x32xf32, #tpu.memory_space<vmem>>, vector<1x17x32xf32>
    %997 = vector.shape_cast %996 : vector<1x17x32xf32> to vector<17x32xf32>
    %998 = vector.extract_strided_slice %997 {offsets = [0, 0], sizes = [15, 32], strides = [1, 1]} : vector<17x32xf32> to vector<15x32xf32>
    %999 = vector.extract_strided_slice %1 {offsets = [0, 0], sizes = [1, 32], strides = [1, 1]} : vector<9x32xf32> to vector<1x32xf32>
    %1000 = vector.broadcast %999 : vector<1x32xf32> to vector<15x32xf32>
    %1001 = arith.mulf %998, %1000 : vector<15x32xf32>
    %1002 = arith.addf %995, %1001 : vector<15x32xf32>
    %1003 = vector.extract_strided_slice %997 {offsets = [1, 0], sizes = [15, 32], strides = [1, 1]} : vector<17x32xf32> to vector<15x32xf32>
    %1004 = vector.extract_strided_slice %1 {offsets = [1, 0], sizes = [1, 32], strides = [1, 1]} : vector<9x32xf32> to vector<1x32xf32>
    %1005 = vector.broadcast %1004 : vector<1x32xf32> to vector<15x32xf32>
    %1006 = arith.mulf %1003, %1005 : vector<15x32xf32>
    %1007 = arith.addf %1002, %1006 : vector<15x32xf32>
    %1008 = vector.extract_strided_slice %997 {offsets = [2, 0], sizes = [15, 32], strides = [1, 1]} : vector<17x32xf32> to vector<15x32xf32>
    %1009 = vector.extract_strided_slice %1 {offsets = [2, 0], sizes = [1, 32], strides = [1, 1]} : vector<9x32xf32> to vector<1x32xf32>
    %1010 = vector.broadcast %1009 : vector<1x32xf32> to vector<15x32xf32>
    %1011 = arith.mulf %1008, %1010 : vector<15x32xf32>
    %1012 = arith.addf %1007, %1011 : vector<15x32xf32>
    %c7_458 = arith.constant 7 : index
    %c0_459 = arith.constant 0 : index
    %c0_460 = arith.constant 0 : index
    %1013 = vector.load %arg13[%c7_458, %c0_459, %c0_460] : memref<17x17x32xf32, #tpu.memory_space<vmem>>, vector<1x17x32xf32>
    %1014 = vector.shape_cast %1013 : vector<1x17x32xf32> to vector<17x32xf32>
    %1015 = vector.extract_strided_slice %1014 {offsets = [0, 0], sizes = [15, 32], strides = [1, 1]} : vector<17x32xf32> to vector<15x32xf32>
    %1016 = vector.extract_strided_slice %1 {offsets = [3, 0], sizes = [1, 32], strides = [1, 1]} : vector<9x32xf32> to vector<1x32xf32>
    %1017 = vector.broadcast %1016 : vector<1x32xf32> to vector<15x32xf32>
    %1018 = arith.mulf %1015, %1017 : vector<15x32xf32>
    %1019 = arith.addf %1012, %1018 : vector<15x32xf32>
    %1020 = vector.extract_strided_slice %1014 {offsets = [1, 0], sizes = [15, 32], strides = [1, 1]} : vector<17x32xf32> to vector<15x32xf32>
    %1021 = vector.extract_strided_slice %1 {offsets = [4, 0], sizes = [1, 32], strides = [1, 1]} : vector<9x32xf32> to vector<1x32xf32>
    %1022 = vector.broadcast %1021 : vector<1x32xf32> to vector<15x32xf32>
    %1023 = arith.mulf %1020, %1022 : vector<15x32xf32>
    %1024 = arith.addf %1019, %1023 : vector<15x32xf32>
    %1025 = vector.extract_strided_slice %1014 {offsets = [2, 0], sizes = [15, 32], strides = [1, 1]} : vector<17x32xf32> to vector<15x32xf32>
    %1026 = vector.extract_strided_slice %1 {offsets = [5, 0], sizes = [1, 32], strides = [1, 1]} : vector<9x32xf32> to vector<1x32xf32>
    %1027 = vector.broadcast %1026 : vector<1x32xf32> to vector<15x32xf32>
    %1028 = arith.mulf %1025, %1027 : vector<15x32xf32>
    %1029 = arith.addf %1024, %1028 : vector<15x32xf32>
    %c8_461 = arith.constant 8 : index
    %c0_462 = arith.constant 0 : index
    %c0_463 = arith.constant 0 : index
    %1030 = vector.load %arg13[%c8_461, %c0_462, %c0_463] : memref<17x17x32xf32, #tpu.memory_space<vmem>>, vector<1x17x32xf32>
    %1031 = vector.shape_cast %1030 : vector<1x17x32xf32> to vector<17x32xf32>
    %1032 = vector.extract_strided_slice %1031 {offsets = [0, 0], sizes = [15, 32], strides = [1, 1]} : vector<17x32xf32> to vector<15x32xf32>
    %1033 = vector.extract_strided_slice %1 {offsets = [6, 0], sizes = [1, 32], strides = [1, 1]} : vector<9x32xf32> to vector<1x32xf32>
    %1034 = vector.broadcast %1033 : vector<1x32xf32> to vector<15x32xf32>
    %1035 = arith.mulf %1032, %1034 : vector<15x32xf32>
    %1036 = arith.addf %1029, %1035 : vector<15x32xf32>
    %1037 = vector.extract_strided_slice %1031 {offsets = [1, 0], sizes = [15, 32], strides = [1, 1]} : vector<17x32xf32> to vector<15x32xf32>
    %1038 = vector.extract_strided_slice %1 {offsets = [7, 0], sizes = [1, 32], strides = [1, 1]} : vector<9x32xf32> to vector<1x32xf32>
    %1039 = vector.broadcast %1038 : vector<1x32xf32> to vector<15x32xf32>
    %1040 = arith.mulf %1037, %1039 : vector<15x32xf32>
    %1041 = arith.addf %1036, %1040 : vector<15x32xf32>
    %1042 = vector.extract_strided_slice %1031 {offsets = [2, 0], sizes = [15, 32], strides = [1, 1]} : vector<17x32xf32> to vector<15x32xf32>
    %1043 = vector.extract_strided_slice %1 {offsets = [8, 0], sizes = [1, 32], strides = [1, 1]} : vector<9x32xf32> to vector<1x32xf32>
    %1044 = vector.broadcast %1043 : vector<1x32xf32> to vector<15x32xf32>
    %1045 = arith.mulf %1042, %1044 : vector<15x32xf32>
    %1046 = arith.addf %1041, %1045 : vector<15x32xf32>
    %1047 = vector.broadcast %6 : vector<1x32xf32> to vector<15x32xf32>
    %1048 = arith.addf %1046, %1047 : vector<15x32xf32>
    %cst_464 = arith.constant 0.000000e+00 : f32
    %1049 = vector.broadcast %cst_464 : f32 to vector<15x32xf32>
    %1050 = arith.maximumf %1048, %1049 : vector<15x32xf32>
    %cst_465 = arith.constant dense<0.000000e+00> : vector<8x32xf32>
    %1051 = tpu.matmul %23, %1050, %cst_465 {dimension_numbers = #tpu.dot_dimension_numbers<[1], [0], [0], [1], [0, 0, 1, 1], [], []>} : vector<8x15xf32>, vector<15x32xf32>, vector<8x32xf32> -> vector<8x32xf32>
    %cst_466 = arith.constant dense<0.000000e+00> : vector<8x48xf32>
    %1052 = tpu.matmul %1051, %3, %cst_466 {dimension_numbers = #tpu.dot_dimension_numbers<[1], [0], [0], [1], [0, 0, 1, 1], [], []>} : vector<8x32xf32>, vector<32x48xf32>, vector<8x48xf32> -> vector<8x48xf32>
    %1053 = vector.broadcast %7 : vector<1x48xf32> to vector<8x48xf32>
    %1054 = arith.addf %1052, %1053 : vector<8x48xf32>
    %cst_467 = arith.constant 0.000000e+00 : f32
    %1055 = vector.broadcast %cst_467 : f32 to vector<8x48xf32>
    %1056 = arith.maximumf %1054, %1055 : vector<8x48xf32>
    %c4_468 = arith.constant 4 : index
    %c1_469 = arith.constant 1 : index
    %c0_470 = arith.constant 0 : index
    %1057 = vector.load %arg14[%c4_468, %c1_469, %c0_470] : memref<10x10x48xf32, #tpu.memory_space<vmem>>, vector<1x8x48xf32>
    %1058 = vector.shape_cast %1057 : vector<1x8x48xf32> to vector<8x48xf32>
    %1059 = vector.shape_cast %1056 : vector<8x48xf32> to vector<1x8x48xf32>
    tpu.vector_store %arg14[%c4_468, %c1_469, %c0_470], %1059 {strides = array<i32>} : memref<10x10x48xf32, #tpu.memory_space<vmem>>, vector<1x8x48xf32>,
    %cst_471 = arith.constant 0.000000e+00 : f32
    %1060 = vector.broadcast %cst_471 : f32 to vector<15x32xf32>
    %c8_472 = arith.constant 8 : index
    %c0_473 = arith.constant 0 : index
    %c0_474 = arith.constant 0 : index
    %1061 = vector.load %arg13[%c8_472, %c0_473, %c0_474] : memref<17x17x32xf32, #tpu.memory_space<vmem>>, vector<1x17x32xf32>
    %1062 = vector.shape_cast %1061 : vector<1x17x32xf32> to vector<17x32xf32>
    %1063 = vector.extract_strided_slice %1062 {offsets = [0, 0], sizes = [15, 32], strides = [1, 1]} : vector<17x32xf32> to vector<15x32xf32>
    %1064 = vector.extract_strided_slice %1 {offsets = [0, 0], sizes = [1, 32], strides = [1, 1]} : vector<9x32xf32> to vector<1x32xf32>
    %1065 = vector.broadcast %1064 : vector<1x32xf32> to vector<15x32xf32>
    %1066 = arith.mulf %1063, %1065 : vector<15x32xf32>
    %1067 = arith.addf %1060, %1066 : vector<15x32xf32>
    %1068 = vector.extract_strided_slice %1062 {offsets = [1, 0], sizes = [15, 32], strides = [1, 1]} : vector<17x32xf32> to vector<15x32xf32>
    %1069 = vector.extract_strided_slice %1 {offsets = [1, 0], sizes = [1, 32], strides = [1, 1]} : vector<9x32xf32> to vector<1x32xf32>
    %1070 = vector.broadcast %1069 : vector<1x32xf32> to vector<15x32xf32>
    %1071 = arith.mulf %1068, %1070 : vector<15x32xf32>
    %1072 = arith.addf %1067, %1071 : vector<15x32xf32>
    %1073 = vector.extract_strided_slice %1062 {offsets = [2, 0], sizes = [15, 32], strides = [1, 1]} : vector<17x32xf32> to vector<15x32xf32>
    %1074 = vector.extract_strided_slice %1 {offsets = [2, 0], sizes = [1, 32], strides = [1, 1]} : vector<9x32xf32> to vector<1x32xf32>
    %1075 = vector.broadcast %1074 : vector<1x32xf32> to vector<15x32xf32>
    %1076 = arith.mulf %1073, %1075 : vector<15x32xf32>
    %1077 = arith.addf %1072, %1076 : vector<15x32xf32>
    %c9_475 = arith.constant 9 : index
    %c0_476 = arith.constant 0 : index
    %c0_477 = arith.constant 0 : index
    %1078 = vector.load %arg13[%c9_475, %c0_476, %c0_477] : memref<17x17x32xf32, #tpu.memory_space<vmem>>, vector<1x17x32xf32>
    %1079 = vector.shape_cast %1078 : vector<1x17x32xf32> to vector<17x32xf32>
    %1080 = vector.extract_strided_slice %1079 {offsets = [0, 0], sizes = [15, 32], strides = [1, 1]} : vector<17x32xf32> to vector<15x32xf32>
    %1081 = vector.extract_strided_slice %1 {offsets = [3, 0], sizes = [1, 32], strides = [1, 1]} : vector<9x32xf32> to vector<1x32xf32>
    %1082 = vector.broadcast %1081 : vector<1x32xf32> to vector<15x32xf32>
    %1083 = arith.mulf %1080, %1082 : vector<15x32xf32>
    %1084 = arith.addf %1077, %1083 : vector<15x32xf32>
    %1085 = vector.extract_strided_slice %1079 {offsets = [1, 0], sizes = [15, 32], strides = [1, 1]} : vector<17x32xf32> to vector<15x32xf32>
    %1086 = vector.extract_strided_slice %1 {offsets = [4, 0], sizes = [1, 32], strides = [1, 1]} : vector<9x32xf32> to vector<1x32xf32>
    %1087 = vector.broadcast %1086 : vector<1x32xf32> to vector<15x32xf32>
    %1088 = arith.mulf %1085, %1087 : vector<15x32xf32>
    %1089 = arith.addf %1084, %1088 : vector<15x32xf32>
    %1090 = vector.extract_strided_slice %1079 {offsets = [2, 0], sizes = [15, 32], strides = [1, 1]} : vector<17x32xf32> to vector<15x32xf32>
    %1091 = vector.extract_strided_slice %1 {offsets = [5, 0], sizes = [1, 32], strides = [1, 1]} : vector<9x32xf32> to vector<1x32xf32>
    %1092 = vector.broadcast %1091 : vector<1x32xf32> to vector<15x32xf32>
    %1093 = arith.mulf %1090, %1092 : vector<15x32xf32>
    %1094 = arith.addf %1089, %1093 : vector<15x32xf32>
    %c10_478 = arith.constant 10 : index
    %c0_479 = arith.constant 0 : index
    %c0_480 = arith.constant 0 : index
    %1095 = vector.load %arg13[%c10_478, %c0_479, %c0_480] : memref<17x17x32xf32, #tpu.memory_space<vmem>>, vector<1x17x32xf32>
    %1096 = vector.shape_cast %1095 : vector<1x17x32xf32> to vector<17x32xf32>
    %1097 = vector.extract_strided_slice %1096 {offsets = [0, 0], sizes = [15, 32], strides = [1, 1]} : vector<17x32xf32> to vector<15x32xf32>
    %1098 = vector.extract_strided_slice %1 {offsets = [6, 0], sizes = [1, 32], strides = [1, 1]} : vector<9x32xf32> to vector<1x32xf32>
    %1099 = vector.broadcast %1098 : vector<1x32xf32> to vector<15x32xf32>
    %1100 = arith.mulf %1097, %1099 : vector<15x32xf32>
    %1101 = arith.addf %1094, %1100 : vector<15x32xf32>
    %1102 = vector.extract_strided_slice %1096 {offsets = [1, 0], sizes = [15, 32], strides = [1, 1]} : vector<17x32xf32> to vector<15x32xf32>
    %1103 = vector.extract_strided_slice %1 {offsets = [7, 0], sizes = [1, 32], strides = [1, 1]} : vector<9x32xf32> to vector<1x32xf32>
    %1104 = vector.broadcast %1103 : vector<1x32xf32> to vector<15x32xf32>
    %1105 = arith.mulf %1102, %1104 : vector<15x32xf32>
    %1106 = arith.addf %1101, %1105 : vector<15x32xf32>
    %1107 = vector.extract_strided_slice %1096 {offsets = [2, 0], sizes = [15, 32], strides = [1, 1]} : vector<17x32xf32> to vector<15x32xf32>
    %1108 = vector.extract_strided_slice %1 {offsets = [8, 0], sizes = [1, 32], strides = [1, 1]} : vector<9x32xf32> to vector<1x32xf32>
    %1109 = vector.broadcast %1108 : vector<1x32xf32> to vector<15x32xf32>
    %1110 = arith.mulf %1107, %1109 : vector<15x32xf32>
    %1111 = arith.addf %1106, %1110 : vector<15x32xf32>
    %1112 = vector.broadcast %6 : vector<1x32xf32> to vector<15x32xf32>
    %1113 = arith.addf %1111, %1112 : vector<15x32xf32>
    %cst_481 = arith.constant 0.000000e+00 : f32
    %1114 = vector.broadcast %cst_481 : f32 to vector<15x32xf32>
    %1115 = arith.maximumf %1113, %1114 : vector<15x32xf32>
    %cst_482 = arith.constant dense<0.000000e+00> : vector<8x32xf32>
    %1116 = tpu.matmul %23, %1115, %cst_482 {dimension_numbers = #tpu.dot_dimension_numbers<[1], [0], [0], [1], [0, 0, 1, 1], [], []>} : vector<8x15xf32>, vector<15x32xf32>, vector<8x32xf32> -> vector<8x32xf32>
    %cst_483 = arith.constant dense<0.000000e+00> : vector<8x48xf32>
    %1117 = tpu.matmul %1116, %3, %cst_483 {dimension_numbers = #tpu.dot_dimension_numbers<[1], [0], [0], [1], [0, 0, 1, 1], [], []>} : vector<8x32xf32>, vector<32x48xf32>, vector<8x48xf32> -> vector<8x48xf32>
    %1118 = vector.broadcast %7 : vector<1x48xf32> to vector<8x48xf32>
    %1119 = arith.addf %1117, %1118 : vector<8x48xf32>
    %cst_484 = arith.constant 0.000000e+00 : f32
    %1120 = vector.broadcast %cst_484 : f32 to vector<8x48xf32>
    %1121 = arith.maximumf %1119, %1120 : vector<8x48xf32>
    %c5_485 = arith.constant 5 : index
    %c1_486 = arith.constant 1 : index
    %c0_487 = arith.constant 0 : index
    %1122 = vector.load %arg14[%c5_485, %c1_486, %c0_487] : memref<10x10x48xf32, #tpu.memory_space<vmem>>, vector<1x8x48xf32>
    %1123 = vector.shape_cast %1122 : vector<1x8x48xf32> to vector<8x48xf32>
    %1124 = vector.shape_cast %1121 : vector<8x48xf32> to vector<1x8x48xf32>
    tpu.vector_store %arg14[%c5_485, %c1_486, %c0_487], %1124 {strides = array<i32>} : memref<10x10x48xf32, #tpu.memory_space<vmem>>, vector<1x8x48xf32>,
    %cst_488 = arith.constant 0.000000e+00 : f32
    %1125 = vector.broadcast %cst_488 : f32 to vector<15x32xf32>
    %c10_489 = arith.constant 10 : index
    %c0_490 = arith.constant 0 : index
    %c0_491 = arith.constant 0 : index
    %1126 = vector.load %arg13[%c10_489, %c0_490, %c0_491] : memref<17x17x32xf32, #tpu.memory_space<vmem>>, vector<1x17x32xf32>
    %1127 = vector.shape_cast %1126 : vector<1x17x32xf32> to vector<17x32xf32>
    %1128 = vector.extract_strided_slice %1127 {offsets = [0, 0], sizes = [15, 32], strides = [1, 1]} : vector<17x32xf32> to vector<15x32xf32>
    %1129 = vector.extract_strided_slice %1 {offsets = [0, 0], sizes = [1, 32], strides = [1, 1]} : vector<9x32xf32> to vector<1x32xf32>
    %1130 = vector.broadcast %1129 : vector<1x32xf32> to vector<15x32xf32>
    %1131 = arith.mulf %1128, %1130 : vector<15x32xf32>
    %1132 = arith.addf %1125, %1131 : vector<15x32xf32>
    %1133 = vector.extract_strided_slice %1127 {offsets = [1, 0], sizes = [15, 32], strides = [1, 1]} : vector<17x32xf32> to vector<15x32xf32>
    %1134 = vector.extract_strided_slice %1 {offsets = [1, 0], sizes = [1, 32], strides = [1, 1]} : vector<9x32xf32> to vector<1x32xf32>
    %1135 = vector.broadcast %1134 : vector<1x32xf32> to vector<15x32xf32>
    %1136 = arith.mulf %1133, %1135 : vector<15x32xf32>
    %1137 = arith.addf %1132, %1136 : vector<15x32xf32>
    %1138 = vector.extract_strided_slice %1127 {offsets = [2, 0], sizes = [15, 32], strides = [1, 1]} : vector<17x32xf32> to vector<15x32xf32>
    %1139 = vector.extract_strided_slice %1 {offsets = [2, 0], sizes = [1, 32], strides = [1, 1]} : vector<9x32xf32> to vector<1x32xf32>
    %1140 = vector.broadcast %1139 : vector<1x32xf32> to vector<15x32xf32>
    %1141 = arith.mulf %1138, %1140 : vector<15x32xf32>
    %1142 = arith.addf %1137, %1141 : vector<15x32xf32>
    %c11_492 = arith.constant 11 : index
    %c0_493 = arith.constant 0 : index
    %c0_494 = arith.constant 0 : index
    %1143 = vector.load %arg13[%c11_492, %c0_493, %c0_494] : memref<17x17x32xf32, #tpu.memory_space<vmem>>, vector<1x17x32xf32>
    %1144 = vector.shape_cast %1143 : vector<1x17x32xf32> to vector<17x32xf32>
    %1145 = vector.extract_strided_slice %1144 {offsets = [0, 0], sizes = [15, 32], strides = [1, 1]} : vector<17x32xf32> to vector<15x32xf32>
    %1146 = vector.extract_strided_slice %1 {offsets = [3, 0], sizes = [1, 32], strides = [1, 1]} : vector<9x32xf32> to vector<1x32xf32>
    %1147 = vector.broadcast %1146 : vector<1x32xf32> to vector<15x32xf32>
    %1148 = arith.mulf %1145, %1147 : vector<15x32xf32>
    %1149 = arith.addf %1142, %1148 : vector<15x32xf32>
    %1150 = vector.extract_strided_slice %1144 {offsets = [1, 0], sizes = [15, 32], strides = [1, 1]} : vector<17x32xf32> to vector<15x32xf32>
    %1151 = vector.extract_strided_slice %1 {offsets = [4, 0], sizes = [1, 32], strides = [1, 1]} : vector<9x32xf32> to vector<1x32xf32>
    %1152 = vector.broadcast %1151 : vector<1x32xf32> to vector<15x32xf32>
    %1153 = arith.mulf %1150, %1152 : vector<15x32xf32>
    %1154 = arith.addf %1149, %1153 : vector<15x32xf32>
    %1155 = vector.extract_strided_slice %1144 {offsets = [2, 0], sizes = [15, 32], strides = [1, 1]} : vector<17x32xf32> to vector<15x32xf32>
    %1156 = vector.extract_strided_slice %1 {offsets = [5, 0], sizes = [1, 32], strides = [1, 1]} : vector<9x32xf32> to vector<1x32xf32>
    %1157 = vector.broadcast %1156 : vector<1x32xf32> to vector<15x32xf32>
    %1158 = arith.mulf %1155, %1157 : vector<15x32xf32>
    %1159 = arith.addf %1154, %1158 : vector<15x32xf32>
    %c12_495 = arith.constant 12 : index
    %c0_496 = arith.constant 0 : index
    %c0_497 = arith.constant 0 : index
    %1160 = vector.load %arg13[%c12_495, %c0_496, %c0_497] : memref<17x17x32xf32, #tpu.memory_space<vmem>>, vector<1x17x32xf32>
    %1161 = vector.shape_cast %1160 : vector<1x17x32xf32> to vector<17x32xf32>
    %1162 = vector.extract_strided_slice %1161 {offsets = [0, 0], sizes = [15, 32], strides = [1, 1]} : vector<17x32xf32> to vector<15x32xf32>
    %1163 = vector.extract_strided_slice %1 {offsets = [6, 0], sizes = [1, 32], strides = [1, 1]} : vector<9x32xf32> to vector<1x32xf32>
    %1164 = vector.broadcast %1163 : vector<1x32xf32> to vector<15x32xf32>
    %1165 = arith.mulf %1162, %1164 : vector<15x32xf32>
    %1166 = arith.addf %1159, %1165 : vector<15x32xf32>
    %1167 = vector.extract_strided_slice %1161 {offsets = [1, 0], sizes = [15, 32], strides = [1, 1]} : vector<17x32xf32> to vector<15x32xf32>
    %1168 = vector.extract_strided_slice %1 {offsets = [7, 0], sizes = [1, 32], strides = [1, 1]} : vector<9x32xf32> to vector<1x32xf32>
    %1169 = vector.broadcast %1168 : vector<1x32xf32> to vector<15x32xf32>
    %1170 = arith.mulf %1167, %1169 : vector<15x32xf32>
    %1171 = arith.addf %1166, %1170 : vector<15x32xf32>
    %1172 = vector.extract_strided_slice %1161 {offsets = [2, 0], sizes = [15, 32], strides = [1, 1]} : vector<17x32xf32> to vector<15x32xf32>
    %1173 = vector.extract_strided_slice %1 {offsets = [8, 0], sizes = [1, 32], strides = [1, 1]} : vector<9x32xf32> to vector<1x32xf32>
    %1174 = vector.broadcast %1173 : vector<1x32xf32> to vector<15x32xf32>
    %1175 = arith.mulf %1172, %1174 : vector<15x32xf32>
    %1176 = arith.addf %1171, %1175 : vector<15x32xf32>
    %1177 = vector.broadcast %6 : vector<1x32xf32> to vector<15x32xf32>
    %1178 = arith.addf %1176, %1177 : vector<15x32xf32>
    %cst_498 = arith.constant 0.000000e+00 : f32
    %1179 = vector.broadcast %cst_498 : f32 to vector<15x32xf32>
    %1180 = arith.maximumf %1178, %1179 : vector<15x32xf32>
    %cst_499 = arith.constant dense<0.000000e+00> : vector<8x32xf32>
    %1181 = tpu.matmul %23, %1180, %cst_499 {dimension_numbers = #tpu.dot_dimension_numbers<[1], [0], [0], [1], [0, 0, 1, 1], [], []>} : vector<8x15xf32>, vector<15x32xf32>, vector<8x32xf32> -> vector<8x32xf32>
    %cst_500 = arith.constant dense<0.000000e+00> : vector<8x48xf32>
    %1182 = tpu.matmul %1181, %3, %cst_500 {dimension_numbers = #tpu.dot_dimension_numbers<[1], [0], [0], [1], [0, 0, 1, 1], [], []>} : vector<8x32xf32>, vector<32x48xf32>, vector<8x48xf32> -> vector<8x48xf32>
    %1183 = vector.broadcast %7 : vector<1x48xf32> to vector<8x48xf32>
    %1184 = arith.addf %1182, %1183 : vector<8x48xf32>
    %cst_501 = arith.constant 0.000000e+00 : f32
    %1185 = vector.broadcast %cst_501 : f32 to vector<8x48xf32>
    %1186 = arith.maximumf %1184, %1185 : vector<8x48xf32>
    %c6_502 = arith.constant 6 : index
    %c1_503 = arith.constant 1 : index
    %c0_504 = arith.constant 0 : index
    %1187 = vector.load %arg14[%c6_502, %c1_503, %c0_504] : memref<10x10x48xf32, #tpu.memory_space<vmem>>, vector<1x8x48xf32>
    %1188 = vector.shape_cast %1187 : vector<1x8x48xf32> to vector<8x48xf32>
    %1189 = vector.shape_cast %1186 : vector<8x48xf32> to vector<1x8x48xf32>
    tpu.vector_store %arg14[%c6_502, %c1_503, %c0_504], %1189 {strides = array<i32>} : memref<10x10x48xf32, #tpu.memory_space<vmem>>, vector<1x8x48xf32>,
    %cst_505 = arith.constant 0.000000e+00 : f32
    %1190 = vector.broadcast %cst_505 : f32 to vector<15x32xf32>
    %c12_506 = arith.constant 12 : index
    %c0_507 = arith.constant 0 : index
    %c0_508 = arith.constant 0 : index
    %1191 = vector.load %arg13[%c12_506, %c0_507, %c0_508] : memref<17x17x32xf32, #tpu.memory_space<vmem>>, vector<1x17x32xf32>
    %1192 = vector.shape_cast %1191 : vector<1x17x32xf32> to vector<17x32xf32>
    %1193 = vector.extract_strided_slice %1192 {offsets = [0, 0], sizes = [15, 32], strides = [1, 1]} : vector<17x32xf32> to vector<15x32xf32>
    %1194 = vector.extract_strided_slice %1 {offsets = [0, 0], sizes = [1, 32], strides = [1, 1]} : vector<9x32xf32> to vector<1x32xf32>
    %1195 = vector.broadcast %1194 : vector<1x32xf32> to vector<15x32xf32>
    %1196 = arith.mulf %1193, %1195 : vector<15x32xf32>
    %1197 = arith.addf %1190, %1196 : vector<15x32xf32>
    %1198 = vector.extract_strided_slice %1192 {offsets = [1, 0], sizes = [15, 32], strides = [1, 1]} : vector<17x32xf32> to vector<15x32xf32>
    %1199 = vector.extract_strided_slice %1 {offsets = [1, 0], sizes = [1, 32], strides = [1, 1]} : vector<9x32xf32> to vector<1x32xf32>
    %1200 = vector.broadcast %1199 : vector<1x32xf32> to vector<15x32xf32>
    %1201 = arith.mulf %1198, %1200 : vector<15x32xf32>
    %1202 = arith.addf %1197, %1201 : vector<15x32xf32>
    %1203 = vector.extract_strided_slice %1192 {offsets = [2, 0], sizes = [15, 32], strides = [1, 1]} : vector<17x32xf32> to vector<15x32xf32>
    %1204 = vector.extract_strided_slice %1 {offsets = [2, 0], sizes = [1, 32], strides = [1, 1]} : vector<9x32xf32> to vector<1x32xf32>
    %1205 = vector.broadcast %1204 : vector<1x32xf32> to vector<15x32xf32>
    %1206 = arith.mulf %1203, %1205 : vector<15x32xf32>
    %1207 = arith.addf %1202, %1206 : vector<15x32xf32>
    %c13_509 = arith.constant 13 : index
    %c0_510 = arith.constant 0 : index
    %c0_511 = arith.constant 0 : index
    %1208 = vector.load %arg13[%c13_509, %c0_510, %c0_511] : memref<17x17x32xf32, #tpu.memory_space<vmem>>, vector<1x17x32xf32>
    %1209 = vector.shape_cast %1208 : vector<1x17x32xf32> to vector<17x32xf32>
    %1210 = vector.extract_strided_slice %1209 {offsets = [0, 0], sizes = [15, 32], strides = [1, 1]} : vector<17x32xf32> to vector<15x32xf32>
    %1211 = vector.extract_strided_slice %1 {offsets = [3, 0], sizes = [1, 32], strides = [1, 1]} : vector<9x32xf32> to vector<1x32xf32>
    %1212 = vector.broadcast %1211 : vector<1x32xf32> to vector<15x32xf32>
    %1213 = arith.mulf %1210, %1212 : vector<15x32xf32>
    %1214 = arith.addf %1207, %1213 : vector<15x32xf32>
    %1215 = vector.extract_strided_slice %1209 {offsets = [1, 0], sizes = [15, 32], strides = [1, 1]} : vector<17x32xf32> to vector<15x32xf32>
    %1216 = vector.extract_strided_slice %1 {offsets = [4, 0], sizes = [1, 32], strides = [1, 1]} : vector<9x32xf32> to vector<1x32xf32>
    %1217 = vector.broadcast %1216 : vector<1x32xf32> to vector<15x32xf32>
    %1218 = arith.mulf %1215, %1217 : vector<15x32xf32>
    %1219 = arith.addf %1214, %1218 : vector<15x32xf32>
    %1220 = vector.extract_strided_slice %1209 {offsets = [2, 0], sizes = [15, 32], strides = [1, 1]} : vector<17x32xf32> to vector<15x32xf32>
    %1221 = vector.extract_strided_slice %1 {offsets = [5, 0], sizes = [1, 32], strides = [1, 1]} : vector<9x32xf32> to vector<1x32xf32>
    %1222 = vector.broadcast %1221 : vector<1x32xf32> to vector<15x32xf32>
    %1223 = arith.mulf %1220, %1222 : vector<15x32xf32>
    %1224 = arith.addf %1219, %1223 : vector<15x32xf32>
    %c14_512 = arith.constant 14 : index
    %c0_513 = arith.constant 0 : index
    %c0_514 = arith.constant 0 : index
    %1225 = vector.load %arg13[%c14_512, %c0_513, %c0_514] : memref<17x17x32xf32, #tpu.memory_space<vmem>>, vector<1x17x32xf32>
    %1226 = vector.shape_cast %1225 : vector<1x17x32xf32> to vector<17x32xf32>
    %1227 = vector.extract_strided_slice %1226 {offsets = [0, 0], sizes = [15, 32], strides = [1, 1]} : vector<17x32xf32> to vector<15x32xf32>
    %1228 = vector.extract_strided_slice %1 {offsets = [6, 0], sizes = [1, 32], strides = [1, 1]} : vector<9x32xf32> to vector<1x32xf32>
    %1229 = vector.broadcast %1228 : vector<1x32xf32> to vector<15x32xf32>
    %1230 = arith.mulf %1227, %1229 : vector<15x32xf32>
    %1231 = arith.addf %1224, %1230 : vector<15x32xf32>
    %1232 = vector.extract_strided_slice %1226 {offsets = [1, 0], sizes = [15, 32], strides = [1, 1]} : vector<17x32xf32> to vector<15x32xf32>
    %1233 = vector.extract_strided_slice %1 {offsets = [7, 0], sizes = [1, 32], strides = [1, 1]} : vector<9x32xf32> to vector<1x32xf32>
    %1234 = vector.broadcast %1233 : vector<1x32xf32> to vector<15x32xf32>
    %1235 = arith.mulf %1232, %1234 : vector<15x32xf32>
    %1236 = arith.addf %1231, %1235 : vector<15x32xf32>
    %1237 = vector.extract_strided_slice %1226 {offsets = [2, 0], sizes = [15, 32], strides = [1, 1]} : vector<17x32xf32> to vector<15x32xf32>
    %1238 = vector.extract_strided_slice %1 {offsets = [8, 0], sizes = [1, 32], strides = [1, 1]} : vector<9x32xf32> to vector<1x32xf32>
    %1239 = vector.broadcast %1238 : vector<1x32xf32> to vector<15x32xf32>
    %1240 = arith.mulf %1237, %1239 : vector<15x32xf32>
    %1241 = arith.addf %1236, %1240 : vector<15x32xf32>
    %1242 = vector.broadcast %6 : vector<1x32xf32> to vector<15x32xf32>
    %1243 = arith.addf %1241, %1242 : vector<15x32xf32>
    %cst_515 = arith.constant 0.000000e+00 : f32
    %1244 = vector.broadcast %cst_515 : f32 to vector<15x32xf32>
    %1245 = arith.maximumf %1243, %1244 : vector<15x32xf32>
    %cst_516 = arith.constant dense<0.000000e+00> : vector<8x32xf32>
    %1246 = tpu.matmul %23, %1245, %cst_516 {dimension_numbers = #tpu.dot_dimension_numbers<[1], [0], [0], [1], [0, 0, 1, 1], [], []>} : vector<8x15xf32>, vector<15x32xf32>, vector<8x32xf32> -> vector<8x32xf32>
    %cst_517 = arith.constant dense<0.000000e+00> : vector<8x48xf32>
    %1247 = tpu.matmul %1246, %3, %cst_517 {dimension_numbers = #tpu.dot_dimension_numbers<[1], [0], [0], [1], [0, 0, 1, 1], [], []>} : vector<8x32xf32>, vector<32x48xf32>, vector<8x48xf32> -> vector<8x48xf32>
    %1248 = vector.broadcast %7 : vector<1x48xf32> to vector<8x48xf32>
    %1249 = arith.addf %1247, %1248 : vector<8x48xf32>
    %cst_518 = arith.constant 0.000000e+00 : f32
    %1250 = vector.broadcast %cst_518 : f32 to vector<8x48xf32>
    %1251 = arith.maximumf %1249, %1250 : vector<8x48xf32>
    %c7_519 = arith.constant 7 : index
    %c1_520 = arith.constant 1 : index
    %c0_521 = arith.constant 0 : index
    %1252 = vector.load %arg14[%c7_519, %c1_520, %c0_521] : memref<10x10x48xf32, #tpu.memory_space<vmem>>, vector<1x8x48xf32>
    %1253 = vector.shape_cast %1252 : vector<1x8x48xf32> to vector<8x48xf32>
    %1254 = vector.shape_cast %1251 : vector<8x48xf32> to vector<1x8x48xf32>
    tpu.vector_store %arg14[%c7_519, %c1_520, %c0_521], %1254 {strides = array<i32>} : memref<10x10x48xf32, #tpu.memory_space<vmem>>, vector<1x8x48xf32>,
    %cst_522 = arith.constant 0.000000e+00 : f32
    %1255 = vector.broadcast %cst_522 : f32 to vector<15x32xf32>
    %c14_523 = arith.constant 14 : index
    %c0_524 = arith.constant 0 : index
    %c0_525 = arith.constant 0 : index
    %1256 = vector.load %arg13[%c14_523, %c0_524, %c0_525] : memref<17x17x32xf32, #tpu.memory_space<vmem>>, vector<1x17x32xf32>
    %1257 = vector.shape_cast %1256 : vector<1x17x32xf32> to vector<17x32xf32>
    %1258 = vector.extract_strided_slice %1257 {offsets = [0, 0], sizes = [15, 32], strides = [1, 1]} : vector<17x32xf32> to vector<15x32xf32>
    %1259 = vector.extract_strided_slice %1 {offsets = [0, 0], sizes = [1, 32], strides = [1, 1]} : vector<9x32xf32> to vector<1x32xf32>
    %1260 = vector.broadcast %1259 : vector<1x32xf32> to vector<15x32xf32>
    %1261 = arith.mulf %1258, %1260 : vector<15x32xf32>
    %1262 = arith.addf %1255, %1261 : vector<15x32xf32>
    %1263 = vector.extract_strided_slice %1257 {offsets = [1, 0], sizes = [15, 32], strides = [1, 1]} : vector<17x32xf32> to vector<15x32xf32>
    %1264 = vector.extract_strided_slice %1 {offsets = [1, 0], sizes = [1, 32], strides = [1, 1]} : vector<9x32xf32> to vector<1x32xf32>
    %1265 = vector.broadcast %1264 : vector<1x32xf32> to vector<15x32xf32>
    %1266 = arith.mulf %1263, %1265 : vector<15x32xf32>
    %1267 = arith.addf %1262, %1266 : vector<15x32xf32>
    %1268 = vector.extract_strided_slice %1257 {offsets = [2, 0], sizes = [15, 32], strides = [1, 1]} : vector<17x32xf32> to vector<15x32xf32>
    %1269 = vector.extract_strided_slice %1 {offsets = [2, 0], sizes = [1, 32], strides = [1, 1]} : vector<9x32xf32> to vector<1x32xf32>
    %1270 = vector.broadcast %1269 : vector<1x32xf32> to vector<15x32xf32>
    %1271 = arith.mulf %1268, %1270 : vector<15x32xf32>
    %1272 = arith.addf %1267, %1271 : vector<15x32xf32>
    %c15_526 = arith.constant 15 : index
    %c0_527 = arith.constant 0 : index
    %c0_528 = arith.constant 0 : index
    %1273 = vector.load %arg13[%c15_526, %c0_527, %c0_528] : memref<17x17x32xf32, #tpu.memory_space<vmem>>, vector<1x17x32xf32>
    %1274 = vector.shape_cast %1273 : vector<1x17x32xf32> to vector<17x32xf32>
    %1275 = vector.extract_strided_slice %1274 {offsets = [0, 0], sizes = [15, 32], strides = [1, 1]} : vector<17x32xf32> to vector<15x32xf32>
    %1276 = vector.extract_strided_slice %1 {offsets = [3, 0], sizes = [1, 32], strides = [1, 1]} : vector<9x32xf32> to vector<1x32xf32>
    %1277 = vector.broadcast %1276 : vector<1x32xf32> to vector<15x32xf32>
    %1278 = arith.mulf %1275, %1277 : vector<15x32xf32>
    %1279 = arith.addf %1272, %1278 : vector<15x32xf32>
    %1280 = vector.extract_strided_slice %1274 {offsets = [1, 0], sizes = [15, 32], strides = [1, 1]} : vector<17x32xf32> to vector<15x32xf32>
    %1281 = vector.extract_strided_slice %1 {offsets = [4, 0], sizes = [1, 32], strides = [1, 1]} : vector<9x32xf32> to vector<1x32xf32>
    %1282 = vector.broadcast %1281 : vector<1x32xf32> to vector<15x32xf32>
    %1283 = arith.mulf %1280, %1282 : vector<15x32xf32>
    %1284 = arith.addf %1279, %1283 : vector<15x32xf32>
    %1285 = vector.extract_strided_slice %1274 {offsets = [2, 0], sizes = [15, 32], strides = [1, 1]} : vector<17x32xf32> to vector<15x32xf32>
    %1286 = vector.extract_strided_slice %1 {offsets = [5, 0], sizes = [1, 32], strides = [1, 1]} : vector<9x32xf32> to vector<1x32xf32>
    %1287 = vector.broadcast %1286 : vector<1x32xf32> to vector<15x32xf32>
    %1288 = arith.mulf %1285, %1287 : vector<15x32xf32>
    %1289 = arith.addf %1284, %1288 : vector<15x32xf32>
    %c16_529 = arith.constant 16 : index
    %c0_530 = arith.constant 0 : index
    %c0_531 = arith.constant 0 : index
    %1290 = vector.load %arg13[%c16_529, %c0_530, %c0_531] : memref<17x17x32xf32, #tpu.memory_space<vmem>>, vector<1x17x32xf32>
    %1291 = vector.shape_cast %1290 : vector<1x17x32xf32> to vector<17x32xf32>
    %1292 = vector.extract_strided_slice %1291 {offsets = [0, 0], sizes = [15, 32], strides = [1, 1]} : vector<17x32xf32> to vector<15x32xf32>
    %1293 = vector.extract_strided_slice %1 {offsets = [6, 0], sizes = [1, 32], strides = [1, 1]} : vector<9x32xf32> to vector<1x32xf32>
    %1294 = vector.broadcast %1293 : vector<1x32xf32> to vector<15x32xf32>
    %1295 = arith.mulf %1292, %1294 : vector<15x32xf32>
    %1296 = arith.addf %1289, %1295 : vector<15x32xf32>
    %1297 = vector.extract_strided_slice %1291 {offsets = [1, 0], sizes = [15, 32], strides = [1, 1]} : vector<17x32xf32> to vector<15x32xf32>
    %1298 = vector.extract_strided_slice %1 {offsets = [7, 0], sizes = [1, 32], strides = [1, 1]} : vector<9x32xf32> to vector<1x32xf32>
    %1299 = vector.broadcast %1298 : vector<1x32xf32> to vector<15x32xf32>
    %1300 = arith.mulf %1297, %1299 : vector<15x32xf32>
    %1301 = arith.addf %1296, %1300 : vector<15x32xf32>
    %1302 = vector.extract_strided_slice %1291 {offsets = [2, 0], sizes = [15, 32], strides = [1, 1]} : vector<17x32xf32> to vector<15x32xf32>
    %1303 = vector.extract_strided_slice %1 {offsets = [8, 0], sizes = [1, 32], strides = [1, 1]} : vector<9x32xf32> to vector<1x32xf32>
    %1304 = vector.broadcast %1303 : vector<1x32xf32> to vector<15x32xf32>
    %1305 = arith.mulf %1302, %1304 : vector<15x32xf32>
    %1306 = arith.addf %1301, %1305 : vector<15x32xf32>
    %1307 = vector.broadcast %6 : vector<1x32xf32> to vector<15x32xf32>
    %1308 = arith.addf %1306, %1307 : vector<15x32xf32>
    %cst_532 = arith.constant 0.000000e+00 : f32
    %1309 = vector.broadcast %cst_532 : f32 to vector<15x32xf32>
    %1310 = arith.maximumf %1308, %1309 : vector<15x32xf32>
    %cst_533 = arith.constant dense<0.000000e+00> : vector<8x32xf32>
    %1311 = tpu.matmul %23, %1310, %cst_533 {dimension_numbers = #tpu.dot_dimension_numbers<[1], [0], [0], [1], [0, 0, 1, 1], [], []>} : vector<8x15xf32>, vector<15x32xf32>, vector<8x32xf32> -> vector<8x32xf32>
    %cst_534 = arith.constant dense<0.000000e+00> : vector<8x48xf32>
    %1312 = tpu.matmul %1311, %3, %cst_534 {dimension_numbers = #tpu.dot_dimension_numbers<[1], [0], [0], [1], [0, 0, 1, 1], [], []>} : vector<8x32xf32>, vector<32x48xf32>, vector<8x48xf32> -> vector<8x48xf32>
    %1313 = vector.broadcast %7 : vector<1x48xf32> to vector<8x48xf32>
    %1314 = arith.addf %1312, %1313 : vector<8x48xf32>
    %cst_535 = arith.constant 0.000000e+00 : f32
    %1315 = vector.broadcast %cst_535 : f32 to vector<8x48xf32>
    %1316 = arith.maximumf %1314, %1315 : vector<8x48xf32>
    %c8_536 = arith.constant 8 : index
    %c1_537 = arith.constant 1 : index
    %c0_538 = arith.constant 0 : index
    %1317 = vector.load %arg14[%c8_536, %c1_537, %c0_538] : memref<10x10x48xf32, #tpu.memory_space<vmem>>, vector<1x8x48xf32>
    %1318 = vector.shape_cast %1317 : vector<1x8x48xf32> to vector<8x48xf32>
    %1319 = vector.shape_cast %1316 : vector<8x48xf32> to vector<1x8x48xf32>
    tpu.vector_store %arg14[%c8_536, %c1_537, %c0_538], %1319 {strides = array<i32>} : memref<10x10x48xf32, #tpu.memory_space<vmem>>, vector<1x8x48xf32>,
    %cst_539 = arith.constant 0.000000e+00 : f32
    %1320 = vector.broadcast %cst_539 : f32 to vector<8x48xf32>
    %c0_540 = arith.constant 0 : index
    %c0_541 = arith.constant 0 : index
    %c0_542 = arith.constant 0 : index
    %1321 = vector.load %arg14[%c0_540, %c0_541, %c0_542] : memref<10x10x48xf32, #tpu.memory_space<vmem>>, vector<1x10x48xf32>
    %1322 = vector.shape_cast %1321 : vector<1x10x48xf32> to vector<10x48xf32>
    %1323 = vector.extract_strided_slice %1322 {offsets = [0, 0], sizes = [8, 48], strides = [1, 1]} : vector<10x48xf32> to vector<8x48xf32>
    %1324 = vector.extract_strided_slice %2 {offsets = [0, 0], sizes = [1, 48], strides = [1, 1]} : vector<9x48xf32> to vector<1x48xf32>
    %1325 = vector.broadcast %1324 : vector<1x48xf32> to vector<8x48xf32>
    %1326 = arith.mulf %1323, %1325 : vector<8x48xf32>
    %1327 = arith.addf %1320, %1326 : vector<8x48xf32>
    %1328 = vector.extract_strided_slice %1322 {offsets = [1, 0], sizes = [8, 48], strides = [1, 1]} : vector<10x48xf32> to vector<8x48xf32>
    %1329 = vector.extract_strided_slice %2 {offsets = [1, 0], sizes = [1, 48], strides = [1, 1]} : vector<9x48xf32> to vector<1x48xf32>
    %1330 = vector.broadcast %1329 : vector<1x48xf32> to vector<8x48xf32>
    %1331 = arith.mulf %1328, %1330 : vector<8x48xf32>
    %1332 = arith.addf %1327, %1331 : vector<8x48xf32>
    %1333 = vector.extract_strided_slice %1322 {offsets = [2, 0], sizes = [8, 48], strides = [1, 1]} : vector<10x48xf32> to vector<8x48xf32>
    %1334 = vector.extract_strided_slice %2 {offsets = [2, 0], sizes = [1, 48], strides = [1, 1]} : vector<9x48xf32> to vector<1x48xf32>
    %1335 = vector.broadcast %1334 : vector<1x48xf32> to vector<8x48xf32>
    %1336 = arith.mulf %1333, %1335 : vector<8x48xf32>
    %1337 = arith.addf %1332, %1336 : vector<8x48xf32>
    %c1_543 = arith.constant 1 : index
    %c0_544 = arith.constant 0 : index
    %c0_545 = arith.constant 0 : index
    %1338 = vector.load %arg14[%c1_543, %c0_544, %c0_545] : memref<10x10x48xf32, #tpu.memory_space<vmem>>, vector<1x10x48xf32>
    %1339 = vector.shape_cast %1338 : vector<1x10x48xf32> to vector<10x48xf32>
    %1340 = vector.extract_strided_slice %1339 {offsets = [0, 0], sizes = [8, 48], strides = [1, 1]} : vector<10x48xf32> to vector<8x48xf32>
    %1341 = vector.extract_strided_slice %2 {offsets = [3, 0], sizes = [1, 48], strides = [1, 1]} : vector<9x48xf32> to vector<1x48xf32>
    %1342 = vector.broadcast %1341 : vector<1x48xf32> to vector<8x48xf32>
    %1343 = arith.mulf %1340, %1342 : vector<8x48xf32>
    %1344 = arith.addf %1337, %1343 : vector<8x48xf32>
    %1345 = vector.extract_strided_slice %1339 {offsets = [1, 0], sizes = [8, 48], strides = [1, 1]} : vector<10x48xf32> to vector<8x48xf32>
    %1346 = vector.extract_strided_slice %2 {offsets = [4, 0], sizes = [1, 48], strides = [1, 1]} : vector<9x48xf32> to vector<1x48xf32>
    %1347 = vector.broadcast %1346 : vector<1x48xf32> to vector<8x48xf32>
    %1348 = arith.mulf %1345, %1347 : vector<8x48xf32>
    %1349 = arith.addf %1344, %1348 : vector<8x48xf32>
    %1350 = vector.extract_strided_slice %1339 {offsets = [2, 0], sizes = [8, 48], strides = [1, 1]} : vector<10x48xf32> to vector<8x48xf32>
    %1351 = vector.extract_strided_slice %2 {offsets = [5, 0], sizes = [1, 48], strides = [1, 1]} : vector<9x48xf32> to vector<1x48xf32>
    %1352 = vector.broadcast %1351 : vector<1x48xf32> to vector<8x48xf32>
    %1353 = arith.mulf %1350, %1352 : vector<8x48xf32>
    %1354 = arith.addf %1349, %1353 : vector<8x48xf32>
    %c2_546 = arith.constant 2 : index
    %c0_547 = arith.constant 0 : index
    %c0_548 = arith.constant 0 : index
    %1355 = vector.load %arg14[%c2_546, %c0_547, %c0_548] : memref<10x10x48xf32, #tpu.memory_space<vmem>>, vector<1x10x48xf32>
    %1356 = vector.shape_cast %1355 : vector<1x10x48xf32> to vector<10x48xf32>
    %1357 = vector.extract_strided_slice %1356 {offsets = [0, 0], sizes = [8, 48], strides = [1, 1]} : vector<10x48xf32> to vector<8x48xf32>
    %1358 = vector.extract_strided_slice %2 {offsets = [6, 0], sizes = [1, 48], strides = [1, 1]} : vector<9x48xf32> to vector<1x48xf32>
    %1359 = vector.broadcast %1358 : vector<1x48xf32> to vector<8x48xf32>
    %1360 = arith.mulf %1357, %1359 : vector<8x48xf32>
    %1361 = arith.addf %1354, %1360 : vector<8x48xf32>
    %1362 = vector.extract_strided_slice %1356 {offsets = [1, 0], sizes = [8, 48], strides = [1, 1]} : vector<10x48xf32> to vector<8x48xf32>
    %1363 = vector.extract_strided_slice %2 {offsets = [7, 0], sizes = [1, 48], strides = [1, 1]} : vector<9x48xf32> to vector<1x48xf32>
    %1364 = vector.broadcast %1363 : vector<1x48xf32> to vector<8x48xf32>
    %1365 = arith.mulf %1362, %1364 : vector<8x48xf32>
    %1366 = arith.addf %1361, %1365 : vector<8x48xf32>
    %1367 = vector.extract_strided_slice %1356 {offsets = [2, 0], sizes = [8, 48], strides = [1, 1]} : vector<10x48xf32> to vector<8x48xf32>
    %1368 = vector.extract_strided_slice %2 {offsets = [8, 0], sizes = [1, 48], strides = [1, 1]} : vector<9x48xf32> to vector<1x48xf32>
    %1369 = vector.broadcast %1368 : vector<1x48xf32> to vector<8x48xf32>
    %1370 = arith.mulf %1367, %1369 : vector<8x48xf32>
    %1371 = arith.addf %1366, %1370 : vector<8x48xf32>
    %1372 = vector.broadcast %8 : vector<1x48xf32> to vector<8x48xf32>
    %1373 = arith.addf %1371, %1372 : vector<8x48xf32>
    %cst_549 = arith.constant 0.000000e+00 : f32
    %1374 = vector.broadcast %cst_549 : f32 to vector<8x48xf32>
    %1375 = arith.maximumf %1373, %1374 : vector<8x48xf32>
    %cst_550 = arith.constant dense<0.000000e+00> : vector<4x48xf32>
    %1376 = tpu.matmul %30, %1375, %cst_550 {dimension_numbers = #tpu.dot_dimension_numbers<[1], [0], [0], [1], [0, 0, 1, 1], [], []>} : vector<4x8xf32>, vector<8x48xf32>, vector<4x48xf32> -> vector<4x48xf32>
    %cst_551 = arith.constant dense<0.000000e+00> : vector<4x64xf32>
    %1377 = tpu.matmul %1376, %4, %cst_551 {dimension_numbers = #tpu.dot_dimension_numbers<[1], [0], [0], [1], [0, 0, 1, 1], [], []>} : vector<4x48xf32>, vector<48x64xf32>, vector<4x64xf32> -> vector<4x64xf32>
    %1378 = vector.broadcast %9 : vector<1x64xf32> to vector<4x64xf32>
    %1379 = arith.addf %1377, %1378 : vector<4x64xf32>
    %cst_552 = arith.constant 0.000000e+00 : f32
    %1380 = vector.broadcast %cst_552 : f32 to vector<4x64xf32>
    %1381 = arith.maximumf %1379, %1380 : vector<4x64xf32>
    %c0_553 = arith.constant 0 : index
    %c0_554 = arith.constant 0 : index
    %c0_555 = arith.constant 0 : index
    %c0_556 = arith.constant 0 : index
    %1382 = vector.load %arg12[%c0_553, %c0_554, %c0_555, %c0_556] : memref<1x4x4x64xf32, #tpu.memory_space<vmem>>, vector<1x1x4x64xf32>
    %1383 = vector.shape_cast %1382 : vector<1x1x4x64xf32> to vector<4x64xf32>
    %1384 = vector.shape_cast %1381 : vector<4x64xf32> to vector<1x1x4x64xf32>
    tpu.vector_store %arg12[%c0_553, %c0_554, %c0_555, %c0_556], %1384 {strides = array<i32>} : memref<1x4x4x64xf32, #tpu.memory_space<vmem>>, vector<1x1x4x64xf32>,
    %cst_557 = arith.constant 0.000000e+00 : f32
    %1385 = vector.broadcast %cst_557 : f32 to vector<8x48xf32>
    %c2_558 = arith.constant 2 : index
    %c0_559 = arith.constant 0 : index
    %c0_560 = arith.constant 0 : index
    %1386 = vector.load %arg14[%c2_558, %c0_559, %c0_560] : memref<10x10x48xf32, #tpu.memory_space<vmem>>, vector<1x10x48xf32>
    %1387 = vector.shape_cast %1386 : vector<1x10x48xf32> to vector<10x48xf32>
    %1388 = vector.extract_strided_slice %1387 {offsets = [0, 0], sizes = [8, 48], strides = [1, 1]} : vector<10x48xf32> to vector<8x48xf32>
    %1389 = vector.extract_strided_slice %2 {offsets = [0, 0], sizes = [1, 48], strides = [1, 1]} : vector<9x48xf32> to vector<1x48xf32>
    %1390 = vector.broadcast %1389 : vector<1x48xf32> to vector<8x48xf32>
    %1391 = arith.mulf %1388, %1390 : vector<8x48xf32>
    %1392 = arith.addf %1385, %1391 : vector<8x48xf32>
    %1393 = vector.extract_strided_slice %1387 {offsets = [1, 0], sizes = [8, 48], strides = [1, 1]} : vector<10x48xf32> to vector<8x48xf32>
    %1394 = vector.extract_strided_slice %2 {offsets = [1, 0], sizes = [1, 48], strides = [1, 1]} : vector<9x48xf32> to vector<1x48xf32>
    %1395 = vector.broadcast %1394 : vector<1x48xf32> to vector<8x48xf32>
    %1396 = arith.mulf %1393, %1395 : vector<8x48xf32>
    %1397 = arith.addf %1392, %1396 : vector<8x48xf32>
    %1398 = vector.extract_strided_slice %1387 {offsets = [2, 0], sizes = [8, 48], strides = [1, 1]} : vector<10x48xf32> to vector<8x48xf32>
    %1399 = vector.extract_strided_slice %2 {offsets = [2, 0], sizes = [1, 48], strides = [1, 1]} : vector<9x48xf32> to vector<1x48xf32>
    %1400 = vector.broadcast %1399 : vector<1x48xf32> to vector<8x48xf32>
    %1401 = arith.mulf %1398, %1400 : vector<8x48xf32>
    %1402 = arith.addf %1397, %1401 : vector<8x48xf32>
    %c3_561 = arith.constant 3 : index
    %c0_562 = arith.constant 0 : index
    %c0_563 = arith.constant 0 : index
    %1403 = vector.load %arg14[%c3_561, %c0_562, %c0_563] : memref<10x10x48xf32, #tpu.memory_space<vmem>>, vector<1x10x48xf32>
    %1404 = vector.shape_cast %1403 : vector<1x10x48xf32> to vector<10x48xf32>
    %1405 = vector.extract_strided_slice %1404 {offsets = [0, 0], sizes = [8, 48], strides = [1, 1]} : vector<10x48xf32> to vector<8x48xf32>
    %1406 = vector.extract_strided_slice %2 {offsets = [3, 0], sizes = [1, 48], strides = [1, 1]} : vector<9x48xf32> to vector<1x48xf32>
    %1407 = vector.broadcast %1406 : vector<1x48xf32> to vector<8x48xf32>
    %1408 = arith.mulf %1405, %1407 : vector<8x48xf32>
    %1409 = arith.addf %1402, %1408 : vector<8x48xf32>
    %1410 = vector.extract_strided_slice %1404 {offsets = [1, 0], sizes = [8, 48], strides = [1, 1]} : vector<10x48xf32> to vector<8x48xf32>
    %1411 = vector.extract_strided_slice %2 {offsets = [4, 0], sizes = [1, 48], strides = [1, 1]} : vector<9x48xf32> to vector<1x48xf32>
    %1412 = vector.broadcast %1411 : vector<1x48xf32> to vector<8x48xf32>
    %1413 = arith.mulf %1410, %1412 : vector<8x48xf32>
    %1414 = arith.addf %1409, %1413 : vector<8x48xf32>
    %1415 = vector.extract_strided_slice %1404 {offsets = [2, 0], sizes = [8, 48], strides = [1, 1]} : vector<10x48xf32> to vector<8x48xf32>
    %1416 = vector.extract_strided_slice %2 {offsets = [5, 0], sizes = [1, 48], strides = [1, 1]} : vector<9x48xf32> to vector<1x48xf32>
    %1417 = vector.broadcast %1416 : vector<1x48xf32> to vector<8x48xf32>
    %1418 = arith.mulf %1415, %1417 : vector<8x48xf32>
    %1419 = arith.addf %1414, %1418 : vector<8x48xf32>
    %c4_564 = arith.constant 4 : index
    %c0_565 = arith.constant 0 : index
    %c0_566 = arith.constant 0 : index
    %1420 = vector.load %arg14[%c4_564, %c0_565, %c0_566] : memref<10x10x48xf32, #tpu.memory_space<vmem>>, vector<1x10x48xf32>
    %1421 = vector.shape_cast %1420 : vector<1x10x48xf32> to vector<10x48xf32>
    %1422 = vector.extract_strided_slice %1421 {offsets = [0, 0], sizes = [8, 48], strides = [1, 1]} : vector<10x48xf32> to vector<8x48xf32>
    %1423 = vector.extract_strided_slice %2 {offsets = [6, 0], sizes = [1, 48], strides = [1, 1]} : vector<9x48xf32> to vector<1x48xf32>
    %1424 = vector.broadcast %1423 : vector<1x48xf32> to vector<8x48xf32>
    %1425 = arith.mulf %1422, %1424 : vector<8x48xf32>
    %1426 = arith.addf %1419, %1425 : vector<8x48xf32>
    %1427 = vector.extract_strided_slice %1421 {offsets = [1, 0], sizes = [8, 48], strides = [1, 1]} : vector<10x48xf32> to vector<8x48xf32>
    %1428 = vector.extract_strided_slice %2 {offsets = [7, 0], sizes = [1, 48], strides = [1, 1]} : vector<9x48xf32> to vector<1x48xf32>
    %1429 = vector.broadcast %1428 : vector<1x48xf32> to vector<8x48xf32>
    %1430 = arith.mulf %1427, %1429 : vector<8x48xf32>
    %1431 = arith.addf %1426, %1430 : vector<8x48xf32>
    %1432 = vector.extract_strided_slice %1421 {offsets = [2, 0], sizes = [8, 48], strides = [1, 1]} : vector<10x48xf32> to vector<8x48xf32>
    %1433 = vector.extract_strided_slice %2 {offsets = [8, 0], sizes = [1, 48], strides = [1, 1]} : vector<9x48xf32> to vector<1x48xf32>
    %1434 = vector.broadcast %1433 : vector<1x48xf32> to vector<8x48xf32>
    %1435 = arith.mulf %1432, %1434 : vector<8x48xf32>
    %1436 = arith.addf %1431, %1435 : vector<8x48xf32>
    %1437 = vector.broadcast %8 : vector<1x48xf32> to vector<8x48xf32>
    %1438 = arith.addf %1436, %1437 : vector<8x48xf32>
    %cst_567 = arith.constant 0.000000e+00 : f32
    %1439 = vector.broadcast %cst_567 : f32 to vector<8x48xf32>
    %1440 = arith.maximumf %1438, %1439 : vector<8x48xf32>
    %cst_568 = arith.constant dense<0.000000e+00> : vector<4x48xf32>
    %1441 = tpu.matmul %30, %1440, %cst_568 {dimension_numbers = #tpu.dot_dimension_numbers<[1], [0], [0], [1], [0, 0, 1, 1], [], []>} : vector<4x8xf32>, vector<8x48xf32>, vector<4x48xf32> -> vector<4x48xf32>
    %cst_569 = arith.constant dense<0.000000e+00> : vector<4x64xf32>
    %1442 = tpu.matmul %1441, %4, %cst_569 {dimension_numbers = #tpu.dot_dimension_numbers<[1], [0], [0], [1], [0, 0, 1, 1], [], []>} : vector<4x48xf32>, vector<48x64xf32>, vector<4x64xf32> -> vector<4x64xf32>
    %1443 = vector.broadcast %9 : vector<1x64xf32> to vector<4x64xf32>
    %1444 = arith.addf %1442, %1443 : vector<4x64xf32>
    %cst_570 = arith.constant 0.000000e+00 : f32
    %1445 = vector.broadcast %cst_570 : f32 to vector<4x64xf32>
    %1446 = arith.maximumf %1444, %1445 : vector<4x64xf32>
    %c0_571 = arith.constant 0 : index
    %c1_572 = arith.constant 1 : index
    %c0_573 = arith.constant 0 : index
    %c0_574 = arith.constant 0 : index
    %1447 = vector.load %arg12[%c0_571, %c1_572, %c0_573, %c0_574] : memref<1x4x4x64xf32, #tpu.memory_space<vmem>>, vector<1x1x4x64xf32>
    %1448 = vector.shape_cast %1447 : vector<1x1x4x64xf32> to vector<4x64xf32>
    %1449 = vector.shape_cast %1446 : vector<4x64xf32> to vector<1x1x4x64xf32>
    tpu.vector_store %arg12[%c0_571, %c1_572, %c0_573, %c0_574], %1449 {strides = array<i32>} : memref<1x4x4x64xf32, #tpu.memory_space<vmem>>, vector<1x1x4x64xf32>,
    %cst_575 = arith.constant 0.000000e+00 : f32
    %1450 = vector.broadcast %cst_575 : f32 to vector<8x48xf32>
    %c4_576 = arith.constant 4 : index
    %c0_577 = arith.constant 0 : index
    %c0_578 = arith.constant 0 : index
    %1451 = vector.load %arg14[%c4_576, %c0_577, %c0_578] : memref<10x10x48xf32, #tpu.memory_space<vmem>>, vector<1x10x48xf32>
    %1452 = vector.shape_cast %1451 : vector<1x10x48xf32> to vector<10x48xf32>
    %1453 = vector.extract_strided_slice %1452 {offsets = [0, 0], sizes = [8, 48], strides = [1, 1]} : vector<10x48xf32> to vector<8x48xf32>
    %1454 = vector.extract_strided_slice %2 {offsets = [0, 0], sizes = [1, 48], strides = [1, 1]} : vector<9x48xf32> to vector<1x48xf32>
    %1455 = vector.broadcast %1454 : vector<1x48xf32> to vector<8x48xf32>
    %1456 = arith.mulf %1453, %1455 : vector<8x48xf32>
    %1457 = arith.addf %1450, %1456 : vector<8x48xf32>
    %1458 = vector.extract_strided_slice %1452 {offsets = [1, 0], sizes = [8, 48], strides = [1, 1]} : vector<10x48xf32> to vector<8x48xf32>
    %1459 = vector.extract_strided_slice %2 {offsets = [1, 0], sizes = [1, 48], strides = [1, 1]} : vector<9x48xf32> to vector<1x48xf32>
    %1460 = vector.broadcast %1459 : vector<1x48xf32> to vector<8x48xf32>
    %1461 = arith.mulf %1458, %1460 : vector<8x48xf32>
    %1462 = arith.addf %1457, %1461 : vector<8x48xf32>
    %1463 = vector.extract_strided_slice %1452 {offsets = [2, 0], sizes = [8, 48], strides = [1, 1]} : vector<10x48xf32> to vector<8x48xf32>
    %1464 = vector.extract_strided_slice %2 {offsets = [2, 0], sizes = [1, 48], strides = [1, 1]} : vector<9x48xf32> to vector<1x48xf32>
    %1465 = vector.broadcast %1464 : vector<1x48xf32> to vector<8x48xf32>
    %1466 = arith.mulf %1463, %1465 : vector<8x48xf32>
    %1467 = arith.addf %1462, %1466 : vector<8x48xf32>
    %c5_579 = arith.constant 5 : index
    %c0_580 = arith.constant 0 : index
    %c0_581 = arith.constant 0 : index
    %1468 = vector.load %arg14[%c5_579, %c0_580, %c0_581] : memref<10x10x48xf32, #tpu.memory_space<vmem>>, vector<1x10x48xf32>
    %1469 = vector.shape_cast %1468 : vector<1x10x48xf32> to vector<10x48xf32>
    %1470 = vector.extract_strided_slice %1469 {offsets = [0, 0], sizes = [8, 48], strides = [1, 1]} : vector<10x48xf32> to vector<8x48xf32>
    %1471 = vector.extract_strided_slice %2 {offsets = [3, 0], sizes = [1, 48], strides = [1, 1]} : vector<9x48xf32> to vector<1x48xf32>
    %1472 = vector.broadcast %1471 : vector<1x48xf32> to vector<8x48xf32>
    %1473 = arith.mulf %1470, %1472 : vector<8x48xf32>
    %1474 = arith.addf %1467, %1473 : vector<8x48xf32>
    %1475 = vector.extract_strided_slice %1469 {offsets = [1, 0], sizes = [8, 48], strides = [1, 1]} : vector<10x48xf32> to vector<8x48xf32>
    %1476 = vector.extract_strided_slice %2 {offsets = [4, 0], sizes = [1, 48], strides = [1, 1]} : vector<9x48xf32> to vector<1x48xf32>
    %1477 = vector.broadcast %1476 : vector<1x48xf32> to vector<8x48xf32>
    %1478 = arith.mulf %1475, %1477 : vector<8x48xf32>
    %1479 = arith.addf %1474, %1478 : vector<8x48xf32>
    %1480 = vector.extract_strided_slice %1469 {offsets = [2, 0], sizes = [8, 48], strides = [1, 1]} : vector<10x48xf32> to vector<8x48xf32>
    %1481 = vector.extract_strided_slice %2 {offsets = [5, 0], sizes = [1, 48], strides = [1, 1]} : vector<9x48xf32> to vector<1x48xf32>
    %1482 = vector.broadcast %1481 : vector<1x48xf32> to vector<8x48xf32>
    %1483 = arith.mulf %1480, %1482 : vector<8x48xf32>
    %1484 = arith.addf %1479, %1483 : vector<8x48xf32>
    %c6_582 = arith.constant 6 : index
    %c0_583 = arith.constant 0 : index
    %c0_584 = arith.constant 0 : index
    %1485 = vector.load %arg14[%c6_582, %c0_583, %c0_584] : memref<10x10x48xf32, #tpu.memory_space<vmem>>, vector<1x10x48xf32>
    %1486 = vector.shape_cast %1485 : vector<1x10x48xf32> to vector<10x48xf32>
    %1487 = vector.extract_strided_slice %1486 {offsets = [0, 0], sizes = [8, 48], strides = [1, 1]} : vector<10x48xf32> to vector<8x48xf32>
    %1488 = vector.extract_strided_slice %2 {offsets = [6, 0], sizes = [1, 48], strides = [1, 1]} : vector<9x48xf32> to vector<1x48xf32>
    %1489 = vector.broadcast %1488 : vector<1x48xf32> to vector<8x48xf32>
    %1490 = arith.mulf %1487, %1489 : vector<8x48xf32>
    %1491 = arith.addf %1484, %1490 : vector<8x48xf32>
    %1492 = vector.extract_strided_slice %1486 {offsets = [1, 0], sizes = [8, 48], strides = [1, 1]} : vector<10x48xf32> to vector<8x48xf32>
    %1493 = vector.extract_strided_slice %2 {offsets = [7, 0], sizes = [1, 48], strides = [1, 1]} : vector<9x48xf32> to vector<1x48xf32>
    %1494 = vector.broadcast %1493 : vector<1x48xf32> to vector<8x48xf32>
    %1495 = arith.mulf %1492, %1494 : vector<8x48xf32>
    %1496 = arith.addf %1491, %1495 : vector<8x48xf32>
    %1497 = vector.extract_strided_slice %1486 {offsets = [2, 0], sizes = [8, 48], strides = [1, 1]} : vector<10x48xf32> to vector<8x48xf32>
    %1498 = vector.extract_strided_slice %2 {offsets = [8, 0], sizes = [1, 48], strides = [1, 1]} : vector<9x48xf32> to vector<1x48xf32>
    %1499 = vector.broadcast %1498 : vector<1x48xf32> to vector<8x48xf32>
    %1500 = arith.mulf %1497, %1499 : vector<8x48xf32>
    %1501 = arith.addf %1496, %1500 : vector<8x48xf32>
    %1502 = vector.broadcast %8 : vector<1x48xf32> to vector<8x48xf32>
    %1503 = arith.addf %1501, %1502 : vector<8x48xf32>
    %cst_585 = arith.constant 0.000000e+00 : f32
    %1504 = vector.broadcast %cst_585 : f32 to vector<8x48xf32>
    %1505 = arith.maximumf %1503, %1504 : vector<8x48xf32>
    %cst_586 = arith.constant dense<0.000000e+00> : vector<4x48xf32>
    %1506 = tpu.matmul %30, %1505, %cst_586 {dimension_numbers = #tpu.dot_dimension_numbers<[1], [0], [0], [1], [0, 0, 1, 1], [], []>} : vector<4x8xf32>, vector<8x48xf32>, vector<4x48xf32> -> vector<4x48xf32>
    %cst_587 = arith.constant dense<0.000000e+00> : vector<4x64xf32>
    %1507 = tpu.matmul %1506, %4, %cst_587 {dimension_numbers = #tpu.dot_dimension_numbers<[1], [0], [0], [1], [0, 0, 1, 1], [], []>} : vector<4x48xf32>, vector<48x64xf32>, vector<4x64xf32> -> vector<4x64xf32>
    %1508 = vector.broadcast %9 : vector<1x64xf32> to vector<4x64xf32>
    %1509 = arith.addf %1507, %1508 : vector<4x64xf32>
    %cst_588 = arith.constant 0.000000e+00 : f32
    %1510 = vector.broadcast %cst_588 : f32 to vector<4x64xf32>
    %1511 = arith.maximumf %1509, %1510 : vector<4x64xf32>
    %c0_589 = arith.constant 0 : index
    %c2_590 = arith.constant 2 : index
    %c0_591 = arith.constant 0 : index
    %c0_592 = arith.constant 0 : index
    %1512 = vector.load %arg12[%c0_589, %c2_590, %c0_591, %c0_592] : memref<1x4x4x64xf32, #tpu.memory_space<vmem>>, vector<1x1x4x64xf32>
    %1513 = vector.shape_cast %1512 : vector<1x1x4x64xf32> to vector<4x64xf32>
    %1514 = vector.shape_cast %1511 : vector<4x64xf32> to vector<1x1x4x64xf32>
    tpu.vector_store %arg12[%c0_589, %c2_590, %c0_591, %c0_592], %1514 {strides = array<i32>} : memref<1x4x4x64xf32, #tpu.memory_space<vmem>>, vector<1x1x4x64xf32>,
    %cst_593 = arith.constant 0.000000e+00 : f32
    %1515 = vector.broadcast %cst_593 : f32 to vector<8x48xf32>
    %c6_594 = arith.constant 6 : index
    %c0_595 = arith.constant 0 : index
    %c0_596 = arith.constant 0 : index
    %1516 = vector.load %arg14[%c6_594, %c0_595, %c0_596] : memref<10x10x48xf32, #tpu.memory_space<vmem>>, vector<1x10x48xf32>
    %1517 = vector.shape_cast %1516 : vector<1x10x48xf32> to vector<10x48xf32>
    %1518 = vector.extract_strided_slice %1517 {offsets = [0, 0], sizes = [8, 48], strides = [1, 1]} : vector<10x48xf32> to vector<8x48xf32>
    %1519 = vector.extract_strided_slice %2 {offsets = [0, 0], sizes = [1, 48], strides = [1, 1]} : vector<9x48xf32> to vector<1x48xf32>
    %1520 = vector.broadcast %1519 : vector<1x48xf32> to vector<8x48xf32>
    %1521 = arith.mulf %1518, %1520 : vector<8x48xf32>
    %1522 = arith.addf %1515, %1521 : vector<8x48xf32>
    %1523 = vector.extract_strided_slice %1517 {offsets = [1, 0], sizes = [8, 48], strides = [1, 1]} : vector<10x48xf32> to vector<8x48xf32>
    %1524 = vector.extract_strided_slice %2 {offsets = [1, 0], sizes = [1, 48], strides = [1, 1]} : vector<9x48xf32> to vector<1x48xf32>
    %1525 = vector.broadcast %1524 : vector<1x48xf32> to vector<8x48xf32>
    %1526 = arith.mulf %1523, %1525 : vector<8x48xf32>
    %1527 = arith.addf %1522, %1526 : vector<8x48xf32>
    %1528 = vector.extract_strided_slice %1517 {offsets = [2, 0], sizes = [8, 48], strides = [1, 1]} : vector<10x48xf32> to vector<8x48xf32>
    %1529 = vector.extract_strided_slice %2 {offsets = [2, 0], sizes = [1, 48], strides = [1, 1]} : vector<9x48xf32> to vector<1x48xf32>
    %1530 = vector.broadcast %1529 : vector<1x48xf32> to vector<8x48xf32>
    %1531 = arith.mulf %1528, %1530 : vector<8x48xf32>
    %1532 = arith.addf %1527, %1531 : vector<8x48xf32>
    %c7_597 = arith.constant 7 : index
    %c0_598 = arith.constant 0 : index
    %c0_599 = arith.constant 0 : index
    %1533 = vector.load %arg14[%c7_597, %c0_598, %c0_599] : memref<10x10x48xf32, #tpu.memory_space<vmem>>, vector<1x10x48xf32>
    %1534 = vector.shape_cast %1533 : vector<1x10x48xf32> to vector<10x48xf32>
    %1535 = vector.extract_strided_slice %1534 {offsets = [0, 0], sizes = [8, 48], strides = [1, 1]} : vector<10x48xf32> to vector<8x48xf32>
    %1536 = vector.extract_strided_slice %2 {offsets = [3, 0], sizes = [1, 48], strides = [1, 1]} : vector<9x48xf32> to vector<1x48xf32>
    %1537 = vector.broadcast %1536 : vector<1x48xf32> to vector<8x48xf32>
    %1538 = arith.mulf %1535, %1537 : vector<8x48xf32>
    %1539 = arith.addf %1532, %1538 : vector<8x48xf32>
    %1540 = vector.extract_strided_slice %1534 {offsets = [1, 0], sizes = [8, 48], strides = [1, 1]} : vector<10x48xf32> to vector<8x48xf32>
    %1541 = vector.extract_strided_slice %2 {offsets = [4, 0], sizes = [1, 48], strides = [1, 1]} : vector<9x48xf32> to vector<1x48xf32>
    %1542 = vector.broadcast %1541 : vector<1x48xf32> to vector<8x48xf32>
    %1543 = arith.mulf %1540, %1542 : vector<8x48xf32>
    %1544 = arith.addf %1539, %1543 : vector<8x48xf32>
    %1545 = vector.extract_strided_slice %1534 {offsets = [2, 0], sizes = [8, 48], strides = [1, 1]} : vector<10x48xf32> to vector<8x48xf32>
    %1546 = vector.extract_strided_slice %2 {offsets = [5, 0], sizes = [1, 48], strides = [1, 1]} : vector<9x48xf32> to vector<1x48xf32>
    %1547 = vector.broadcast %1546 : vector<1x48xf32> to vector<8x48xf32>
    %1548 = arith.mulf %1545, %1547 : vector<8x48xf32>
    %1549 = arith.addf %1544, %1548 : vector<8x48xf32>
    %c8_600 = arith.constant 8 : index
    %c0_601 = arith.constant 0 : index
    %c0_602 = arith.constant 0 : index
    %1550 = vector.load %arg14[%c8_600, %c0_601, %c0_602] : memref<10x10x48xf32, #tpu.memory_space<vmem>>, vector<1x10x48xf32>
    %1551 = vector.shape_cast %1550 : vector<1x10x48xf32> to vector<10x48xf32>
    %1552 = vector.extract_strided_slice %1551 {offsets = [0, 0], sizes = [8, 48], strides = [1, 1]} : vector<10x48xf32> to vector<8x48xf32>
    %1553 = vector.extract_strided_slice %2 {offsets = [6, 0], sizes = [1, 48], strides = [1, 1]} : vector<9x48xf32> to vector<1x48xf32>
    %1554 = vector.broadcast %1553 : vector<1x48xf32> to vector<8x48xf32>
    %1555 = arith.mulf %1552, %1554 : vector<8x48xf32>
    %1556 = arith.addf %1549, %1555 : vector<8x48xf32>
    %1557 = vector.extract_strided_slice %1551 {offsets = [1, 0], sizes = [8, 48], strides = [1, 1]} : vector<10x48xf32> to vector<8x48xf32>
    %1558 = vector.extract_strided_slice %2 {offsets = [7, 0], sizes = [1, 48], strides = [1, 1]} : vector<9x48xf32> to vector<1x48xf32>
    %1559 = vector.broadcast %1558 : vector<1x48xf32> to vector<8x48xf32>
    %1560 = arith.mulf %1557, %1559 : vector<8x48xf32>
    %1561 = arith.addf %1556, %1560 : vector<8x48xf32>
    %1562 = vector.extract_strided_slice %1551 {offsets = [2, 0], sizes = [8, 48], strides = [1, 1]} : vector<10x48xf32> to vector<8x48xf32>
    %1563 = vector.extract_strided_slice %2 {offsets = [8, 0], sizes = [1, 48], strides = [1, 1]} : vector<9x48xf32> to vector<1x48xf32>
    %1564 = vector.broadcast %1563 : vector<1x48xf32> to vector<8x48xf32>
    %1565 = arith.mulf %1562, %1564 : vector<8x48xf32>
    %1566 = arith.addf %1561, %1565 : vector<8x48xf32>
    %1567 = vector.broadcast %8 : vector<1x48xf32> to vector<8x48xf32>
    %1568 = arith.addf %1566, %1567 : vector<8x48xf32>
    %cst_603 = arith.constant 0.000000e+00 : f32
    %1569 = vector.broadcast %cst_603 : f32 to vector<8x48xf32>
    %1570 = arith.maximumf %1568, %1569 : vector<8x48xf32>
    %cst_604 = arith.constant dense<0.000000e+00> : vector<4x48xf32>
    %1571 = tpu.matmul %30, %1570, %cst_604 {dimension_numbers = #tpu.dot_dimension_numbers<[1], [0], [0], [1], [0, 0, 1, 1], [], []>} : vector<4x8xf32>, vector<8x48xf32>, vector<4x48xf32> -> vector<4x48xf32>
    %cst_605 = arith.constant dense<0.000000e+00> : vector<4x64xf32>
    %1572 = tpu.matmul %1571, %4, %cst_605 {dimension_numbers = #tpu.dot_dimension_numbers<[1], [0], [0], [1], [0, 0, 1, 1], [], []>} : vector<4x48xf32>, vector<48x64xf32>, vector<4x64xf32> -> vector<4x64xf32>
    %1573 = vector.broadcast %9 : vector<1x64xf32> to vector<4x64xf32>
    %1574 = arith.addf %1572, %1573 : vector<4x64xf32>
    %cst_606 = arith.constant 0.000000e+00 : f32
    %1575 = vector.broadcast %cst_606 : f32 to vector<4x64xf32>
    %1576 = arith.maximumf %1574, %1575 : vector<4x64xf32>
    %c0_607 = arith.constant 0 : index
    %c3_608 = arith.constant 3 : index
    %c0_609 = arith.constant 0 : index
    %c0_610 = arith.constant 0 : index
    %1577 = vector.load %arg12[%c0_607, %c3_608, %c0_609, %c0_610] : memref<1x4x4x64xf32, #tpu.memory_space<vmem>>, vector<1x1x4x64xf32>
    %1578 = vector.shape_cast %1577 : vector<1x1x4x64xf32> to vector<4x64xf32>
    %1579 = vector.shape_cast %1576 : vector<4x64xf32> to vector<1x1x4x64xf32>
    tpu.vector_store %arg12[%c0_607, %c3_608, %c0_609, %c0_610], %1579 {strides = array<i32>} : memref<1x4x4x64xf32, #tpu.memory_space<vmem>>, vector<1x1x4x64xf32>,
    return
  }
  func.func @transform_0(%arg0: i32) -> (i32, i32, i32, i32) {
    %c0_i32 = arith.constant 0 : i32
    %c0_i32_0 = arith.constant 0 : i32
    %c0_i32_1 = arith.constant 0 : i32
    %c0_i32_2 = arith.constant 0 : i32
    return %arg0, %c0_i32, %c0_i32_0, %c0_i32_1 : i32, i32, i32, i32
  }
  func.func @transform_1(%arg0: i32) -> (i32, i32) {
    %c0_i32 = arith.constant 0 : i32
    %c0_i32_0 = arith.constant 0 : i32
    %c0_i32_1 = arith.constant 0 : i32
    return %c0_i32, %c0_i32_0 : i32, i32
  }
  func.func @transform_2(%arg0: i32) -> (i32, i32) {
    %c0_i32 = arith.constant 0 : i32
    %c0_i32_0 = arith.constant 0 : i32
    %c0_i32_1 = arith.constant 0 : i32
    return %c0_i32, %c0_i32_0 : i32, i32
  }
  func.func @transform_3(%arg0: i32) -> (i32, i32) {
    %c0_i32 = arith.constant 0 : i32
    %c0_i32_0 = arith.constant 0 : i32
    %c0_i32_1 = arith.constant 0 : i32
    return %c0_i32, %c0_i32_0 : i32, i32
  }
  func.func @transform_4(%arg0: i32) -> (i32, i32) {
    %c0_i32 = arith.constant 0 : i32
    %c0_i32_0 = arith.constant 0 : i32
    %c0_i32_1 = arith.constant 0 : i32
    return %c0_i32, %c0_i32_0 : i32, i32
  }
  func.func @transform_5(%arg0: i32) -> (i32, i32) {
    %c0_i32 = arith.constant 0 : i32
    %c0_i32_0 = arith.constant 0 : i32
    %c0_i32_1 = arith.constant 0 : i32
    return %c0_i32, %c0_i32_0 : i32, i32
  }
  func.func @transform_6(%arg0: i32) -> (i32, i32) {
    %c0_i32 = arith.constant 0 : i32
    %c0_i32_0 = arith.constant 0 : i32
    %c0_i32_1 = arith.constant 0 : i32
    return %c0_i32, %c0_i32_0 : i32, i32
  }
  func.func @transform_7(%arg0: i32) -> (i32, i32) {
    %c0_i32 = arith.constant 0 : i32
    %c0_i32_0 = arith.constant 0 : i32
    %c0_i32_1 = arith.constant 0 : i32
    return %c0_i32, %c0_i32_0 : i32, i32
  }
  func.func @transform_8(%arg0: i32) -> (i32, i32) {
    %c0_i32 = arith.constant 0 : i32
    %c0_i32_0 = arith.constant 0 : i32
    %c0_i32_1 = arith.constant 0 : i32
    return %c0_i32, %c0_i32_0 : i32, i32
  }
  func.func @transform_9(%arg0: i32) -> (i32, i32) {
    %c0_i32 = arith.constant 0 : i32
    %c0_i32_0 = arith.constant 0 : i32
    %c0_i32_1 = arith.constant 0 : i32
    return %c0_i32, %c0_i32_0 : i32, i32
  }
  func.func @transform_10(%arg0: i32) -> (i32, i32) {
    %c0_i32 = arith.constant 0 : i32
    %c0_i32_0 = arith.constant 0 : i32
    %c0_i32_1 = arith.constant 0 : i32
    return %c0_i32, %c0_i32_0 : i32, i32
  }
  func.func @transform_11(%arg0: i32) -> (i32, i32, i32, i32) {
    %c0_i32 = arith.constant 0 : i32
    %c0_i32_0 = arith.constant 0 : i32
    %c0_i32_1 = arith.constant 0 : i32
    %c0_i32_2 = arith.constant 0 : i32
    return %arg0, %c0_i32, %c0_i32_0, %c0_i32_1 : i32, i32, i32, i32
  }
}

</mosaic_0001>

<bundles_post_ra>
// kernel: learning_to_downsample.1
= control target key start
LH: loop header
LB: loop body
LE: loop exit
PB: predicated region body
PF: predicated region fallthrough
CT: control target
= control target key end

     0   :  { %s26374_s0 = inlined_call_operand.vmem [shape: f32[2,32,32,3], index: 0, kind: input, shape index: {}]   ;;  %s26375_s1 = inlined_call_operand.vmem [shape: f32[27,32], index: 1, kind: input, shape index: {}]   ;;  %s26376_s2 = inlined_call_operand.vmem [shape: f32[1,32], index: 2, kind: input, shape index: {}]   ;;  %s26377_s3 = inlined_call_operand.vmem [shape: f32[9,32], index: 3, kind: input, shape index: {}]   ;;  %s26378_s4 = inlined_call_operand.vmem [shape: f32[1,32], index: 4, kind: input, shape index: {}]   ;;  %s26379_s5 = inlined_call_operand.vmem [shape: f32[32,48], index: 5, kind: input, shape index: {}]   ;;  %s26380_s6 = inlined_call_operand.vmem [shape: f32[1,48], index: 6, kind: input, shape index: {}]   ;;  %s26381_s7 = inlined_call_operand.vmem [shape: f32[9,48], index: 7, kind: input, shape index: {}]   ;;  %s26382_s8 = inlined_call_operand.vmem [shape: f32[1,48], index: 8, kind: input, shape index: {}]   ;;  %s26383_s9 = inlined_call_operand.vmem [shape: f32[48,64], index: 9, kind: input, shape index: {}]   ;;  %s26384_s10 = inlined_call_operand.vmem [shape: f32[1,64], index: 10, kind: input, shape index: {}]   ;;  %s26385_s11 = inlined_call_operand.hbm [shape: f32[2,4,4,64], index: 11, kind: output, shape index: {}]  }
   0x1   :  { %26396 = sst [smem:[#allocation7_spill]] %s26374_s0 }
   0x2   :  { %16 = vsyncpa [#allocation5], 0 }
   0x3   :  { %18 = vsyncpa [#allocation5 + $0x1], 0  ;;  %s23067_s17 = smov 0   ;;  %s23069_s18 = smov 0  }
   0x4   :  { %s23071_s19 = smov 0   ;;  %s23073_s20 = smov 0  }
   0x5 LB: > { %s23088_s21 = sadd.s32 4294967295, %s22998_s20   ;;  %s18840_s22 = sadd.s32 4294967294, %s22998_s20   ;;  %s22998_s20 = sphi %s23073_s20, %s26416_s20   ;;  %s22994_s19 = sphi %s23071_s19, %s26415_s19   ;;  %s22990_s18 = sphi %s23069_s18, %s26414_s18   ;;  %s22986_s17 = sphi %s23067_s17, %s26413_s17  }
   0x6   : > { %s23092_s23 = sadd.s32 1, %s22998_s20   ;;  %s267_s24 = sadd.s32 1, %s22994_s19 }
   0x7   : > { %s264_s25 = ssub.s32 %s22998_s20, %s23092_s23  ;;  %p277_p0 = scmp.ne.s32.totalorder %s22994_s19, %s22990_s18 }
   0x8   : > { %p265_p1 = scmp.eq.s32.totalorder %s264_s25, 0  ;;  %p278_p2 = scmp.eq.s32.totalorder %s23088_s21, 1 }
   0x9   : > { %p283_p3 = scmp.ne.s32.totalorder %s22990_s18, %s22986_s17  ;;  %p284_p4 = scmp.eq.s32.totalorder %s18840_s22, 1 }
   0xa   : > { %s23103_s26 = scalar_select %p265_p1, %s22994_s19, %s267_s24  }
   0xb   : > { %p23105_p5 = por %p278_p2, %p277_p0  ;;  %p23109_p6 = por %p284_p4, %p283_p3 }
   0xc   : > { %p18843_p7 = scmp.ge.s32.totalorder %s22998_s20, 1  ;;  %p340_p8 = scmp.lt.s32.totalorder %s22998_s20, 3 }
   0xe   : > { %p341_p9 = pnand %p18843_p7, %p340_p8 }
   0xf   : > { %v23118_v0 = vld [vmem:[%s26375_s1] sm:$0xff] (!%p341_p9)  ;;  %vm523_vm0 = vcmask (!%p341_p9), 1042432   ;;  %p380_p10 = scmp.lt.s32.totalorder (!%p341_p9), %s23088_s21, 1  ;;  %v386_v2 = vld [vmem:[%s26375_s1 + $0x8] sm:$0xff] (!%p341_p9)  ;;  %s26399_s0 = sld [smem:[#allocation7_spill]] (!%p341_p9)  ;;  %vm504_vm1 = vcmask (!%p341_p9), 1046528  }
  0x10   : > { %344 = sbr.rel (%p341_p9) target bundleno = 6592 (0x19c0), region = 64  ;;  %v23122_v1 = vrot.slane (!%p341_p9), %v23118_v0, 3  ;;  %vm514_vm2 = vcmask (!%p341_p9), 23552   ;;  %v716_v6 = vrot.slane (!%p341_p9), %v23118_v0, 6  ;;  %v717_v7 = vrot.slane (!%p341_p9), %v386_v2, 6  ;;  %v387_v26 = vld [vmem:[%s26375_s1 + $0x10] sm:$0xff] (!%p341_p9) }
  0x11   : > { %vm715_vm3 = vcmask (!%p341_p9), 1041408   ;;  %v23158_v17 = vrot.slane (!%p341_p9), %v386_v2, 1  ;;  %vm706_vm4 = vcmask (!%p341_p9), 1045504   ;;  %v23170_v24 = vrot.slane (!%p341_p9), %v386_v2, 4  ;;  %v23239_v55 = vld [vmem:[%s26375_s1 + $0x18] sm:$0x7] (!%p341_p9) }
  0x12   : > { %20659 = vmatprep.subr.msk.mxu0 (!%p341_p9), %vm523_vm0, %v23122_v1  ;;  %v23148_v16 = vsel (!%p341_p9), %vm715_vm3, %v716_v6, %v717_v7  ;;  %v1043_v28 = vrot.slane (!%p341_p9), %v386_v2, 7  ;;  %v1044_v29 = vrot.slane (!%p341_p9), %v387_v26, 7  ;;  %vm1042_vm5 = vcmask (!%p341_p9), 1040384   ;;  %s19793_s25 = sshll.u32 (!%p341_p9), %s23088_s21, 8 }
  0x13   : > { %20660 = vmatpush3.msk.msra.mxu0 (!%p341_p9), %vm523_vm0, %v23122_v1  ;;  %v23200_v41 = vrot.slane (!%p341_p9), %v387_v26, 2  ;;  %v23213_v48 = vrot.slane (!%p341_p9), %v387_v26, 5  ;;  %v408_v7 = vlaneseq (!%p341_p9)  ;;  %vm1474_vm7 = vcmask (!%p341_p9), 244736   ;;  %s26328_s30 = scalar_lea.hbm (!%p341_p9), %s26385_s11, %s19793_s25 }
  0x14   : > { %20667 = vmatprep.subr.msk.mxu0 (!%p341_p9), %vm523_vm0, %v23118_v0  ;;  %v23187_v34 = vsel (!%p341_p9), %vm1042_vm5, %v1043_v28, %v1044_v29  ;;  %vm421_vm8 = vcmask (!%p341_p9), 261120   ;;  %vm23001_vm9 = vmmov (!%p341_p9), 1   ;;  %vm424_vm12 = vcmask (!%p341_p9), 253952  }
  0x15   : > { %vm23383_vm10 = vmpackc.low (!%p341_p9), %vm706_vm4, %vm23001_vm9  ;;  %vm1563_vm13 = vcmask (!%p341_p9), 260096   ;;  %vm23003_vm14 = vmmov (!%p341_p9), 0   ;;  %vm476_vm3 = vcmask (!%p341_p9), 386048   ;;  %vm17967_vm5 = vcmask (!%p341_p9), 64512  }
  0x16   : > { %vm25858_vm15 = vmpackc.low (!%p341_p9), %vm504_vm1, %vm23001_vm9 }
  0x17   : > { %s381_s12 = scalar_select %p380_p10, %s23088_s21, 1 }
  0x18   : > { %s23004_s21 = smov [#allocation4]  }
  0x19   : > { %s19792_s15 = sshll.u32 %s381_s12, 10  ;;  %s377_s12 = sand.u32 1, %s22990_s18  }
  0x1a   : > { %s23135_s24 = scalar_lea.vmem %s26399_s0, %s19792_s15  ;;  %s18844_s15 = sshll.u32 %s377_s12, 4 }
  0x1b   : > { %v496_v3 = vld [vmem:[%s23135_s24] sm:$0xff]  ;;  %v497_v4 = vld [vmem:[%s23135_s24 + $0x8] sm:$0xff]  ;;  %v498_v5 = vld [vmem:[%s23135_s24 + $0x10] sm:$0xff]  ;;  %s379_s16 = scalar_lea.vmem [#allocation4], %s18844_s15  ;;  %s26333_s13 = scalar_lea.sflag [#allocation5], %s377_s12 }
  0x1c   : > { %v505_v8 = vrot.slane %v496_v3, 1  ;;  %v506_v9 = vrot.slane %v497_v4, 1  ;;  %v508_v10 = vrot.slane %v498_v5, 1  ;;  %v499_v11 = vld [vmem:[%s23135_s24 + $0x18] sm:$0xff]  ;;  %v707_v18 = vrot.slane %v496_v3, 2  ;;  %v18864_v27 = vld [vmem:[%s23135_s24 + $0x20] sm:$0xff] }
  0x1d   : > { %v510_v12 = vrot.slane %v499_v11, 1  ;;  %v708_v19 = vrot.slane %v497_v4, 2  ;;  %v710_v20 = vrot.slane %v498_v5, 2  ;;  %v712_v22 = vrot.slane %v499_v11, 2  ;;  %v18865_v30 = vld [vmem:[%s23135_s24 + $0x28] sm:$0xff]  ;;  %v18866_v32 = vld [vmem:[%s23135_s24 + $0x30] sm:$0xff] }
  0x1e   : > { %v507_v13 = vsel %vm504_vm1, %v505_v8, %v506_v9  ;;  %v509_v14 = vsel %vm504_vm1, %v506_v9, %v508_v10  ;;  %v927_v31 = vrot.slane %v18864_v27, 1  ;;  %v928_v33 = vrot.slane %v18865_v30, 1  ;;  %v18867_v36 = vld [vmem:[%s23135_s24 + $0x38] sm:$0xff]  ;;  %v23221_v50 = vld [vmem:[%s23135_s24 + $0x40] sm:$0xff]  ;;  %v23229_v51 = vld [vmem:[%s23135_s24 + $0x48] sm:$0xff]  ;;  %s18778_s22 = sshll.u32 %s379_s16, 4  ;;  %s26323_s22 = int_to_ptr.vmem [resolvable:$true] %s18778_s22 }
  0x1f   : > { %20661 = vmatprep.mubr.msk.f32.mxu0 %vm514_vm2, %v507_v13  ;;  %v511_v15 = vsel %vm504_vm1, %v508_v10, %v510_v12  ;;  %v709_v21 = vsel %vm706_vm4, %v707_v18, %v708_v19  ;;  %v711_v23 = vsel %vm706_vm4, %v708_v19, %v710_v20  ;;  %v713_v25 = vsel %vm706_vm4, %v710_v20, %v712_v22  ;;  %v23233_v53 = vld [vmem:[%s23135_s24 + $0x50] sm:$0xff]  ;;  %v23249_v57 = vld [vmem:[%s23135_s24 + $0x58] sm:$0xff]  ;;  %v18925_v26 = vld [vmem:[%s23135_s24 + $0x60] sm:$0xff]  ;;  %s22936_s14 = scalar_lea.vmem %s26323_s22, 256  ;;  %s22940_s15 = sshll.u32 %s23004_s21, 4  ;;  %s22941_s15 = int_to_ptr.vmem [resolvable:$false] %s22940_s15 }
  0x20   : > { %20662 = vmatmul.mubr.msk.f32.vlgmr.msra.gmra.mrb[0].mxu0 %vm514_vm2, %v509_v14  ;;  %v930_v35 = vrot.slane %v18866_v32, 1  ;;  %v932_v37 = vrot.slane %v18867_v36, 1  ;;  %v929_v38 = vsel %vm504_vm1, %v927_v31, %v928_v33  ;;  %v1034_v40 = vrot.slane %v18864_v27, 2  ;;  %v18927_v29 = vld [vmem:[%s23135_s24 + $0x70] sm:$0xff]  ;;  %p22937_p11 = scmp.ne.s32.totalorder %s26323_s22, %s22936_s14  ;;  %s22942_s0 = scalar_lea.vmem %s22941_s15, 512 }
  0x21   : > { %20664 = vmatprep.mubr.msk.f32.mxu0 %vm514_vm2, %v511_v15  ;;  %20668 = vmatpush3.msk.msra.mxu0 %vm523_vm0, %v23118_v0  ;;  %v1035_v43 = vrot.slane %v18865_v30, 2  ;;  %v1037_v44 = vrot.slane %v18866_v32, 2  ;;  %v1039_v45 = vrot.slane %v18867_v36, 2  ;;  %v1254_v52 = vrot.slane %v23221_v50, 1  ;;  %p22943_p0 = scmp.lt.s32.totalorder %s26323_s22, %s22941_s15  ;;  %p22944_p1 = scmp.lt.s32.totalorder %s22942_s0, %s22936_s14 }
  0x22   : > { %20675 = vmatprep.subr.msk.mxu0 %vm523_vm0, %v23148_v16  ;;  %v931_v39 = vsel %vm504_vm1, %v928_v33, %v930_v35  ;;  %v933_v42 = vsel %vm504_vm1, %v930_v35, %v932_v37  ;;  %v1255_v54 = vrot.slane %v23229_v51, 1  ;;  %v1257_v56 = vrot.slane %v23233_v53, 1  ;;  %p22938_p12 = pnand %p22937_p11, %p23105_p5 }
  0x23   : > { %v1036_v46 = vsel %vm706_vm4, %v1034_v40, %v1035_v43  ;;  %v1038_v47 = vsel %vm706_vm4, %v1035_v43, %v1037_v44  ;;  %v1040_v49 = vsel %vm706_vm4, %v1037_v44, %v1039_v45  ;;  %v23252_v58 = vrot.slane %v23249_v57, 1  ;;  %p22945_p2 = por %p22944_p1, %p22943_p0 }
  0x24   : > { %20665 = vmatmul.mubr.msk.f32.gmra.mrb[2].mxu0 %vm514_vm2, %v510_v12  ;;  %v23255_v59 = vsel %vm504_vm1, %v1254_v52, %v1255_v54  ;;  %v23264_v60 = vsel %vm504_vm1, %v1255_v54, %v1257_v56  ;;  %v1361_v61 = vrot.slane %v23221_v50, 2  ;;  %v1362_v63 = vrot.slane %v23229_v51, 2  ;;  %p22939_p13 = pneg %p22938_p12 }
  0x25   : > { %20669 = vmatprep.mubr.msk.f32.mxu0 %vm514_vm2, %v496_v3  ;;  %v23269_v62 = vsel %vm504_vm1, %v1257_v56, %v23252_v58  ;;  %v1364_v2 = vrot.slane %v23233_v53, 2  ;;  %v23280_v3 = vrot.slane %v23249_v57, 2  ;;  %v23302_v8 = vshrl.u32 %v408_v7, 7 }
  0x26   : > { %v412_v9 = vand.u32 127, %v408_v7  ;;  %v1976_v28 = vrot.slane %v18925_v26, 1  ;;  %v1979_v31 = vrot.slane %v18927_v29, 1  ;;  %v2083_v40 = vrot.slane %v18927_v29, 2  ;;  %p22946_p3 = pnand %p22945_p2, %p22939_p13 }
  0x27   : > { %v23294_v6 = vsel %vm706_vm4, %v1364_v2, %v23280_v3  ;;  %v413_v10 = vmul.u32 2, %v23302_v8  ;;  %v410_v13 = vadd.s32 8, %v23302_v8 }
  0x28   : > { %20670 = vmatmul.mubr.msk.f32.vlgmr.msra.gmra.mrb[0].mxu0 %vm514_vm2, %v497_v4  ;;  %v23283_v4 = vsel %vm706_vm4, %v1361_v61, %v1362_v63 }
  0x29   : > { %20672 = vmatprep.mubr.msk.f32.mxu0 %vm514_vm2, %v498_v5  ;;  %20676 = vmatpush3.msk.msra.mxu0 %vm523_vm0, %v23148_v16  ;;  %v23290_v5 = vsel %vm706_vm4, %v1362_v63, %v1364_v2  ;;  %vm415_vm6 = vcmp.eq.s32.totalorder %v412_v9, %v413_v10  ;;  %v414_v19 = vmul.u32 2, %v410_v13 }
  0x2a   : > { %20683 = vmatprep.subr.msk.mxu0 %vm523_vm0, %v23158_v17 }
  0x2b   : > { %vm416_vm11 = vcmp.eq.s32.totalorder %v412_v9, %v414_v19 }
  0x2c   : > { %20673 = vmatmul.mubr.msk.f32.gmra.mrb[2].mxu0 %vm514_vm2, %v499_v11  ;;  %v26394_v11 = vmov 0.0  }
  0x2d   : > { %20677 = vmatprep.mubr.msk.f32.mxu0 %vm514_vm2, %v709_v21  ;;  %v23306_v12 = vsel %vm415_vm6, 1.0, %v26394_v11  ;;  %427 = vst.msk [vmem:[#allocation2 + $0x20] sm:$0xff] %vm421_vm8, %v26394_v11  ;;  %422 = vst.msk [vmem:[#allocation2] sm:$0xff] %vm421_vm8, %v26394_v11 }
  0x2e   : > { %20739 = vmatprep.mubr.msk.f32.mxu1 %vm1474_vm7, %v23306_v12  ;;  %423 = vst.msk [vmem:[#allocation2 + $0x8] sm:$0xff] %vm421_vm8, %v26394_v11  ;;  %426 = vst.msk [vmem:[#allocation2 + $0x18] sm:$0xff] %vm421_vm8, %v26394_v11 }
  0x2f   : > { %429 = vst.msk [vmem:[#allocation2 + $0x30] sm:$0xff] %vm421_vm8, %v26394_v11  ;;  %430 = vst.msk [vmem:[#allocation2 + $0x38] sm:$0xff] %vm421_vm8, %v26394_v11 }
  0x30   : > { %20678 = vmatmul.mubr.msk.f32.vlgmr.msra.gmra.mrb[0].mxu0 %vm514_vm2, %v711_v23  ;;  %432 = vst.msk [vmem:[#allocation2 + $0x48] sm:$0xff] %vm421_vm8, %v26394_v11  ;;  %433 = vst.msk [vmem:[#allocation2 + $0x50] sm:$0xff] %vm421_vm8, %v26394_v11 }
  0x31   : > { %20680 = vmatprep.mubr.msk.f32.mxu0 %vm514_vm2, %v713_v25  ;;  %20684 = vmatpush3.msk.msra.mxu0 %vm523_vm0, %v23158_v17  ;;  %435 = vst.msk [vmem:[#allocation2 + $0x60] sm:$0xff] %vm421_vm8, %v26394_v11  ;;  %436 = vst.msk [vmem:[#allocation2 + $0x68] sm:$0xff] %vm421_vm8, %v26394_v11  ;;  %v23392_v25 = vsel %vm416_vm11, 1.0, %v26394_v11 }
  0x32   : > { %20691 = vmatprep.subr.msk.mxu0 %vm523_vm0, %v23170_v24  ;;  %438 = vst.msk [vmem:[#allocation2 + $0x78] sm:$0xff] %vm421_vm8, %v26394_v11  ;;  %439 = vst.msk [vmem:[#allocation2 + $0x80] sm:$0xff] %vm421_vm8, %v26394_v11 }
  0x33   : > { %441 = vst.msk [vmem:[#allocation2 + $0x90] sm:$0xff] %vm421_vm8, %v26394_v11  ;;  %442 = vst.msk [vmem:[#allocation2 + $0x98] sm:$0xff] %vm421_vm8, %v26394_v11 }
  0x34   : > { %20681 = vmatmul.mubr.msk.f32.gmra.mrb[2].mxu0 %vm514_vm2, %v712_v22  ;;  %444 = vst.msk [vmem:[#allocation2 + $0xa8] sm:$0xff] %vm421_vm8, %v26394_v11  ;;  %445 = vst.msk [vmem:[#allocation2 + $0xb0] sm:$0xff] %vm421_vm8, %v26394_v11  ;;  %v395_v22 = vld [vmem:[%s26379_s5 + $0x10] sm:$0xff] }
  0x35   : > { %20685 = vmatprep.mubr.msk.f32.mxu0 %vm514_vm2, %v18864_v27  ;;  %447 = vst.msk [vmem:[#allocation2 + $0xc0] sm:$0xff] %vm421_vm8, %v26394_v11  ;;  %448 = vst.msk [vmem:[#allocation2 + $0xc8] sm:$0xff] %vm421_vm8, %v26394_v11  ;;  %v18926_v27 = vld [vmem:[%s23135_s24 + $0x68] sm:$0xff] }
  0x36   : > { %450 = vst.msk [vmem:[#allocation2 + $0xd8] sm:$0xff] %vm421_vm8, %v26394_v11  ;;  %451 = vst.msk [vmem:[#allocation2 + $0xe0] sm:$0xff] %vm421_vm8, %v26394_v11 }
  0x37   : > { %453 = vst.msk [vmem:[#allocation2 + $0xf0] sm:$0xff] %vm421_vm8, %v26394_v11  ;;  %454 = vst.msk [vmem:[#allocation2 + $0xf8] sm:$0xff] %vm421_vm8, %v26394_v11 }
  0x38   : > { %20686 = vmatmul.mubr.msk.f32.vlgmr.msra.gmra.mrb[0].mxu0 %vm514_vm2, %v18865_v30  ;;  %456 = vst.msk [vmem:[#allocation2 + $0x108] sm:$0xff] %vm421_vm8, %v26394_v11  ;;  %457 = vst.msk [vmem:[#allocation2 + $0x110] sm:$0xff] %vm421_vm8, %v26394_v11  ;;  %v1977_v30 = vrot.slane %v18926_v27, 1 }
  0x39   : > { %20688 = vmatprep.mubr.msk.f32.mxu0 %vm514_vm2, %v18866_v32  ;;  %20692 = vmatpush3.msk.msra.mxu0 %vm523_vm0, %v23170_v24  ;;  %459 = vst.msk [vmem:[#allocation2 + $0x120] sm:$0xff] %vm421_vm8, %v26394_v11  ;;  %460 = vst.msk [vmem:[#allocation2 + $0x128] sm:$0xff] %vm421_vm8, %v26394_v11  ;;  %v18928_v32 = vld [vmem:[%s23135_s24 + $0x78] sm:$0xff] }
  0x3a   : > { %20699 = vmatprep.subr.msk.mxu0 %vm523_vm0, %v23187_v34  ;;  %462 = vst.msk [vmem:[#allocation2 + $0x138] sm:$0xff] %vm421_vm8, %v26394_v11  ;;  %463 = vst.msk [vmem:[#allocation2 + $0x140] sm:$0xff] %vm421_vm8, %v26394_v11  ;;  %v1981_v33 = vrot.slane %v18928_v32, 1  ;;  %v1978_v35 = vsel %vm504_vm1, %v1976_v28, %v1977_v30  ;;  %v18987_v28 = vld [vmem:[%s23135_s24 + $0xb0] sm:$0xff] }
  0x3b   : > { %465 = vst.msk [vmem:[#allocation2 + $0x150] sm:$0xff] %vm421_vm8, %v26394_v11  ;;  %466 = vst.msk [vmem:[#allocation2 + $0x158] sm:$0xff] %vm421_vm8, %v26394_v11 }
  0x3c   : > { %20689 = vmatmul.mubr.msk.f32.gmra.mrb[2].mxu0 %vm514_vm2, %v18867_v36  ;;  %468 = vst.msk [vmem:[#allocation2 + $0x168] sm:$0xff] %vm421_vm8, %v26394_v11  ;;  %469 = vst.msk [vmem:[#allocation2 + $0x170] sm:$0xff] %vm421_vm8, %v26394_v11  ;;  %v1980_v36 = vsel %vm504_vm1, %v1977_v30, %v1979_v31  ;;  %v2995_v30 = vrot.slane %v18987_v28, 1 }
  0x3d   : > { %20693 = vmatprep.mubr.msk.f32.mxu0 %vm514_vm2, %v929_v38  ;;  %471 = vst.msk [vmem:[#allocation2 + $0x180] sm:$0xff] %vm421_vm8, %v26394_v11  ;;  %472 = vst.msk [vmem:[#allocation2 + $0x188] sm:$0xff] %vm421_vm8, %v26394_v11  ;;  %v1982_v38 = vsel %vm504_vm1, %v1979_v31, %v1981_v33  ;;  %v18988_v31 = vld [vmem:[%s23135_s24 + $0xb8] sm:$0xff] }
  0x3e   : > { %425 = vst.msk [vmem:[#allocation2 + $0x10] sm:$0x1] %vm424_vm12, %v26394_v11  ;;  %428 = vst.msk [vmem:[#allocation2 + $0x28] sm:$0x1] %vm424_vm12, %v26394_v11 }
  0x3f   : > { %431 = vst.msk [vmem:[#allocation2 + $0x40] sm:$0x1] %vm424_vm12, %v26394_v11  ;;  %434 = vst.msk [vmem:[#allocation2 + $0x58] sm:$0x1] %vm424_vm12, %v26394_v11 }
  0x40   : > { %20694 = vmatmul.mubr.msk.f32.vlgmr.msra.gmra.mrb[0].mxu0 %vm514_vm2, %v931_v39  ;;  %v2081_v39 = vrot.slane %v18926_v27, 2  ;;  %437 = vst.msk [vmem:[#allocation2 + $0x70] sm:$0x1] %vm424_vm12, %v26394_v11  ;;  %440 = vst.msk [vmem:[#allocation2 + $0x88] sm:$0x1] %vm424_vm12, %v26394_v11 }
  0x41   : > { %20696 = vmatprep.mubr.msk.f32.mxu0 %vm514_vm2, %v933_v42  ;;  %20700 = vmatpush3.msk.msra.mxu0 %vm523_vm0, %v23187_v34  ;;  %v2085_v42 = vrot.slane %v18928_v32, 2  ;;  %443 = vst.msk [vmem:[#allocation2 + $0xa0] sm:$0x1] %vm424_vm12, %v26394_v11  ;;  %446 = vst.msk [vmem:[#allocation2 + $0xb8] sm:$0x1] %vm424_vm12, %v26394_v11 }
  0x42   : > { %20707 = vmatprep.subr.msk.mxu0 %vm523_vm0, %v23200_v41  ;;  %v2084_v44 = vsel %vm706_vm4, %v2081_v39, %v2083_v40  ;;  %449 = vst.msk [vmem:[#allocation2 + $0xd0] sm:$0x1] %vm424_vm12, %v26394_v11  ;;  %452 = vst.msk [vmem:[#allocation2 + $0xe8] sm:$0x1] %vm424_vm12, %v26394_v11 }
  0x43   : > { %455 = vst.msk [vmem:[#allocation2 + $0x100] sm:$0x1] %vm424_vm12, %v26394_v11  ;;  %458 = vst.msk [vmem:[#allocation2 + $0x118] sm:$0x1] %vm424_vm12, %v26394_v11 }
  0x44   : > { %20697 = vmatmul.mubr.msk.f32.gmra.mrb[2].mxu0 %vm514_vm2, %v932_v37  ;;  %v2080_v37 = vrot.slane %v18925_v26, 2  ;;  %461 = vst.msk [vmem:[#allocation2 + $0x130] sm:$0x1] %vm424_vm12, %v26394_v11  ;;  %464 = vst.msk [vmem:[#allocation2 + $0x148] sm:$0x1] %vm424_vm12, %v26394_v11 }
  0x45   : > { %20701 = vmatprep.mubr.msk.f32.mxu0 %vm514_vm2, %v1036_v46  ;;  %v23470_v46 = vld [vmem:[%s23135_s24 + $0x80] sm:$0xff]  ;;  %467 = vst.msk [vmem:[#allocation2 + $0x160] sm:$0x1] %vm424_vm12, %v26394_v11  ;;  %470 = vst.msk [vmem:[#allocation2 + $0x178] sm:$0x1] %vm424_vm12, %v26394_v11 }
  0x46   : > { %v2082_v43 = vsel %vm706_vm4, %v2080_v37, %v2081_v39  ;;  %473 = vst.msk [vmem:[#allocation2 + $0x190] sm:$0x1] %vm424_vm12, %v26394_v11  ;;  %v3099_v39 = vrot.slane %v18987_v28, 2 }
  0x48   : > { %20702 = vmatmul.mubr.msk.f32.vlgmr.msra.gmra.mrb[0].mxu0 %vm514_vm2, %v1038_v47  ;;  %v23478_v47 = vld [vmem:[%s23135_s24 + $0x88] sm:$0xff] }
  0x49   : > { %20704 = vmatprep.mubr.msk.f32.mxu0 %vm514_vm2, %v1040_v49  ;;  %20708 = vmatpush3.msk.msra.mxu0 %vm523_vm0, %v23200_v41  ;;  %v2290_v49 = vrot.slane %v23470_v46, 1 }
  0x4a   : > { %20715 = vmatprep.subr.msk.mxu0 %vm523_vm0, %v23213_v48 }
  0x4c   : > { %20705 = vmatmul.mubr.msk.f32.gmra.mrb[2].mxu0 %vm514_vm2, %v1039_v45  ;;  %v2086_v45 = vsel %vm706_vm4, %v2083_v40, %v2085_v42  ;;  %v3101_v40 = vrot.slane %v18988_v31, 2 }
  0x4d   : > { %20709 = vmatprep.mubr.msk.f32.mxu0 %vm514_vm2, %v23221_v50 }
  0x50   : > { %20710 = vmatmul.mubr.msk.f32.vlgmr.msra.gmra.mrb[0].mxu0 %vm514_vm2, %v23229_v51 }
  0x51   : > { %20712 = vmatprep.mubr.msk.f32.mxu0 %vm514_vm2, %v23233_v53  ;;  %20716 = vmatpush3.msk.msra.mxu0 %vm523_vm0, %v23213_v48 }
  0x52   : > { %20723 = vmatprep.subr.msk.mxu0 %vm523_vm0, %v23239_v55 }
  0x54   : > { %20713 = vmatmul.mubr.msk.f32.gmra.mrb[2].mxu0 %vm514_vm2, %v23249_v57 }
  0x55   : > { %20717 = vmatprep.mubr.msk.f32.mxu0 %vm514_vm2, %v23255_v59 }
  0x58   : > { %20718 = vmatmul.mubr.msk.f32.vlgmr.msra.gmra.mrb[0].mxu0 %vm514_vm2, %v23264_v60 }
  0x59   : > { %20720 = vmatprep.mubr.msk.f32.mxu0 %vm514_vm2, %v23269_v62  ;;  %20724 = vmatpush3.msk.msra.mxu0 %vm523_vm0, %v23239_v55 }
  0x5c   : > { %20721 = vmatmul.mubr.msk.f32.gmra.mrb[2].mxu0 %vm514_vm2, %v23252_v58 }
  0x5d   : > { %20725 = vmatprep.mubr.msk.f32.mxu0 %vm514_vm2, %v23283_v4 }
  0x60   : > { %20726 = vmatmul.mubr.msk.f32.vlgmr.msra.gmra.mrb[0].mxu0 %vm514_vm2, %v23290_v5 }
  0x61   : > { %20728 = vmatprep.mubr.msk.f32.mxu0 %vm514_vm2, %v23294_v6 }
  0x64   : > { %20729 = vmatmul.mubr.msk.f32.gmra.mrb[2].mxu0 %vm514_vm2, %v23280_v3 }
  0x65   : > { %20822 = vmatprep.mubr.msk.f32.mxu0 %vm1474_vm7, %v23306_v12 }
 0x133   : > { %v20727_v14 = vpop.f32.mrb[0].mxu0 }
 0x134   : > { %v1445_v15 = vpop.f32.mrb[1].mxu0 }
 0x135   : > { %v22128_v18 = vpack.c.bf16 %v20727_v14, %v1445_v15 }
 0x137   : > { %v20730_v20 = vpop.f32.mrb[2].mxu0  ;;  %22129 = vmatprep.subr.bf16.mxu1 %v22128_v18 }
 0x138   : > { %v1455_v21 = vpop.f32.mrb[3].mxu0  ;;  %22131 = vmatpush3.bf16.msra.mxu1 %v22128_v18 }
 0x139   : > { %v22132_v23 = vpack.c.bf16 %v20730_v20, %v1455_v21 }
 0x13b   : > { %22134 = vmatprep.subr.msk.bf16.mxu1 %vm23383_vm10, %v22132_v23 }
 0x13c   : > { %22137 = vmatpush3.bf16.msk.msra.mxu1 %vm23383_vm10, %v22132_v23  ;;  %v18985_v23 = vld [vmem:[%s23135_s24 + $0xa0] sm:$0xff] }
 0x13d   : > { %20742 = vmatprep.subr.msk.mxu1 %vm523_vm0, %v23122_v1 }
 0x13f   : > { %20740 = vmatmul.mubr.msk.f32.vlgmr.msra.gmra.mrb[0].mxu1 %vm1474_vm7, %v23392_v25 }
 0x140   : > { %20743 = vmatpush3.msk.msra.mxu1 %vm523_vm0, %v23122_v1  ;;  %20744 = vmatprep.mubr.msk.f32.mxu1 %vm514_vm2, %v23255_v59 }
 0x141   : > { %20750 = vmatprep.subr.msk.mxu1 %vm523_vm0, %v23118_v0 }
 0x143   : > { %20745 = vmatmul.mubr.msk.f32.vlgmr.msra.gmra.mrb[2].mxu1 %vm514_vm2, %v23264_v60  ;;  %v2395_v60 = vrot.slane %v23478_v47, 2 }
 0x144   : > { %20747 = vmatprep.mubr.msk.f32.mxu1 %vm514_vm2, %v23269_v62  ;;  %20751 = vmatpush3.msk.msra.mxu1 %vm523_vm0, %v23118_v0 }
 0x145   : > { %20758 = vmatprep.subr.msk.mxu1 %vm523_vm0, %v23148_v16 }
 0x147   : > { %20748 = vmatmul.mubr.msk.f32.gmra.mrb[4].mxu1 %vm514_vm2, %v23252_v58  ;;  %v2394_v58 = vrot.slane %v23470_v46, 2 }
 0x148   : > { %20752 = vmatprep.mubr.msk.f32.mxu1 %vm514_vm2, %v23221_v50  ;;  %v23482_v50 = vld [vmem:[%s23135_s24 + $0x90] sm:$0xff] }
 0x149   : > { %v2293_v52 = vrot.slane %v23482_v50, 1  ;;  %v2397_v61 = vrot.slane %v23482_v50, 2  ;;  %v23521_v63 = vsel %vm706_vm4, %v2394_v58, %v2395_v60 }
 0x14b   : > { %20753 = vmatmul.mubr.msk.f32.vlgmr.msra.gmra.mrb[2].mxu1 %vm514_vm2, %v23229_v51  ;;  %v2291_v51 = vrot.slane %v23478_v47, 1  ;;  %v2398_v2 = vsel %vm706_vm4, %v2395_v60, %v2397_v61 }
 0x14c   : > { %20755 = vmatprep.mubr.msk.f32.mxu1 %vm514_vm2, %v23233_v53  ;;  %20759 = vmatpush3.msk.msra.mxu1 %vm523_vm0, %v23148_v16  ;;  %v23493_v53 = vld [vmem:[%s23135_s24 + $0x98] sm:$0xff] }
 0x14d   : > { %20766 = vmatprep.subr.msk.mxu1 %vm523_vm0, %v23158_v17  ;;  %v23496_v54 = vrot.slane %v23493_v53, 1  ;;  %v23499_v56 = vsel %vm504_vm1, %v2290_v49, %v2291_v51  ;;  %v23518_v62 = vrot.slane %v23493_v53, 2  ;;  %v23667_v49 = vld [vmem:[%s23135_s24 + $0xd0] sm:$0xff] }
 0x14e   : > { %v3413_v60 = vrot.slane %v23667_v49, 2 }
 0x14f   : > { %20756 = vmatmul.mubr.msk.f32.gmra.mrb[4].mxu1 %vm514_vm2, %v23249_v57  ;;  %v2294_v57 = vsel %vm504_vm1, %v2291_v51, %v2293_v52  ;;  %v2296_v59 = vsel %vm504_vm1, %v2293_v52, %v23496_v54  ;;  %v3309_v51 = vrot.slane %v23667_v49, 1  ;;  %v23678_v52 = vld [vmem:[%s23135_s24 + $0xd8] sm:$0xff] }
 0x150   : > { %20760 = vmatprep.mubr.msk.f32.mxu1 %vm514_vm2, %v23283_v4  ;;  %v23573_v4 = vld [vmem:[%s26376_s2] ss:$0 sm:$0xff] }
 0x153   : > { %20761 = vmatmul.mubr.msk.f32.vlgmr.msra.gmra.mrb[2].mxu1 %vm514_vm2, %v23290_v5 }
 0x154   : > { %20763 = vmatprep.mubr.msk.f32.mxu1 %vm514_vm2, %v23294_v6  ;;  %20767 = vmatpush3.msk.msra.mxu1 %vm523_vm0, %v23158_v17 }
 0x155   : > { %20774 = vmatprep.subr.msk.mxu1 %vm523_vm0, %v23170_v24 }
 0x157   : > { %20764 = vmatmul.mubr.msk.f32.gmra.mrb[4].mxu1 %vm514_vm2, %v23280_v3  ;;  %v2400_v3 = vsel %vm706_vm4, %v2397_v61, %v23518_v62  ;;  %v23706_v61 = vrot.slane %v23678_v52, 2 }
 0x158   : > { %20768 = vmatprep.mubr.msk.f32.mxu1 %vm514_vm2, %v18925_v26  ;;  %v18986_v26 = vld [vmem:[%s23135_s24 + $0xa8] sm:$0xff] }
 0x15b   : > { %20769 = vmatmul.mubr.msk.f32.vlgmr.msra.gmra.mrb[2].mxu1 %vm514_vm2, %v18926_v27  ;;  %v2992_v27 = vrot.slane %v18985_v23, 1 }
 0x15c   : > { %20771 = vmatprep.mubr.msk.f32.mxu1 %vm514_vm2, %v18927_v29  ;;  %20775 = vmatpush3.msk.msra.mxu1 %vm523_vm0, %v23170_v24  ;;  %v2993_v29 = vrot.slane %v18986_v26, 1 }
 0x15d   : > { %20782 = vmatprep.subr.msk.mxu1 %vm523_vm0, %v23187_v34 }
 0x15f   : > { %20772 = vmatmul.mubr.msk.f32.gmra.mrb[4].mxu1 %vm514_vm2, %v18928_v32  ;;  %v2997_v32 = vrot.slane %v18988_v31, 1 }
 0x160   : > { %20776 = vmatprep.mubr.msk.f32.mxu1 %vm514_vm2, %v1978_v35  ;;  %v2996_v35 = vsel %vm504_vm1, %v2993_v29, %v2995_v30 }
 0x161   : > { %v2998_v37 = vsel %vm504_vm1, %v2995_v30, %v2997_v32 }
 0x163   : > { %20777 = vmatmul.mubr.msk.f32.vlgmr.msra.gmra.mrb[2].mxu1 %vm514_vm2, %v1980_v36  ;;  %v3096_v36 = vrot.slane %v18985_v23, 2 }
 0x164   : > { %20779 = vmatprep.mubr.msk.f32.mxu1 %vm514_vm2, %v1982_v38  ;;  %20783 = vmatpush3.msk.msra.mxu1 %vm523_vm0, %v23187_v34  ;;  %v3097_v38 = vrot.slane %v18986_v26, 2 }
 0x165   : > { %20790 = vmatprep.subr.msk.mxu1 %vm523_vm0, %v23200_v41 }
 0x167   : > { %20780 = vmatmul.mubr.msk.f32.gmra.mrb[4].mxu1 %vm514_vm2, %v1981_v33  ;;  %v2994_v33 = vsel %vm504_vm1, %v2992_v27, %v2993_v29 }
 0x168   : > { %20784 = vmatprep.mubr.msk.f32.mxu1 %vm514_vm2, %v2082_v43  ;;  %v3100_v43 = vsel %vm706_vm4, %v3097_v38, %v3099_v39 }
 0x16b   : > { %20785 = vmatmul.mubr.msk.f32.vlgmr.msra.gmra.mrb[2].mxu1 %vm514_vm2, %v2084_v44  ;;  %v3102_v44 = vsel %vm706_vm4, %v3099_v39, %v3101_v40 }
 0x16c   : > { %20787 = vmatprep.mubr.msk.f32.mxu1 %vm514_vm2, %v2086_v45  ;;  %20791 = vmatpush3.msk.msra.mxu1 %vm523_vm0, %v23200_v41  ;;  %v23655_v45 = vld [vmem:[%s23135_s24 + $0xc0] sm:$0xff] }
 0x16d   : > { %20798 = vmatprep.subr.msk.mxu1 %vm523_vm0, %v23213_v48 }
 0x16f   : > { %20788 = vmatmul.mubr.msk.f32.gmra.mrb[4].mxu1 %vm514_vm2, %v2085_v42  ;;  %v3098_v42 = vsel %vm706_vm4, %v3096_v36, %v3097_v38 }
 0x170   : > { %20792 = vmatprep.mubr.msk.f32.mxu1 %vm514_vm2, %v23470_v46 }
 0x173   : > { %20793 = vmatmul.mubr.msk.f32.vlgmr.msra.gmra.mrb[2].mxu1 %vm514_vm2, %v23478_v47 }
 0x174   : > { %20795 = vmatprep.mubr.msk.f32.mxu1 %vm514_vm2, %v23482_v50  ;;  %20799 = vmatpush3.msk.msra.mxu1 %vm523_vm0, %v23213_v48 }
 0x175   : > { %20806 = vmatprep.subr.msk.mxu1 %vm523_vm0, %v23239_v55 }
 0x177   : > { %20796 = vmatmul.mubr.msk.f32.gmra.mrb[4].mxu1 %vm514_vm2, %v23493_v53 }
 0x178   : > { %20800 = vmatprep.mubr.msk.f32.mxu1 %vm514_vm2, %v23499_v56 }
 0x17b   : > { %20801 = vmatmul.mubr.msk.f32.vlgmr.msra.gmra.mrb[2].mxu1 %vm514_vm2, %v2294_v57 }
 0x17c   : > { %20803 = vmatprep.mubr.msk.f32.mxu1 %vm514_vm2, %v2296_v59  ;;  %20807 = vmatpush3.msk.msra.mxu1 %vm523_vm0, %v23239_v55 }
 0x17f   : > { %20804 = vmatmul.mubr.msk.f32.gmra.mrb[4].mxu1 %vm514_vm2, %v23496_v54 }
 0x180   : > { %20808 = vmatprep.mubr.msk.f32.mxu1 %vm514_vm2, %v23521_v63 }
 0x183   : > { %20809 = vmatmul.mubr.msk.f32.vlgmr.msra.gmra.mrb[2].mxu1 %vm514_vm2, %v2398_v2 }
 0x184   : > { %20811 = vmatprep.mubr.msk.f32.mxu1 %vm514_vm2, %v2400_v3 }
 0x187   : > { %20812 = vmatmul.mubr.msk.f32.gmra.mrb[4].mxu1 %vm514_vm2, %v23518_v62 }
 0x188   : > { %20905 = vmatprep.mubr.msk.f32.mxu1 %vm1474_vm7, %v23306_v12 }
 0x212   : > { %v20741_v5 = vpop.f32.mrb[0].mxu1 }
 0x213   : > { %v1556_v6 = vadd.f32 %v20741_v5, %v23573_v4  ;;  %v1550_v7 = vpop.f32.mrb[1].mxu1 }
 0x214   : > { %v1551_v9 = vadd.f32 %v23573_v4, %v1550_v7 }
 0x215   : > { %v1560_v10 = vmax.f32 %v1556_v6, 0.0 }
 0x216   : > { %v1559_v13 = vmax.f32 %v1551_v9, 0.0 }
 0x217   : > { %1564 = vst.msk [vmem:[#allocation2 + $0x21] sm:$0x7f] %vm1563_vm13, %v1560_v10 }
 0x218   : > { %1562 = vst.msk [vmem:[#allocation2 + $0x19] sm:$0xff] %vm421_vm8, %v1559_v13  ;;  %v26393_v13 = vsub.s32 1, %v23302_v8 }
 0x256   : > { %v20810_v14 = vpop.f32.mrb[2].mxu1 }
 0x257   : > { %v2475_v15 = vpop.f32.mrb[3].mxu1 }
 0x258   : > { %v22138_v18 = vpack.c.bf16 %v20810_v14, %v2475_v15  ;;  %v23738_v14 = vld [vmem:[%s26377_s3] sm:$0xff]  ;;  %v26392_v15 = vsub.s32 2, %v23302_v8 }
 0x25a   : > { %v20813_v19 = vpop.f32.mrb[4].mxu1  ;;  %22139 = vmatprep.subr.bf16.mxu0 %v22138_v18 }
 0x25b   : > { %v2485_v20 = vpop.f32.mrb[5].mxu1  ;;  %22141 = vmatpush3.bf16.msra.mxu0 %v22138_v18 }
 0x25c   : > { %v22142_v21 = vpack.c.bf16 %v20813_v19, %v2485_v20  ;;  %v26391_v19 = vsub.s32 0, %v23302_v8  ;;  %v23745_v20 = vrot.slane %v23738_v14, %v26393_v13 }
 0x25e   : > { %22144 = vmatprep.subr.msk.bf16.mxu0 %vm23383_vm10, %v22142_v21  ;;  %v23763_v29 = vrot.slane %v23738_v14, %v26391_v19 }
 0x25f   : > { %22147 = vmatpush3.bf16.msk.msra.mxu0 %vm23383_vm10, %v22142_v21 }
 0x260   : > { %20825 = vmatprep.subr.msk.mxu0 %vm523_vm0, %v23122_v1 }
 0x262   : > { %20823 = vmatmul.mubr.msk.f32.vlgmr.msra.gmra.mrb[4].mxu0 %vm1474_vm7, %v23392_v25 }
 0x263   : > { %20826 = vmatpush3.msk.msra.mxu0 %vm523_vm0, %v23122_v1  ;;  %20827 = vmatprep.mubr.msk.f32.mxu0 %vm514_vm2, %v23499_v56 }
 0x264   : > { %20833 = vmatprep.subr.msk.mxu0 %vm523_vm0, %v23118_v0 }
 0x266   : > { %20828 = vmatmul.mubr.msk.f32.vlgmr.msra.gmra.mrb[6].mxu0 %vm514_vm2, %v2294_v57  ;;  %v3410_v57 = vrot.slane %v23655_v45, 2 }
 0x267   : > { %20830 = vmatprep.mubr.msk.f32.mxu0 %vm514_vm2, %v2296_v59  ;;  %20834 = vmatpush3.msk.msra.mxu0 %vm523_vm0, %v23118_v0 }
 0x268   : > { %20841 = vmatprep.subr.msk.mxu0 %vm523_vm0, %v23148_v16 }
 0x26a   : > { %20831 = vmatmul.mubr.msk.f32.gmra.mrb[8].mxu0 %vm514_vm2, %v23496_v54 }
 0x26b   : > { %20835 = vmatprep.mubr.msk.f32.mxu0 %vm514_vm2, %v23470_v46  ;;  %v23663_v46 = vld [vmem:[%s23135_s24 + $0xc8] sm:$0xff] }
 0x26c   : > { %v3411_v59 = vrot.slane %v23663_v46, 2 }
 0x26e   : > { %20836 = vmatmul.mubr.msk.f32.vlgmr.msra.gmra.mrb[6].mxu0 %vm514_vm2, %v23478_v47  ;;  %v3306_v47 = vrot.slane %v23655_v45, 1 }
 0x26f   : > { %20838 = vmatprep.mubr.msk.f32.mxu0 %vm514_vm2, %v23482_v50  ;;  %20842 = vmatpush3.msk.msra.mxu0 %vm523_vm0, %v23148_v16  ;;  %v3307_v50 = vrot.slane %v23663_v46, 1 }
 0x270   : > { %20849 = vmatprep.subr.msk.mxu0 %vm523_vm0, %v23158_v17 }
 0x271   : > { %v23684_v54 = vsel %vm504_vm1, %v3306_v47, %v3307_v50  ;;  %v23693_v56 = vsel %vm504_vm1, %v3307_v50, %v3309_v51 }
 0x272   : > { %20839 = vmatmul.mubr.msk.f32.gmra.mrb[8].mxu0 %vm514_vm2, %v23493_v53  ;;  %v23681_v53 = vrot.slane %v23678_v52, 1 }
 0x273   : > { %20843 = vmatprep.mubr.msk.f32.mxu0 %vm514_vm2, %v23521_v63  ;;  %v23716_v63 = vsel %vm706_vm4, %v3411_v59, %v3413_v60 }
 0x274   : > { %v3312_v58 = vsel %vm504_vm1, %v3309_v51, %v23681_v53 }
 0x276   : > { %20844 = vmatmul.mubr.msk.f32.vlgmr.msra.gmra.mrb[6].mxu0 %vm514_vm2, %v2398_v2  ;;  %v23720_v2 = vsel %vm706_vm4, %v3413_v60, %v23706_v61 }
 0x277   : > { %20846 = vmatprep.mubr.msk.f32.mxu0 %vm514_vm2, %v2400_v3  ;;  %20850 = vmatpush3.msk.msra.mxu0 %vm523_vm0, %v23158_v17 }
 0x278   : > { %20857 = vmatprep.subr.msk.mxu0 %vm523_vm0, %v23170_v24 }
 0x27a   : > { %20847 = vmatmul.mubr.msk.f32.gmra.mrb[8].mxu0 %vm514_vm2, %v23518_v62  ;;  %v23709_v62 = vsel %vm706_vm4, %v3410_v57, %v3411_v59 }
 0x27b   : > { %20851 = vmatprep.mubr.msk.f32.mxu0 %vm514_vm2, %v18985_v23  ;;  %v23752_v23 = vrot.slane %v23738_v14, %v26392_v15 }
 0x27e   : > { %20852 = vmatmul.mubr.msk.f32.vlgmr.msra.gmra.mrb[6].mxu0 %vm514_vm2, %v18986_v26 }
 0x27f   : > { %20854 = vmatprep.mubr.msk.f32.mxu0 %vm514_vm2, %v18987_v28  ;;  %20858 = vmatpush3.msk.msra.mxu0 %vm523_vm0, %v23170_v24 }
 0x280   : > { %20865 = vmatprep.subr.msk.mxu0 %vm523_vm0, %v23187_v34 }
 0x282   : > { %20855 = vmatmul.mubr.msk.f32.gmra.mrb[8].mxu0 %vm514_vm2, %v18988_v31 }
 0x283   : > { %20859 = vmatprep.mubr.msk.f32.mxu0 %vm514_vm2, %v2994_v33 }
 0x286   : > { %20860 = vmatmul.mubr.msk.f32.vlgmr.msra.gmra.mrb[6].mxu0 %vm514_vm2, %v2996_v35 }
 0x287   : > { %20862 = vmatprep.mubr.msk.f32.mxu0 %vm514_vm2, %v2998_v37  ;;  %20866 = vmatpush3.msk.msra.mxu0 %vm523_vm0, %v23187_v34 }
 0x288   : > { %20873 = vmatprep.subr.msk.mxu0 %vm523_vm0, %v23200_v41 }
 0x28a   : > { %20863 = vmatmul.mubr.msk.f32.gmra.mrb[8].mxu0 %vm514_vm2, %v2997_v32 }
 0x28b   : > { %20867 = vmatprep.mubr.msk.f32.mxu0 %vm514_vm2, %v3098_v42 }
 0x28e   : > { %20868 = vmatmul.mubr.msk.f32.vlgmr.msra.gmra.mrb[6].mxu0 %vm514_vm2, %v3100_v43 }
 0x28f   : > { %20870 = vmatprep.mubr.msk.f32.mxu0 %vm514_vm2, %v3102_v44  ;;  %20874 = vmatpush3.msk.msra.mxu0 %vm523_vm0, %v23200_v41 }
 0x290   : > { %20881 = vmatprep.subr.msk.mxu0 %vm523_vm0, %v23213_v48 }
 0x292   : > { %20871 = vmatmul.mubr.msk.f32.gmra.mrb[8].mxu0 %vm514_vm2, %v3101_v40 }
 0x293   : > { %20875 = vmatprep.mubr.msk.f32.mxu0 %vm514_vm2, %v23655_v45 }
 0x296   : > { %20876 = vmatmul.mubr.msk.f32.vlgmr.msra.gmra.mrb[6].mxu0 %vm514_vm2, %v23663_v46 }
 0x297   : > { %20878 = vmatprep.mubr.msk.f32.mxu0 %vm514_vm2, %v23667_v49  ;;  %20882 = vmatpush3.msk.msra.mxu0 %vm523_vm0, %v23213_v48 }
 0x298   : > { %20889 = vmatprep.subr.msk.mxu0 %vm523_vm0, %v23239_v55 }
 0x29a   : > { %20879 = vmatmul.mubr.msk.f32.gmra.mrb[8].mxu0 %vm514_vm2, %v23678_v52 }
 0x29b   : > { %20883 = vmatprep.mubr.msk.f32.mxu0 %vm514_vm2, %v23684_v54 }
 0x29e   : > { %20884 = vmatmul.mubr.msk.f32.vlgmr.msra.gmra.mrb[6].mxu0 %vm514_vm2, %v23693_v56 }
 0x29f   : > { %20886 = vmatprep.mubr.msk.f32.mxu0 %vm514_vm2, %v3312_v58  ;;  %20890 = vmatpush3.msk.msra.mxu0 %vm523_vm0, %v23239_v55 }
 0x2a2   : > { %20887 = vmatmul.mubr.msk.f32.gmra.mrb[8].mxu0 %vm514_vm2, %v23681_v53 }
 0x2a3   : > { %20891 = vmatprep.mubr.msk.f32.mxu0 %vm514_vm2, %v23709_v62 }
 0x2a6   : > { %20892 = vmatmul.mubr.msk.f32.vlgmr.msra.gmra.mrb[6].mxu0 %vm514_vm2, %v23716_v63 }
 0x2a7   : > { %20894 = vmatprep.mubr.msk.f32.mxu0 %vm514_vm2, %v23720_v2 }
 0x2aa   : > { %20895 = vmatmul.mubr.msk.f32.gmra.mrb[8].mxu0 %vm514_vm2, %v23706_v61 }
 0x2ab   : > { %20988 = vmatprep.mubr.msk.f32.mxu0 %vm1474_vm7, %v23306_v12 }
 0x335   : > { %v20824_v3 = vpop.f32.mrb[4].mxu0 }
 0x336   : > { %v2573_v5 = vadd.f32 %v20824_v3, %v23573_v4  ;;  %v2567_v6 = vpop.f32.mrb[5].mxu0 }
 0x337   : > { %v2568_v7 = vadd.f32 %v23573_v4, %v2567_v6  ;;  %v23859_v6 = vld [vmem:[%s23135_s24 + $0x100] sm:$0xff] }
 0x338   : > { %v2577_v9 = vmax.f32 %v2573_v5, 0.0 }
 0x339   : > { %v2576_v10 = vmax.f32 %v2568_v7, 0.0  ;;  %v19065_v7 = vld [vmem:[%s23135_s24 + $0x108] sm:$0xff] }
 0x33a   : > { %2580 = vst.msk [vmem:[#allocation2 + $0x39] sm:$0x7f] %vm1563_vm13, %v2577_v9  ;;  %v4322_v9 = vrot.slane %v23859_v6, 1 }
 0x33b   : > { %2579 = vst.msk [vmem:[#allocation2 + $0x31] sm:$0xff] %vm421_vm8, %v2576_v10  ;;  %v19066_v10 = vld [vmem:[%s23135_s24 + $0x110] sm:$0xff] }
 0x342   : > { %v15879_v18 = vld [vmem:[#allocation2 + $0x30] sm:$0xff]  ;;  %v23747_v21 = vld [vmem:[#allocation2 + $0x38] sm:$0xff] }
 0x343   : > { %v16099_v26 = vmul.f32 %v15879_v18, %v23745_v20  ;;  %v23757_v27 = vmul.f32 %v23747_v21, %v23745_v20  ;;  %v16110_v28 = vmul.f32 %v15879_v18, %v23752_v23  ;;  %v16095_v32 = vmul.f32 %v15879_v18, %v23763_v29 }
 0x344   : > { %v23769_v33 = vmul.f32 %v23747_v21, %v23752_v23  ;;  %v4323_v18 = vrot.slane %v19065_v7, 1 }
 0x345   : > { %v16103_v30 = vrot.slane %v16099_v26, 1  ;;  %v16104_v31 = vrot.slane %v23757_v27, 1  ;;  %v16116_v35 = vrot.slane %v16110_v28, 2  ;;  %v4325_v26 = vrot.slane %v19066_v10, 1  ;;  %v19067_v28 = vld [vmem:[%s23135_s24 + $0x118] sm:$0xff] }
 0x346   : > { %v16117_v38 = vrot.slane %v23769_v33, 2 }
 0x347   : > { %v16105_v36 = vsel %vm504_vm1, %v16103_v30, %v16104_v31  ;;  %v4327_v30 = vrot.slane %v19067_v28, 1 }
 0x348   : > { %v16108_v37 = vadd.f32 %v16105_v36, %v16095_v32  ;;  %v16118_v39 = vsel %vm706_vm4, %v16116_v35, %v16117_v38  ;;  %v4324_v32 = vsel %vm504_vm1, %v4322_v9, %v4323_v18  ;;  %v4326_v35 = vsel %vm504_vm1, %v4323_v18, %v4325_v26 }
 0x349   : > { %v4426_v36 = vrot.slane %v23859_v6, 2 }
 0x34a   : > { %v23778_v40 = vadd.f32 %v16118_v39, %v16108_v37  ;;  %v4328_v37 = vsel %vm504_vm1, %v4325_v26, %v4327_v30  ;;  %v4427_v39 = vrot.slane %v19065_v7, 2 }
 0x379   : > { %v20893_v42 = vpop.f32.mrb[6].mxu0 }
 0x37a   : > { %v3491_v43 = vpop.f32.mrb[7].mxu0 }
 0x37b   : > { %v22148_v44 = vpack.c.bf16 %v20893_v42, %v3491_v43  ;;  %v4429_v42 = vrot.slane %v19066_v10, 2  ;;  %v4431_v43 = vrot.slane %v19067_v28, 2 }
 0x37d   : > { %v20896_v47 = vpop.f32.mrb[8].mxu0  ;;  %22149 = vmatprep.subr.bf16.mxu1 %v22148_v44 }
 0x37e   : > { %v3501_v50 = vpop.f32.mrb[9].mxu0  ;;  %22151 = vmatpush3.bf16.msra.mxu1 %v22148_v44  ;;  %v4428_v44 = vsel %vm706_vm4, %v4426_v36, %v4427_v39 }
 0x37f   : > { %v22152_v51 = vpack.c.bf16 %v20896_v47, %v3501_v50  ;;  %v4430_v47 = vsel %vm706_vm4, %v4427_v39, %v4429_v42  ;;  %v4432_v50 = vsel %vm706_vm4, %v4429_v42, %v4431_v43  ;;  %v23982_v39 = vld [vmem:[%s23135_s24 + $0x148] sm:$0xff] }
 0x381   : > { %22154 = vmatprep.subr.msk.bf16.mxu1 %vm23383_vm10, %v22152_v51 }
 0x382   : > { %22157 = vmatpush3.bf16.msk.msra.mxu1 %vm23383_vm10, %v22152_v51 }
 0x383   : > { %20908 = vmatprep.subr.msk.mxu1 %vm523_vm0, %v23122_v1 }
 0x385   : > { %20906 = vmatmul.mubr.msk.f32.vlgmr.msra.gmra.mrb[6].mxu1 %vm1474_vm7, %v23392_v25 }
 0x386   : > { %20909 = vmatpush3.msk.msra.mxu1 %vm523_vm0, %v23122_v1  ;;  %20910 = vmatprep.mubr.msk.f32.mxu1 %vm514_vm2, %v23684_v54  ;;  %v19048_v54 = vld [vmem:[%s23135_s24 + $0xf8] sm:$0xff] }
 0x387   : > { %20916 = vmatprep.subr.msk.mxu1 %vm523_vm0, %v23118_v0 }
 0x389   : > { %20911 = vmatmul.mubr.msk.f32.vlgmr.msra.gmra.mrb[8].mxu1 %vm514_vm2, %v23693_v56  ;;  %v4013_v56 = vrot.slane %v19048_v54, 1 }
 0x38a   : > { %20913 = vmatprep.mubr.msk.f32.mxu1 %vm514_vm2, %v3312_v58  ;;  %20917 = vmatpush3.msk.msra.mxu1 %vm523_vm0, %v23118_v0  ;;  %v19045_v0 = vld [vmem:[%s23135_s24 + $0xe0] sm:$0xff] }
 0x38b   : > { %20924 = vmatprep.subr.msk.mxu1 %vm523_vm0, %v23148_v16  ;;  %v4112_v59 = vrot.slane %v19045_v0, 2 }
 0x38d   : > { %20914 = vmatmul.mubr.msk.f32.gmra.mrb[10].mxu1 %vm514_vm2, %v23681_v53 }
 0x38e   : > { %20918 = vmatprep.mubr.msk.f32.mxu1 %vm514_vm2, %v23655_v45  ;;  %v19046_v45 = vld [vmem:[%s23135_s24 + $0xe8] sm:$0xff] }
 0x391   : > { %20919 = vmatmul.mubr.msk.f32.vlgmr.msra.gmra.mrb[8].mxu1 %vm514_vm2, %v23663_v46  ;;  %v4008_v46 = vrot.slane %v19045_v0, 1 }
 0x392   : > { %20921 = vmatprep.mubr.msk.f32.mxu1 %vm514_vm2, %v23667_v49  ;;  %20925 = vmatpush3.msk.msra.mxu1 %vm523_vm0, %v23148_v16  ;;  %v19047_v49 = vld [vmem:[%s23135_s24 + $0xf0] sm:$0xff] }
 0x393   : > { %20932 = vmatprep.subr.msk.mxu1 %vm523_vm0, %v23158_v17  ;;  %v4011_v53 = vrot.slane %v19047_v49, 1 }
 0x395   : > { %20922 = vmatmul.mubr.msk.f32.gmra.mrb[10].mxu1 %vm514_vm2, %v23678_v52  ;;  %v4009_v52 = vrot.slane %v19046_v45, 1  ;;  %v4014_v60 = vsel %vm504_vm1, %v4011_v53, %v4013_v56 }
 0x396   : > { %20926 = vmatprep.mubr.msk.f32.mxu1 %vm514_vm2, %v23709_v62  ;;  %v4115_v62 = vrot.slane %v19047_v49, 2 }
 0x397   : > { %v4010_v57 = vsel %vm504_vm1, %v4008_v46, %v4009_v52  ;;  %v4012_v58 = vsel %vm504_vm1, %v4009_v52, %v4011_v53 }
 0x399   : > { %20927 = vmatmul.mubr.msk.f32.vlgmr.msra.gmra.mrb[8].mxu1 %vm514_vm2, %v23716_v63  ;;  %v4117_v63 = vrot.slane %v19048_v54, 2 }
 0x39a   : > { %20929 = vmatprep.mubr.msk.f32.mxu1 %vm514_vm2, %v23720_v2  ;;  %20933 = vmatpush3.msk.msra.mxu1 %vm523_vm0, %v23158_v17 }
 0x39b   : > { %20940 = vmatprep.subr.msk.mxu1 %vm523_vm0, %v23170_v24  ;;  %v4118_v5 = vsel %vm706_vm4, %v4115_v62, %v4117_v63 }
 0x39d   : > { %20930 = vmatmul.mubr.msk.f32.gmra.mrb[10].mxu1 %vm514_vm2, %v23706_v61  ;;  %v4113_v61 = vrot.slane %v19046_v45, 2 }
 0x39e   : > { %20934 = vmatprep.mubr.msk.f32.mxu1 %vm514_vm2, %v19045_v0 }
 0x39f   : > { %v4114_v2 = vsel %vm706_vm4, %v4112_v59, %v4113_v61  ;;  %v4116_v3 = vsel %vm706_vm4, %v4113_v61, %v4115_v62  ;;  %v23914_v59 = vld [vmem:[%s26375_s1] sm:$0xff]  ;;  %v19106_v61 = vld [vmem:[%s23135_s24 + $0x128] sm:$0xff] }
 0x3a0   : > { %v5129_v26 = vrot.slane %v19106_v61, 2 }
 0x3a1   : > { %20935 = vmatmul.mubr.msk.f32.vlgmr.msra.gmra.mrb[8].mxu1 %vm514_vm2, %v19046_v45 }
 0x3a2   : > { %20937 = vmatprep.mubr.msk.f32.mxu1 %vm514_vm2, %v19047_v49  ;;  %20941 = vmatpush3.msk.msra.mxu1 %vm523_vm0, %v23170_v24 }
 0x3a3   : > { %20948 = vmatprep.subr.msk.mxu1 %vm523_vm0, %v23187_v34 }
 0x3a5   : > { %20938 = vmatmul.mubr.msk.f32.gmra.mrb[10].mxu1 %vm514_vm2, %v19048_v54 }
 0x3a6   : > { %20942 = vmatprep.mubr.msk.f32.mxu1 %vm514_vm2, %v4010_v57 }
 0x3a9   : > { %20943 = vmatmul.mubr.msk.f32.vlgmr.msra.gmra.mrb[8].mxu1 %vm514_vm2, %v4012_v58 }
 0x3aa   : > { %20945 = vmatprep.mubr.msk.f32.mxu1 %vm514_vm2, %v4014_v60  ;;  %20949 = vmatpush3.msk.msra.mxu1 %vm523_vm0, %v23187_v34  ;;  %v19105_v60 = vld [vmem:[%s23135_s24 + $0x120] sm:$0xff] }
 0x3ab   : > { %20956 = vmatprep.subr.msk.mxu1 %vm523_vm0, %v23200_v41  ;;  %v5024_v62 = vrot.slane %v19105_v60, 1 }
 0x3ad   : > { %20946 = vmatmul.mubr.msk.f32.gmra.mrb[10].mxu1 %vm514_vm2, %v4013_v56 }
 0x3ae   : > { %20950 = vmatprep.mubr.msk.f32.mxu1 %vm514_vm2, %v4114_v2  ;;  %v5025_v2 = vrot.slane %v19106_v61, 1 }
 0x3b1   : > { %20951 = vmatmul.mubr.msk.f32.vlgmr.msra.gmra.mrb[8].mxu1 %vm514_vm2, %v4116_v3 }
 0x3b2   : > { %20953 = vmatprep.mubr.msk.f32.mxu1 %vm514_vm2, %v4118_v5  ;;  %20957 = vmatpush3.msk.msra.mxu1 %vm523_vm0, %v23200_v41  ;;  %v19108_v5 = vld [vmem:[%s23135_s24 + $0x138] sm:$0xff] }
 0x3b3   : > { %20964 = vmatprep.subr.msk.mxu1 %vm523_vm0, %v23213_v48 }
 0x3b5   : > { %20954 = vmatmul.mubr.msk.f32.gmra.mrb[10].mxu1 %vm514_vm2, %v4117_v63  ;;  %v19107_v63 = vld [vmem:[%s23135_s24 + $0x130] sm:$0xff] }
 0x3b6   : > { %20958 = vmatprep.mubr.msk.f32.mxu1 %vm514_vm2, %v23859_v6  ;;  %v5027_v3 = vrot.slane %v19107_v63, 1 }
 0x3b8   : > { %v5028_v9 = vsel %vm504_vm1, %v5025_v2, %v5027_v3 }
 0x3b9   : > { %20959 = vmatmul.mubr.msk.f32.vlgmr.msra.gmra.mrb[8].mxu1 %vm514_vm2, %v19065_v7 }
 0x3ba   : > { %20961 = vmatprep.mubr.msk.f32.mxu1 %vm514_vm2, %v19066_v10  ;;  %20965 = vmatpush3.msk.msra.mxu1 %vm523_vm0, %v23213_v48 }
 0x3bb   : > { %20972 = vmatprep.subr.msk.mxu1 %vm523_vm0, %v23239_v55 }
 0x3bd   : > { %20962 = vmatmul.mubr.msk.f32.gmra.mrb[10].mxu1 %vm514_vm2, %v19067_v28 }
 0x3be   : > { %20966 = vmatprep.mubr.msk.f32.mxu1 %vm514_vm2, %v4324_v32 }
 0x3c1   : > { %20967 = vmatmul.mubr.msk.f32.vlgmr.msra.gmra.mrb[8].mxu1 %vm514_vm2, %v4326_v35 }
 0x3c2   : > { %20969 = vmatprep.mubr.msk.f32.mxu1 %vm514_vm2, %v4328_v37  ;;  %20973 = vmatpush3.msk.msra.mxu1 %vm523_vm0, %v23239_v55 }
 0x3c5   : > { %20970 = vmatmul.mubr.msk.f32.gmra.mrb[10].mxu1 %vm514_vm2, %v4327_v30 }
 0x3c6   : > { %20974 = vmatprep.mubr.msk.f32.mxu1 %vm514_vm2, %v4428_v44 }
 0x3c9   : > { %20975 = vmatmul.mubr.msk.f32.vlgmr.msra.gmra.mrb[8].mxu1 %vm514_vm2, %v4430_v47 }
 0x3ca   : > { %20977 = vmatprep.mubr.msk.f32.mxu1 %vm514_vm2, %v4432_v50 }
 0x3cd   : > { %20978 = vmatmul.mubr.msk.f32.gmra.mrb[10].mxu1 %vm514_vm2, %v4431_v43 }
 0x3ce   : > { %21071 = vmatprep.mubr.msk.f32.mxu1 %vm1474_vm7, %v23306_v12 }
 0x458   : > { %v20907_v55 = vpop.f32.mrb[6].mxu1 }
 0x459   : > { %v3589_v51 = vadd.f32 %v20907_v55, %v23573_v4  ;;  %v3583_v0 = vpop.f32.mrb[7].mxu1 }
 0x45a   : > { %v3584_v45 = vadd.f32 %v23573_v4, %v3583_v0  ;;  %v24008_v0 = vld [vmem:[%s26375_s1 + $0x18] sm:$0x7] }
 0x45b   : > { %v3593_v46 = vmax.f32 %v3589_v51, 0.0 }
 0x45c   : > { %v3592_v49 = vmax.f32 %v3584_v45, 0.0 }
 0x45d   : > { %3596 = vst.msk [vmem:[#allocation2 + $0x51] sm:$0x7f] %vm1563_vm13, %v3593_v46 }
 0x45e   : > { %3595 = vst.msk [vmem:[#allocation2 + $0x49] sm:$0xff] %vm421_vm8, %v3592_v49 }
 0x49c   : > { %v20976_v52 = vpop.f32.mrb[8].mxu1 }
 0x49d   : > { %v4507_v53 = vpop.f32.mrb[9].mxu1 }
 0x49e   : > { %v22158_v54 = vpack.c.bf16 %v20976_v52, %v4507_v53  ;;  %v5443_v52 = vrot.slane %v23982_v39, 2 }
 0x4a0   : > { %v20979_v56 = vpop.f32.mrb[10].mxu1  ;;  %22159 = vmatprep.subr.bf16.mxu0 %v22158_v54 }
 0x4a1   : > { %v4517_v57 = vpop.f32.mrb[11].mxu1  ;;  %22161 = vmatpush3.bf16.msra.mxu0 %v22158_v54 }
 0x4a2   : > { %v22162_v58 = vpack.c.bf16 %v20979_v56, %v4517_v57 }
 0x4a4   : > { %22164 = vmatprep.subr.msk.bf16.mxu0 %vm23383_vm10, %v22162_v58 }
 0x4a5   : > { %22167 = vmatpush3.bf16.msk.msra.mxu0 %vm23383_vm10, %v22162_v58 }
 0x4a6   : > { %20991 = vmatprep.subr.msk.mxu0 %vm523_vm0, %v23122_v1 }
 0x4a8   : > { %20989 = vmatmul.mubr.msk.f32.vlgmr.msra.gmra.mrb[10].mxu0 %vm1474_vm7, %v23392_v25 }
 0x4a9   : > { %20992 = vmatpush3.msk.msra.mxu0 %vm523_vm0, %v23122_v1  ;;  %20993 = vmatprep.mubr.msk.f32.mxu0 %vm514_vm2, %v4324_v32 }
 0x4aa   : > { %20999 = vmatprep.subr.msk.mxu0 %vm523_vm0, %v23914_v59 }
 0x4ac   : > { %20994 = vmatmul.mubr.msk.f32.vlgmr.msra.gmra.mrb[12].mxu0 %vm514_vm2, %v4326_v35 }
 0x4ad   : > { %20996 = vmatprep.mubr.msk.f32.mxu0 %vm514_vm2, %v4328_v37  ;;  %21000 = vmatpush3.msk.msra.mxu0 %vm523_vm0, %v23914_v59  ;;  %v23974_v37 = vld [vmem:[%s23135_s24 + $0x140] sm:$0xff] }
 0x4ae   : > { %21007 = vmatprep.subr.msk.mxu0 %vm523_vm0, %v23148_v16  ;;  %v5338_v42 = vrot.slane %v23974_v37, 1  ;;  %v5442_v46 = vrot.slane %v23974_v37, 2 }
 0x4b0   : > { %20997 = vmatmul.mubr.msk.f32.gmra.mrb[14].mxu0 %vm514_vm2, %v4327_v30  ;;  %v5133_v30 = vrot.slane %v19108_v5, 2  ;;  %v24036_v56 = vsel %vm706_vm4, %v5442_v46, %v5443_v52 }
 0x4b1   : > { %21001 = vmatprep.mubr.msk.f32.mxu0 %vm514_vm2, %v23859_v6  ;;  %v5029_v6 = vrot.slane %v19108_v5, 1 }
 0x4b3   : > { %v5030_v18 = vsel %vm504_vm1, %v5027_v3, %v5029_v6  ;;  %v16125_v3 = vld [vmem:[#allocation2 + $0x48] sm:$0xff] }
 0x4b4   : > { %21002 = vmatmul.mubr.msk.f32.vlgmr.msra.gmra.mrb[12].mxu0 %vm514_vm2, %v19065_v7  ;;  %v5026_v7 = vsel %vm504_vm1, %v5024_v62, %v5025_v2  ;;  %v26388_v2 = vsub.s32 5, %v23302_v8 }
 0x4b5   : > { %21004 = vmatprep.mubr.msk.f32.mxu0 %vm514_vm2, %v19066_v10  ;;  %21008 = vmatpush3.msk.msra.mxu0 %vm523_vm0, %v23148_v16  ;;  %v5128_v10 = vrot.slane %v19105_v60, 2 }
 0x4b6   : > { %21015 = vmatprep.subr.msk.mxu0 %vm523_vm0, %v23158_v17 }
 0x4b7   : > { %v5130_v32 = vsel %vm706_vm4, %v5128_v10, %v5129_v26  ;;  %v16127_v10 = vld [vmem:[#allocation2 + $0x58] sm:$0x1] }
 0x4b8   : > { %21005 = vmatmul.mubr.msk.f32.gmra.mrb[14].mxu0 %vm514_vm2, %v19067_v28  ;;  %v5131_v28 = vrot.slane %v19107_v63, 2 }
 0x4b9   : > { %21009 = vmatprep.mubr.msk.f32.mxu0 %vm514_vm2, %v4428_v44  ;;  %v5339_v44 = vrot.slane %v23982_v39, 1 }
 0x4ba   : > { %v5132_v35 = vsel %vm706_vm4, %v5129_v26, %v5131_v28  ;;  %v5134_v36 = vsel %vm706_vm4, %v5131_v28, %v5133_v30 }
 0x4bb   : > { %v24003_v51 = vsel %vm504_vm1, %v5338_v42, %v5339_v44 }
 0x4bc   : > { %21010 = vmatmul.mubr.msk.f32.vlgmr.msra.gmra.mrb[12].mxu0 %vm514_vm2, %v4430_v47 }
 0x4bd   : > { %21012 = vmatprep.mubr.msk.f32.mxu0 %vm514_vm2, %v4432_v50  ;;  %21016 = vmatpush3.msk.msra.mxu0 %vm523_vm0, %v23158_v17  ;;  %v23997_v50 = vld [vmem:[%s23135_s24 + $0x158] sm:$0xff] }
 0x4be   : > { %21023 = vmatprep.subr.msk.mxu0 %vm523_vm0, %v23170_v24  ;;  %v24000_v55 = vrot.slane %v23997_v50, 1  ;;  %v24033_v54 = vrot.slane %v23997_v50, 2 }
 0x4c0   : > { %21013 = vmatmul.mubr.msk.f32.gmra.mrb[14].mxu0 %vm514_vm2, %v4431_v43  ;;  %v23986_v43 = vld [vmem:[%s23135_s24 + $0x150] sm:$0xff] }
 0x4c1   : > { %21017 = vmatprep.mubr.msk.f32.mxu0 %vm514_vm2, %v19105_v60  ;;  %v5341_v47 = vrot.slane %v23986_v43, 1  ;;  %v5445_v53 = vrot.slane %v23986_v43, 2  ;;  %v16094_v60 = vld [vmem:[#allocation2 + $0x40] sm:$0x1] }
 0x4c2   : > { %v16112_v62 = vmul.f32 %v16094_v60, %v23752_v23 }
 0x4c3   : > { %v24017_v45 = vsel %vm504_vm1, %v5339_v44, %v5341_v47  ;;  %v24022_v49 = vsel %vm504_vm1, %v5341_v47, %v24000_v55  ;;  %v24043_v57 = vsel %vm706_vm4, %v5443_v52, %v5445_v53  ;;  %v24047_v58 = vsel %vm706_vm4, %v5445_v53, %v24033_v54 }
 0x4c4   : > { %21018 = vmatmul.mubr.msk.f32.vlgmr.msra.gmra.mrb[12].mxu0 %vm514_vm2, %v19106_v61  ;;  %v26390_v61 = vsub.s32 4, %v23302_v8 }
 0x4c5   : > { %21020 = vmatprep.mubr.msk.f32.mxu0 %vm514_vm2, %v19107_v63  ;;  %21024 = vmatpush3.msk.msra.mxu0 %vm523_vm0, %v23170_v24  ;;  %v26389_v63 = vsub.s32 3, %v23302_v8 }
 0x4c6   : > { %21031 = vmatprep.subr.msk.mxu0 %vm523_vm0, %v23187_v34 }
 0x4c7   : > { %v24073_v28 = vrot.slane %v23738_v14, %v26389_v63 }
 0x4c8   : > { %21021 = vmatmul.mubr.msk.f32.gmra.mrb[14].mxu0 %vm514_vm2, %v19108_v5  ;;  %v16126_v5 = vld [vmem:[#allocation2 + $0x50] sm:$0xff] }
 0x4c9   : > { %21025 = vmatprep.mubr.msk.f32.mxu0 %vm514_vm2, %v5026_v7  ;;  %v16119_v7 = vrot.slane %v16112_v62, 2  ;;  %v16128_v44 = vmul.f32 %v16125_v3, %v24073_v28  ;;  %v16129_v47 = vmul.f32 %v16126_v5, %v24073_v28 }
 0x4cc   : > { %21026 = vmatmul.mubr.msk.f32.vlgmr.msra.gmra.mrb[12].mxu0 %vm514_vm2, %v5028_v9  ;;  %v16096_v9 = vmul.f32 %v23747_v21, %v23763_v29  ;;  %v16120_v21 = vsel %vm706_vm4, %v16117_v38, %v16119_v7  ;;  %v16130_v7 = vadd.f32 %v16128_v44, %v23778_v40 }
 0x4cd   : > { %21028 = vmatprep.mubr.msk.f32.mxu0 %vm514_vm2, %v5030_v18  ;;  %21032 = vmatpush3.msk.msra.mxu0 %vm523_vm0, %v23187_v34 }
 0x4ce   : > { %21039 = vmatprep.subr.msk.mxu0 %vm523_vm0, %v23200_v41 }
 0x4d0   : > { %21029 = vmatmul.mubr.msk.f32.gmra.mrb[14].mxu0 %vm514_vm2, %v5029_v6  ;;  %v24064_v6 = vrot.slane %v23738_v14, %v26390_v61 }
 0x4d1   : > { %21033 = vmatprep.mubr.msk.f32.mxu0 %vm514_vm2, %v5130_v32  ;;  %v16109_v32 = vadd.f32 %v16104_v31, %v16096_v9 }
 0x4d2   : > { %v16132_v18 = vmul.f32 %v16125_v3, %v24064_v6  ;;  %v16133_v26 = vmul.f32 %v16126_v5, %v24064_v6 }
 0x4d3   : > { %v16124_v62 = vadd.f32 %v16120_v21, %v16109_v32  ;;  %v16160_v32 = vld [vmem:[#allocation2 + $0x70] sm:$0x1] }
 0x4d4   : > { %21034 = vmatmul.mubr.msk.f32.vlgmr.msra.gmra.mrb[12].mxu0 %vm514_vm2, %v5132_v35  ;;  %v16136_v53 = vrot.slane %v16132_v18, 1  ;;  %v16137_v60 = vrot.slane %v16133_v26, 1  ;;  %v26386_v18 = vsub.s32 6, %v23302_v8 }
 0x4d5   : > { %21036 = vmatprep.mubr.msk.f32.mxu0 %vm514_vm2, %v5134_v36  ;;  %21040 = vmatpush3.msk.msra.mxu0 %vm523_vm0, %v23200_v41  ;;  %v16131_v9 = vadd.f32 %v16129_v47, %v16124_v62 }
 0x4d6   : > { %21047 = vmatprep.subr.msk.mxu0 %vm523_vm0, %v23213_v48  ;;  %v24108_v44 = vrot.slane %v23738_v14, %v26386_v18 }
 0x4d8   : > { %21037 = vmatmul.mubr.msk.f32.gmra.mrb[14].mxu0 %vm514_vm2, %v5133_v30  ;;  %v24078_v30 = vrot.slane %v23738_v14, %v26388_v2 }
 0x4d9   : > { %21041 = vmatprep.mubr.msk.f32.mxu0 %vm514_vm2, %v23974_v37 }
 0x4da   : > { %v16145_v46 = vmul.f32 %v16127_v10, %v24078_v30  ;;  %v16144_v27 = vmul.f32 %v16126_v5, %v24078_v30  ;;  %v16143_v38 = vmul.f32 %v16125_v3, %v24078_v30  ;;  %v16138_v10 = vsel %vm504_vm1, %v16136_v53, %v16137_v60  ;;  %v24101_v3 = vld [vmem:[%s26377_s3 + $0x8] ss:$0 sm:$0xff] }
 0x4db   : > { %v26387_v5 = vsub.s32 7, %v23302_v8  ;;  %v16141_v21 = vadd.f32 %v16138_v10, %v16130_v7 }
 0x4dc   : > { %21042 = vmatmul.mubr.msk.f32.vlgmr.msra.gmra.mrb[12].mxu0 %vm514_vm2, %v23982_v39  ;;  %v16149_v26 = vrot.slane %v16143_v38, 2 }
 0x4dd   : > { %21044 = vmatprep.mubr.msk.f32.mxu0 %vm514_vm2, %v23986_v43  ;;  %21048 = vmatpush3.msk.msra.mxu0 %vm523_vm0, %v23213_v48  ;;  %v24113_v47 = vrot.slane %v23738_v14, %v26387_v5 }
 0x4de   : > { %21055 = vmatprep.subr.msk.mxu0 %vm523_vm0, %v24008_v0 }
 0x4e0   : > { %21045 = vmatmul.mubr.msk.f32.gmra.mrb[14].mxu0 %vm514_vm2, %v23997_v50 }
 0x4e1   : > { %21049 = vmatprep.mubr.msk.f32.mxu0 %vm514_vm2, %v24003_v51 }
 0x4e4   : > { %21050 = vmatmul.mubr.msk.f32.vlgmr.msra.gmra.mrb[12].mxu0 %vm514_vm2, %v24017_v45 }
 0x4e5   : > { %21052 = vmatprep.mubr.msk.f32.mxu0 %vm514_vm2, %v24022_v49  ;;  %21056 = vmatpush3.msk.msra.mxu0 %vm523_vm0, %v24008_v0 }
 0x4e8   : > { %21053 = vmatmul.mubr.msk.f32.gmra.mrb[14].mxu0 %vm514_vm2, %v24000_v55 }
 0x4e9   : > { %21057 = vmatprep.mubr.msk.f32.mxu0 %vm514_vm2, %v24036_v56 }
 0x4ec   : > { %21058 = vmatmul.mubr.msk.f32.vlgmr.msra.gmra.mrb[12].mxu0 %vm514_vm2, %v24043_v57 }
 0x4ed   : > { %21060 = vmatprep.mubr.msk.f32.mxu0 %vm514_vm2, %v24047_v58 }
 0x4f0   : > { %21061 = vmatmul.mubr.msk.f32.gmra.mrb[14].mxu0 %vm514_vm2, %v24033_v54 }
 0x4f1   : > { %21154 = vmatprep.mubr.msk.f32.mxu0 %vm1474_vm7, %v23306_v12 }
 0x57b   : > { %v20990_v35 = vpop.f32.mrb[10].mxu0 }
 0x57c   : > { %v4605_v36 = vadd.f32 %v20990_v35, %v23573_v4  ;;  %v4599_v42 = vpop.f32.mrb[11].mxu0  ;;  %v16150_v35 = vrot.slane %v16144_v27, 2 }
 0x57d   : > { %v4600_v52 = vadd.f32 %v23573_v4, %v4599_v42  ;;  %v16152_v4 = vrot.slane %v16145_v46, 2  ;;  %v16178_v42 = vmul.f32 %v24101_v3, %v16160_v32 }
 0x57e   : > { %v4609_v31 = vmax.f32 %v4605_v36, 0.0  ;;  %v16142_v36 = vadd.f32 %v16137_v60, %v16131_v9  ;;  %v16151_v46 = vsel %vm706_vm4, %v16149_v26, %v16150_v35 }
 0x57f   : > { %v4608_v33 = vmax.f32 %v4600_v52, 0.0  ;;  %v16153_v40 = vsel %vm706_vm4, %v16150_v35, %v16152_v4  ;;  %v16156_v52 = vadd.f32 %v16151_v46, %v16141_v21  ;;  %v16185_v9 = vrot.slane %v16178_v42, 2 }
 0x580   : > { %4612 = vst.msk [vmem:[#allocation2 + $0x69] sm:$0x7f] %vm1563_vm13, %v4609_v31  ;;  %v16157_v53 = vadd.f32 %v16153_v40, %v16142_v36 }
 0x581   : > { %4611 = vst.msk [vmem:[#allocation2 + $0x61] sm:$0xff] %vm421_vm8, %v4608_v33 }
 0x588   : > { %v16158_v60 = vld [vmem:[#allocation2 + $0x60] sm:$0xff]  ;;  %v24116_v27 = vld [vmem:[#allocation2 + $0x68] sm:$0xff] }
 0x589   : > { %v16161_v31 = vmul.f32 %v16158_v60, %v24108_v44  ;;  %v16162_v62 = vmul.f32 %v24116_v27, %v24108_v44  ;;  %v16165_v33 = vmul.f32 %v16158_v60, %v24113_v47  ;;  %v16166_v38 = vmul.f32 %v24116_v27, %v24113_v47 }
 0x58a   : > { %v16176_v14 = vmul.f32 %v24101_v3, %v16158_v60  ;;  %v16177_v7 = vmul.f32 %v24101_v3, %v24116_v27  ;;  %v16351_v36 = vmul.f32 %v16158_v60, %v23745_v20  ;;  %v24130_v40 = vmul.f32 %v24116_v27, %v23745_v20 }
 0x58b   : > { %v16163_v10 = vadd.f32 %v16161_v31, %v16156_v52  ;;  %v16164_v35 = vadd.f32 %v16162_v62, %v16157_v53  ;;  %v16169_v4 = vrot.slane %v16165_v33, 1  ;;  %v16170_v26 = vrot.slane %v16166_v38, 1 }
 0x58c   : > { %v16182_v32 = vrot.slane %v16176_v14, 2  ;;  %v16183_v21 = vrot.slane %v16177_v7, 2  ;;  %v16362_v46 = vmul.f32 %v16158_v60, %v23752_v23  ;;  %v16347_v52 = vmul.f32 %v16158_v60, %v23763_v29  ;;  %v24145_v7 = vld [vmem:[%s26378_s4] ss:$0 sm:$0xff] }
 0x58d   : > { %v16171_v18 = vsel %vm504_vm1, %v16169_v4, %v16170_v26  ;;  %v16175_v5 = vadd.f32 %v16170_v26, %v16164_v35  ;;  %v16355_v53 = vrot.slane %v16351_v36, 1  ;;  %v16356_v31 = vrot.slane %v24130_v40, 1 }
 0x58e   : > { %v16186_v2 = vsel %vm706_vm4, %v16183_v21, %v16185_v9  ;;  %v16174_v42 = vadd.f32 %v16171_v18, %v16163_v10  ;;  %v16184_v62 = vsel %vm706_vm4, %v16182_v32, %v16183_v21  ;;  %v24140_v38 = vmul.f32 %v24116_v27, %v23752_v23 }
 0x58f   : > { %v16190_v33 = vadd.f32 %v16186_v2, %v16175_v5  ;;  %v16368_v14 = vrot.slane %v16362_v46, 2  ;;  %v16357_v18 = vsel %vm504_vm1, %v16355_v53, %v16356_v31 }
 0x590   : > { %v16189_v9 = vadd.f32 %v16184_v62, %v16174_v42  ;;  %v16360_v10 = vadd.f32 %v16357_v18, %v16347_v52  ;;  %v16369_v2 = vrot.slane %v24140_v38, 2 }
 0x591   : > { %v16192_v60 = vadd.f32 %v24145_v7, %v16190_v33 }
 0x592   : > { %v16191_v5 = vadd.f32 %v24145_v7, %v16189_v9  ;;  %v16370_v4 = vsel %vm706_vm4, %v16368_v14, %v16369_v2 }
 0x593   : > { %v16194_v35 = vmax.f32 %v16192_v60, 0.0  ;;  %v24156_v32 = vadd.f32 %v16370_v4, %v16360_v10 }
 0x594   : > { %v16193_v26 = vmax.f32 %v16191_v5, 0.0  ;;  %v24240_v5 = vld [vmem:[%s23135_s24 + $0x180] sm:$0xff] }
 0x595   : > { %v6354_v4 = vrot.slane %v24240_v5, 1 }
 0x596   : > { %v24158_v21 = vpack.c.bf16 %v16194_v35, %v16193_v26  ;;  %v19185_v35 = vld [vmem:[%s23135_s24 + $0x188] sm:$0xff]  ;;  %v19186_v26 = vld [vmem:[%s23135_s24 + $0x190] sm:$0xff] }
 0x5bf   : > { %v21059_v36 = vpop.f32.mrb[12].mxu0 }
 0x5c0   : > { %v5523_v46 = vpop.f32.mrb[13].mxu0 }
 0x5c1   : > { %v22168_v42 = vpack.c.bf16 %v21059_v36, %v5523_v46  ;;  %v6355_v36 = vrot.slane %v19185_v35, 1  ;;  %v6357_v46 = vrot.slane %v19186_v26, 1 }
 0x5c3   : > { %v21062_v53 = vpop.f32.mrb[14].mxu0  ;;  %22169 = vmatprep.subr.bf16.mxu1 %v22168_v42 }
 0x5c4   : > { %v5533_v52 = vpop.f32.mrb[15].mxu0  ;;  %22171 = vmatpush3.bf16.msra.mxu1 %v22168_v42  ;;  %v19187_v42 = vld [vmem:[%s23135_s24 + $0x198] sm:$0xff] }
 0x5c5   : > { %v22172_v62 = vpack.c.bf16 %v21062_v53, %v5533_v52  ;;  %v6359_v53 = vrot.slane %v19187_v42, 1  ;;  %v6356_v52 = vsel %vm504_vm1, %v6354_v4, %v6355_v36 }
 0x5c7   : > { %22174 = vmatprep.subr.msk.bf16.mxu1 %vm23383_vm10, %v22172_v62 }
 0x5c8   : > { %22177 = vmatpush3.bf16.msk.msra.mxu1 %vm23383_vm10, %v22172_v62  ;;  %v6358_v62 = vsel %vm504_vm1, %v6355_v36, %v6357_v46 }
 0x5c9   : > { %21074 = vmatprep.subr.msk.mxu1 %vm523_vm0, %v23122_v1 }
 0x5cb   : > { %21072 = vmatmul.mubr.msk.f32.vlgmr.msra.gmra.mrb[12].mxu1 %vm1474_vm7, %v23392_v25 }
 0x5cc   : > { %21075 = vmatpush3.msk.msra.mxu1 %vm523_vm0, %v23122_v1  ;;  %21076 = vmatprep.mubr.msk.f32.mxu1 %vm514_vm2, %v24003_v51 }
 0x5cd   : > { %21082 = vmatprep.subr.msk.mxu1 %vm523_vm0, %v23914_v59 }
 0x5cf   : > { %21077 = vmatmul.mubr.msk.f32.vlgmr.msra.gmra.mrb[14].mxu1 %vm514_vm2, %v24017_v45  ;;  %v19168_v45 = vld [vmem:[%s23135_s24 + $0x178] sm:$0xff] }
 0x5d0   : > { %21079 = vmatprep.mubr.msk.f32.mxu1 %vm514_vm2, %v24022_v49  ;;  %21083 = vmatpush3.msk.msra.mxu1 %vm523_vm0, %v23914_v59  ;;  %v6045_v49 = vrot.slane %v19168_v45, 1  ;;  %v6149_v9 = vrot.slane %v19168_v45, 2 }
 0x5d1   : > { %21090 = vmatprep.subr.msk.mxu1 %vm523_vm0, %v23148_v16 }
 0x5d3   : > { %21080 = vmatmul.mubr.msk.f32.gmra.mrb[16].mxu1 %vm514_vm2, %v24000_v55 }
 0x5d4   : > { %21084 = vmatprep.mubr.msk.f32.mxu1 %vm514_vm2, %v23974_v37  ;;  %v19165_v37 = vld [vmem:[%s23135_s24 + $0x160] sm:$0xff] }
 0x5d7   : > { %21085 = vmatmul.mubr.msk.f32.vlgmr.msra.gmra.mrb[14].mxu1 %vm514_vm2, %v23982_v39  ;;  %v19166_v39 = vld [vmem:[%s23135_s24 + $0x168] sm:$0xff] }
 0x5d8   : > { %21087 = vmatprep.mubr.msk.f32.mxu1 %vm514_vm2, %v23986_v43  ;;  %21091 = vmatpush3.msk.msra.mxu1 %vm523_vm0, %v23148_v16  ;;  %v6040_v43 = vrot.slane %v19165_v37, 1  ;;  %v6041_v55 = vrot.slane %v19166_v39, 1  ;;  %v6145_v33 = vrot.slane %v19166_v39, 2 }
 0x5d9   : > { %21098 = vmatprep.subr.msk.mxu1 %vm523_vm0, %v23158_v17 }
 0x5db   : > { %21088 = vmatmul.mubr.msk.f32.gmra.mrb[16].mxu1 %vm514_vm2, %v23997_v50  ;;  %v19167_v50 = vld [vmem:[%s23135_s24 + $0x170] sm:$0xff] }
 0x5dc   : > { %21092 = vmatprep.mubr.msk.f32.mxu1 %vm514_vm2, %v24036_v56  ;;  %v6043_v51 = vrot.slane %v19167_v50, 1  ;;  %v6042_v56 = vsel %vm504_vm1, %v6040_v43, %v6041_v55  ;;  %v6147_v14 = vrot.slane %v19167_v50, 2  ;;  %v6459_v43 = vrot.slane %v19185_v35, 2 }
 0x5de   : > { %v6148_v60 = vsel %vm706_vm4, %v6145_v33, %v6147_v14  ;;  %v6150_v10 = vsel %vm706_vm4, %v6147_v14, %v6149_v9 }
 0x5df   : > { %21093 = vmatmul.mubr.msk.f32.vlgmr.msra.gmra.mrb[14].mxu1 %vm514_vm2, %v24043_v57  ;;  %v6144_v57 = vrot.slane %v19165_v37, 2 }
 0x5e0   : > { %21095 = vmatprep.mubr.msk.f32.mxu1 %vm514_vm2, %v24047_v58  ;;  %21099 = vmatpush3.msk.msra.mxu1 %vm523_vm0, %v23158_v17  ;;  %v6046_v58 = vsel %vm504_vm1, %v6043_v51, %v6045_v49 }
 0x5e1   : > { %21106 = vmatprep.subr.msk.mxu1 %vm523_vm0, %v23170_v24  ;;  %v6146_v18 = vsel %vm706_vm4, %v6144_v57, %v6145_v33 }
 0x5e3   : > { %21096 = vmatmul.mubr.msk.f32.gmra.mrb[16].mxu1 %vm514_vm2, %v24033_v54  ;;  %v6044_v54 = vsel %vm504_vm1, %v6041_v55, %v6043_v51  ;;  %v6463_v55 = vrot.slane %v19187_v42, 2 }
 0x5e4   : > { %21100 = vmatprep.mubr.msk.f32.mxu1 %vm514_vm2, %v19165_v37  ;;  %v6458_v37 = vrot.slane %v24240_v5, 2 }
 0x5e6   : > { %v6460_v51 = vsel %vm706_vm4, %v6458_v37, %v6459_v43 }
 0x5e7   : > { %21101 = vmatmul.mubr.msk.f32.vlgmr.msra.gmra.mrb[14].mxu1 %vm514_vm2, %v19166_v39  ;;  %v6360_v39 = vsel %vm504_vm1, %v6357_v46, %v6359_v53 }
 0x5e8   : > { %21103 = vmatprep.mubr.msk.f32.mxu1 %vm514_vm2, %v19167_v50  ;;  %21107 = vmatpush3.msk.msra.mxu1 %vm523_vm0, %v23170_v24  ;;  %v6461_v50 = vrot.slane %v19186_v26, 2 }
 0x5e9   : > { %21114 = vmatprep.subr.msk.mxu1 %vm523_vm0, %v23187_v34 }
 0x5eb   : > { %21104 = vmatmul.mubr.msk.f32.gmra.mrb[16].mxu1 %vm514_vm2, %v19168_v45  ;;  %v6462_v45 = vsel %vm706_vm4, %v6459_v43, %v6461_v50 }
 0x5ec   : > { %21108 = vmatprep.mubr.msk.f32.mxu1 %vm514_vm2, %v6042_v56 }
 0x5ef   : > { %21109 = vmatmul.mubr.msk.f32.vlgmr.msra.gmra.mrb[14].mxu1 %vm514_vm2, %v6044_v54  ;;  %v24280_v54 = vld [vmem:[%s26376_s2] ss:$0 sm:$0xff] }
 0x5f0   : > { %21111 = vmatprep.mubr.msk.f32.mxu1 %vm514_vm2, %v6046_v58  ;;  %21115 = vmatpush3.msk.msra.mxu1 %vm523_vm0, %v23187_v34 }
 0x5f1   : > { %21122 = vmatprep.subr.msk.mxu1 %vm523_vm0, %v23200_v41 }
 0x5f3   : > { %21112 = vmatmul.mubr.msk.f32.gmra.mrb[16].mxu1 %vm514_vm2, %v6045_v49  ;;  %v6464_v49 = vsel %vm706_vm4, %v6461_v50, %v6463_v55 }
 0x5f4   : > { %21116 = vmatprep.mubr.msk.f32.mxu1 %vm514_vm2, %v6146_v18 }
 0x5f7   : > { %21117 = vmatmul.mubr.msk.f32.vlgmr.msra.gmra.mrb[14].mxu1 %vm514_vm2, %v6148_v60 }
 0x5f8   : > { %21119 = vmatprep.mubr.msk.f32.mxu1 %vm514_vm2, %v6150_v10  ;;  %21123 = vmatpush3.msk.msra.mxu1 %vm523_vm0, %v23200_v41 }
 0x5f9   : > { %21130 = vmatprep.subr.msk.mxu1 %vm523_vm0, %v23213_v48 }
 0x5fb   : > { %21120 = vmatmul.mubr.msk.f32.gmra.mrb[16].mxu1 %vm514_vm2, %v6149_v9 }
 0x5fc   : > { %21124 = vmatprep.mubr.msk.f32.mxu1 %vm514_vm2, %v24240_v5 }
 0x5ff   : > { %21125 = vmatmul.mubr.msk.f32.vlgmr.msra.gmra.mrb[14].mxu1 %vm514_vm2, %v19185_v35 }
 0x600   : > { %21127 = vmatprep.mubr.msk.f32.mxu1 %vm514_vm2, %v19186_v26  ;;  %21131 = vmatpush3.msk.msra.mxu1 %vm523_vm0, %v23213_v48 }
 0x601   : > { %21138 = vmatprep.subr.msk.mxu1 %vm523_vm0, %v24008_v0 }
 0x603   : > { %21128 = vmatmul.mubr.msk.f32.gmra.mrb[16].mxu1 %vm514_vm2, %v19187_v42 }
 0x604   : > { %21132 = vmatprep.mubr.msk.f32.mxu1 %vm514_vm2, %v6356_v52 }
 0x607   : > { %21133 = vmatmul.mubr.msk.f32.vlgmr.msra.gmra.mrb[14].mxu1 %vm514_vm2, %v6358_v62 }
 0x608   : > { %21135 = vmatprep.mubr.msk.f32.mxu1 %vm514_vm2, %v6360_v39  ;;  %21139 = vmatpush3.msk.msra.mxu1 %vm523_vm0, %v24008_v0 }
 0x60b   : > { %21136 = vmatmul.mubr.msk.f32.gmra.mrb[16].mxu1 %vm514_vm2, %v6359_v53 }
 0x60c   : > { %21140 = vmatprep.mubr.msk.f32.mxu1 %vm514_vm2, %v6460_v51 }
 0x60f   : > { %21141 = vmatmul.mubr.msk.f32.vlgmr.msra.gmra.mrb[14].mxu1 %vm514_vm2, %v6462_v45 }
 0x610   : > { %21143 = vmatprep.mubr.msk.f32.mxu1 %vm514_vm2, %v6464_v49 }
 0x613   : > { %21144 = vmatmul.mubr.msk.f32.gmra.mrb[16].mxu1 %vm514_vm2, %v6463_v55 }
 0x614   : > { %21237 = vmatprep.mubr.msk.f32.mxu1 %vm1474_vm7, %v23306_v12 }
 0x69e   : > { %v21073_v56 = vpop.f32.mrb[12].mxu1 }
 0x69f   : > { %v5621_v57 = vadd.f32 %v24280_v54, %v21073_v56  ;;  %v5615_v58 = vpop.f32.mrb[13].mxu1 }
 0x6a0   : > { %v5616_v33 = vadd.f32 %v24280_v54, %v5615_v58 }
 0x6a1   : > { %v5625_v14 = vmax.f32 %v5621_v57, 0.0 }
 0x6a2   : > { %v5624_v9 = vmax.f32 %v5616_v33, 0.0  ;;  %v24355_v33 = vld [vmem:[%s23135_s24 + $0x1c0] sm:$0xff] }
 0x6a3   : > { %5628 = vst.msk [vmem:[#allocation2 + $0x81] sm:$0x7f] %vm1563_vm13, %v5625_v14  ;;  %v24363_v14 = vld [vmem:[%s23135_s24 + $0x1c8] sm:$0xff] }
 0x6a4   : > { %5627 = vst.msk [vmem:[#allocation2 + $0x79] sm:$0xff] %vm421_vm8, %v5624_v9  ;;  %v7370_v9 = vrot.slane %v24355_v33, 1 }
 0x6e2   : > { %v21142_v18 = vpop.f32.mrb[14].mxu1 }
 0x6e3   : > { %v6539_v60 = vpop.f32.mrb[15].mxu1 }
 0x6e4   : > { %v22178_v10 = vpack.c.bf16 %v21142_v18, %v6539_v60  ;;  %v24367_v18 = vld [vmem:[%s23135_s24 + $0x1d0] sm:$0xff]  ;;  %v7371_v60 = vrot.slane %v24363_v14, 1 }
 0x6e6   : > { %v21145_v4 = vpop.f32.mrb[16].mxu1  ;;  %22179 = vmatprep.subr.bf16.mxu0 %v22178_v10 }
 0x6e7   : > { %v6549_v36 = vpop.f32.mrb[17].mxu1  ;;  %22181 = vmatpush3.bf16.msra.mxu0 %v22178_v10  ;;  %v7373_v10 = vrot.slane %v24367_v18, 1 }
 0x6e8   : > { %v22182_v46 = vpack.c.bf16 %v21145_v4, %v6549_v36  ;;  %v24378_v4 = vld [vmem:[%s23135_s24 + $0x1d8] sm:$0xff] }
 0x6e9   : > { %v24381_v36 = vrot.slane %v24378_v4, 1 }
 0x6ea   : > { %22184 = vmatprep.subr.msk.bf16.mxu0 %vm23383_vm10, %v22182_v46 }
 0x6eb   : > { %22187 = vmatpush3.bf16.msk.msra.mxu0 %vm23383_vm10, %v22182_v46  ;;  %v24384_v46 = vsel %vm504_vm1, %v7370_v9, %v7371_v60 }
 0x6ec   : > { %21157 = vmatprep.subr.msk.mxu0 %vm523_vm0, %v23122_v1 }
 0x6ee   : > { %21155 = vmatmul.mubr.msk.f32.vlgmr.msra.gmra.mrb[16].mxu0 %vm1474_vm7, %v23392_v25 }
 0x6ef   : > { %21158 = vmatpush3.msk.msra.mxu0 %vm523_vm0, %v23122_v1  ;;  %21159 = vmatprep.mubr.msk.f32.mxu0 %vm514_vm2, %v6356_v52 }
 0x6f0   : > { %21165 = vmatprep.subr.msk.mxu0 %vm523_vm0, %v23914_v59 }
 0x6f2   : > { %21160 = vmatmul.mubr.msk.f32.vlgmr.msra.gmra.mrb[18].mxu0 %vm514_vm2, %v6358_v62  ;;  %v19228_v62 = vld [vmem:[%s23135_s24 + $0x1b8] sm:$0xff] }
 0x6f3   : > { %21162 = vmatprep.mubr.msk.f32.mxu0 %vm514_vm2, %v6360_v39  ;;  %21166 = vmatpush3.msk.msra.mxu0 %vm523_vm0, %v23914_v59  ;;  %v7061_v37 = vrot.slane %v19228_v62, 1 }
 0x6f4   : > { %21173 = vmatprep.subr.msk.mxu0 %vm523_vm0, %v23148_v16 }
 0x6f6   : > { %21163 = vmatmul.mubr.msk.f32.gmra.mrb[20].mxu0 %vm514_vm2, %v6359_v53 }
 0x6f7   : > { %21167 = vmatprep.mubr.msk.f32.mxu0 %vm514_vm2, %v24240_v5  ;;  %v19225_v5 = vld [vmem:[%s23135_s24 + $0x1a0] sm:$0xff] }
 0x6f8   : > { %v7160_v50 = vrot.slane %v19225_v5, 2 }
 0x6fa   : > { %21168 = vmatmul.mubr.msk.f32.vlgmr.msra.gmra.mrb[18].mxu0 %vm514_vm2, %v19185_v35  ;;  %v19226_v35 = vld [vmem:[%s23135_s24 + $0x1a8] sm:$0xff] }
 0x6fb   : > { %21170 = vmatprep.mubr.msk.f32.mxu0 %vm514_vm2, %v19186_v26  ;;  %21174 = vmatpush3.msk.msra.mxu0 %vm523_vm0, %v23148_v16  ;;  %v7056_v26 = vrot.slane %v19225_v5, 1  ;;  %v7057_v53 = vrot.slane %v19226_v35, 1 }
 0x6fc   : > { %21181 = vmatprep.subr.msk.mxu0 %vm523_vm0, %v23158_v17 }
 0x6fd   : > { %v7058_v39 = vsel %vm504_vm1, %v7056_v26, %v7057_v53  ;;  %v24398_v26 = vsel %vm504_vm1, %v7373_v10, %v24381_v36 }
 0x6fe   : > { %21171 = vmatmul.mubr.msk.f32.gmra.mrb[20].mxu0 %vm514_vm2, %v19187_v42  ;;  %v19227_v42 = vld [vmem:[%s23135_s24 + $0x1b0] sm:$0xff] }
 0x6ff   : > { %21175 = vmatprep.mubr.msk.f32.mxu0 %vm514_vm2, %v6460_v51  ;;  %v7059_v52 = vrot.slane %v19227_v42, 1  ;;  %v7161_v51 = vrot.slane %v19226_v35, 2 }
 0x701   : > { %v7060_v43 = vsel %vm504_vm1, %v7057_v53, %v7059_v52  ;;  %v7162_v56 = vsel %vm706_vm4, %v7160_v50, %v7161_v51  ;;  %v7477_v53 = vrot.slane %v24367_v18, 2 }
 0x702   : > { %21176 = vmatmul.mubr.msk.f32.vlgmr.msra.gmra.mrb[18].mxu0 %vm514_vm2, %v6462_v45  ;;  %v7163_v45 = vrot.slane %v19227_v42, 2 }
 0x703   : > { %21178 = vmatprep.mubr.msk.f32.mxu0 %vm514_vm2, %v6464_v49  ;;  %21182 = vmatpush3.msk.msra.mxu0 %vm523_vm0, %v23158_v17  ;;  %v7165_v49 = vrot.slane %v19228_v62, 2 }
 0x704   : > { %21189 = vmatprep.subr.msk.mxu0 %vm523_vm0, %v23170_v24  ;;  %v7164_v57 = vsel %vm706_vm4, %v7161_v51, %v7163_v45  ;;  %v16378_v51 = vld [vmem:[#allocation2 + $0x80] sm:$0xff] }
 0x705   : > { %v7166_v58 = vsel %vm706_vm4, %v7163_v45, %v7165_v49  ;;  %v16396_v40 = vmul.f32 %v16378_v51, %v24078_v30 }
 0x706   : > { %21179 = vmatmul.mubr.msk.f32.gmra.mrb[20].mxu0 %vm514_vm2, %v6463_v55  ;;  %v7062_v55 = vsel %vm504_vm1, %v7059_v52, %v7061_v37  ;;  %v24409_v52 = vrot.slane %v24378_v4, 2 }
 0x707   : > { %21183 = vmatprep.mubr.msk.f32.mxu0 %vm514_vm2, %v19225_v5  ;;  %v24393_v5 = vsel %vm504_vm1, %v7371_v60, %v7373_v10  ;;  %v16402_v19 = vrot.slane %v16396_v40, 2 }
 0x70a   : > { %21184 = vmatmul.mubr.msk.f32.vlgmr.msra.gmra.mrb[18].mxu0 %vm514_vm2, %v19226_v35  ;;  %v7474_v35 = vrot.slane %v24355_v33, 2 }
 0x70b   : > { %21186 = vmatprep.mubr.msk.f32.mxu0 %vm514_vm2, %v19227_v42  ;;  %21190 = vmatpush3.msk.msra.mxu0 %vm523_vm0, %v23170_v24  ;;  %v7475_v42 = vrot.slane %v24363_v14, 2 }
 0x70c   : > { %21197 = vmatprep.subr.msk.mxu0 %vm523_vm0, %v23187_v34 }
 0x70e   : > { %21187 = vmatmul.mubr.msk.f32.gmra.mrb[20].mxu0 %vm514_vm2, %v19228_v62  ;;  %v24412_v62 = vsel %vm706_vm4, %v7474_v35, %v7475_v42 }
 0x70f   : > { %21191 = vmatprep.mubr.msk.f32.mxu0 %vm514_vm2, %v7058_v39  ;;  %v24423_v39 = vsel %vm706_vm4, %v7477_v53, %v24409_v52 }
 0x712   : > { %21192 = vmatmul.mubr.msk.f32.vlgmr.msra.gmra.mrb[18].mxu0 %vm514_vm2, %v7060_v43  ;;  %v16346_v43 = vld [vmem:[#allocation2 + $0x70] sm:$0x1] }
 0x713   : > { %21194 = vmatprep.mubr.msk.f32.mxu0 %vm514_vm2, %v7062_v55  ;;  %21198 = vmatpush3.msk.msra.mxu0 %vm523_vm0, %v23187_v34  ;;  %v16364_v50 = vmul.f32 %v16346_v43, %v23752_v23  ;;  %v16377_v55 = vld [vmem:[#allocation2 + $0x78] sm:$0xff] }
 0x714   : > { %21205 = vmatprep.subr.msk.mxu0 %vm523_vm0, %v23200_v41 }
 0x715   : > { %v16371_v45 = vrot.slane %v16364_v50, 2 }
 0x716   : > { %21195 = vmatmul.mubr.msk.f32.gmra.mrb[20].mxu0 %vm514_vm2, %v7061_v37  ;;  %v24419_v37 = vsel %vm706_vm4, %v7475_v42, %v7477_v53  ;;  %v16380_v53 = vmul.f32 %v16377_v55, %v24073_v28 }
 0x717   : > { %21199 = vmatprep.mubr.msk.f32.mxu0 %vm514_vm2, %v7162_v56  ;;  %v16379_v56 = vld [vmem:[#allocation2 + $0x88] sm:$0x1]  ;;  %v16372_v10 = vsel %vm706_vm4, %v16369_v2, %v16371_v45  ;;  %v16395_v2 = vmul.f32 %v16377_v55, %v24078_v30 }
 0x718   : > { %v16397_v43 = vmul.f32 %v16379_v56, %v24078_v30  ;;  %v16382_v45 = vadd.f32 %v16380_v53, %v24156_v32 }
 0x71a   : > { %21200 = vmatmul.mubr.msk.f32.vlgmr.msra.gmra.mrb[18].mxu0 %vm514_vm2, %v7164_v57  ;;  %v16384_v57 = vmul.f32 %v16377_v55, %v24064_v6 }
 0x71b   : > { %21202 = vmatprep.mubr.msk.f32.mxu0 %vm514_vm2, %v7166_v58  ;;  %21206 = vmatpush3.msk.msra.mxu0 %vm523_vm0, %v23200_v41  ;;  %v16385_v58 = vmul.f32 %v16378_v51, %v24064_v6 }
 0x71c   : > { %21213 = vmatprep.subr.msk.mxu0 %vm523_vm0, %v23213_v48  ;;  %v16388_v63 = vrot.slane %v16384_v57, 1  ;;  %v16401_v57 = vrot.slane %v16395_v2, 2 }
 0x71d   : > { %v16389_v61 = vrot.slane %v16385_v58, 1  ;;  %v16412_v58 = vld [vmem:[#allocation2 + $0xa0] sm:$0x1] }
 0x71e   : > { %21203 = vmatmul.mubr.msk.f32.gmra.mrb[20].mxu0 %vm514_vm2, %v7165_v49  ;;  %v16348_v49 = vmul.f32 %v24116_v27, %v23763_v29  ;;  %v16381_v27 = vmul.f32 %v16378_v51, %v24073_v28  ;;  %v16403_v55 = vsel %vm706_vm4, %v16401_v57, %v16402_v19 }
 0x71f   : > { %21207 = vmatprep.mubr.msk.f32.mxu0 %vm514_vm2, %v24355_v33  ;;  %v16390_v56 = vsel %vm504_vm1, %v16388_v63, %v16389_v61 }
 0x720   : > { %v16361_v9 = vadd.f32 %v16356_v31, %v16348_v49  ;;  %v16393_v15 = vadd.f32 %v16390_v56, %v16382_v45 }
 0x722   : > { %21208 = vmatmul.mubr.msk.f32.vlgmr.msra.gmra.mrb[18].mxu0 %vm514_vm2, %v24363_v14  ;;  %v16376_v49 = vadd.f32 %v16372_v10, %v16361_v9  ;;  %v16430_v10 = vmul.f32 %v24101_v3, %v16412_v58 }
 0x723   : > { %21210 = vmatprep.mubr.msk.f32.mxu0 %vm514_vm2, %v24367_v18  ;;  %21214 = vmatpush3.msk.msra.mxu0 %vm523_vm0, %v23213_v48 }
 0x724   : > { %21221 = vmatprep.subr.msk.mxu0 %vm523_vm0, %v24008_v0 }
 0x726   : > { %21211 = vmatmul.mubr.msk.f32.gmra.mrb[20].mxu0 %vm514_vm2, %v24378_v4 }
 0x727   : > { %21215 = vmatprep.mubr.msk.f32.mxu0 %vm514_vm2, %v24384_v46 }
 0x72a   : > { %21216 = vmatmul.mubr.msk.f32.vlgmr.msra.gmra.mrb[18].mxu0 %vm514_vm2, %v24393_v5 }
 0x72b   : > { %21218 = vmatprep.mubr.msk.f32.mxu0 %vm514_vm2, %v24398_v26  ;;  %21222 = vmatpush3.msk.msra.mxu0 %vm523_vm0, %v24008_v0 }
 0x72e   : > { %21219 = vmatmul.mubr.msk.f32.gmra.mrb[20].mxu0 %vm514_vm2, %v24381_v36 }
 0x72f   : > { %21223 = vmatprep.mubr.msk.f32.mxu0 %vm514_vm2, %v24412_v62 }
 0x732   : > { %21224 = vmatmul.mubr.msk.f32.vlgmr.msra.gmra.mrb[18].mxu0 %vm514_vm2, %v24419_v37 }
 0x733   : > { %21226 = vmatprep.mubr.msk.f32.mxu0 %vm514_vm2, %v24423_v39 }
 0x736   : > { %21227 = vmatmul.mubr.msk.f32.gmra.mrb[20].mxu0 %vm514_vm2, %v24409_v52 }
 0x737   : > { %21320 = vmatprep.mubr.msk.f32.mxu0 %vm1474_vm7, %v23306_v12 }
 0x7c1   : > { %v21156_v60 = vpop.f32.mrb[16].mxu0 }
 0x7c2   : > { %v6637_v35 = vadd.f32 %v24280_v54, %v21156_v60  ;;  %v6631_v42 = vpop.f32.mrb[17].mxu0  ;;  %v16383_v60 = vadd.f32 %v16381_v27, %v16376_v49 }
 0x7c3   : > { %v6632_v50 = vadd.f32 %v24280_v54, %v6631_v42  ;;  %v16404_v42 = vrot.slane %v16397_v43, 2 }
 0x7c4   : > { %v6641_v31 = vmax.f32 %v6637_v35, 0.0  ;;  %v16394_v51 = vadd.f32 %v16389_v61, %v16383_v60  ;;  %v16408_v35 = vadd.f32 %v16403_v55, %v16393_v15  ;;  %v16437_v15 = vrot.slane %v16430_v10, 2 }
 0x7c5   : > { %v6640_v38 = vmax.f32 %v6632_v50, 0.0  ;;  %v16405_v9 = vsel %vm706_vm4, %v16402_v19, %v16404_v42 }
 0x7c6   : > { %6644 = vst.msk [vmem:[#allocation2 + $0x99] sm:$0x7f] %vm1563_vm13, %v6641_v31  ;;  %v16409_v50 = vadd.f32 %v16405_v9, %v16394_v51 }
 0x7c7   : > { %6643 = vst.msk [vmem:[#allocation2 + $0x91] sm:$0xff] %vm421_vm8, %v6640_v38 }
 0x7ce   : > { %v16410_v32 = vld [vmem:[#allocation2 + $0x90] sm:$0xff]  ;;  %v24457_v53 = vld [vmem:[#allocation2 + $0x98] sm:$0xff] }
 0x7cf   : > { %v16413_v27 = vmul.f32 %v16410_v32, %v24108_v44  ;;  %v16414_v63 = vmul.f32 %v24457_v53, %v24108_v44  ;;  %v16417_v43 = vmul.f32 %v16410_v32, %v24113_v47  ;;  %v16418_v61 = vmul.f32 %v24457_v53, %v24113_v47 }
 0x7d0   : > { %v16428_v40 = vmul.f32 %v24101_v3, %v16410_v32  ;;  %v16429_v19 = vmul.f32 %v24101_v3, %v24457_v53  ;;  %v16603_v56 = vmul.f32 %v16410_v32, %v23745_v20  ;;  %v24471_v42 = vmul.f32 %v24457_v53, %v23745_v20 }
 0x7d1   : > { %v16415_v31 = vadd.f32 %v16413_v27, %v16408_v35  ;;  %v16416_v49 = vadd.f32 %v16414_v63, %v16409_v50  ;;  %v16421_v38 = vrot.slane %v16417_v43, 1  ;;  %v16422_v2 = vrot.slane %v16418_v61, 1 }
 0x7d2   : > { %v16434_v45 = vrot.slane %v16428_v40, 2  ;;  %v16435_v60 = vrot.slane %v16429_v19, 2  ;;  %v16614_v57 = vmul.f32 %v16410_v32, %v23752_v23  ;;  %v16599_v10 = vmul.f32 %v16410_v32, %v23763_v29 }
 0x7d3   : > { %v16423_v58 = vsel %vm504_vm1, %v16421_v38, %v16422_v2  ;;  %v16427_v51 = vadd.f32 %v16422_v2, %v16416_v49  ;;  %v16607_v55 = vrot.slane %v16603_v56, 1  ;;  %v16608_v35 = vrot.slane %v24471_v42, 1 }
 0x7d4   : > { %v16438_v3 = vsel %vm706_vm4, %v16435_v60, %v16437_v15  ;;  %v16426_v9 = vadd.f32 %v16423_v58, %v16415_v31  ;;  %v16436_v50 = vsel %vm706_vm4, %v16434_v45, %v16435_v60  ;;  %v24481_v63 = vmul.f32 %v24457_v53, %v23752_v23 }
 0x7d5   : > { %v16442_v27 = vadd.f32 %v16438_v3, %v16427_v51  ;;  %v16620_v43 = vrot.slane %v16614_v57, 2  ;;  %v16609_v40 = vsel %vm504_vm1, %v16607_v55, %v16608_v35 }
 0x7d6   : > { %v16441_v61 = vadd.f32 %v16436_v50, %v16426_v9  ;;  %v16612_v15 = vadd.f32 %v16609_v40, %v16599_v10  ;;  %v16621_v32 = vrot.slane %v24481_v63, 2 }
 0x7d7   : > { %v16444_v19 = vadd.f32 %v24145_v7, %v16442_v27 }
 0x7d8   : > { %v16443_v31 = vadd.f32 %v24145_v7, %v16441_v61  ;;  %v16622_v38 = vsel %vm706_vm4, %v16620_v43, %v16621_v32  ;;  %v19286_v7 = vld [vmem:[%s23135_s24 + $0x1e8] sm:$0xff]  ;;  %v24576_v43 = vld [vmem:[%s23135_s24 + $0x200] sm:$0xff] }
 0x7d9   : > { %v16446_v49 = vmax.f32 %v16444_v19, 0.0  ;;  %v24492_v45 = vadd.f32 %v16622_v38, %v16612_v15  ;;  %v19305_v61 = vld [vmem:[%s23135_s24 + $0x208] sm:$0xff]  ;;  %v8386_v40 = vrot.slane %v24576_v43, 1  ;;  %v19306_v19 = vld [vmem:[%s23135_s24 + $0x210] sm:$0xff] }
 0x7da   : > { %v16445_v2 = vmax.f32 %v16443_v31, 0.0  ;;  %v8387_v15 = vrot.slane %v19305_v61, 1  ;;  %v8389_v31 = vrot.slane %v19306_v19, 1 }
 0x7dc   : > { %v24494_v60 = vpack.c.bf16 %v16446_v49, %v16445_v2  ;;  %v19307_v49 = vld [vmem:[%s23135_s24 + $0x218] sm:$0xff]  ;;  %v8388_v2 = vsel %vm504_vm1, %v8386_v40, %v8387_v15 }
 0x7dd   : > { %v8391_v38 = vrot.slane %v19307_v49, 1 }
 0x805   : > { %v21225_v56 = vpop.f32.mrb[18].mxu0 }
 0x806   : > { %v7555_v57 = vpop.f32.mrb[19].mxu0 }
 0x807   : > { %v22188_v58 = vpack.c.bf16 %v21225_v56, %v7555_v57  ;;  %v8390_v56 = vsel %vm504_vm1, %v8387_v15, %v8389_v31  ;;  %v8490_v57 = vrot.slane %v24576_v43, 2 }
 0x809   : > { %v21228_v51 = vpop.f32.mrb[20].mxu0  ;;  %22189 = vmatprep.subr.bf16.mxu1 %v22188_v58 }
 0x80a   : > { %v7565_v3 = vpop.f32.mrb[21].mxu0  ;;  %22191 = vmatpush3.bf16.msra.mxu1 %v22188_v58  ;;  %v8392_v58 = vsel %vm504_vm1, %v8389_v31, %v8391_v38 }
 0x80b   : > { %v22192_v9 = vpack.c.bf16 %v21228_v51, %v7565_v3  ;;  %v8491_v51 = vrot.slane %v19305_v61, 2  ;;  %v8493_v3 = vrot.slane %v19306_v19, 2 }
 0x80d   : > { %22194 = vmatprep.subr.msk.bf16.mxu1 %vm23383_vm10, %v22192_v9 }
 0x80e   : > { %22197 = vmatpush3.bf16.msk.msra.mxu1 %vm23383_vm10, %v22192_v9  ;;  %v8495_v9 = vrot.slane %v19307_v49, 2 }
 0x80f   : > { %21240 = vmatprep.subr.msk.mxu1 %vm523_vm0, %v23122_v1 }
 0x811   : > { %21238 = vmatmul.mubr.msk.f32.vlgmr.msra.gmra.mrb[18].mxu1 %vm1474_vm7, %v23392_v25 }
 0x812   : > { %21241 = vmatpush3.msk.msra.mxu1 %vm523_vm0, %v23122_v1  ;;  %21242 = vmatprep.mubr.msk.f32.mxu1 %vm514_vm2, %v24384_v46 }
 0x813   : > { %21248 = vmatprep.subr.msk.mxu1 %vm523_vm0, %v23914_v59 }
 0x815   : > { %21243 = vmatmul.mubr.msk.f32.vlgmr.msra.gmra.mrb[20].mxu1 %vm514_vm2, %v24393_v5 }
 0x816   : > { %21245 = vmatprep.mubr.msk.f32.mxu1 %vm514_vm2, %v24398_v26  ;;  %21249 = vmatpush3.msk.msra.mxu1 %vm523_vm0, %v23914_v59  ;;  %v19285_v59 = vld [vmem:[%s23135_s24 + $0x1e0] sm:$0xff] }
 0x817   : > { %21256 = vmatprep.subr.msk.mxu1 %vm523_vm0, %v23148_v16 }
 0x819   : > { %21246 = vmatmul.mubr.msk.f32.gmra.mrb[22].mxu1 %vm514_vm2, %v24381_v36  ;;  %v19288_v36 = vld [vmem:[%s23135_s24 + $0x1f8] sm:$0xff] }
 0x81a   : > { %21250 = vmatprep.mubr.msk.f32.mxu1 %vm514_vm2, %v24355_v33  ;;  %v8072_v33 = vrot.slane %v19285_v59, 1  ;;  %v8077_v46 = vrot.slane %v19288_v36, 1  ;;  %v8181_v10 = vrot.slane %v19288_v36, 2 }
 0x81d   : > { %21251 = vmatmul.mubr.msk.f32.vlgmr.msra.gmra.mrb[20].mxu1 %vm514_vm2, %v24363_v14  ;;  %v19287_v14 = vld [vmem:[%s23135_s24 + $0x1f0] sm:$0xff] }
 0x81e   : > { %21253 = vmatprep.mubr.msk.f32.mxu1 %vm514_vm2, %v24367_v18  ;;  %21257 = vmatpush3.msk.msra.mxu1 %vm523_vm0, %v23148_v16  ;;  %v8073_v18 = vrot.slane %v19286_v7, 1 }
 0x81f   : > { %21264 = vmatprep.subr.msk.mxu1 %vm523_vm0, %v23158_v17 }
 0x820   : > { %v8074_v5 = vsel %vm504_vm1, %v8072_v33, %v8073_v18  ;;  %v8496_v33 = vsel %vm706_vm4, %v8493_v3, %v8495_v9 }
 0x821   : > { %21254 = vmatmul.mubr.msk.f32.gmra.mrb[22].mxu1 %vm514_vm2, %v24378_v4  ;;  %v8075_v4 = vrot.slane %v19287_v14, 1 }
 0x822   : > { %21258 = vmatprep.mubr.msk.f32.mxu1 %vm514_vm2, %v24412_v62 }
 0x823   : > { %v8076_v26 = vsel %vm504_vm1, %v8073_v18, %v8075_v4  ;;  %v8078_v62 = vsel %vm504_vm1, %v8075_v4, %v8077_v46 }
 0x825   : > { %21259 = vmatmul.mubr.msk.f32.vlgmr.msra.gmra.mrb[20].mxu1 %vm514_vm2, %v24419_v37  ;;  %v8177_v37 = vrot.slane %v19286_v7, 2 }
 0x826   : > { %21261 = vmatprep.mubr.msk.f32.mxu1 %vm514_vm2, %v24423_v39  ;;  %21265 = vmatpush3.msk.msra.mxu1 %vm523_vm0, %v23158_v17  ;;  %v8179_v39 = vrot.slane %v19287_v14, 2 }
 0x827   : > { %21272 = vmatprep.subr.msk.mxu1 %vm523_vm0, %v23170_v24 }
 0x828   : > { %v8180_v50 = vsel %vm706_vm4, %v8177_v37, %v8179_v39  ;;  %v8182_v27 = vsel %vm706_vm4, %v8179_v39, %v8181_v10 }
 0x829   : > { %21262 = vmatmul.mubr.msk.f32.gmra.mrb[22].mxu1 %vm514_vm2, %v24409_v52  ;;  %v8176_v52 = vrot.slane %v19285_v59, 2 }
 0x82a   : > { %21266 = vmatprep.mubr.msk.f32.mxu1 %vm514_vm2, %v19285_v59  ;;  %v8492_v59 = vsel %vm706_vm4, %v8490_v57, %v8491_v51 }
 0x82b   : > { %v8178_v55 = vsel %vm706_vm4, %v8176_v52, %v8177_v37 }
 0x82d   : > { %21267 = vmatmul.mubr.msk.f32.vlgmr.msra.gmra.mrb[20].mxu1 %vm514_vm2, %v19286_v7  ;;  %v8494_v7 = vsel %vm706_vm4, %v8491_v51, %v8493_v3 }
 0x82e   : > { %21269 = vmatprep.mubr.msk.f32.mxu1 %vm514_vm2, %v19287_v14  ;;  %21273 = vmatpush3.msk.msra.mxu1 %vm523_vm0, %v23170_v24 }
 0x82f   : > { %21280 = vmatprep.subr.msk.mxu1 %vm523_vm0, %v23187_v34 }
 0x831   : > { %21270 = vmatmul.mubr.msk.f32.gmra.mrb[22].mxu1 %vm514_vm2, %v19288_v36 }
 0x832   : > { %21274 = vmatprep.mubr.msk.f32.mxu1 %vm514_vm2, %v8074_v5 }
 0x835   : > { %21275 = vmatmul.mubr.msk.f32.vlgmr.msra.gmra.mrb[20].mxu1 %vm514_vm2, %v8076_v26 }
 0x836   : > { %21277 = vmatprep.mubr.msk.f32.mxu1 %vm514_vm2, %v8078_v62  ;;  %21281 = vmatpush3.msk.msra.mxu1 %vm523_vm0, %v23187_v34 }
 0x837   : > { %21288 = vmatprep.subr.msk.mxu1 %vm523_vm0, %v23200_v41 }
 0x839   : > { %21278 = vmatmul.mubr.msk.f32.gmra.mrb[22].mxu1 %vm514_vm2, %v8077_v46 }
 0x83a   : > { %21282 = vmatprep.mubr.msk.f32.mxu1 %vm514_vm2, %v8178_v55  ;;  %v19345_v55 = vld [vmem:[%s23135_s24 + $0x220] sm:$0xff] }
 0x83d   : > { %21283 = vmatmul.mubr.msk.f32.vlgmr.msra.gmra.mrb[20].mxu1 %vm514_vm2, %v8180_v50  ;;  %v19346_v50 = vld [vmem:[%s23135_s24 + $0x228] sm:$0xff] }
 0x83e   : > { %21285 = vmatprep.mubr.msk.f32.mxu1 %vm514_vm2, %v8182_v27  ;;  %21289 = vmatpush3.msk.msra.mxu1 %vm523_vm0, %v23200_v41  ;;  %v9088_v27 = vrot.slane %v19345_v55, 1 }
 0x83f   : > { %21296 = vmatprep.subr.msk.mxu1 %vm523_vm0, %v23213_v48 }
 0x841   : > { %21286 = vmatmul.mubr.msk.f32.gmra.mrb[22].mxu1 %vm514_vm2, %v8181_v10  ;;  %v24631_v10 = vld [vmem:[%s26375_s1] sm:$0xff] }
 0x842   : > { %21290 = vmatprep.mubr.msk.f32.mxu1 %vm514_vm2, %v24576_v43 }
 0x845   : > { %21291 = vmatmul.mubr.msk.f32.vlgmr.msra.gmra.mrb[20].mxu1 %vm514_vm2, %v19305_v61 }
 0x846   : > { %21293 = vmatprep.mubr.msk.f32.mxu1 %vm514_vm2, %v19306_v19  ;;  %21297 = vmatpush3.msk.msra.mxu1 %vm523_vm0, %v23213_v48 }
 0x847   : > { %21304 = vmatprep.subr.msk.mxu1 %vm523_vm0, %v24008_v0 }
 0x849   : > { %21294 = vmatmul.mubr.msk.f32.gmra.mrb[22].mxu1 %vm514_vm2, %v19307_v49 }
 0x84a   : > { %21298 = vmatprep.mubr.msk.f32.mxu1 %vm514_vm2, %v8388_v2 }
 0x84d   : > { %21299 = vmatmul.mubr.msk.f32.vlgmr.msra.gmra.mrb[20].mxu1 %vm514_vm2, %v8390_v56 }
 0x84e   : > { %21301 = vmatprep.mubr.msk.f32.mxu1 %vm514_vm2, %v8392_v58  ;;  %21305 = vmatpush3.msk.msra.mxu1 %vm523_vm0, %v24008_v0 }
 0x851   : > { %21302 = vmatmul.mubr.msk.f32.gmra.mrb[22].mxu1 %vm514_vm2, %v8391_v38 }
 0x852   : > { %21306 = vmatprep.mubr.msk.f32.mxu1 %vm514_vm2, %v8492_v59 }
 0x855   : > { %21307 = vmatmul.mubr.msk.f32.vlgmr.msra.gmra.mrb[20].mxu1 %vm514_vm2, %v8494_v7 }
 0x856   : > { %21309 = vmatprep.mubr.msk.f32.mxu1 %vm514_vm2, %v8496_v33 }
 0x859   : > { %21310 = vmatmul.mubr.msk.f32.gmra.mrb[22].mxu1 %vm514_vm2, %v8495_v9 }
 0x85a   : > { %21403 = vmatprep.mubr.msk.f32.mxu1 %vm1474_vm7, %v23306_v12 }
 0x8e4   : > { %v21239_v0 = vpop.f32.mrb[18].mxu1 }
 0x8e5   : > { %v7653_v14 = vadd.f32 %v24280_v54, %v21239_v0  ;;  %v7647_v18 = vpop.f32.mrb[19].mxu1  ;;  %v24703_v0 = vld [vmem:[%s23135_s24 + $0x250] sm:$0xff] }
 0x8e6   : > { %v7648_v4 = vadd.f32 %v24280_v54, %v7647_v18  ;;  %v9405_v18 = vrot.slane %v24703_v0, 1 }
 0x8e7   : > { %v7657_v36 = vmax.f32 %v7653_v14, 0.0 }
 0x8e8   : > { %v7656_v46 = vmax.f32 %v7648_v4, 0.0  ;;  %v24714_v4 = vld [vmem:[%s23135_s24 + $0x258] sm:$0xff] }
 0x8e9   : > { %7660 = vst.msk [vmem:[#allocation2 + $0xb1] sm:$0x7f] %vm1563_vm13, %v7657_v36  ;;  %v24717_v36 = vrot.slane %v24714_v4, 1 }
 0x8ea   : > { %7659 = vst.msk [vmem:[#allocation2 + $0xa9] sm:$0xff] %vm421_vm8, %v7656_v46 }
 0x928   : > { %v21308_v5 = vpop.f32.mrb[20].mxu1 }
 0x929   : > { %v8571_v26 = vpop.f32.mrb[21].mxu1 }
 0x92a   : > { %v22198_v52 = vpack.c.bf16 %v21308_v5, %v8571_v26  ;;  %v24725_v5 = vld [vmem:[%s26375_s1 + $0x18] sm:$0x7] }
 0x92c   : > { %v21311_v62 = vpop.f32.mrb[22].mxu1  ;;  %22199 = vmatprep.subr.bf16.mxu0 %v22198_v52 }
 0x92d   : > { %v8581_v37 = vpop.f32.mrb[23].mxu1  ;;  %22201 = vmatpush3.bf16.msra.mxu0 %v22198_v52 }
 0x92e   : > { %v22202_v39 = vpack.c.bf16 %v21311_v62, %v8581_v37  ;;  %v24739_v62 = vsel %vm504_vm1, %v9405_v18, %v24717_v36 }
 0x930   : > { %22204 = vmatprep.subr.msk.bf16.mxu0 %vm23383_vm10, %v22202_v39 }
 0x931   : > { %22207 = vmatpush3.bf16.msk.msra.mxu0 %vm23383_vm10, %v22202_v39  ;;  %v9509_v39 = vrot.slane %v24703_v0, 2 }
 0x932   : > { %21323 = vmatprep.subr.msk.mxu0 %vm523_vm0, %v23122_v1 }
 0x934   : > { %21321 = vmatmul.mubr.msk.f32.vlgmr.msra.gmra.mrb[22].mxu0 %vm1474_vm7, %v23392_v25 }
 0x935   : > { %21324 = vmatpush3.msk.msra.mxu0 %vm523_vm0, %v23122_v1  ;;  %21325 = vmatprep.mubr.msk.f32.mxu0 %vm514_vm2, %v8388_v2 }
 0x936   : > { %21331 = vmatprep.subr.msk.mxu0 %vm523_vm0, %v24631_v10 }
 0x938   : > { %21326 = vmatmul.mubr.msk.f32.vlgmr.msra.gmra.mrb[24].mxu0 %vm514_vm2, %v8390_v56  ;;  %v9193_v56 = vrot.slane %v19346_v50, 2 }
 0x939   : > { %21328 = vmatprep.mubr.msk.f32.mxu0 %vm514_vm2, %v8392_v58  ;;  %21332 = vmatpush3.msk.msra.mxu0 %vm523_vm0, %v24631_v10 }
 0x93a   : > { %21339 = vmatprep.subr.msk.mxu0 %vm523_vm0, %v23148_v16 }
 0x93c   : > { %21329 = vmatmul.mubr.msk.f32.gmra.mrb[26].mxu0 %vm514_vm2, %v8391_v38  ;;  %v9192_v38 = vrot.slane %v19345_v55, 2 }
 0x93d   : > { %21333 = vmatprep.mubr.msk.f32.mxu0 %vm514_vm2, %v24576_v43  ;;  %v19347_v43 = vld [vmem:[%s23135_s24 + $0x230] sm:$0xff] }
 0x93e   : > { %v9091_v40 = vrot.slane %v19347_v43, 1  ;;  %v9195_v57 = vrot.slane %v19347_v43, 2  ;;  %v9194_v51 = vsel %vm706_vm4, %v9192_v38, %v9193_v56  ;;  %v16631_v38 = vld [vmem:[#allocation2 + $0xb8] sm:$0x1] }
 0x940   : > { %21334 = vmatmul.mubr.msk.f32.vlgmr.msra.gmra.mrb[24].mxu0 %vm514_vm2, %v19305_v61  ;;  %v9089_v61 = vrot.slane %v19346_v50, 1  ;;  %v9196_v3 = vsel %vm706_vm4, %v9193_v56, %v9195_v57 }
 0x941   : > { %21336 = vmatprep.mubr.msk.f32.mxu0 %vm514_vm2, %v19306_v19  ;;  %21340 = vmatpush3.msk.msra.mxu0 %vm523_vm0, %v23148_v16  ;;  %v19348_v19 = vld [vmem:[%s23135_s24 + $0x238] sm:$0xff] }
 0x942   : > { %21347 = vmatprep.subr.msk.mxu0 %vm523_vm0, %v23158_v17  ;;  %v9093_v15 = vrot.slane %v19348_v19, 1  ;;  %v9090_v31 = vsel %vm504_vm1, %v9088_v27, %v9089_v61  ;;  %v9197_v58 = vrot.slane %v19348_v19, 2 }
 0x944   : > { %21337 = vmatmul.mubr.msk.f32.gmra.mrb[26].mxu0 %vm514_vm2, %v19307_v49  ;;  %v9092_v49 = vsel %vm504_vm1, %v9089_v61, %v9091_v40  ;;  %v9094_v2 = vsel %vm504_vm1, %v9091_v40, %v9093_v15  ;;  %v16598_v61 = vld [vmem:[#allocation2 + $0xa0] sm:$0x1] }
 0x945   : > { %21341 = vmatprep.mubr.msk.f32.mxu0 %vm514_vm2, %v8492_v59  ;;  %v24691_v59 = vld [vmem:[%s23135_s24 + $0x240] sm:$0xff]  ;;  %v16616_v40 = vmul.f32 %v16598_v61, %v23752_v23 }
 0x946   : > { %v9506_v52 = vrot.slane %v24691_v59, 2 }
 0x948   : > { %21342 = vmatmul.mubr.msk.f32.vlgmr.msra.gmra.mrb[24].mxu0 %vm514_vm2, %v8494_v7  ;;  %v24699_v7 = vld [vmem:[%s23135_s24 + $0x248] sm:$0xff] }
 0x949   : > { %21344 = vmatprep.mubr.msk.f32.mxu0 %vm514_vm2, %v8496_v33  ;;  %21348 = vmatpush3.msk.msra.mxu0 %vm523_vm0, %v23158_v17  ;;  %v9402_v33 = vrot.slane %v24691_v59, 1  ;;  %v9403_v14 = vrot.slane %v24699_v7, 1  ;;  %v9507_v37 = vrot.slane %v24699_v7, 2 }
 0x94a   : > { %21355 = vmatprep.subr.msk.mxu0 %vm523_vm0, %v23170_v24 }
 0x94b   : > { %v24720_v46 = vsel %vm504_vm1, %v9402_v33, %v9403_v14  ;;  %v24734_v26 = vsel %vm504_vm1, %v9403_v14, %v9405_v18  ;;  %v24760_v27 = vsel %vm706_vm4, %v9507_v37, %v9509_v39  ;;  %v16649_v14 = vmul.f32 %v16631_v38, %v24078_v30 }
 0x94c   : > { %21345 = vmatmul.mubr.msk.f32.gmra.mrb[26].mxu0 %vm514_vm2, %v8495_v9  ;;  %v9198_v9 = vsel %vm706_vm4, %v9195_v57, %v9197_v58 }
 0x94d   : > { %21349 = vmatprep.mubr.msk.f32.mxu0 %vm514_vm2, %v19345_v55  ;;  %v24750_v55 = vrot.slane %v24714_v4, 2 }
 0x950   : > { %21350 = vmatmul.mubr.msk.f32.vlgmr.msra.gmra.mrb[24].mxu0 %vm514_vm2, %v19346_v50  ;;  %v24753_v50 = vsel %vm706_vm4, %v9506_v52, %v9507_v37 }
 0x951   : > { %21352 = vmatprep.mubr.msk.f32.mxu0 %vm514_vm2, %v19347_v43  ;;  %21356 = vmatpush3.msk.msra.mxu0 %vm523_vm0, %v23170_v24  ;;  %v24764_v43 = vsel %vm706_vm4, %v9509_v39, %v24750_v55 }
 0x952   : > { %21363 = vmatprep.subr.msk.mxu0 %vm523_vm0, %v23187_v34 }
 0x954   : > { %21353 = vmatmul.mubr.msk.f32.gmra.mrb[26].mxu0 %vm514_vm2, %v19348_v19  ;;  %v16629_v19 = vld [vmem:[#allocation2 + $0xa8] sm:$0xff] }
 0x955   : > { %21357 = vmatprep.mubr.msk.f32.mxu0 %vm514_vm2, %v9090_v31  ;;  %v16623_v31 = vrot.slane %v16616_v40, 2  ;;  %v16632_v33 = vmul.f32 %v16629_v19, %v24073_v28 }
 0x957   : > { %v16634_v61 = vadd.f32 %v16632_v33, %v24492_v45 }
 0x958   : > { %21358 = vmatmul.mubr.msk.f32.vlgmr.msra.gmra.mrb[24].mxu0 %vm514_vm2, %v9092_v49  ;;  %v16600_v49 = vmul.f32 %v24457_v53, %v23763_v29 }
 0x959   : > { %21360 = vmatprep.mubr.msk.f32.mxu0 %vm514_vm2, %v9094_v2  ;;  %21364 = vmatpush3.msk.msra.mxu0 %vm523_vm0, %v23187_v34  ;;  %v16636_v2 = vmul.f32 %v16629_v19, %v24064_v6 }
 0x95a   : > { %21371 = vmatprep.subr.msk.mxu0 %vm523_vm0, %v23200_v41  ;;  %v16613_v57 = vadd.f32 %v16608_v35, %v16600_v49 }
 0x95b   : > { %v16640_v52 = vrot.slane %v16636_v2, 1  ;;  %v16664_v2 = vld [vmem:[#allocation2 + $0xd0] sm:$0x1] }
 0x95c   : > { %21361 = vmatmul.mubr.msk.f32.gmra.mrb[26].mxu0 %vm514_vm2, %v9093_v15  ;;  %v16630_v15 = vld [vmem:[#allocation2 + $0xb0] sm:$0xff] }
 0x95d   : > { %21365 = vmatprep.mubr.msk.f32.mxu0 %vm514_vm2, %v9194_v51  ;;  %v16637_v56 = vmul.f32 %v16630_v15, %v24064_v6  ;;  %v16624_v51 = vsel %vm706_vm4, %v16621_v32, %v16623_v31  ;;  %v16633_v53 = vmul.f32 %v16630_v15, %v24073_v28  ;;  %v16648_v42 = vmul.f32 %v16630_v15, %v24078_v30 }
 0x95e   : > { %v16628_v39 = vadd.f32 %v16624_v51, %v16613_v57  ;;  %v16647_v32 = vmul.f32 %v16629_v19, %v24078_v30  ;;  %v24799_v19 = vld [vmem:[%s26377_s3 + $0x8] ss:$0 sm:$0xff] }
 0x95f   : > { %v16641_v37 = vrot.slane %v16637_v56, 1  ;;  %v16654_v49 = vrot.slane %v16648_v42, 2  ;;  %v16682_v45 = vmul.f32 %v24799_v19, %v16664_v2 }
 0x960   : > { %21366 = vmatmul.mubr.msk.f32.vlgmr.msra.gmra.mrb[24].mxu0 %vm514_vm2, %v9196_v3  ;;  %v16635_v40 = vadd.f32 %v16633_v53, %v16628_v39  ;;  %v16653_v38 = vrot.slane %v16647_v32, 2 }
 0x961   : > { %21368 = vmatprep.mubr.msk.f32.mxu0 %vm514_vm2, %v9198_v9  ;;  %21372 = vmatpush3.msk.msra.mxu0 %vm523_vm0, %v23200_v41  ;;  %v16642_v31 = vsel %vm504_vm1, %v16640_v52, %v16641_v37 }
 0x962   : > { %21379 = vmatprep.subr.msk.mxu0 %vm523_vm0, %v23213_v48  ;;  %v16645_v56 = vadd.f32 %v16642_v31, %v16634_v61  ;;  %v16646_v15 = vadd.f32 %v16641_v37, %v16635_v40 }
 0x964   : > { %21369 = vmatmul.mubr.msk.f32.gmra.mrb[26].mxu0 %vm514_vm2, %v9197_v58 }
 0x965   : > { %21373 = vmatprep.mubr.msk.f32.mxu0 %vm514_vm2, %v24691_v59 }
 0x968   : > { %21374 = vmatmul.mubr.msk.f32.vlgmr.msra.gmra.mrb[24].mxu0 %vm514_vm2, %v24699_v7 }
 0x969   : > { %21376 = vmatprep.mubr.msk.f32.mxu0 %vm514_vm2, %v24703_v0  ;;  %21380 = vmatpush3.msk.msra.mxu0 %vm523_vm0, %v23213_v48 }
 0x96a   : > { %21387 = vmatprep.subr.msk.mxu0 %vm523_vm0, %v24725_v5 }
 0x96c   : > { %21377 = vmatmul.mubr.msk.f32.gmra.mrb[26].mxu0 %vm514_vm2, %v24714_v4 }
 0x96d   : > { %21381 = vmatprep.mubr.msk.f32.mxu0 %vm514_vm2, %v24720_v46 }
 0x970   : > { %21382 = vmatmul.mubr.msk.f32.vlgmr.msra.gmra.mrb[24].mxu0 %vm514_vm2, %v24734_v26 }
 0x971   : > { %21384 = vmatprep.mubr.msk.f32.mxu0 %vm514_vm2, %v24739_v62  ;;  %21388 = vmatpush3.msk.msra.mxu0 %vm523_vm0, %v24725_v5 }
 0x974   : > { %21385 = vmatmul.mubr.msk.f32.gmra.mrb[26].mxu0 %vm514_vm2, %v24717_v36 }
 0x975   : > { %21389 = vmatprep.mubr.msk.f32.mxu0 %vm514_vm2, %v24753_v50 }
 0x978   : > { %21390 = vmatmul.mubr.msk.f32.vlgmr.msra.gmra.mrb[24].mxu0 %vm514_vm2, %v24760_v27 }
 0x979   : > { %21392 = vmatprep.mubr.msk.f32.mxu0 %vm514_vm2, %v24764_v43 }
 0x97c   : > { %21393 = vmatmul.mubr.msk.f32.gmra.mrb[26].mxu0 %vm514_vm2, %v24750_v55 }
 0x97d   : > { %21486 = vmatprep.mubr.msk.f32.mxu0 %vm1474_vm7, %v23306_v12 }
 0xa07   : > { %v21322_v58 = vpop.f32.mrb[22].mxu0 }
 0xa08   : > { %v8669_v3 = vadd.f32 %v24280_v54, %v21322_v58  ;;  %v8663_v9 = vpop.f32.mrb[23].mxu0  ;;  %v16655_v58 = vsel %vm706_vm4, %v16653_v38, %v16654_v49 }
 0xa09   : > { %v8664_v18 = vadd.f32 %v24280_v54, %v8663_v9  ;;  %v16656_v54 = vrot.slane %v16649_v14, 2  ;;  %v16660_v51 = vadd.f32 %v16655_v58, %v16645_v56 }
 0xa0a   : > { %v8673_v35 = vmax.f32 %v8669_v3, 0.0 }
 0xa0b   : > { %v8672_v63 = vmax.f32 %v8664_v18, 0.0  ;;  %v16657_v57 = vsel %vm706_vm4, %v16654_v49, %v16656_v54 }
 0xa0c   : > { %8676 = vst.msk [vmem:[#allocation2 + $0xc9] sm:$0x7f] %vm1563_vm13, %v8673_v35  ;;  %v16661_v3 = vadd.f32 %v16657_v57, %v16646_v15  ;;  %v16689_v35 = vrot.slane %v16682_v45, 2 }
 0xa0d   : > { %8675 = vst.msk [vmem:[#allocation2 + $0xc1] sm:$0xff] %vm421_vm8, %v8672_v63 }
 0xa14   : > { %v16662_v9 = vld [vmem:[#allocation2 + $0xc0] sm:$0xff]  ;;  %v24803_v33 = vld [vmem:[#allocation2 + $0xc8] sm:$0xff] }
 0xa15   : > { %v16665_v53 = vmul.f32 %v16662_v9, %v24108_v44  ;;  %v16666_v14 = vmul.f32 %v24803_v33, %v24108_v44  ;;  %v16669_v18 = vmul.f32 %v16662_v9, %v24113_v47  ;;  %v16670_v52 = vmul.f32 %v24803_v33, %v24113_v47 }
 0xa16   : > { %v16680_v37 = vmul.f32 %v24799_v19, %v16662_v9  ;;  %v16681_v42 = vmul.f32 %v24799_v19, %v24803_v33  ;;  %v16855_v49 = vmul.f32 %v16662_v9, %v23745_v20  ;;  %v24817_v54 = vmul.f32 %v24803_v33, %v23745_v20 }
 0xa17   : > { %v16667_v39 = vadd.f32 %v16665_v53, %v16660_v51  ;;  %v16668_v63 = vadd.f32 %v16666_v14, %v16661_v3  ;;  %v16673_v32 = vrot.slane %v16669_v18, 1  ;;  %v16674_v61 = vrot.slane %v16670_v52, 1 }
 0xa18   : > { %v16686_v40 = vrot.slane %v16680_v37, 2  ;;  %v16687_v31 = vrot.slane %v16681_v42, 2  ;;  %v16866_v38 = vmul.f32 %v16662_v9, %v23752_v23  ;;  %v16851_v45 = vmul.f32 %v16662_v9, %v23763_v29  ;;  %v24835_v9 = vld [vmem:[%s26378_s4] ss:$0 sm:$0xff] }
 0xa19   : > { %v16675_v2 = vsel %vm504_vm1, %v16673_v32, %v16674_v61  ;;  %v16679_v56 = vadd.f32 %v16674_v61, %v16668_v63  ;;  %v16859_v58 = vrot.slane %v16855_v49, 1  ;;  %v16860_v51 = vrot.slane %v24817_v54, 1 }
 0xa1a   : > { %v16690_v15 = vsel %vm706_vm4, %v16687_v31, %v16689_v35  ;;  %v16678_v57 = vadd.f32 %v16675_v2, %v16667_v39  ;;  %v16688_v3 = vsel %vm706_vm4, %v16686_v40, %v16687_v31  ;;  %v24827_v14 = vmul.f32 %v24803_v33, %v23752_v23 }
 0xa1b   : > { %v16694_v53 = vadd.f32 %v16690_v15, %v16679_v56  ;;  %v16872_v18 = vrot.slane %v16866_v38, 2  ;;  %v16861_v37 = vsel %vm504_vm1, %v16859_v58, %v16860_v51 }
 0xa1c   : > { %v16693_v52 = vadd.f32 %v16688_v3, %v16678_v57  ;;  %v16864_v35 = vadd.f32 %v16861_v37, %v16851_v45  ;;  %v16873_v39 = vrot.slane %v24827_v14, 2 }
 0xa1d   : > { %v16696_v42 = vadd.f32 %v24835_v9, %v16694_v53 }
 0xa1e   : > { %v16695_v63 = vadd.f32 %v24835_v9, %v16693_v52  ;;  %v16874_v61 = vsel %vm706_vm4, %v16872_v18, %v16873_v39 }
 0xa1f   : > { %v16698_v32 = vmax.f32 %v16696_v42, 0.0  ;;  %v24843_v31 = vadd.f32 %v16874_v61, %v16864_v35  ;;  %v24927_v42 = vld [vmem:[%s23135_s24 + $0x280] sm:$0xff]  ;;  %v19425_v35 = vld [vmem:[%s23135_s24 + $0x288] sm:$0xff] }
 0xa20   : > { %v16697_v40 = vmax.f32 %v16695_v63, 0.0  ;;  %v10418_v63 = vrot.slane %v24927_v42, 1  ;;  %v10419_v61 = vrot.slane %v19425_v35, 1 }
 0xa22   : > { %v24845_v49 = vpack.c.bf16 %v16698_v32, %v16697_v40  ;;  %v19426_v32 = vld [vmem:[%s23135_s24 + $0x290] sm:$0xff] }
 0xa23   : > { %v10421_v40 = vrot.slane %v19426_v32, 1 }
 0xa4b   : > { %v21391_v38 = vpop.f32.mrb[24].mxu0 }
 0xa4c   : > { %v9587_v2 = vpop.f32.mrb[25].mxu0 }
 0xa4d   : > { %v22208_v56 = vpack.c.bf16 %v21391_v38, %v9587_v2  ;;  %v19427_v38 = vld [vmem:[%s23135_s24 + $0x298] sm:$0xff] }
 0xa4e   : > { %v10423_v2 = vrot.slane %v19427_v38, 1 }
 0xa4f   : > { %v21394_v15 = vpop.f32.mrb[26].mxu0  ;;  %22209 = vmatprep.subr.bf16.mxu1 %v22208_v56 }
 0xa50   : > { %v9597_v57 = vpop.f32.mrb[27].mxu0  ;;  %22211 = vmatpush3.bf16.msra.mxu1 %v22208_v56  ;;  %v10420_v56 = vsel %vm504_vm1, %v10418_v63, %v10419_v61 }
 0xa51   : > { %v22212_v45 = vpack.c.bf16 %v21394_v15, %v9597_v57  ;;  %v10422_v15 = vsel %vm504_vm1, %v10419_v61, %v10421_v40  ;;  %v10522_v57 = vrot.slane %v24927_v42, 2  ;;  %v19467_v61 = vld [vmem:[%s23135_s24 + $0x2b0] sm:$0xff] }
 0xa53   : > { %22214 = vmatprep.subr.msk.bf16.mxu1 %vm23383_vm10, %v22212_v45 }
 0xa54   : > { %22217 = vmatpush3.bf16.msk.msra.mxu1 %vm23383_vm10, %v22212_v45  ;;  %v10424_v45 = vsel %vm504_vm1, %v10421_v40, %v10423_v2 }
 0xa55   : > { %21406 = vmatprep.subr.msk.mxu1 %vm523_vm0, %v23122_v1 }
 0xa57   : > { %21404 = vmatmul.mubr.msk.f32.vlgmr.msra.gmra.mrb[24].mxu1 %vm1474_vm7, %v23392_v25 }
 0xa58   : > { %21407 = vmatpush3.msk.msra.mxu1 %vm523_vm0, %v23122_v1  ;;  %21408 = vmatprep.mubr.msk.f32.mxu1 %vm514_vm2, %v24720_v46 }
 0xa59   : > { %21414 = vmatprep.subr.msk.mxu1 %vm523_vm0, %v24631_v10 }
 0xa5b   : > { %21409 = vmatmul.mubr.msk.f32.vlgmr.msra.gmra.mrb[26].mxu1 %vm514_vm2, %v24734_v26  ;;  %v19408_v26 = vld [vmem:[%s23135_s24 + $0x278] sm:$0xff] }
 0xa5c   : > { %21411 = vmatprep.mubr.msk.f32.mxu1 %vm514_vm2, %v24739_v62  ;;  %21415 = vmatpush3.msk.msra.mxu1 %vm523_vm0, %v24631_v10  ;;  %v10109_v62 = vrot.slane %v19408_v26, 1  ;;  %v10213_v53 = vrot.slane %v19408_v26, 2 }
 0xa5d   : > { %21422 = vmatprep.subr.msk.mxu1 %vm523_vm0, %v23148_v16 }
 0xa5f   : > { %21412 = vmatmul.mubr.msk.f32.gmra.mrb[28].mxu1 %vm514_vm2, %v24717_v36 }
 0xa60   : > { %21416 = vmatprep.mubr.msk.f32.mxu1 %vm514_vm2, %v24691_v59  ;;  %v19405_v59 = vld [vmem:[%s23135_s24 + $0x260] sm:$0xff] }
 0xa63   : > { %21417 = vmatmul.mubr.msk.f32.vlgmr.msra.gmra.mrb[26].mxu1 %vm514_vm2, %v24699_v7  ;;  %v19406_v7 = vld [vmem:[%s23135_s24 + $0x268] sm:$0xff] }
 0xa64   : > { %21419 = vmatprep.mubr.msk.f32.mxu1 %vm514_vm2, %v24703_v0  ;;  %21423 = vmatpush3.msk.msra.mxu1 %vm523_vm0, %v23148_v16  ;;  %v10104_v0 = vrot.slane %v19405_v59, 1  ;;  %v10105_v36 = vrot.slane %v19406_v7, 1  ;;  %v10209_v58 = vrot.slane %v19406_v7, 2 }
 0xa65   : > { %21430 = vmatprep.subr.msk.mxu1 %vm523_vm0, %v23158_v17 }
 0xa67   : > { %21420 = vmatmul.mubr.msk.f32.gmra.mrb[28].mxu1 %vm514_vm2, %v24714_v4  ;;  %v19407_v4 = vld [vmem:[%s23135_s24 + $0x270] sm:$0xff] }
 0xa68   : > { %21424 = vmatprep.mubr.msk.f32.mxu1 %vm514_vm2, %v24753_v50  ;;  %v10107_v46 = vrot.slane %v19407_v4, 1  ;;  %v10106_v50 = vsel %vm504_vm1, %v10104_v0, %v10105_v36  ;;  %v10211_v3 = vrot.slane %v19407_v4, 2  ;;  %v10527_v0 = vrot.slane %v19427_v38, 2 }
 0xa6a   : > { %v10212_v52 = vsel %vm706_vm4, %v10209_v58, %v10211_v3  ;;  %v10214_v37 = vsel %vm706_vm4, %v10211_v3, %v10213_v53 }
 0xa6b   : > { %21425 = vmatmul.mubr.msk.f32.vlgmr.msra.gmra.mrb[26].mxu1 %vm514_vm2, %v24760_v27  ;;  %v10208_v27 = vrot.slane %v19405_v59, 2 }
 0xa6c   : > { %21427 = vmatprep.mubr.msk.f32.mxu1 %vm514_vm2, %v24764_v43  ;;  %21431 = vmatpush3.msk.msra.mxu1 %vm523_vm0, %v23158_v17  ;;  %v10110_v43 = vsel %vm504_vm1, %v10107_v46, %v10109_v62 }
 0xa6d   : > { %21438 = vmatprep.subr.msk.mxu1 %vm523_vm0, %v23170_v24  ;;  %v10210_v18 = vsel %vm706_vm4, %v10208_v27, %v10209_v58 }
 0xa6f   : > { %21428 = vmatmul.mubr.msk.f32.gmra.mrb[28].mxu1 %vm514_vm2, %v24750_v55  ;;  %v10108_v55 = vsel %vm504_vm1, %v10105_v36, %v10107_v46 }
 0xa70   : > { %21432 = vmatprep.mubr.msk.f32.mxu1 %vm514_vm2, %v19405_v59  ;;  %v10523_v59 = vrot.slane %v19425_v35, 2 }
 0xa73   : > { %21433 = vmatmul.mubr.msk.f32.vlgmr.msra.gmra.mrb[26].mxu1 %vm514_vm2, %v19406_v7  ;;  %v10525_v7 = vrot.slane %v19426_v32, 2 }
 0xa74   : > { %21435 = vmatprep.mubr.msk.f32.mxu1 %vm514_vm2, %v19407_v4  ;;  %21439 = vmatpush3.msk.msra.mxu1 %vm523_vm0, %v23170_v24  ;;  %v10524_v4 = vsel %vm706_vm4, %v10522_v57, %v10523_v59 }
 0xa75   : > { %21446 = vmatprep.subr.msk.mxu1 %vm523_vm0, %v23187_v34  ;;  %v10526_v36 = vsel %vm706_vm4, %v10523_v59, %v10525_v7  ;;  %v10528_v46 = vsel %vm706_vm4, %v10525_v7, %v10527_v0 }
 0xa77   : > { %21436 = vmatmul.mubr.msk.f32.gmra.mrb[28].mxu1 %vm514_vm2, %v19408_v26 }
 0xa78   : > { %21440 = vmatprep.mubr.msk.f32.mxu1 %vm514_vm2, %v10106_v50 }
 0xa7b   : > { %21441 = vmatmul.mubr.msk.f32.vlgmr.msra.gmra.mrb[26].mxu1 %vm514_vm2, %v10108_v55 }
 0xa7c   : > { %21443 = vmatprep.mubr.msk.f32.mxu1 %vm514_vm2, %v10110_v43  ;;  %21447 = vmatpush3.msk.msra.mxu1 %vm523_vm0, %v23187_v34 }
 0xa7d   : > { %21454 = vmatprep.subr.msk.mxu1 %vm523_vm0, %v23200_v41 }
 0xa7f   : > { %21444 = vmatmul.mubr.msk.f32.gmra.mrb[28].mxu1 %vm514_vm2, %v10109_v62  ;;  %v24967_v62 = vld [vmem:[%s26376_s2] ss:$0 sm:$0xff] }
 0xa80   : > { %21448 = vmatprep.mubr.msk.f32.mxu1 %vm514_vm2, %v10210_v18 }
 0xa83   : > { %21449 = vmatmul.mubr.msk.f32.vlgmr.msra.gmra.mrb[26].mxu1 %vm514_vm2, %v10212_v52 }
 0xa84   : > { %21451 = vmatprep.mubr.msk.f32.mxu1 %vm514_vm2, %v10214_v37  ;;  %21455 = vmatpush3.msk.msra.mxu1 %vm523_vm0, %v23200_v41 }
 0xa85   : > { %21462 = vmatprep.subr.msk.mxu1 %vm523_vm0, %v23213_v48 }
 0xa87   : > { %21452 = vmatmul.mubr.msk.f32.gmra.mrb[28].mxu1 %vm514_vm2, %v10213_v53 }
 0xa88   : > { %21456 = vmatprep.mubr.msk.f32.mxu1 %vm514_vm2, %v24927_v42 }
 0xa8b   : > { %21457 = vmatmul.mubr.msk.f32.vlgmr.msra.gmra.mrb[26].mxu1 %vm514_vm2, %v19425_v35 }
 0xa8c   : > { %21459 = vmatprep.mubr.msk.f32.mxu1 %vm514_vm2, %v19426_v32  ;;  %21463 = vmatpush3.msk.msra.mxu1 %vm523_vm0, %v23213_v48 }
 0xa8d   : > { %21470 = vmatprep.subr.msk.mxu1 %vm523_vm0, %v24725_v5 }
 0xa8f   : > { %21460 = vmatmul.mubr.msk.f32.gmra.mrb[28].mxu1 %vm514_vm2, %v19427_v38 }
 0xa90   : > { %21464 = vmatprep.mubr.msk.f32.mxu1 %vm514_vm2, %v10420_v56 }
 0xa93   : > { %21465 = vmatmul.mubr.msk.f32.vlgmr.msra.gmra.mrb[26].mxu1 %vm514_vm2, %v10422_v15 }
 0xa94   : > { %21467 = vmatprep.mubr.msk.f32.mxu1 %vm514_vm2, %v10424_v45  ;;  %21471 = vmatpush3.msk.msra.mxu1 %vm523_vm0, %v24725_v5 }
 0xa97   : > { %21468 = vmatmul.mubr.msk.f32.gmra.mrb[28].mxu1 %vm514_vm2, %v10423_v2 }
 0xa98   : > { %21472 = vmatprep.mubr.msk.f32.mxu1 %vm514_vm2, %v10524_v4 }
 0xa9b   : > { %21473 = vmatmul.mubr.msk.f32.vlgmr.msra.gmra.mrb[26].mxu1 %vm514_vm2, %v10526_v36 }
 0xa9c   : > { %21475 = vmatprep.mubr.msk.f32.mxu1 %vm514_vm2, %v10528_v46 }
 0xa9f   : > { %21476 = vmatmul.mubr.msk.f32.gmra.mrb[28].mxu1 %vm514_vm2, %v10527_v0 }
 0xaa0   : > { %21569 = vmatprep.mubr.msk.f32.mxu1 %vm1474_vm7, %v23306_v12 }
 0xb2a   : > { %v21405_v26 = vpop.f32.mrb[24].mxu1 }
 0xb2b   : > { %v9685_v50 = vadd.f32 %v24967_v62, %v21405_v26  ;;  %v9679_v55 = vpop.f32.mrb[25].mxu1 }
 0xb2c   : > { %v9680_v27 = vadd.f32 %v24967_v62, %v9679_v55  ;;  %v25050_v55 = vld [vmem:[%s23135_s24 + $0x2c8] sm:$0xff] }
 0xb2d   : > { %v9689_v43 = vmax.f32 %v9685_v50, 0.0  ;;  %v25042_v50 = vld [vmem:[%s23135_s24 + $0x2c0] sm:$0xff] }
 0xb2e   : > { %v9688_v58 = vmax.f32 %v9680_v27, 0.0  ;;  %v11434_v27 = vrot.slane %v25042_v50, 1 }
 0xb2f   : > { %9692 = vst.msk [vmem:[#allocation2 + $0xe1] sm:$0x7f] %vm1563_vm13, %v9689_v43  ;;  %v25054_v43 = vld [vmem:[%s23135_s24 + $0x2d0] sm:$0xff] }
 0xb30   : > { %9691 = vst.msk [vmem:[#allocation2 + $0xd9] sm:$0xff] %vm421_vm8, %v9688_v58  ;;  %v11435_v58 = vrot.slane %v25050_v55, 1 }
 0xb6e   : > { %v21474_v3 = vpop.f32.mrb[26].mxu1 }
 0xb6f   : > { %v10603_v53 = vpop.f32.mrb[27].mxu1 }
 0xb70   : > { %v22218_v18 = vpack.c.bf16 %v21474_v3, %v10603_v53  ;;  %v11437_v3 = vrot.slane %v25054_v43, 1  ;;  %v25065_v53 = vld [vmem:[%s23135_s24 + $0x2d8] sm:$0xff] }
 0xb72   : > { %v21477_v52 = vpop.f32.mrb[28].mxu1  ;;  %22219 = vmatprep.subr.bf16.mxu0 %v22218_v18 }
 0xb73   : > { %v10613_v37 = vpop.f32.mrb[29].mxu1  ;;  %22221 = vmatpush3.bf16.msra.mxu0 %v22218_v18  ;;  %v25068_v18 = vrot.slane %v25065_v53, 1 }
 0xb74   : > { %v22222_v63 = vpack.c.bf16 %v21477_v52, %v10613_v37  ;;  %v25071_v52 = vsel %vm504_vm1, %v11434_v27, %v11435_v58  ;;  %v25080_v37 = vsel %vm504_vm1, %v11435_v58, %v11437_v3 }
 0xb76   : > { %22224 = vmatprep.subr.msk.bf16.mxu0 %vm23383_vm10, %v22222_v63 }
 0xb77   : > { %22227 = vmatpush3.bf16.msk.msra.mxu0 %vm23383_vm10, %v22222_v63  ;;  %v11538_v63 = vrot.slane %v25042_v50, 2 }
 0xb78   : > { %21489 = vmatprep.subr.msk.mxu0 %vm523_vm0, %v23122_v1 }
 0xb7a   : > { %21487 = vmatmul.mubr.msk.f32.vlgmr.msra.gmra.mrb[28].mxu0 %vm1474_vm7, %v23392_v25 }
 0xb7b   : > { %21490 = vmatpush3.msk.msra.mxu0 %vm523_vm0, %v23122_v1  ;;  %21491 = vmatprep.mubr.msk.f32.mxu0 %vm514_vm2, %v10420_v56 }
 0xb7c   : > { %21497 = vmatprep.subr.msk.mxu0 %vm523_vm0, %v24631_v10 }
 0xb7e   : > { %21492 = vmatmul.mubr.msk.f32.vlgmr.msra.gmra.mrb[30].mxu0 %vm514_vm2, %v10422_v15 }
 0xb7f   : > { %21494 = vmatprep.mubr.msk.f32.mxu0 %vm514_vm2, %v10424_v45  ;;  %21498 = vmatpush3.msk.msra.mxu0 %vm523_vm0, %v24631_v10 }
 0xb80   : > { %21505 = vmatprep.subr.msk.mxu0 %vm523_vm0, %v23148_v16 }
 0xb82   : > { %21495 = vmatmul.mubr.msk.f32.gmra.mrb[32].mxu0 %vm514_vm2, %v10423_v2  ;;  %v19468_v2 = vld [vmem:[%s23135_s24 + $0x2b8] sm:$0xff] }
 0xb83   : > { %21499 = vmatprep.mubr.msk.f32.mxu0 %vm514_vm2, %v24927_v42  ;;  %v19465_v42 = vld [vmem:[%s23135_s24 + $0x2a0] sm:$0xff]  ;;  %v11125_v56 = vrot.slane %v19468_v2, 1 }
 0xb84   : > { %v11224_v45 = vrot.slane %v19465_v42, 2 }
 0xb86   : > { %21500 = vmatmul.mubr.msk.f32.vlgmr.msra.gmra.mrb[30].mxu0 %vm514_vm2, %v19425_v35  ;;  %v19466_v35 = vld [vmem:[%s23135_s24 + $0x2a8] sm:$0xff] }
 0xb87   : > { %21502 = vmatprep.mubr.msk.f32.mxu0 %vm514_vm2, %v19426_v32  ;;  %21506 = vmatpush3.msk.msra.mxu0 %vm523_vm0, %v23148_v16  ;;  %v11120_v32 = vrot.slane %v19465_v42, 1  ;;  %v11121_v40 = vrot.slane %v19466_v35, 1  ;;  %v11225_v7 = vrot.slane %v19466_v35, 2 }
 0xb88   : > { %21513 = vmatprep.subr.msk.mxu0 %vm523_vm0, %v23158_v17 }
 0xb89   : > { %v11122_v15 = vsel %vm504_vm1, %v11120_v32, %v11121_v40  ;;  %v11541_v32 = vrot.slane %v25054_v43, 2 }
 0xb8a   : > { %21503 = vmatmul.mubr.msk.f32.gmra.mrb[32].mxu0 %vm514_vm2, %v19427_v38  ;;  %v11123_v38 = vrot.slane %v19467_v61, 1 }
 0xb8b   : > { %21507 = vmatprep.mubr.msk.f32.mxu0 %vm514_vm2, %v10524_v4  ;;  %v11229_v4 = vrot.slane %v19468_v2, 2 }
 0xb8c   : > { %v11124_v57 = vsel %vm504_vm1, %v11121_v40, %v11123_v38  ;;  %v11126_v59 = vsel %vm504_vm1, %v11123_v38, %v11125_v56 }
 0xb8e   : > { %21508 = vmatmul.mubr.msk.f32.vlgmr.msra.gmra.mrb[30].mxu0 %vm514_vm2, %v10526_v36  ;;  %v11226_v36 = vsel %vm706_vm4, %v11224_v45, %v11225_v7  ;;  %v16882_v45 = vld [vmem:[#allocation2 + $0xe0] sm:$0xff] }
 0xb8f   : > { %21510 = vmatprep.mubr.msk.f32.mxu0 %vm514_vm2, %v10528_v46  ;;  %21514 = vmatpush3.msk.msra.mxu0 %vm523_vm0, %v23158_v17  ;;  %v16900_v54 = vmul.f32 %v16882_v45, %v24078_v30 }
 0xb90   : > { %21521 = vmatprep.subr.msk.mxu0 %vm523_vm0, %v23170_v24 }
 0xb91   : > { %v16906_v13 = vrot.slane %v16900_v54, 2 }
 0xb92   : > { %21511 = vmatmul.mubr.msk.f32.gmra.mrb[32].mxu0 %vm514_vm2, %v10527_v0  ;;  %v11227_v0 = vrot.slane %v19467_v61, 2 }
 0xb93   : > { %21515 = vmatprep.mubr.msk.f32.mxu0 %vm514_vm2, %v19465_v42  ;;  %v25085_v42 = vsel %vm504_vm1, %v11437_v3, %v25068_v18 }
 0xb94   : > { %v11228_v46 = vsel %vm706_vm4, %v11225_v7, %v11227_v0  ;;  %v11230_v26 = vsel %vm706_vm4, %v11227_v0, %v11229_v4  ;;  %v16852_v7 = vmul.f32 %v24803_v33, %v23763_v29  ;;  %v16883_v0 = vld [vmem:[#allocation2 + $0xe8] sm:$0x1]  ;;  %v16885_v33 = vmul.f32 %v16882_v45, %v24073_v28 }
 0xb96   : > { %21516 = vmatmul.mubr.msk.f32.vlgmr.msra.gmra.mrb[30].mxu0 %vm514_vm2, %v19466_v35  ;;  %v11539_v35 = vrot.slane %v25050_v55, 2 }
 0xb97   : > { %21518 = vmatprep.mubr.msk.f32.mxu0 %vm514_vm2, %v19467_v61  ;;  %21522 = vmatpush3.msk.msra.mxu0 %vm523_vm0, %v23170_v24  ;;  %v25096_v61 = vrot.slane %v25065_v53, 2 }
 0xb98   : > { %21529 = vmatprep.subr.msk.mxu0 %vm523_vm0, %v23187_v34  ;;  %v25099_v40 = vsel %vm706_vm4, %v11538_v63, %v11539_v35  ;;  %v25106_v38 = vsel %vm706_vm4, %v11539_v35, %v11541_v32  ;;  %v16901_v35 = vmul.f32 %v16883_v0, %v24078_v30 }
 0xb9a   : > { %21519 = vmatmul.mubr.msk.f32.gmra.mrb[32].mxu0 %vm514_vm2, %v19468_v2  ;;  %v25110_v2 = vsel %vm706_vm4, %v11541_v32, %v25096_v61 }
 0xb9b   : > { %21523 = vmatprep.mubr.msk.f32.mxu0 %vm514_vm2, %v11122_v15 }
 0xb9e   : > { %21524 = vmatmul.mubr.msk.f32.vlgmr.msra.gmra.mrb[30].mxu0 %vm514_vm2, %v11124_v57  ;;  %v16881_v57 = vld [vmem:[#allocation2 + $0xd8] sm:$0xff] }
 0xb9f   : > { %21526 = vmatprep.mubr.msk.f32.mxu0 %vm514_vm2, %v11126_v59  ;;  %21530 = vmatpush3.msk.msra.mxu0 %vm523_vm0, %v23187_v34  ;;  %v16884_v63 = vmul.f32 %v16881_v57, %v24073_v28 }
 0xba0   : > { %21537 = vmatprep.subr.msk.mxu0 %vm523_vm0, %v23200_v41 }
 0xba2   : > { %21527 = vmatmul.mubr.msk.f32.gmra.mrb[32].mxu0 %vm514_vm2, %v11125_v56  ;;  %v16850_v56 = vld [vmem:[#allocation2 + $0xd0] sm:$0x1] }
 0xba3   : > { %21531 = vmatprep.mubr.msk.f32.mxu0 %vm514_vm2, %v11226_v36  ;;  %v16868_v15 = vmul.f32 %v16850_v56, %v23752_v23  ;;  %v16889_v36 = vmul.f32 %v16882_v45, %v24064_v6 }
 0xba5   : > { %v16875_v59 = vrot.slane %v16868_v15, 2  ;;  %v16893_v15 = vrot.slane %v16889_v36, 1  ;;  %v16916_v36 = vld [vmem:[#allocation2 + $0x100] sm:$0x1] }
 0xba6   : > { %21532 = vmatmul.mubr.msk.f32.vlgmr.msra.gmra.mrb[30].mxu0 %vm514_vm2, %v11228_v46  ;;  %v16865_v46 = vadd.f32 %v16860_v51, %v16852_v7 }
 0xba7   : > { %21534 = vmatprep.mubr.msk.f32.mxu0 %vm514_vm2, %v11230_v26  ;;  %21538 = vmatpush3.msk.msra.mxu0 %vm523_vm0, %v23200_v41  ;;  %v16876_v27 = vsel %vm706_vm4, %v16873_v39, %v16875_v59  ;;  %v16899_v39 = vmul.f32 %v16881_v57, %v24078_v30  ;;  %v16886_v59 = vadd.f32 %v16884_v63, %v24843_v31 }
 0xba8   : > { %21545 = vmatprep.subr.msk.mxu0 %vm523_vm0, %v23213_v48  ;;  %v16880_v7 = vadd.f32 %v16876_v27, %v16865_v46  ;;  %v16934_v27 = vmul.f32 %v24799_v19, %v16916_v36 }
 0xbaa   : > { %21535 = vmatmul.mubr.msk.f32.gmra.mrb[32].mxu0 %vm514_vm2, %v11229_v4  ;;  %v16888_v4 = vmul.f32 %v16881_v57, %v24064_v6 }
 0xbab   : > { %21539 = vmatprep.mubr.msk.f32.mxu0 %vm514_vm2, %v25042_v50 }
 0xbac   : > { %v16892_v56 = vrot.slane %v16888_v4, 1  ;;  %v16905_v4 = vrot.slane %v16899_v39, 2 }
 0xbae   : > { %21540 = vmatmul.mubr.msk.f32.vlgmr.msra.gmra.mrb[30].mxu0 %vm514_vm2, %v25050_v55  ;;  %v16894_v0 = vsel %vm504_vm1, %v16892_v56, %v16893_v15  ;;  %v16907_v57 = vsel %vm706_vm4, %v16905_v4, %v16906_v13 }
 0xbaf   : > { %21542 = vmatprep.mubr.msk.f32.mxu0 %vm514_vm2, %v25054_v43  ;;  %21546 = vmatpush3.msk.msra.mxu0 %vm523_vm0, %v23213_v48  ;;  %v16897_v11 = vadd.f32 %v16894_v0, %v16886_v59 }
 0xbb0   : > { %21553 = vmatprep.subr.msk.mxu0 %vm523_vm0, %v24725_v5 }
 0xbb2   : > { %21543 = vmatmul.mubr.msk.f32.gmra.mrb[32].mxu0 %vm514_vm2, %v25065_v53 }
 0xbb3   : > { %21547 = vmatprep.mubr.msk.f32.mxu0 %vm514_vm2, %v25071_v52 }
 0xbb6   : > { %21548 = vmatmul.mubr.msk.f32.vlgmr.msra.gmra.mrb[30].mxu0 %vm514_vm2, %v25080_v37 }
 0xbb7   : > { %21550 = vmatprep.mubr.msk.f32.mxu0 %vm514_vm2, %v25085_v42  ;;  %21554 = vmatpush3.msk.msra.mxu0 %vm523_vm0, %v24725_v5 }
 0xbba   : > { %21551 = vmatmul.mubr.msk.f32.gmra.mrb[32].mxu0 %vm514_vm2, %v25068_v18 }
 0xbbb   : > { %21555 = vmatprep.mubr.msk.f32.mxu0 %vm514_vm2, %v25099_v40 }
 0xbbe   : > { %21556 = vmatmul.mubr.msk.f32.vlgmr.msra.gmra.mrb[30].mxu0 %vm514_vm2, %v25106_v38 }
 0xbbf   : > { %21558 = vmatprep.mubr.msk.f32.mxu0 %vm514_vm2, %v25110_v2 }
 0xbc2   : > { %21559 = vmatmul.mubr.msk.f32.gmra.mrb[32].mxu0 %vm514_vm2, %v25096_v61 }
 0xbc3   : > { %21652 = vmatprep.mubr.msk.f32.mxu0 %vm1474_vm7, %v23306_v12 }
 0xc4d   : > { %v21488_v26 = vpop.f32.mrb[28].mxu0 }
 0xc4e   : > { %v10701_v58 = vadd.f32 %v24967_v62, %v21488_v26  ;;  %v10695_v3 = vpop.f32.mrb[29].mxu0  ;;  %v16887_v26 = vadd.f32 %v16885_v33, %v16880_v7 }
 0xc4f   : > { %v10696_v32 = vadd.f32 %v24967_v62, %v10695_v3  ;;  %v16908_v3 = vrot.slane %v16901_v35, 2 }
 0xc50   : > { %v10705_v51 = vmax.f32 %v10701_v58, 0.0  ;;  %v16898_v45 = vadd.f32 %v16893_v15, %v16887_v26  ;;  %v16912_v58 = vadd.f32 %v16907_v57, %v16897_v11  ;;  %v16941_v11 = vrot.slane %v16934_v27, 2 }
 0xc51   : > { %v10704_v14 = vmax.f32 %v10696_v32, 0.0  ;;  %v16909_v46 = vsel %vm706_vm4, %v16906_v13, %v16908_v3 }
 0xc52   : > { %10708 = vst.msk [vmem:[#allocation2 + $0xf9] sm:$0x7f] %vm1563_vm13, %v10705_v51  ;;  %v16913_v32 = vadd.f32 %v16909_v46, %v16898_v45 }
 0xc53   : > { %10707 = vst.msk [vmem:[#allocation2 + $0xf1] sm:$0xff] %vm421_vm8, %v10704_v14 }
 0xc5a   : > { %v16914_v31 = vld [vmem:[#allocation2 + $0xf0] sm:$0xff]  ;;  %v25144_v63 = vld [vmem:[#allocation2 + $0xf8] sm:$0xff] }
 0xc5b   : > { %v16917_v33 = vmul.f32 %v16914_v31, %v24108_v44  ;;  %v16918_v35 = vmul.f32 %v25144_v63, %v24108_v44  ;;  %v16921_v56 = vmul.f32 %v16914_v31, %v24113_v47  ;;  %v16922_v15 = vmul.f32 %v25144_v63, %v24113_v47 }
 0xc5c   : > { %v16932_v54 = vmul.f32 %v24799_v19, %v16914_v31  ;;  %v16933_v13 = vmul.f32 %v24799_v19, %v25144_v63  ;;  %v17107_v0 = vmul.f32 %v16914_v31, %v23745_v20  ;;  %v25158_v3 = vmul.f32 %v25144_v63, %v23745_v20 }
 0xc5d   : > { %v16919_v51 = vadd.f32 %v16917_v33, %v16912_v58  ;;  %v16920_v7 = vadd.f32 %v16918_v35, %v16913_v32  ;;  %v16925_v14 = vrot.slane %v16921_v56, 1  ;;  %v16926_v39 = vrot.slane %v16922_v15, 1 }
 0xc5e   : > { %v16938_v59 = vrot.slane %v16932_v54, 2  ;;  %v16939_v26 = vrot.slane %v16933_v13, 2  ;;  %v17118_v4 = vmul.f32 %v16914_v31, %v23752_v23  ;;  %v17103_v27 = vmul.f32 %v16914_v31, %v23763_v29 }
 0xc5f   : > { %v16927_v36 = vsel %vm504_vm1, %v16925_v14, %v16926_v39  ;;  %v16931_v45 = vadd.f32 %v16926_v39, %v16920_v7  ;;  %v17111_v57 = vrot.slane %v17107_v0, 1  ;;  %v17112_v58 = vrot.slane %v25158_v3, 1 }
 0xc60   : > { %v16942_v19 = vsel %vm706_vm4, %v16939_v26, %v16941_v11  ;;  %v16930_v46 = vadd.f32 %v16927_v36, %v16919_v51  ;;  %v16940_v32 = vsel %vm706_vm4, %v16938_v59, %v16939_v26  ;;  %v25168_v35 = vmul.f32 %v25144_v63, %v23752_v23 }
 0xc61   : > { %v16946_v33 = vadd.f32 %v16942_v19, %v16931_v45  ;;  %v17124_v56 = vrot.slane %v17118_v4, 2  ;;  %v17113_v54 = vsel %vm504_vm1, %v17111_v57, %v17112_v58 }
 0xc62   : > { %v16945_v15 = vadd.f32 %v16940_v32, %v16930_v46  ;;  %v17116_v11 = vadd.f32 %v17113_v54, %v17103_v27  ;;  %v17125_v31 = vrot.slane %v25168_v35, 2 }
 0xc63   : > { %v16948_v13 = vadd.f32 %v24835_v9, %v16946_v33 }
 0xc64   : > { %v16947_v51 = vadd.f32 %v24835_v9, %v16945_v15  ;;  %v17126_v14 = vsel %vm706_vm4, %v17124_v56, %v17125_v31  ;;  %v19526_v9 = vld [vmem:[%s23135_s24 + $0x2e8] sm:$0xff]  ;;  %v25263_v56 = vld [vmem:[%s23135_s24 + $0x300] sm:$0xff] }
 0xc65   : > { %v16950_v7 = vmax.f32 %v16948_v13, 0.0  ;;  %v25179_v59 = vadd.f32 %v17126_v14, %v17116_v11  ;;  %v19545_v15 = vld [vmem:[%s23135_s24 + $0x308] sm:$0xff]  ;;  %v12450_v54 = vrot.slane %v25263_v56, 1  ;;  %v19546_v13 = vld [vmem:[%s23135_s24 + $0x310] sm:$0xff] }
 0xc66   : > { %v16949_v39 = vmax.f32 %v16947_v51, 0.0  ;;  %v12451_v11 = vrot.slane %v19545_v15, 1  ;;  %v12453_v51 = vrot.slane %v19546_v13, 1 }
 0xc68   : > { %v25181_v26 = vpack.c.bf16 %v16950_v7, %v16949_v39  ;;  %v19547_v7 = vld [vmem:[%s23135_s24 + $0x318] sm:$0xff]  ;;  %v12452_v39 = vsel %vm504_vm1, %v12450_v54, %v12451_v11 }
 0xc69   : > { %v12455_v14 = vrot.slane %v19547_v7, 1 }
 0xc91   : > { %v21557_v0 = vpop.f32.mrb[30].mxu0 }
 0xc92   : > { %v11619_v4 = vpop.f32.mrb[31].mxu0 }
 0xc93   : > { %v22228_v36 = vpack.c.bf16 %v21557_v0, %v11619_v4  ;;  %v12454_v0 = vsel %vm504_vm1, %v12451_v11, %v12453_v51  ;;  %v12554_v4 = vrot.slane %v25263_v56, 2 }
 0xc95   : > { %v21560_v45 = vpop.f32.mrb[32].mxu0  ;;  %22229 = vmatprep.subr.bf16.mxu1 %v22228_v36 }
 0xc96   : > { %v11629_v19 = vpop.f32.mrb[33].mxu0  ;;  %22231 = vmatpush3.bf16.msra.mxu1 %v22228_v36  ;;  %v12456_v36 = vsel %vm504_vm1, %v12453_v51, %v12455_v14 }
 0xc97   : > { %v22232_v46 = vpack.c.bf16 %v21560_v45, %v11629_v19  ;;  %v12555_v45 = vrot.slane %v19545_v15, 2  ;;  %v12557_v19 = vrot.slane %v19546_v13, 2 }
 0xc99   : > { %22234 = vmatprep.subr.msk.bf16.mxu1 %vm23383_vm10, %v22232_v46 }
 0xc9a   : > { %22237 = vmatpush3.bf16.msk.msra.mxu1 %vm23383_vm10, %v22232_v46  ;;  %v12559_v46 = vrot.slane %v19547_v7, 2 }
 0xc9b   : > { %21572 = vmatprep.subr.msk.mxu1 %vm523_vm0, %v23122_v1 }
 0xc9d   : > { %21570 = vmatmul.mubr.msk.f32.vlgmr.msra.gmra.mrb[30].mxu1 %vm1474_vm7, %v23392_v25 }
 0xc9e   : > { %21573 = vmatpush3.msk.msra.mxu1 %vm523_vm0, %v23122_v1  ;;  %21574 = vmatprep.mubr.msk.f32.mxu1 %vm514_vm2, %v25071_v52 }
 0xc9f   : > { %21580 = vmatprep.subr.msk.mxu1 %vm523_vm0, %v24631_v10 }
 0xca1   : > { %21575 = vmatmul.mubr.msk.f32.vlgmr.msra.gmra.mrb[32].mxu1 %vm514_vm2, %v25080_v37 }
 0xca2   : > { %21577 = vmatprep.mubr.msk.f32.mxu1 %vm514_vm2, %v25085_v42  ;;  %21581 = vmatpush3.msk.msra.mxu1 %vm523_vm0, %v24631_v10  ;;  %v19525_v10 = vld [vmem:[%s23135_s24 + $0x2e0] sm:$0xff] }
 0xca3   : > { %21588 = vmatprep.subr.msk.mxu1 %vm523_vm0, %v23148_v16 }
 0xca5   : > { %21578 = vmatmul.mubr.msk.f32.gmra.mrb[34].mxu1 %vm514_vm2, %v25068_v18  ;;  %v19528_v18 = vld [vmem:[%s23135_s24 + $0x2f8] sm:$0xff] }
 0xca6   : > { %21582 = vmatprep.mubr.msk.f32.mxu1 %vm514_vm2, %v25042_v50  ;;  %v12136_v50 = vrot.slane %v19525_v10, 1  ;;  %v12141_v52 = vrot.slane %v19528_v18, 1  ;;  %v12245_v27 = vrot.slane %v19528_v18, 2 }
 0xca9   : > { %21583 = vmatmul.mubr.msk.f32.vlgmr.msra.gmra.mrb[32].mxu1 %vm514_vm2, %v25050_v55  ;;  %v19527_v55 = vld [vmem:[%s23135_s24 + $0x2f0] sm:$0xff] }
 0xcaa   : > { %21585 = vmatprep.mubr.msk.f32.mxu1 %vm514_vm2, %v25054_v43  ;;  %21589 = vmatpush3.msk.msra.mxu1 %vm523_vm0, %v23148_v16  ;;  %v12137_v43 = vrot.slane %v19526_v9, 1 }
 0xcab   : > { %21596 = vmatprep.subr.msk.mxu1 %vm523_vm0, %v23158_v17 }
 0xcac   : > { %v12138_v37 = vsel %vm504_vm1, %v12136_v50, %v12137_v43  ;;  %v12560_v50 = vsel %vm706_vm4, %v12557_v19, %v12559_v46 }
 0xcad   : > { %21586 = vmatmul.mubr.msk.f32.gmra.mrb[34].mxu1 %vm514_vm2, %v25065_v53  ;;  %v12139_v53 = vrot.slane %v19527_v55, 1 }
 0xcae   : > { %21590 = vmatprep.mubr.msk.f32.mxu1 %vm514_vm2, %v25099_v40 }
 0xcaf   : > { %v12140_v42 = vsel %vm504_vm1, %v12137_v43, %v12139_v53  ;;  %v12142_v40 = vsel %vm504_vm1, %v12139_v53, %v12141_v52 }
 0xcb1   : > { %21591 = vmatmul.mubr.msk.f32.vlgmr.msra.gmra.mrb[32].mxu1 %vm514_vm2, %v25106_v38  ;;  %v12241_v38 = vrot.slane %v19526_v9, 2 }
 0xcb2   : > { %21593 = vmatprep.mubr.msk.f32.mxu1 %vm514_vm2, %v25110_v2  ;;  %21597 = vmatpush3.msk.msra.mxu1 %vm523_vm0, %v23158_v17  ;;  %v12243_v2 = vrot.slane %v19527_v55, 2 }
 0xcb3   : > { %21604 = vmatprep.subr.msk.mxu1 %vm523_vm0, %v23170_v24 }
 0xcb4   : > { %v12244_v32 = vsel %vm706_vm4, %v12241_v38, %v12243_v2  ;;  %v12246_v33 = vsel %vm706_vm4, %v12243_v2, %v12245_v27 }
 0xcb5   : > { %21594 = vmatmul.mubr.msk.f32.gmra.mrb[34].mxu1 %vm514_vm2, %v25096_v61  ;;  %v12240_v61 = vrot.slane %v19525_v10, 2 }
 0xcb6   : > { %21598 = vmatprep.mubr.msk.f32.mxu1 %vm514_vm2, %v19525_v10  ;;  %v12556_v10 = vsel %vm706_vm4, %v12554_v4, %v12555_v45 }
 0xcb7   : > { %v12242_v57 = vsel %vm706_vm4, %v12240_v61, %v12241_v38 }
 0xcb9   : > { %21599 = vmatmul.mubr.msk.f32.vlgmr.msra.gmra.mrb[32].mxu1 %vm514_vm2, %v19526_v9  ;;  %v12558_v9 = vsel %vm706_vm4, %v12555_v45, %v12557_v19 }
 0xcba   : > { %21601 = vmatprep.mubr.msk.f32.mxu1 %vm514_vm2, %v19527_v55  ;;  %21605 = vmatpush3.msk.msra.mxu1 %vm523_vm0, %v23170_v24 }
 0xcbb   : > { %21612 = vmatprep.subr.msk.mxu1 %vm523_vm0, %v23187_v34 }
 0xcbd   : > { %21602 = vmatmul.mubr.msk.f32.gmra.mrb[34].mxu1 %vm514_vm2, %v19528_v18 }
 0xcbe   : > { %21606 = vmatprep.mubr.msk.f32.mxu1 %vm514_vm2, %v12138_v37 }
 0xcc1   : > { %21607 = vmatmul.mubr.msk.f32.vlgmr.msra.gmra.mrb[32].mxu1 %vm514_vm2, %v12140_v42 }
 0xcc2   : > { %21609 = vmatprep.mubr.msk.f32.mxu1 %vm514_vm2, %v12142_v40  ;;  %21613 = vmatpush3.msk.msra.mxu1 %vm523_vm0, %v23187_v34 }
 0xcc3   : > { %21620 = vmatprep.subr.msk.mxu1 %vm523_vm0, %v23200_v41 }
 0xcc5   : > { %21610 = vmatmul.mubr.msk.f32.gmra.mrb[34].mxu1 %vm514_vm2, %v12141_v52 }
 0xcc6   : > { %21614 = vmatprep.mubr.msk.f32.mxu1 %vm514_vm2, %v12242_v57  ;;  %v19585_v57 = vld [vmem:[%s23135_s24 + $0x320] sm:$0xff] }
 0xcc9   : > { %21615 = vmatmul.mubr.msk.f32.vlgmr.msra.gmra.mrb[32].mxu1 %vm514_vm2, %v12244_v32  ;;  %v19586_v32 = vld [vmem:[%s23135_s24 + $0x328] sm:$0xff] }
 0xcca   : > { %21617 = vmatprep.mubr.msk.f32.mxu1 %vm514_vm2, %v12246_v33  ;;  %21621 = vmatpush3.msk.msra.mxu1 %vm523_vm0, %v23200_v41  ;;  %v13152_v33 = vrot.slane %v19585_v57, 1 }
 0xccb   : > { %21628 = vmatprep.subr.msk.mxu1 %vm523_vm0, %v23213_v48 }
 0xccd   : > { %21618 = vmatmul.mubr.msk.f32.gmra.mrb[34].mxu1 %vm514_vm2, %v12245_v27  ;;  %v25318_v27 = vld [vmem:[%s26375_s1] sm:$0xff] }
 0xcce   : > { %21622 = vmatprep.mubr.msk.f32.mxu1 %vm514_vm2, %v25263_v56 }
 0xcd1   : > { %21623 = vmatmul.mubr.msk.f32.vlgmr.msra.gmra.mrb[32].mxu1 %vm514_vm2, %v19545_v15 }
 0xcd2   : > { %21625 = vmatprep.mubr.msk.f32.mxu1 %vm514_vm2, %v19546_v13  ;;  %21629 = vmatpush3.msk.msra.mxu1 %vm523_vm0, %v23213_v48 }
 0xcd3   : > { %21636 = vmatprep.subr.msk.mxu1 %vm523_vm0, %v24725_v5 }
 0xcd5   : > { %21626 = vmatmul.mubr.msk.f32.gmra.mrb[34].mxu1 %vm514_vm2, %v19547_v7 }
 0xcd6   : > { %21630 = vmatprep.mubr.msk.f32.mxu1 %vm514_vm2, %v12452_v39 }
 0xcd9   : > { %21631 = vmatmul.mubr.msk.f32.vlgmr.msra.gmra.mrb[32].mxu1 %vm514_vm2, %v12454_v0 }
 0xcda   : > { %21633 = vmatprep.mubr.msk.f32.mxu1 %vm514_vm2, %v12456_v36  ;;  %21637 = vmatpush3.msk.msra.mxu1 %vm523_vm0, %v24725_v5 }
 0xcdd   : > { %21634 = vmatmul.mubr.msk.f32.gmra.mrb[34].mxu1 %vm514_vm2, %v12455_v14 }
 0xcde   : > { %21638 = vmatprep.mubr.msk.f32.mxu1 %vm514_vm2, %v12556_v10 }
 0xce1   : > { %21639 = vmatmul.mubr.msk.f32.vlgmr.msra.gmra.mrb[32].mxu1 %vm514_vm2, %v12558_v9 }
 0xce2   : > { %21641 = vmatprep.mubr.msk.f32.mxu1 %vm514_vm2, %v12560_v50 }
 0xce5   : > { %21642 = vmatmul.mubr.msk.f32.gmra.mrb[34].mxu1 %vm514_vm2, %v12559_v46 }
 0xce6   : > { %21735 = vmatprep.mubr.msk.f32.mxu1 %vm1474_vm7, %v23306_v12 }
 0xd70   : > { %v21571_v5 = vpop.f32.mrb[30].mxu1 }
 0xd71   : > { %v11717_v55 = vadd.f32 %v24967_v62, %v21571_v5  ;;  %v11711_v43 = vpop.f32.mrb[31].mxu1  ;;  %v25390_v5 = vld [vmem:[%s23135_s24 + $0x350] sm:$0xff] }
 0xd72   : > { %v11712_v53 = vadd.f32 %v24967_v62, %v11711_v43  ;;  %v13469_v43 = vrot.slane %v25390_v5, 1 }
 0xd73   : > { %v11721_v18 = vmax.f32 %v11717_v55, 0.0 }
 0xd74   : > { %v11720_v52 = vmax.f32 %v11712_v53, 0.0  ;;  %v25401_v53 = vld [vmem:[%s23135_s24 + $0x358] sm:$0xff] }
 0xd75   : > { %11724 = vst.msk [vmem:[#allocation2 + $0x111] sm:$0x7f] %vm1563_vm13, %v11721_v18  ;;  %v25404_v18 = vrot.slane %v25401_v53, 1 }
 0xd76   : > { %11723 = vst.msk [vmem:[#allocation2 + $0x109] sm:$0xff] %vm421_vm8, %v11720_v52 }
 0xdb4   : > { %v21640_v37 = vpop.f32.mrb[32].mxu1 }
 0xdb5   : > { %v12635_v42 = vpop.f32.mrb[33].mxu1 }
 0xdb6   : > { %v22238_v61 = vpack.c.bf16 %v21640_v37, %v12635_v42  ;;  %v25412_v37 = vld [vmem:[%s26375_s1 + $0x18] sm:$0x7] }
 0xdb8   : > { %v21643_v40 = vpop.f32.mrb[34].mxu1  ;;  %22239 = vmatprep.subr.bf16.mxu0 %v22238_v61 }
 0xdb9   : > { %v12645_v38 = vpop.f32.mrb[35].mxu1  ;;  %22241 = vmatpush3.bf16.msra.mxu0 %v22238_v61 }
 0xdba   : > { %v22242_v2 = vpack.c.bf16 %v21643_v40, %v12645_v38  ;;  %v25426_v40 = vsel %vm504_vm1, %v13469_v43, %v25404_v18 }
 0xdbc   : > { %22244 = vmatprep.subr.msk.bf16.mxu0 %vm23383_vm10, %v22242_v2 }
 0xdbd   : > { %22247 = vmatpush3.bf16.msk.msra.mxu0 %vm23383_vm10, %v22242_v2  ;;  %v13573_v2 = vrot.slane %v25390_v5, 2 }
 0xdbe   : > { %21655 = vmatprep.subr.msk.mxu0 %vm523_vm0, %v23122_v1 }
 0xdc0   : > { %21653 = vmatmul.mubr.msk.f32.vlgmr.msra.gmra.mrb[34].mxu0 %vm1474_vm7, %v23392_v25 }
 0xdc1   : > { %21656 = vmatpush3.msk.msra.mxu0 %vm523_vm0, %v23122_v1  ;;  %21657 = vmatprep.mubr.msk.f32.mxu0 %vm514_vm2, %v12452_v39 }
 0xdc2   : > { %21663 = vmatprep.subr.msk.mxu0 %vm523_vm0, %v25318_v27 }
 0xdc4   : > { %21658 = vmatmul.mubr.msk.f32.vlgmr.msra.gmra.mrb[36].mxu0 %vm514_vm2, %v12454_v0  ;;  %v13257_v0 = vrot.slane %v19586_v32, 2 }
 0xdc5   : > { %21660 = vmatprep.mubr.msk.f32.mxu0 %vm514_vm2, %v12456_v36  ;;  %21664 = vmatpush3.msk.msra.mxu0 %vm523_vm0, %v25318_v27 }
 0xdc6   : > { %21671 = vmatprep.subr.msk.mxu0 %vm523_vm0, %v23148_v16 }
 0xdc8   : > { %21661 = vmatmul.mubr.msk.f32.gmra.mrb[38].mxu0 %vm514_vm2, %v12455_v14  ;;  %v13256_v14 = vrot.slane %v19585_v57, 2 }
 0xdc9   : > { %21665 = vmatprep.mubr.msk.f32.mxu0 %vm514_vm2, %v25263_v56  ;;  %v19587_v56 = vld [vmem:[%s23135_s24 + $0x330] sm:$0xff] }
 0xdca   : > { %v13155_v54 = vrot.slane %v19587_v56, 1  ;;  %v13259_v4 = vrot.slane %v19587_v56, 2  ;;  %v13258_v45 = vsel %vm706_vm4, %v13256_v14, %v13257_v0  ;;  %v17135_v14 = vld [vmem:[#allocation2 + $0x118] sm:$0x1] }
 0xdcc   : > { %21666 = vmatmul.mubr.msk.f32.vlgmr.msra.gmra.mrb[36].mxu0 %vm514_vm2, %v19545_v15  ;;  %v13153_v15 = vrot.slane %v19586_v32, 1  ;;  %v13260_v19 = vsel %vm706_vm4, %v13257_v0, %v13259_v4 }
 0xdcd   : > { %21668 = vmatprep.mubr.msk.f32.mxu0 %vm514_vm2, %v19546_v13  ;;  %21672 = vmatpush3.msk.msra.mxu0 %vm523_vm0, %v23148_v16  ;;  %v19588_v13 = vld [vmem:[%s23135_s24 + $0x338] sm:$0xff] }
 0xdce   : > { %21679 = vmatprep.subr.msk.mxu0 %vm523_vm0, %v23158_v17  ;;  %v13157_v11 = vrot.slane %v19588_v13, 1  ;;  %v13154_v51 = vsel %vm504_vm1, %v13152_v33, %v13153_v15  ;;  %v13261_v36 = vrot.slane %v19588_v13, 2 }
 0xdd0   : > { %21669 = vmatmul.mubr.msk.f32.gmra.mrb[38].mxu0 %vm514_vm2, %v19547_v7  ;;  %v13156_v7 = vsel %vm504_vm1, %v13153_v15, %v13155_v54  ;;  %v13158_v39 = vsel %vm504_vm1, %v13155_v54, %v13157_v11  ;;  %v17102_v15 = vld [vmem:[#allocation2 + $0x100] sm:$0x1] }
 0xdd1   : > { %21673 = vmatprep.mubr.msk.f32.mxu0 %vm514_vm2, %v12556_v10  ;;  %v25378_v10 = vld [vmem:[%s23135_s24 + $0x340] sm:$0xff]  ;;  %v17120_v54 = vmul.f32 %v17102_v15, %v23752_v23 }
 0xdd2   : > { %v13570_v61 = vrot.slane %v25378_v10, 2 }
 0xdd4   : > { %21674 = vmatmul.mubr.msk.f32.vlgmr.msra.gmra.mrb[36].mxu0 %vm514_vm2, %v12558_v9  ;;  %v25386_v9 = vld [vmem:[%s23135_s24 + $0x348] sm:$0xff] }
 0xdd5   : > { %21676 = vmatprep.mubr.msk.f32.mxu0 %vm514_vm2, %v12560_v50  ;;  %21680 = vmatpush3.msk.msra.mxu0 %vm523_vm0, %v23158_v17  ;;  %v13466_v50 = vrot.slane %v25378_v10, 1  ;;  %v13467_v55 = vrot.slane %v25386_v9, 1  ;;  %v13571_v38 = vrot.slane %v25386_v9, 2 }
 0xdd6   : > { %21687 = vmatprep.subr.msk.mxu0 %vm523_vm0, %v23170_v24 }
 0xdd7   : > { %v25407_v52 = vsel %vm504_vm1, %v13466_v50, %v13467_v55  ;;  %v25421_v42 = vsel %vm504_vm1, %v13467_v55, %v13469_v43  ;;  %v25447_v33 = vsel %vm706_vm4, %v13571_v38, %v13573_v2  ;;  %v17153_v55 = vmul.f32 %v17135_v14, %v24078_v30 }
 0xdd8   : > { %21677 = vmatmul.mubr.msk.f32.gmra.mrb[38].mxu0 %vm514_vm2, %v12559_v46  ;;  %v13262_v46 = vsel %vm706_vm4, %v13259_v4, %v13261_v36 }
 0xdd9   : > { %21681 = vmatprep.mubr.msk.f32.mxu0 %vm514_vm2, %v19585_v57  ;;  %v25437_v57 = vrot.slane %v25401_v53, 2 }
 0xddc   : > { %21682 = vmatmul.mubr.msk.f32.vlgmr.msra.gmra.mrb[36].mxu0 %vm514_vm2, %v19586_v32  ;;  %v25440_v32 = vsel %vm706_vm4, %v13570_v61, %v13571_v38 }
 0xddd   : > { %21684 = vmatprep.mubr.msk.f32.mxu0 %vm514_vm2, %v19587_v56  ;;  %21688 = vmatpush3.msk.msra.mxu0 %vm523_vm0, %v23170_v24  ;;  %v25451_v56 = vsel %vm706_vm4, %v13573_v2, %v25437_v57 }
 0xdde   : > { %21695 = vmatprep.subr.msk.mxu0 %vm523_vm0, %v23187_v34 }
 0xde0   : > { %21685 = vmatmul.mubr.msk.f32.gmra.mrb[38].mxu0 %vm514_vm2, %v19588_v13  ;;  %v17133_v13 = vld [vmem:[#allocation2 + $0x108] sm:$0xff] }
 0xde1   : > { %21689 = vmatprep.mubr.msk.f32.mxu0 %vm514_vm2, %v13154_v51  ;;  %v17127_v51 = vrot.slane %v17120_v54, 2  ;;  %v17136_v50 = vmul.f32 %v17133_v13, %v24073_v28 }
 0xde3   : > { %v17138_v15 = vadd.f32 %v17136_v50, %v25179_v59 }
 0xde4   : > { %21690 = vmatmul.mubr.msk.f32.vlgmr.msra.gmra.mrb[36].mxu0 %vm514_vm2, %v13156_v7  ;;  %v17104_v7 = vmul.f32 %v25144_v63, %v23763_v29 }
 0xde5   : > { %21692 = vmatprep.mubr.msk.f32.mxu0 %vm514_vm2, %v13158_v39  ;;  %21696 = vmatpush3.msk.msra.mxu0 %vm523_vm0, %v23187_v34  ;;  %v17140_v39 = vmul.f32 %v17133_v13, %v24064_v6 }
 0xde6   : > { %21703 = vmatprep.subr.msk.mxu0 %vm523_vm0, %v23200_v41  ;;  %v17117_v4 = vadd.f32 %v17112_v58, %v17104_v7 }
 0xde7   : > { %v17144_v61 = vrot.slane %v17140_v39, 1  ;;  %v17168_v39 = vld [vmem:[#allocation2 + $0x130] sm:$0x1] }
 0xde8   : > { %21693 = vmatmul.mubr.msk.f32.gmra.mrb[38].mxu0 %vm514_vm2, %v13157_v11  ;;  %v17134_v11 = vld [vmem:[#allocation2 + $0x110] sm:$0xff] }
 0xde9   : > { %21697 = vmatprep.mubr.msk.f32.mxu0 %vm514_vm2, %v13258_v45  ;;  %v17141_v0 = vmul.f32 %v17134_v11, %v24064_v6  ;;  %v17128_v45 = vsel %vm706_vm4, %v17125_v31, %v17127_v51  ;;  %v17137_v63 = vmul.f32 %v17134_v11, %v24073_v28  ;;  %v17152_v3 = vmul.f32 %v17134_v11, %v24078_v30 }
 0xdea   : > { %v17132_v2 = vadd.f32 %v17128_v45, %v17117_v4  ;;  %v17151_v31 = vmul.f32 %v17133_v13, %v24078_v30  ;;  %v25486_v13 = vld [vmem:[%s26377_s3 + $0x8] ss:$0 sm:$0xff] }
 0xdeb   : > { %v17145_v38 = vrot.slane %v17141_v0, 1  ;;  %v17158_v7 = vrot.slane %v17152_v3, 2  ;;  %v17186_v59 = vmul.f32 %v25486_v13, %v17168_v39 }
 0xdec   : > { %21698 = vmatmul.mubr.msk.f32.vlgmr.msra.gmra.mrb[36].mxu0 %vm514_vm2, %v13260_v19  ;;  %v17139_v54 = vadd.f32 %v17137_v63, %v17132_v2  ;;  %v17157_v14 = vrot.slane %v17151_v31, 2 }
 0xded   : > { %21700 = vmatprep.mubr.msk.f32.mxu0 %vm514_vm2, %v13262_v46  ;;  %21704 = vmatpush3.msk.msra.mxu0 %vm523_vm0, %v23200_v41  ;;  %v17146_v51 = vsel %vm504_vm1, %v17144_v61, %v17145_v38 }
 0xdee   : > { %21711 = vmatprep.subr.msk.mxu0 %vm523_vm0, %v23213_v48  ;;  %v17149_v0 = vadd.f32 %v17146_v51, %v17138_v15  ;;  %v17150_v11 = vadd.f32 %v17145_v38, %v17139_v54 }
 0xdf0   : > { %21701 = vmatmul.mubr.msk.f32.gmra.mrb[38].mxu0 %vm514_vm2, %v13261_v36 }
 0xdf1   : > { %21705 = vmatprep.mubr.msk.f32.mxu0 %vm514_vm2, %v25378_v10 }
 0xdf4   : > { %21706 = vmatmul.mubr.msk.f32.vlgmr.msra.gmra.mrb[36].mxu0 %vm514_vm2, %v25386_v9 }
 0xdf5   : > { %21708 = vmatprep.mubr.msk.f32.mxu0 %vm514_vm2, %v25390_v5  ;;  %21712 = vmatpush3.msk.msra.mxu0 %vm523_vm0, %v23213_v48 }
 0xdf6   : > { %21719 = vmatprep.subr.msk.mxu0 %vm523_vm0, %v25412_v37 }
 0xdf8   : > { %21709 = vmatmul.mubr.msk.f32.gmra.mrb[38].mxu0 %vm514_vm2, %v25401_v53 }
 0xdf9   : > { %21713 = vmatprep.mubr.msk.f32.mxu0 %vm514_vm2, %v25407_v52 }
 0xdfc   : > { %21714 = vmatmul.mubr.msk.f32.vlgmr.msra.gmra.mrb[36].mxu0 %vm514_vm2, %v25421_v42 }
 0xdfd   : > { %21716 = vmatprep.mubr.msk.f32.mxu0 %vm514_vm2, %v25426_v40  ;;  %21720 = vmatpush3.msk.msra.mxu0 %vm523_vm0, %v25412_v37 }
 0xe00   : > { %21717 = vmatmul.mubr.msk.f32.gmra.mrb[38].mxu0 %vm514_vm2, %v25404_v18 }
 0xe01   : > { %21721 = vmatprep.mubr.msk.f32.mxu0 %vm514_vm2, %v25440_v32 }
 0xe04   : > { %21722 = vmatmul.mubr.msk.f32.vlgmr.msra.gmra.mrb[36].mxu0 %vm514_vm2, %v25447_v33 }
 0xe05   : > { %21724 = vmatprep.mubr.msk.f32.mxu0 %vm514_vm2, %v25451_v56 }
 0xe08   : > { %21725 = vmatmul.mubr.msk.f32.gmra.mrb[38].mxu0 %vm514_vm2, %v25437_v57 }
 0xe09   : > { %21818 = vmatprep.mubr.msk.f32.mxu0 %vm1474_vm7, %v23306_v12 }
 0xe93   : > { %v21654_v36 = vpop.f32.mrb[34].mxu0 }
 0xe94   : > { %v12733_v19 = vadd.f32 %v24967_v62, %v21654_v36  ;;  %v12727_v46 = vpop.f32.mrb[35].mxu0  ;;  %v17159_v36 = vsel %vm706_vm4, %v17157_v14, %v17158_v7 }
 0xe95   : > { %v12728_v43 = vadd.f32 %v24967_v62, %v12727_v46  ;;  %v17160_v62 = vrot.slane %v17153_v55, 2  ;;  %v17164_v45 = vadd.f32 %v17159_v36, %v17149_v0 }
 0xe96   : > { %v12737_v58 = vmax.f32 %v12733_v19, 0.0 }
 0xe97   : > { %v12736_v35 = vmax.f32 %v12728_v43, 0.0  ;;  %v17161_v4 = vsel %vm706_vm4, %v17158_v7, %v17160_v62 }
 0xe98   : > { %12740 = vst.msk [vmem:[#allocation2 + $0x129] sm:$0x7f] %vm1563_vm13, %v12737_v58  ;;  %v17165_v19 = vadd.f32 %v17161_v4, %v17150_v11  ;;  %v17193_v58 = vrot.slane %v17186_v59, 2 }
 0xe99   : > { %12739 = vst.msk [vmem:[#allocation2 + $0x121] sm:$0xff] %vm421_vm8, %v12736_v35 }
 0xea0   : > { %v17166_v46 = vld [vmem:[#allocation2 + $0x120] sm:$0xff]  ;;  %v25490_v50 = vld [vmem:[#allocation2 + $0x128] sm:$0xff] }
 0xea1   : > { %v17169_v63 = vmul.f32 %v17166_v46, %v24108_v44  ;;  %v17170_v55 = vmul.f32 %v25490_v50, %v24108_v44  ;;  %v17173_v43 = vmul.f32 %v17166_v46, %v24113_v47  ;;  %v17174_v61 = vmul.f32 %v25490_v50, %v24113_v47 }
 0xea2   : > { %v17184_v38 = vmul.f32 %v25486_v13, %v17166_v46  ;;  %v17185_v3 = vmul.f32 %v25486_v13, %v25490_v50  ;;  %v17359_v7 = vmul.f32 %v17166_v46, %v23745_v20  ;;  %v25504_v62 = vmul.f32 %v25490_v50, %v23745_v20 }
 0xea3   : > { %v17171_v2 = vadd.f32 %v17169_v63, %v17164_v45  ;;  %v17172_v35 = vadd.f32 %v17170_v55, %v17165_v19  ;;  %v17177_v31 = vrot.slane %v17173_v43, 1  ;;  %v17178_v15 = vrot.slane %v17174_v61, 1 }
 0xea4   : > { %v17190_v54 = vrot.slane %v17184_v38, 2  ;;  %v17191_v51 = vrot.slane %v17185_v3, 2  ;;  %v17370_v14 = vmul.f32 %v17166_v46, %v23752_v23  ;;  %v17355_v59 = vmul.f32 %v17166_v46, %v23763_v29  ;;  %v25522_v46 = vld [vmem:[%s26378_s4] ss:$0 sm:$0xff] }
 0xea5   : > { %v17179_v39 = vsel %vm504_vm1, %v17177_v31, %v17178_v15  ;;  %v17183_v0 = vadd.f32 %v17178_v15, %v17172_v35  ;;  %v17363_v36 = vrot.slane %v17359_v7, 1  ;;  %v17364_v45 = vrot.slane %v25504_v62, 1 }
 0xea6   : > { %v17194_v11 = vsel %vm706_vm4, %v17191_v51, %v17193_v58  ;;  %v17182_v4 = vadd.f32 %v17179_v39, %v17171_v2  ;;  %v17192_v19 = vsel %vm706_vm4, %v17190_v54, %v17191_v51  ;;  %v25514_v55 = vmul.f32 %v25490_v50, %v23752_v23 }
 0xea7   : > { %v17198_v63 = vadd.f32 %v17194_v11, %v17183_v0  ;;  %v17376_v43 = vrot.slane %v17370_v14, 2  ;;  %v17365_v38 = vsel %vm504_vm1, %v17363_v36, %v17364_v45 }
 0xea8   : > { %v17197_v61 = vadd.f32 %v17192_v19, %v17182_v4  ;;  %v17368_v58 = vadd.f32 %v17365_v38, %v17355_v59  ;;  %v17377_v2 = vrot.slane %v25514_v55, 2 }
 0xea9   : > { %v17200_v3 = vadd.f32 %v25522_v46, %v17198_v63 }
 0xeaa   : > { %v17199_v35 = vadd.f32 %v25522_v46, %v17197_v61  ;;  %v17378_v15 = vsel %vm706_vm4, %v17376_v43, %v17377_v2 }
 0xeab   : > { %v17202_v31 = vmax.f32 %v17200_v3, 0.0  ;;  %v25530_v51 = vadd.f32 %v17378_v15, %v17368_v58  ;;  %v25614_v3 = vld [vmem:[%s23135_s24 + $0x380] sm:$0xff]  ;;  %v19665_v58 = vld [vmem:[%s23135_s24 + $0x388] sm:$0xff] }
 0xeac   : > { %v17201_v54 = vmax.f32 %v17199_v35, 0.0  ;;  %v14482_v35 = vrot.slane %v25614_v3, 1  ;;  %v14483_v15 = vrot.slane %v19665_v58, 1 }
 0xeae   : > { %v25532_v7 = vpack.c.bf16 %v17202_v31, %v17201_v54  ;;  %v19666_v31 = vld [vmem:[%s23135_s24 + $0x390] sm:$0xff] }
 0xeaf   : > { %v14485_v54 = vrot.slane %v19666_v31, 1 }
 0xed7   : > { %v21723_v14 = vpop.f32.mrb[36].mxu0 }
 0xed8   : > { %v13651_v39 = vpop.f32.mrb[37].mxu0 }
 0xed9   : > { %v22248_v0 = vpack.c.bf16 %v21723_v14, %v13651_v39  ;;  %v19667_v14 = vld [vmem:[%s23135_s24 + $0x398] sm:$0xff] }
 0xeda   : > { %v14487_v39 = vrot.slane %v19667_v14, 1 }
 0xedb   : > { %v21726_v11 = vpop.f32.mrb[38].mxu0  ;;  %22249 = vmatprep.subr.bf16.mxu1 %v22248_v0 }
 0xedc   : > { %v13661_v4 = vpop.f32.mrb[39].mxu0  ;;  %22251 = vmatpush3.bf16.msra.mxu1 %v22248_v0  ;;  %v14484_v0 = vsel %vm504_vm1, %v14482_v35, %v14483_v15 }
 0xedd   : > { %v22252_v59 = vpack.c.bf16 %v21726_v11, %v13661_v4  ;;  %v14486_v11 = vsel %vm504_vm1, %v14483_v15, %v14485_v54  ;;  %v14586_v4 = vrot.slane %v25614_v3, 2 }
 0xedf   : > { %22254 = vmatprep.subr.msk.bf16.mxu1 %vm23383_vm10, %v22252_v59 }
 0xee0   : > { %22257 = vmatpush3.bf16.msk.msra.mxu1 %vm23383_vm10, %v22252_v59  ;;  %v14488_v59 = vsel %vm504_vm1, %v14485_v54, %v14487_v39 }
 0xee1   : > { %21738 = vmatprep.subr.msk.mxu1 %vm523_vm0, %v23122_v1 }
 0xee3   : > { %21736 = vmatmul.mubr.msk.f32.vlgmr.msra.gmra.mrb[36].mxu1 %vm1474_vm7, %v23392_v25 }
 0xee4   : > { %21739 = vmatpush3.msk.msra.mxu1 %vm523_vm0, %v23122_v1  ;;  %21740 = vmatprep.mubr.msk.f32.mxu1 %vm514_vm2, %v25407_v52 }
 0xee5   : > { %21746 = vmatprep.subr.msk.mxu1 %vm523_vm0, %v25318_v27 }
 0xee7   : > { %21741 = vmatmul.mubr.msk.f32.vlgmr.msra.gmra.mrb[38].mxu1 %vm514_vm2, %v25421_v42  ;;  %v19648_v42 = vld [vmem:[%s23135_s24 + $0x378] sm:$0xff] }
 0xee8   : > { %21743 = vmatprep.mubr.msk.f32.mxu1 %vm514_vm2, %v25426_v40  ;;  %21747 = vmatpush3.msk.msra.mxu1 %vm523_vm0, %v25318_v27  ;;  %v14173_v40 = vrot.slane %v19648_v42, 1  ;;  %v14277_v63 = vrot.slane %v19648_v42, 2 }
 0xee9   : > { %21754 = vmatprep.subr.msk.mxu1 %vm523_vm0, %v23148_v16 }
 0xeeb   : > { %21744 = vmatmul.mubr.msk.f32.gmra.mrb[40].mxu1 %vm514_vm2, %v25404_v18 }
 0xeec   : > { %21748 = vmatprep.mubr.msk.f32.mxu1 %vm514_vm2, %v25378_v10  ;;  %v19645_v10 = vld [vmem:[%s23135_s24 + $0x360] sm:$0xff] }
 0xeef   : > { %21749 = vmatmul.mubr.msk.f32.vlgmr.msra.gmra.mrb[38].mxu1 %vm514_vm2, %v25386_v9  ;;  %v19646_v9 = vld [vmem:[%s23135_s24 + $0x368] sm:$0xff] }
 0xef0   : > { %21751 = vmatprep.mubr.msk.f32.mxu1 %vm514_vm2, %v25390_v5  ;;  %21755 = vmatpush3.msk.msra.mxu1 %vm523_vm0, %v23148_v16  ;;  %v14168_v5 = vrot.slane %v19645_v10, 1  ;;  %v14169_v18 = vrot.slane %v19646_v9, 1  ;;  %v14273_v36 = vrot.slane %v19646_v9, 2 }
 0xef1   : > { %21762 = vmatprep.subr.msk.mxu1 %vm523_vm0, %v23158_v17 }
 0xef3   : > { %21752 = vmatmul.mubr.msk.f32.gmra.mrb[40].mxu1 %vm514_vm2, %v25401_v53  ;;  %v19647_v53 = vld [vmem:[%s23135_s24 + $0x370] sm:$0xff] }
 0xef4   : > { %21756 = vmatprep.mubr.msk.f32.mxu1 %vm514_vm2, %v25440_v32  ;;  %v14171_v52 = vrot.slane %v19647_v53, 1  ;;  %v14170_v32 = vsel %vm504_vm1, %v14168_v5, %v14169_v18  ;;  %v14275_v19 = vrot.slane %v19647_v53, 2  ;;  %v14591_v5 = vrot.slane %v19667_v14, 2 }
 0xef6   : > { %v14276_v61 = vsel %vm706_vm4, %v14273_v36, %v14275_v19  ;;  %v14278_v38 = vsel %vm706_vm4, %v14275_v19, %v14277_v63 }
 0xef7   : > { %21757 = vmatmul.mubr.msk.f32.vlgmr.msra.gmra.mrb[38].mxu1 %vm514_vm2, %v25447_v33  ;;  %v14272_v33 = vrot.slane %v19645_v10, 2 }
 0xef8   : > { %21759 = vmatprep.mubr.msk.f32.mxu1 %vm514_vm2, %v25451_v56  ;;  %21763 = vmatpush3.msk.msra.mxu1 %vm523_vm0, %v23158_v17  ;;  %v14174_v56 = vsel %vm504_vm1, %v14171_v52, %v14173_v40 }
 0xef9   : > { %21770 = vmatprep.subr.msk.mxu1 %vm523_vm0, %v23170_v24  ;;  %v14274_v43 = vsel %vm706_vm4, %v14272_v33, %v14273_v36 }
 0xefb   : > { %21760 = vmatmul.mubr.msk.f32.gmra.mrb[40].mxu1 %vm514_vm2, %v25437_v57  ;;  %v14172_v57 = vsel %vm504_vm1, %v14169_v18, %v14171_v52 }
 0xefc   : > { %21764 = vmatprep.mubr.msk.f32.mxu1 %vm514_vm2, %v19645_v10  ;;  %v14587_v10 = vrot.slane %v19665_v58, 2 }
 0xeff   : > { %21765 = vmatmul.mubr.msk.f32.vlgmr.msra.gmra.mrb[38].mxu1 %vm514_vm2, %v19646_v9  ;;  %v14589_v9 = vrot.slane %v19666_v31, 2 }
 0xf00   : > { %21767 = vmatprep.mubr.msk.f32.mxu1 %vm514_vm2, %v19647_v53  ;;  %21771 = vmatpush3.msk.msra.mxu1 %vm523_vm0, %v23170_v24  ;;  %v14588_v53 = vsel %vm706_vm4, %v14586_v4, %v14587_v10 }
 0xf01   : > { %21778 = vmatprep.subr.msk.mxu1 %vm523_vm0, %v23187_v34  ;;  %v14590_v18 = vsel %vm706_vm4, %v14587_v10, %v14589_v9  ;;  %v14592_v52 = vsel %vm706_vm4, %v14589_v9, %v14591_v5 }
 0xf03   : > { %21768 = vmatmul.mubr.msk.f32.gmra.mrb[40].mxu1 %vm514_vm2, %v19648_v42 }
 0xf04   : > { %21772 = vmatprep.mubr.msk.f32.mxu1 %vm514_vm2, %v14170_v32 }
 0xf07   : > { %21773 = vmatmul.mubr.msk.f32.vlgmr.msra.gmra.mrb[38].mxu1 %vm514_vm2, %v14172_v57 }
 0xf08   : > { %21775 = vmatprep.mubr.msk.f32.mxu1 %vm514_vm2, %v14174_v56  ;;  %21779 = vmatpush3.msk.msra.mxu1 %vm523_vm0, %v23187_v34 }
 0xf09   : > { %21786 = vmatprep.subr.msk.mxu1 %vm523_vm0, %v23200_v41 }
 0xf0b   : > { %21776 = vmatmul.mubr.msk.f32.gmra.mrb[40].mxu1 %vm514_vm2, %v14173_v40  ;;  %v25654_v40 = vld [vmem:[%s26376_s2] ss:$0 sm:$0xff] }
 0xf0c   : > { %21780 = vmatprep.mubr.msk.f32.mxu1 %vm514_vm2, %v14274_v43 }
 0xf0f   : > { %21781 = vmatmul.mubr.msk.f32.vlgmr.msra.gmra.mrb[38].mxu1 %vm514_vm2, %v14276_v61 }
 0xf10   : > { %21783 = vmatprep.mubr.msk.f32.mxu1 %vm514_vm2, %v14278_v38  ;;  %21787 = vmatpush3.msk.msra.mxu1 %vm523_vm0, %v23200_v41 }
 0xf11   : > { %21794 = vmatprep.subr.msk.mxu1 %vm523_vm0, %v23213_v48 }
 0xf13   : > { %21784 = vmatmul.mubr.msk.f32.gmra.mrb[40].mxu1 %vm514_vm2, %v14277_v63 }
 0xf14   : > { %21788 = vmatprep.mubr.msk.f32.mxu1 %vm514_vm2, %v25614_v3 }
 0xf17   : > { %21789 = vmatmul.mubr.msk.f32.vlgmr.msra.gmra.mrb[38].mxu1 %vm514_vm2, %v19665_v58 }
 0xf18   : > { %21791 = vmatprep.mubr.msk.f32.mxu1 %vm514_vm2, %v19666_v31  ;;  %21795 = vmatpush3.msk.msra.mxu1 %vm523_vm0, %v23213_v48 }
 0xf19   : > { %21802 = vmatprep.subr.msk.mxu1 %vm523_vm0, %v25412_v37 }
 0xf1b   : > { %21792 = vmatmul.mubr.msk.f32.gmra.mrb[40].mxu1 %vm514_vm2, %v19667_v14 }
 0xf1c   : > { %21796 = vmatprep.mubr.msk.f32.mxu1 %vm514_vm2, %v14484_v0 }
 0xf1f   : > { %21797 = vmatmul.mubr.msk.f32.vlgmr.msra.gmra.mrb[38].mxu1 %vm514_vm2, %v14486_v11 }
 0xf20   : > { %21799 = vmatprep.mubr.msk.f32.mxu1 %vm514_vm2, %v14488_v59  ;;  %21803 = vmatpush3.msk.msra.mxu1 %vm523_vm0, %v25412_v37 }
 0xf23   : > { %21800 = vmatmul.mubr.msk.f32.gmra.mrb[40].mxu1 %vm514_vm2, %v14487_v39 }
 0xf24   : > { %21804 = vmatprep.mubr.msk.f32.mxu1 %vm514_vm2, %v14588_v53 }
 0xf27   : > { %21805 = vmatmul.mubr.msk.f32.vlgmr.msra.gmra.mrb[38].mxu1 %vm514_vm2, %v14590_v18 }
 0xf28   : > { %21807 = vmatprep.mubr.msk.f32.mxu1 %vm514_vm2, %v14592_v52 }
 0xf2b   : > { %21808 = vmatmul.mubr.msk.f32.gmra.mrb[40].mxu1 %vm514_vm2, %v14591_v5 }
 0xf2c   : > { %21901 = vmatprep.mubr.msk.f32.mxu1 %vm1474_vm7, %v23306_v12 }
 0xfb6   : > { %v21737_v42 = vpop.f32.mrb[36].mxu1 }
 0xfb7   : > { %v13749_v32 = vadd.f32 %v25654_v40, %v21737_v42  ;;  %v13743_v57 = vpop.f32.mrb[37].mxu1 }
 0xfb8   : > { %v13744_v33 = vadd.f32 %v25654_v40, %v13743_v57 }
 0xfb9   : > { %v13753_v56 = vmax.f32 %v13749_v32, 0.0 }
 0xfba   : > { %v13752_v36 = vmax.f32 %v13744_v33, 0.0 }
 0xfbb   : > { %13756 = vst.msk [vmem:[#allocation2 + $0x141] sm:$0x7f] %vm1563_vm13, %v13753_v56 }
 0xfbc   : > { %13755 = vst.msk [vmem:[#allocation2 + $0x139] sm:$0xff] %vm421_vm8, %v13752_v36 }
 0xffa   : > { %v21806_v19 = vpop.f32.mrb[38].mxu1 }
 0xffb   : > { %v14667_v63 = vpop.f32.mrb[39].mxu1 }
 0xffc   : > { %v22258_v43 = vpack.c.bf16 %v21806_v19, %v14667_v63 }
 0xffe   : > { %v21809_v61 = vpop.f32.mrb[40].mxu1  ;;  %22259 = vmatprep.subr.bf16.mxu0 %v22258_v43 }
 0xfff   : > { %v14677_v38 = vpop.f32.mrb[41].mxu1  ;;  %22261 = vmatpush3.bf16.msra.mxu0 %v22258_v43 }
0x1000   : > { %v22262_v35 = vpack.c.bf16 %v21809_v61, %v14677_v38 }
0x1002   : > { %22264 = vmatprep.subr.msk.bf16.mxu0 %vm23383_vm10, %v22262_v35 }
0x1003   : > { %22267 = vmatpush3.bf16.msk.msra.mxu0 %vm23383_vm10, %v22262_v35  ;;  %v23002_v35 = vmov 0.0|0.0  }
0x1004   : > { %21821 = vmatprep.subr.msk.mxu0 %vm523_vm0, %v23122_v1 }
0x1006   : > { %21819 = vmatmul.mubr.msk.f32.vlgmr.msra.gmra.mrb[40].mxu0 %vm1474_vm7, %v23392_v25 }
0x1007   : > { %21822 = vmatpush3.msk.msra.mxu0 %vm523_vm0, %v23122_v1  ;;  %21823 = vmatprep.mubr.msk.f32.mxu0 %vm514_vm2, %v14484_v0  ;;  %v19705_v1 = vld [vmem:[%s23135_s24 + $0x3a0] sm:$0xff] }
0x1008   : > { %21829 = vmatprep.subr.msk.mxu0 %vm523_vm0, %v25318_v27 }
0x100a   : > { %21824 = vmatmul.mubr.msk.f32.vlgmr.msra.gmra.mrb[42].mxu0 %vm514_vm2, %v14486_v11 }
0x100b   : > { %21826 = vmatprep.mubr.msk.f32.mxu0 %vm514_vm2, %v14488_v59  ;;  %21830 = vmatpush3.msk.msra.mxu0 %vm523_vm0, %v25318_v27  ;;  %v15184_v27 = vrot.slane %v19705_v1, 1 }
0x100c   : > { %21837 = vmatprep.subr.msk.mxu0 %vm523_vm0, %v23148_v16 }
0x100e   : > { %21827 = vmatmul.mubr.msk.f32.gmra.mrb[44].mxu0 %vm514_vm2, %v14487_v39  ;;  %v15288_v39 = vrot.slane %v19705_v1, 2 }
0x100f   : > { %21831 = vmatprep.mubr.msk.f32.mxu0 %vm514_vm2, %v25614_v3  ;;  %v19707_v3 = vld [vmem:[%s23135_s24 + $0x3b0] sm:$0xff] }
0x1012   : > { %21832 = vmatmul.mubr.msk.f32.vlgmr.msra.gmra.mrb[42].mxu0 %vm514_vm2, %v19665_v58 }
0x1013   : > { %21834 = vmatprep.mubr.msk.f32.mxu0 %vm514_vm2, %v19666_v31  ;;  %21838 = vmatpush3.msk.msra.mxu0 %vm523_vm0, %v23148_v16  ;;  %v19706_v16 = vld [vmem:[%s23135_s24 + $0x3a8] sm:$0xff]  ;;  %v15187_v31 = vrot.slane %v19707_v3, 1 }
0x1014   : > { %21845 = vmatprep.subr.msk.mxu0 %vm523_vm0, %v23158_v17  ;;  %v15185_v58 = vrot.slane %v19706_v16, 1  ;;  %v15289_v11 = vrot.slane %v19706_v16, 2 }
0x1016   : > { %21835 = vmatmul.mubr.msk.f32.gmra.mrb[44].mxu0 %vm514_vm2, %v19667_v14  ;;  %v15186_v54 = vsel %vm504_vm1, %v15184_v27, %v15185_v58  ;;  %v15188_v14 = vsel %vm504_vm1, %v15185_v58, %v15187_v31  ;;  %v15290_v59 = vsel %vm706_vm4, %v15288_v39, %v15289_v11  ;;  %v17387_v39 = vld [vmem:[#allocation2 + $0x148] sm:$0x1] }
0x1017   : > { %21839 = vmatprep.mubr.msk.f32.mxu0 %vm514_vm2, %v14588_v53 }
0x101a   : > { %21840 = vmatmul.mubr.msk.f32.vlgmr.msra.gmra.mrb[42].mxu0 %vm514_vm2, %v14590_v18  ;;  %v19726_v18 = vld [vmem:[%s23135_s24 + $0x3d0] sm:$0xff] }
0x101b   : > { %21842 = vmatprep.mubr.msk.f32.mxu0 %vm514_vm2, %v14592_v52  ;;  %21846 = vmatpush3.msk.msra.mxu0 %vm523_vm0, %v23158_v17  ;;  %v19708_v17 = vld [vmem:[%s23135_s24 + $0x3b8] sm:$0xff]  ;;  %v15501_v42 = vrot.slane %v19726_v18, 1 }
0x101c   : > { %21853 = vmatprep.subr.msk.mxu0 %vm523_vm0, %v23170_v24  ;;  %v15189_v15 = vrot.slane %v19708_v17, 1  ;;  %v15293_v4 = vrot.slane %v19708_v17, 2 }
0x101e   : > { %21843 = vmatmul.mubr.msk.f32.gmra.mrb[44].mxu0 %vm514_vm2, %v14591_v5  ;;  %v15190_v0 = vsel %vm504_vm1, %v15187_v31, %v15189_v15  ;;  %v19725_v5 = vld [vmem:[%s23135_s24 + $0x3c8] sm:$0xff]  ;;  %v17385_v31 = vld [vmem:[#allocation2 + $0x138] sm:$0xff] }
0x101f   : > { %21847 = vmatprep.mubr.msk.f32.mxu0 %vm514_vm2, %v19705_v1  ;;  %v15499_v52 = vrot.slane %v19725_v5, 1  ;;  %v15603_v19 = vrot.slane %v19725_v5, 2  ;;  %v393_v1 = vld [vmem:[%s26379_s5] sm:$0xff] }
0x1021   : > { %v15502_v33 = vsel %vm504_vm1, %v15499_v52, %v15501_v42 }
0x1022   : > { %21848 = vmatmul.mubr.msk.f32.vlgmr.msra.gmra.mrb[42].mxu0 %vm514_vm2, %v19706_v16  ;;  %v394_v16 = vld [vmem:[%s26379_s5 + $0x8] sm:$0xff] }
0x1023   : > { %21850 = vmatprep.mubr.msk.f32.mxu0 %vm514_vm2, %v19707_v3  ;;  %21854 = vmatpush3.msk.msra.mxu0 %vm523_vm0, %v23170_v24  ;;  %v15291_v24 = vrot.slane %v19707_v3, 2  ;;  %v25768_v27 = vpack.c.bf16 %v394_v16, %v393_v1  ;;  %v17354_v3 = vld [vmem:[#allocation2 + $0x130] sm:$0x1] }
0x1024   : > { %21861 = vmatprep.subr.msk.mxu0 %vm523_vm0, %v23187_v34  ;;  %v17372_v58 = vmul.f32 %v17354_v3, %v23752_v23 }
0x1025   : > { %v15292_v10 = vsel %vm706_vm4, %v15289_v11, %v15291_v24  ;;  %v15294_v9 = vsel %vm706_vm4, %v15291_v24, %v15293_v4 }
0x1026   : > { %21851 = vmatmul.mubr.msk.f32.gmra.mrb[44].mxu0 %vm514_vm2, %v19708_v17  ;;  %v17386_v17 = vld [vmem:[#allocation2 + $0x140] sm:$0xff] }
0x1027   : > { %21855 = vmatprep.mubr.msk.f32.mxu0 %vm514_vm2, %v15186_v54  ;;  %v17356_v54 = vmul.f32 %v25490_v50, %v23763_v29  ;;  %v17393_v11 = vmul.f32 %v17386_v17, %v24064_v6  ;;  %v17388_v50 = vmul.f32 %v17385_v31, %v24073_v28 }
0x1029   : > { %v17390_v55 = vadd.f32 %v17388_v50, %v25530_v51 }
0x102a   : > { %21856 = vmatmul.mubr.msk.f32.vlgmr.msra.gmra.mrb[42].mxu0 %vm514_vm2, %v15188_v14 }
0x102b   : > { %21858 = vmatprep.mubr.msk.f32.mxu0 %vm514_vm2, %v15190_v0  ;;  %21862 = vmatpush3.msk.msra.mxu0 %vm523_vm0, %v23187_v34  ;;  %v19724_v34 = vld [vmem:[%s23135_s24 + $0x3c0] sm:$0xff]  ;;  %v17392_v0 = vmul.f32 %v17385_v31, %v24064_v6 }
0x102c   : > { %21869 = vmatprep.subr.msk.mxu0 %vm523_vm0, %v23200_v41  ;;  %v15498_v53 = vrot.slane %v19724_v34, 1  ;;  %v15602_v56 = vrot.slane %v19724_v34, 2 }
0x102e   : > { %21859 = vmatmul.mubr.msk.f32.gmra.mrb[44].mxu0 %vm514_vm2, %v15189_v15  ;;  %v15500_v57 = vsel %vm504_vm1, %v15498_v53, %v15499_v52  ;;  %v15604_v43 = vsel %vm706_vm4, %v15602_v56, %v15603_v19  ;;  %v17379_v15 = vrot.slane %v17372_v58, 2  ;;  %v17405_v53 = vmul.f32 %v17387_v39, %v24078_v30 }
0x102f   : > { %21863 = vmatprep.mubr.msk.f32.mxu0 %vm514_vm2, %v15290_v59  ;;  %v17369_v59 = vadd.f32 %v17364_v45, %v17356_v54  ;;  %v17396_v52 = vrot.slane %v17392_v0, 1  ;;  %v17403_v45 = vmul.f32 %v17385_v31, %v24078_v30 }
0x1031   : > { %v17409_v56 = vrot.slane %v17403_v45, 2 }
0x1032   : > { %21864 = vmatmul.mubr.msk.f32.vlgmr.msra.gmra.mrb[42].mxu0 %vm514_vm2, %v15292_v10 }
0x1033   : > { %21866 = vmatprep.mubr.msk.f32.mxu0 %vm514_vm2, %v15294_v9  ;;  %21870 = vmatpush3.msk.msra.mxu0 %vm523_vm0, %v23200_v41  ;;  %v19727_v41 = vld [vmem:[%s23135_s24 + $0x3d8] sm:$0xff]  ;;  %v17380_v9 = vsel %vm706_vm4, %v17377_v2, %v17379_v15 }
0x1034   : > { %21877 = vmatprep.subr.msk.mxu0 %vm523_vm0, %v23213_v48  ;;  %v15503_v32 = vrot.slane %v19727_v41, 1  ;;  %v15607_v63 = vrot.slane %v19727_v41, 2  ;;  %v17384_v62 = vadd.f32 %v17380_v9, %v17369_v59 }
0x1036   : > { %21867 = vmatmul.mubr.msk.f32.gmra.mrb[44].mxu0 %vm514_vm2, %v15293_v4  ;;  %v15504_v36 = vsel %vm504_vm1, %v15501_v42, %v15503_v32  ;;  %v17397_v42 = vrot.slane %v17393_v11, 1 }
0x1037   : > { %21871 = vmatprep.mubr.msk.f32.mxu0 %vm514_vm2, %v19724_v34 }
0x103a   : > { %21872 = vmatmul.mubr.msk.f32.vlgmr.msra.gmra.mrb[42].mxu0 %vm514_vm2, %v19725_v5  ;;  %v17389_v5 = vmul.f32 %v17386_v17, %v24073_v28 }
0x103b   : > { %21874 = vmatprep.mubr.msk.f32.mxu0 %vm514_vm2, %v19726_v18  ;;  %21878 = vmatpush3.msk.msra.mxu0 %vm523_vm0, %v23213_v48  ;;  %v15605_v48 = vrot.slane %v19726_v18, 2 }
0x103c   : > { %21885 = vmatprep.subr.msk.mxu0 %vm523_vm0, %v25412_v37  ;;  %v17391_v2 = vadd.f32 %v17389_v5, %v17384_v62 }
0x103d   : > { %v15606_v61 = vsel %vm706_vm4, %v15603_v19, %v15605_v48  ;;  %v15608_v38 = vsel %vm706_vm4, %v15605_v48, %v15607_v63 }
0x103e   : > { %21875 = vmatmul.mubr.msk.f32.gmra.mrb[44].mxu0 %vm514_vm2, %v19727_v41  ;;  %v17404_v41 = vmul.f32 %v17386_v17, %v24078_v30  ;;  %v17402_v19 = vadd.f32 %v17397_v42, %v17391_v2 }
0x103f   : > { %21879 = vmatprep.mubr.msk.f32.mxu0 %vm514_vm2, %v15500_v57 }
0x1040   : > { %v17410_v57 = vrot.slane %v17404_v41, 2 }
0x1042   : > { %21880 = vmatmul.mubr.msk.f32.vlgmr.msra.gmra.mrb[42].mxu0 %vm514_vm2, %v15502_v33  ;;  %v17412_v33 = vrot.slane %v17405_v53, 2 }
0x1043   : > { %21882 = vmatprep.mubr.msk.f32.mxu0 %vm514_vm2, %v15504_v36  ;;  %21886 = vmatpush3.msk.msra.mxu0 %vm523_vm0, %v25412_v37  ;;  %v26402_v37 = vmov 0.0   ;;  %vm15934_vm0 = vcmask 121856  }
0x1044   : > { %22332 = vmatprep.subr.bf16.mxu0 %v23002_v35  ;;  %v17413_v48 = vsel %vm706_vm4, %v17410_v57, %v17412_v33  ;;  %479 = vst.msk [vmem:[#allocation3 + $0x18] sm:$0x3] %vm476_vm3, %v26402_v37  ;;  %477 = vst.msk [vmem:[#allocation3 + $0x8] sm:$0x3] %vm476_vm3, %v26402_v37 }
0x1045   : > { %v17417_v16 = vadd.f32 %v17413_v48, %v17402_v19  ;;  %481 = vst.msk [vmem:[#allocation3 + $0x28] sm:$0x3] %vm476_vm3, %v26402_v37  ;;  %483 = vst.msk [vmem:[#allocation3 + $0x38] sm:$0x3] %vm476_vm3, %v26402_v37 }
0x1046   : > { %21883 = vmatmul.mubr.msk.f32.gmra.mrb[44].mxu0 %vm514_vm2, %v15503_v32  ;;  %v17398_v32 = vsel %vm504_vm1, %v17396_v52, %v17397_v42  ;;  %v15789_v52 = vld [vmem:[#allocation2] sm:$0xff]  ;;  %v15790_v42 = vld [vmem:[#allocation2 + $0x8] sm:$0xff]  ;;  %485 = vst.msk [vmem:[#allocation3 + $0x48] sm:$0x3] %vm476_vm3, %v26402_v37  ;;  %487 = vst.msk [vmem:[#allocation3 + $0x58] sm:$0x3] %vm476_vm3, %v26402_v37 }
0x1047   : > { %21887 = vmatprep.mubr.msk.f32.mxu0 %vm514_vm2, %v15604_v43  ;;  %v17401_v36 = vadd.f32 %v17398_v32, %v17390_v55  ;;  %v15804_v45 = vmul.f32 %v23745_v20, %v15789_v52  ;;  %v15805_v32 = vmul.f32 %v23745_v20, %v15790_v42  ;;  %v15819_v19 = vmul.f32 %v23752_v23, %v15789_v52 }
0x1048   : > { %v15820_v48 = vmul.f32 %v23752_v23, %v15790_v42  ;;  %489 = vst.msk [vmem:[#allocation3 + $0x68] sm:$0x3] %vm476_vm3, %v26402_v37  ;;  %491 = vst.msk [vmem:[#allocation3 + $0x78] sm:$0x3] %vm476_vm3, %v26402_v37 }
0x1049   : > { %493 = vst.msk [vmem:[#allocation3 + $0x88] sm:$0x3] %vm476_vm3, %v26402_v37 }
0x104a   : > { %21888 = vmatmul.mubr.msk.f32.vlgmr.msra.gmra.mrb[42].mxu0 %vm514_vm2, %v15606_v61  ;;  %v17420_v61 = vld [vmem:[#allocation2 + $0x160] sm:$0x1] }
0x104b   : > { %21890 = vmatprep.mubr.msk.f32.mxu0 %vm514_vm2, %v15608_v38  ;;  %22334 = vmatpush3.bf16.msra.mxu0 %v25768_v27  ;;  %v17411_v38 = vsel %vm706_vm4, %v17409_v56, %v17410_v57  ;;  %v17438_v17 = vmul.f32 %v25486_v13, %v17420_v61  ;;  %v15791_v57 = vld [vmem:[#allocation2 + $0x10] sm:$0x1]  ;;  %v15808_v56 = vrot.slane %v15804_v45, 1 }
0x104c   : > { %22335 = vmatprep.subr.bf16.mxu0 %v23002_v35  ;;  %v17416_v1 = vadd.f32 %v17411_v38, %v17401_v36  ;;  %v15809_v36 = vrot.slane %v15805_v32, 1  ;;  %v15821_v61 = vmul.f32 %v23752_v23, %v15791_v57  ;;  %v15796_v38 = vmul.f32 %v23763_v29, %v15789_v52  ;;  %v22933_v57 = vld [vmem:[#allocation2 + $0x38] sm:$0xff] }
0x104d   : > { %v17445_v59 = vrot.slane %v17438_v17, 2  ;;  %v15835_v17 = vld [vmem:[#allocation2 + $0x20] sm:$0xff] }
0x104e   : > { %21891 = vmatmul.mubr.msk.f32.gmra.mrb[44].mxu0 %vm514_vm2, %v15607_v63  ;;  %vm474_vm2 = vcmask 392192  }
0x104f   : > { %22009 = vmatprep.mubr.msk.f32.mxu0 %vm23003_vm14, %v26402_v37  ;;  %478 = vst.msk [vmem:[#allocation3 + $0x10] sm:$0xff] %vm474_vm2, %v26402_v37  ;;  %475 = vst.msk [vmem:[#allocation3] sm:$0xff] %vm474_vm2, %v26402_v37 }
0x1050   : > { %480 = vst.msk [vmem:[#allocation3 + $0x20] sm:$0xff] %vm474_vm2, %v26402_v37  ;;  %482 = vst.msk [vmem:[#allocation3 + $0x30] sm:$0xff] %vm474_vm2, %v26402_v37 }
0x1051   : > { %484 = vst.msk [vmem:[#allocation3 + $0x40] sm:$0xff] %vm474_vm2, %v26402_v37  ;;  %486 = vst.msk [vmem:[#allocation3 + $0x50] sm:$0xff] %vm474_vm2, %v26402_v37 }
0x1052   : > { %488 = vst.msk [vmem:[#allocation3 + $0x60] sm:$0xff] %vm474_vm2, %v26402_v37  ;;  %490 = vst.msk [vmem:[#allocation3 + $0x70] sm:$0xff] %vm474_vm2, %v26402_v37 }
0x1053   : > { %492 = vst.msk [vmem:[#allocation3 + $0x80] sm:$0xff] %vm474_vm2, %v26402_v37 }
0x10d9   : > { %v21820_v14 = vpop.f32.mrb[40].mxu0 }
0x10da   : > { %v14765_v24 = vadd.f32 %v25654_v40, %v21820_v14  ;;  %v14759_v4 = vpop.f32.mrb[41].mxu0 }
0x10db   : > { %v14760_v10 = vadd.f32 %v25654_v40, %v14759_v4 }
0x10dc   : > { %v14769_v34 = vmax.f32 %v14765_v24, 0.0 }
0x10dd   : > { %v14768_v18 = vmax.f32 %v14760_v10, 0.0 }
0x10de   : > { %14772 = vst.msk [vmem:[#allocation2 + $0x159] sm:$0x7f] %vm1563_vm13, %v14769_v34 }
0x10df   : > { %14771 = vst.msk [vmem:[#allocation2 + $0x151] sm:$0xff] %vm421_vm8, %v14768_v18 }
0x10e6   : > { %v25794_v63 = vld [vmem:[#allocation2 + $0x150] sm:$0xff]  ;;  %v25796_v43 = vld [vmem:[#allocation2 + $0x158] sm:$0xff] }
0x10e7   : > { %v17421_v51 = vmul.f32 %v25794_v63, %v24108_v44  ;;  %v17422_v3 = vmul.f32 %v25796_v43, %v24108_v44  ;;  %v17425_v58 = vmul.f32 %v25794_v63, %v24113_v47  ;;  %v17426_v31 = vmul.f32 %v25796_v43, %v24113_v47 }
0x10e8   : > { %v17436_v0 = vmul.f32 %v25486_v13, %v25794_v63  ;;  %v17437_v4 = vmul.f32 %v25486_v13, %v25796_v43 }
0x10e9   : > { %v17423_v15 = vadd.f32 %v17421_v51, %v17416_v1  ;;  %v17424_v54 = vadd.f32 %v17422_v3, %v17417_v16  ;;  %v17429_v14 = vrot.slane %v17425_v58, 1  ;;  %v17430_v39 = vrot.slane %v17426_v31, 1  ;;  %v15834_v31 = vld [vmem:[#allocation2 + $0x18] sm:$0xff] }
0x10ea   : > { %v17442_v9 = vrot.slane %v17436_v0, 2  ;;  %v17443_v34 = vrot.slane %v17437_v4, 2  ;;  %v15797_v1 = vmul.f32 %v23763_v29, %v15790_v42  ;;  %v15810_v16 = vsel %vm504_vm1, %v15808_v56, %v15809_v36 }
0x10eb   : > { %v17431_v11 = vsel %vm504_vm1, %v17429_v14, %v17430_v39  ;;  %v17435_v24 = vadd.f32 %v17430_v39, %v17424_v54  ;;  %v15825_v51 = vrot.slane %v15819_v19, 2  ;;  %v15826_v3 = vrot.slane %v15820_v48, 2  ;;  %v15881_v48 = vld [vmem:[#allocation2 + $0x40] sm:$0x1] }
0x10ec   : > { %v17434_v10 = vadd.f32 %v17431_v11, %v17423_v15  ;;  %v17444_v50 = vsel %vm706_vm4, %v17442_v9, %v17443_v34  ;;  %v17446_v5 = vsel %vm706_vm4, %v17443_v34, %v17445_v59  ;;  %v15828_v58 = vrot.slane %v15821_v61, 2 }
0x10ed   : > { %v17450_v18 = vadd.f32 %v17446_v5, %v17435_v24  ;;  %v15813_v15 = vadd.f32 %v15810_v16, %v15796_v38  ;;  %v15814_v54 = vadd.f32 %v15809_v36, %v15797_v1  ;;  %v15827_v14 = vsel %vm706_vm4, %v15825_v51, %v15826_v3  ;;  %v15836_v24 = vld [vmem:[#allocation2 + $0x28] sm:$0x1] }
0x10ee   : > { %v17449_v53 = vadd.f32 %v17444_v50, %v17434_v10  ;;  %v15829_v39 = vsel %vm706_vm4, %v15826_v3, %v15828_v58  ;;  %v15849_v0 = vmul.f32 %v24064_v6, %v15834_v31  ;;  %v15850_v11 = vmul.f32 %v24064_v6, %v15835_v17 }
0x10ef   : > { %v17452_v62 = vadd.f32 %v25522_v46, %v17450_v18  ;;  %v15832_v4 = vadd.f32 %v15827_v14, %v15813_v15  ;;  %v15833_v59 = vadd.f32 %v15829_v39, %v15814_v54  ;;  %v15841_v10 = vmul.f32 %v24073_v28, %v15834_v31 }
0x10f0   : > { %v17451_v41 = vadd.f32 %v25522_v46, %v17449_v53  ;;  %v15842_v9 = vmul.f32 %v24073_v28, %v15835_v17  ;;  %v15853_v34 = vrot.slane %v15849_v0, 1  ;;  %v15854_v50 = vrot.slane %v15850_v11, 1 }
0x10f1   : > { %v17454_v2 = vmax.f32 %v17452_v62, 0.0  ;;  %v15865_v5 = vmul.f32 %v24078_v30, %v15835_v17  ;;  %v15866_v53 = vmul.f32 %v24078_v30, %v15836_v24  ;;  %v15864_v18 = vmul.f32 %v24078_v30, %v15834_v31 }
0x10f2   : > { %v17453_v55 = vmax.f32 %v17451_v41, 0.0  ;;  %v15843_v52 = vadd.f32 %v15841_v10, %v15832_v4  ;;  %v15844_v42 = vadd.f32 %v15842_v9, %v15833_v59  ;;  %v15855_v41 = vsel %vm504_vm1, %v15853_v34, %v15854_v50 }
0x10f3   : > { %v15871_v62 = vrot.slane %v15865_v5, 2  ;;  %v15873_v45 = vrot.slane %v15866_v53, 2  ;;  %v15895_v56 = vmul.f32 %v22933_v57, %v24113_v47  ;;  %v15887_v16 = vmul.f32 %v22933_v57, %v24108_v44 }
0x10f4   : > { %v25819_v33 = vpack.c.bf16 %v17454_v2, %v17453_v55  ;;  %v15870_v55 = vrot.slane %v15864_v18, 2  ;;  %v22932_v2 = vld [vmem:[#allocation2 + $0x30] sm:$0xff]  ;;  %v15858_v36 = vadd.f32 %v15855_v41, %v15843_v52  ;;  %v15859_v19 = vadd.f32 %v15854_v50, %v15844_v42 }
0x10f5   : > { %v15894_v32 = vmul.f32 %v22932_v2, %v24113_v47  ;;  %v15874_v61 = vsel %vm706_vm4, %v15871_v62, %v15873_v45  ;;  %v15886_v1 = vmul.f32 %v22932_v2, %v24108_v44  ;;  %v15899_v3 = vrot.slane %v15895_v56, 1 }
0x10f6   : > { %v15872_v38 = vsel %vm706_vm4, %v15870_v55, %v15871_v62  ;;  %v15910_v58 = vmul.f32 %v22933_v57, %v25486_v13  ;;  %v15911_v31 = vmul.f32 %v25486_v13, %v15881_v48  ;;  %v15878_v15 = vadd.f32 %v15874_v61, %v15859_v19 }
0x10f7   : > { %v15898_v51 = vrot.slane %v15894_v32, 1  ;;  %v15877_v17 = vadd.f32 %v15872_v38, %v15858_v36  ;;  %v15909_v54 = vmul.f32 %v22932_v2, %v25486_v13 }
0x10f8   : > { %v15889_v39 = vadd.f32 %v15887_v16, %v15878_v15  ;;  %v15916_v11 = vrot.slane %v15910_v58, 2  ;;  %v15918_v24 = vrot.slane %v15911_v31, 2 }
0x10f9   : > { %v15888_v14 = vadd.f32 %v15886_v1, %v15877_v17  ;;  %v15900_v0 = vsel %vm504_vm1, %v15898_v51, %v15899_v3  ;;  %v15915_v4 = vrot.slane %v15909_v54, 2 }
0x10fa   : > { %v15904_v10 = vadd.f32 %v15899_v3, %v15889_v39  ;;  %v15919_v9 = vsel %vm706_vm4, %v15916_v11, %v15918_v24 }
0x10fb   : > { %v15903_v59 = vadd.f32 %v15900_v0, %v15888_v14  ;;  %v15917_v34 = vsel %vm706_vm4, %v15915_v4, %v15916_v11 }
0x10fc   : > { %v15923_v5 = vadd.f32 %v15919_v9, %v15904_v10  ;;  %v17612_v9 = vmul.f32 %v25796_v43, %v23745_v20 }
0x10fd   : > { %v15922_v50 = vadd.f32 %v15917_v34, %v15903_v59  ;;  %v17606_v34 = vld [vmem:[#allocation2 + $0x160] sm:$0x1] }
0x10fe   : > { %v15931_v42 = vadd.f32 %v25522_v46, %v15923_v5  ;;  %v17616_v5 = vrot.slane %v17612_v9, 1 }
0x10ff   : > { %v15930_v13 = vadd.f32 %v25522_v46, %v15922_v50 }
0x1100   : > { %v15933_v2 = vmax.f32 %v15931_v42, 0.0 }
0x1101   : > { %v15932_v55 = vmax.f32 %v15930_v13, 0.0 }
0x1103   : > { %v22279_v46 = vpack.c.bf16 %v15933_v2, %v15932_v55  ;;  %v17608_v55 = vmul.f32 %v25796_v43, %v23763_v29 }
0x111d   : > { %v21889_v53 = vpop.f32.mrb[42].mxu0 }
0x111e   : > { %v15683_v18 = vpop.f32.mrb[43].mxu0 }
0x111f   : > { %v22268_v52 = vpack.c.bf16 %v21889_v53, %v15683_v18  ;;  %v17623_v53 = vmul.f32 %v25796_v43, %v23752_v23  ;;  %v17624_v18 = vmul.f32 %v17606_v34, %v23752_v23 }
0x1121   : > { %v21892_v41 = vpop.f32.mrb[44].mxu0  ;;  %22269 = vmatprep.subr.bf16.mxu1 %v22268_v52 }
0x1122   : > { %v15693_v62 = vpop.f32.mrb[45].mxu0  ;;  %22271 = vmatpush3.bf16.msra.mxu1 %v22268_v52  ;;  %v17622_v52 = vmul.f32 %v25794_v63, %v23752_v23  ;;  %v17639_v23 = vld [vmem:[#allocation2 + $0x178] sm:$0x1] }
0x1123   : > { %v22272_v45 = vpack.c.bf16 %v21892_v41, %v15693_v62  ;;  %v17629_v62 = vrot.slane %v17623_v53, 2  ;;  %v17657_v43 = vmul.f32 %v17639_v23, %v24078_v30 }
0x1124   : > { %v17628_v2 = vrot.slane %v17622_v52, 2 }
0x1125   : > { %22274 = vmatprep.subr.msk.bf16.mxu1 %vm23383_vm10, %v22272_v45 }
0x1126   : > { %22277 = vmatpush3.bf16.msk.msra.mxu1 %vm23383_vm10, %v22272_v45  ;;  %v17631_v45 = vrot.slane %v17624_v18, 2 }
0x1127   : > { %22278 = vmatprep.subr.bf16.mxu1 %v23002_v35 }
0x1129   : > { %21902 = vmatmul.mubr.msk.f32.vlgmr.msra.gmra.mrb[42].mxu1 %vm1474_vm7, %v23392_v25  ;;  %v396_v25 = vld [vmem:[%s26379_s5 + $0x18] sm:$0xff] }
0x112a   : > { %22281 = vmatpush3.bf16.msk.msra.mxu1 %vm25858_vm15, %v22279_v46  ;;  %21908 = vmatprep.mubr.msk.f32.mxu1 %vm23003_vm14, %v26402_v37  ;;  %v25881_v57 = vpack.c.bf16 %v396_v25, %v395_v22 }
0x112b   : > { %22282 = vmatprep.subr.bf16.mxu1 %v23002_v35 }
0x112c   : > { %22337 = vmatpush3.bf16.msra.mxu0 %v25881_v57 }
0x112d   : > { %21909 = vmatmul.mubr.msk.f32.vlgmr.msra.gmra.mrb[44].mxu1 %vm15934_vm0, %v23306_v12  ;;  %22338 = vmatprep.subr.bf16.mxu0 %v23002_v35 }
0x112e   : > { %22284 = vmatpush3.bf16.msra.mxu1 %v25768_v27  ;;  %21919 = vmatprep.mubr.msk.f32.mxu1 %vm23003_vm14, %v26402_v37 }
0x112f   : > { %22285 = vmatprep.subr.bf16.mxu1 %v23002_v35 }
0x1132   : > { %22287 = vmatpush3.bf16.msra.mxu1 %v25881_v57 }
0x1133   : > { %22288 = vmatprep.subr.bf16.mxu1 %v23002_v35 }
0x11fc   : > { %v21903_v56 = vpop.f32.mrb[42].mxu1 }
0x11fd   : > { %v15781_v36 = vadd.f32 %v25654_v40, %v21903_v56  ;;  %v15775_v19 = vpop.f32.mrb[43].mxu1  ;;  %v17621_v56 = vadd.f32 %v17616_v5, %v17608_v55 }
0x11fe   : > { %v15776_v48 = vadd.f32 %v25654_v40, %v15775_v19  ;;  %v17630_v19 = vsel %vm706_vm4, %v17628_v2, %v17629_v62 }
0x11ff   : > { %v15785_v61 = vmax.f32 %v15781_v36, 0.0  ;;  %v17632_v36 = vsel %vm706_vm4, %v17629_v62, %v17631_v45 }
0x1200   : > { %v15784_v38 = vmax.f32 %v15776_v48, 0.0  ;;  %v16006_v1 = vpop.f32.mrb[44].mxu1 }
0x1201   : > { %15788 = vst.msk [vmem:[#allocation2 + $0x171] sm:$0x7f] %vm1563_vm13, %v15785_v61  ;;  %v21910_v16 = vpop.f32.mrb[45].mxu1  ;;  %21920 = vmatmul.mubr.msk.f32.vlgmr.msra.gmra.mrb[46].mxu1 %vm421_vm8, %v16006_v1 }
0x1202   : > { %15787 = vst.msk [vmem:[#allocation2 + $0x169] sm:$0xff] %vm421_vm8, %v15784_v38  ;;  %22291 = vmatpush3.bf16.msk.msra.mxu1 %vm25858_vm15, %v24158_v21  ;;  %21926 = vmatprep.mubr.msk.f32.mxu1 %vm23003_vm14, %v26402_v37  ;;  %v25945_v21 = vld [vmem:[%s26380_s6] ss:$0 sm:$0xff]  ;;  %v17636_v16 = vadd.f32 %v17632_v36, %v17621_v56 }
0x1203   : > { %22292 = vmatprep.subr.bf16.mxu1 %v23002_v35 }
0x1205   : > { %21927 = vmatmul.mubr.msk.f32.vlgmr.msra.gmra.mrb[48].mxu1 %vm15934_vm0, %v23306_v12 }
0x1206   : > { %22294 = vmatpush3.bf16.msra.mxu1 %v25768_v27  ;;  %21937 = vmatprep.mubr.msk.f32.mxu1 %vm23003_vm14, %v26402_v37 }
0x1207   : > { %22295 = vmatprep.subr.bf16.mxu1 %v23002_v35 }
0x1209   : > { %v17637_v13 = vld [vmem:[#allocation2 + $0x168] sm:$0xff]  ;;  %v17638_v42 = vld [vmem:[#allocation2 + $0x170] sm:$0xff] }
0x120a   : > { %22297 = vmatpush3.bf16.msra.mxu1 %v25881_v57  ;;  %v17644_v46 = vmul.f32 %v17637_v13, %v24064_v6  ;;  %v17645_v22 = vmul.f32 %v17638_v42, %v24064_v6  ;;  %v17640_v48 = vmul.f32 %v17637_v13, %v24073_v28  ;;  %v17641_v61 = vmul.f32 %v17638_v42, %v24073_v28 }
0x120b   : > { %22298 = vmatprep.subr.bf16.mxu1 %v23002_v35  ;;  %v17655_v6 = vmul.f32 %v17637_v13, %v24078_v30 }
0x120c   : > { %v17649_v38 = vrot.slane %v17645_v22, 1 }
0x12d4   : > { %v16085_v40 = vpop.f32.mrb[46].mxu1 }
0x12d5   : > { %v16086_v51 = vadd.f32 %v25945_v21, %v16085_v40  ;;  %v21921_v3 = vpop.f32.mrb[47].mxu1 }
0x12d7   : > { %v16089_v58 = vmax.f32 %v16086_v51, 0.0  ;;  %v17643_v51 = vadd.f32 %v17641_v61, %v17636_v16 }
0x12d8   : > { %v16264_v31 = vpop.f32.mrb[48].mxu1 }
0x12d9   : > { %16091 = vst.msk [vmem:[#allocation3 + $0x11] sm:$0xff] %vm474_vm2, %v16089_v58  ;;  %v21928_v17 = vpop.f32.mrb[49].mxu1  ;;  %21938 = vmatmul.mubr.msk.f32.vlgmr.msra.gmra.mrb[50].mxu1 %vm421_vm8, %v16264_v31  ;;  %v17664_v31 = vrot.slane %v17657_v43, 2 }
0x12da   : > { %22301 = vmatpush3.bf16.msk.msra.mxu1 %vm25858_vm15, %v24494_v60  ;;  %21944 = vmatprep.mubr.msk.f32.mxu1 %vm23003_vm14, %v26402_v37  ;;  %v17671_v17 = vld [vmem:[#allocation2 + $0x180] sm:$0xff] }
0x12db   : > { %22302 = vmatprep.subr.bf16.mxu1 %v23002_v35 }
0x12dd   : > { %21945 = vmatmul.mubr.msk.f32.vlgmr.msra.gmra.mrb[52].mxu1 %vm15934_vm0, %v23306_v12 }
0x12de   : > { %22304 = vmatpush3.bf16.msra.mxu1 %v25768_v27  ;;  %21955 = vmatprep.mubr.msk.f32.mxu1 %vm23003_vm14, %v26402_v37 }
0x12df   : > { %22305 = vmatprep.subr.bf16.mxu1 %v23002_v35 }
0x12e2   : > { %22307 = vmatpush3.bf16.msra.mxu1 %v25881_v57 }
0x12e3   : > { %22308 = vmatprep.subr.bf16.mxu1 %v23002_v35 }
0x13ac   : > { %v16337_v60 = vpop.f32.mrb[50].mxu1 }
0x13ad   : > { %v16338_v15 = vadd.f32 %v25945_v21, %v16337_v60  ;;  %v21939_v54 = vpop.f32.mrb[51].mxu1  ;;  %v17672_v60 = vld [vmem:[#allocation2 + $0x188] sm:$0xff] }
0x13ae   : > { %v17654_v54 = vadd.f32 %v17649_v38, %v17643_v51  ;;  %v26406_v51 = vsub.s32 2, %v23302_v8 }
0x13af   : > { %v16341_v14 = vmax.f32 %v16338_v15, 0.0  ;;  %v17661_v15 = vrot.slane %v17655_v6, 2 }
0x13b0   : > { %v16516_v39 = vpop.f32.mrb[52].mxu1 }
0x13b1   : > { %16343 = vst.msk [vmem:[#allocation3 + $0x21] sm:$0xff] %vm474_vm2, %v16341_v14  ;;  %v21946_v0 = vpop.f32.mrb[53].mxu1  ;;  %21956 = vmatmul.mubr.msk.f32.vlgmr.msra.gmra.mrb[54].mxu1 %vm421_vm8, %v16516_v39  ;;  %v17678_v39 = vmul.f32 %v17671_v17, %v24113_v47 }
0x13b2   : > { %22311 = vmatpush3.bf16.msk.msra.mxu1 %vm25858_vm15, %v24845_v49  ;;  %21962 = vmatprep.mubr.msk.f32.mxu1 %vm23003_vm14, %v26402_v37  ;;  %v17679_v0 = vmul.f32 %v17672_v60, %v24113_v47 }
0x13b3   : > { %22312 = vmatprep.subr.bf16.mxu1 %v23002_v35  ;;  %v17682_v9 = vrot.slane %v17678_v39, 1  ;;  %v26408_v39 = vsub.s32 4, %v23302_v8 }
0x13b4   : > { %v17683_v34 = vrot.slane %v17679_v0, 1 }
0x13b5   : > { %21963 = vmatmul.mubr.msk.f32.vlgmr.msra.gmra.mrb[56].mxu1 %vm15934_vm0, %v23306_v12 }
0x13b6   : > { %22314 = vmatpush3.bf16.msra.mxu1 %v25768_v27  ;;  %21973 = vmatprep.mubr.msk.f32.mxu1 %vm23003_vm14, %v26402_v37  ;;  %v17684_v18 = vsel %vm504_vm1, %v17682_v9, %v17683_v34 }
0x13b7   : > { %22315 = vmatprep.subr.bf16.mxu1 %v23002_v35 }
0x13b8   : > { %v18123_v43 = vld [vmem:[#allocation3 + $0x28] sm:$0x3] }
0x13ba   : > { %22317 = vmatpush3.bf16.msra.mxu1 %v25881_v57 }
0x13bb   : > { %22318 = vmatprep.subr.bf16.mxu1 %v23002_v35 }
0x1484   : > { %v16589_v49 = vpop.f32.mrb[54].mxu1 }
0x1485   : > { %v16590_v11 = vadd.f32 %v25945_v21, %v16589_v49  ;;  %v21957_v24 = vpop.f32.mrb[55].mxu1  ;;  %v17673_v49 = vld [vmem:[#allocation2 + $0x190] sm:$0x1] }
0x1487   : > { %v16593_v4 = vmax.f32 %v16590_v11, 0.0  ;;  %v17675_v11 = vmul.f32 %v17672_v60, %v24108_v44 }
0x1488   : > { %v16768_v59 = vpop.f32.mrb[56].mxu1 }
0x1489   : > { %16595 = vst.msk [vmem:[#allocation3 + $0x31] sm:$0xff] %vm474_vm2, %v16593_v4  ;;  %v21964_v10 = vpop.f32.mrb[57].mxu1  ;;  %21974 = vmatmul.mubr.msk.f32.vlgmr.msra.gmra.mrb[58].mxu1 %vm421_vm8, %v16768_v59  ;;  %v17674_v59 = vmul.f32 %v17671_v17, %v24108_v44 }
0x148a   : > { %22321 = vmatpush3.bf16.msk.msra.mxu1 %vm25858_vm15, %v25181_v26  ;;  %21980 = vmatprep.mubr.msk.f32.mxu1 %vm23003_vm14, %v26402_v37  ;;  %v17611_v26 = vmul.f32 %v25794_v63, %v23745_v20  ;;  %v17607_v20 = vmul.f32 %v25794_v63, %v23763_v29  ;;  %v17648_v63 = vrot.slane %v17644_v46, 1  ;;  %v17656_v29 = vmul.f32 %v17638_v42, %v24078_v30  ;;  %v22934_v10 = vld [vmem:[%s26377_s3 + $0x8] ss:$0 sm:$0xff]  ;;  %v22935_v46 = vld [vmem:[%s26378_s4] ss:$0 sm:$0xff] }
0x148b   : > { %22322 = vmatprep.subr.bf16.mxu1 %v23002_v35 }
0x148c   : > { %v17615_v50 = vrot.slane %v17611_v26, 1  ;;  %v17650_v3 = vsel %vm504_vm1, %v17648_v63, %v17649_v38  ;;  %v17662_v58 = vrot.slane %v17656_v29, 2  ;;  %v17690_v26 = vmul.f32 %v22934_v10, %v17672_v60  ;;  %v26064_v29 = vld [vmem:[#allocation3 + $0x20] sm:$0xff] }
0x148d   : > { %21981 = vmatmul.mubr.msk.f32.vlgmr.msra.gmra.mrb[60].mxu1 %vm15934_vm0, %v23306_v12 }
0x148e   : > { %22324 = vmatpush3.bf16.msra.mxu1 %v25768_v27  ;;  %21991 = vmatprep.mubr.msk.f32.mxu1 %vm23003_vm14, %v26402_v37  ;;  %v17617_v41 = vsel %vm504_vm1, %v17615_v50, %v17616_v5  ;;  %v17665_v14 = vsel %vm706_vm4, %v17662_v58, %v17664_v31  ;;  %v17663_v30 = vsel %vm706_vm4, %v17661_v15, %v17662_v58  ;;  %v17696_v13 = vrot.slane %v17690_v26, 2 }
0x148f   : > { %22325 = vmatprep.subr.bf16.mxu1 %v23002_v35  ;;  %v17620_v25 = vadd.f32 %v17617_v41, %v17607_v20  ;;  %v17669_v4 = vadd.f32 %v17665_v14, %v17654_v54  ;;  %v17689_v50 = vmul.f32 %v22934_v10, %v17671_v17  ;;  %v17691_v5 = vmul.f32 %v22934_v10, %v17673_v49 }
0x1490   : > { %v26407_v15 = vsub.s32 0, %v23302_v8  ;;  %v18144_v54 = vld [vmem:[#allocation3 + $0x30] sm:$0xff]  ;;  %v18145_v14 = vld [vmem:[#allocation3 + $0x38] sm:$0x3]  ;;  %v26409_v10 = vsub.s32 3, %v23302_v8 }
0x1491   : > { %v17635_v1 = vadd.f32 %v17630_v19, %v17620_v25  ;;  %v17677_v47 = vadd.f32 %v17675_v11, %v17669_v4  ;;  %v17695_v52 = vrot.slane %v17689_v50, 2  ;;  %v17698_v42 = vrot.slane %v17691_v5, 2 }
0x1492   : > { %22327 = vmatpush3.bf16.msra.mxu1 %v25881_v57  ;;  %v26410_v50 = vsub.s32 5, %v23302_v8 }
0x1493   : > { %22328 = vmatprep.subr.bf16.mxu1 %v23002_v35  ;;  %v17642_v40 = vadd.f32 %v17640_v48, %v17635_v1  ;;  %v17688_v62 = vadd.f32 %v17683_v34, %v17677_v47  ;;  %v17697_v44 = vsel %vm706_vm4, %v17695_v52, %v17696_v13  ;;  %v17699_v45 = vsel %vm706_vm4, %v17696_v13, %v17698_v42 }
0x1494   : > { %v26405_v1 = vsub.s32 1, %v23302_v8 }
0x1495   : > { %v17653_v28 = vadd.f32 %v17650_v3, %v17642_v40  ;;  %v17703_v55 = vadd.f32 %v17699_v45, %v17688_v62  ;;  %v26411_v45 = vsub.s32 7, %v23302_v8 }
0x1497   : > { %v17668_v24 = vadd.f32 %v17663_v30, %v17653_v28  ;;  %v17705_v25 = vadd.f32 %v22935_v46, %v17703_v55 }
0x1499   : > { %v17676_v53 = vadd.f32 %v17674_v59, %v17668_v24  ;;  %v17707_v61 = vmax.f32 %v17705_v25, 0.0 }
0x149b   : > { %v17687_v41 = vadd.f32 %v17684_v18, %v17676_v53 }
0x149d   : > { %v17702_v20 = vadd.f32 %v17697_v44, %v17687_v41 }
0x149f   : > { %v17704_v22 = vadd.f32 %v22935_v46, %v17702_v20 }
0x14a1   : > { %v17706_v48 = vmax.f32 %v17704_v22, 0.0 }
0x14a3   : > { %v22349_v38 = vpack.c.bf16 %v17707_v61, %v17706_v48 }
0x155c   : > { %v16841_v2 = vpop.f32.mrb[58].mxu1 }
0x155d   : > { %v16842_v56 = vadd.f32 %v25945_v21, %v16841_v2  ;;  %v21975_v23 = vpop.f32.mrb[59].mxu1 }
0x155f   : > { %v16845_v36 = vmax.f32 %v16842_v56, 0.0  ;;  %v26412_v56 = vsub.s32 6, %v23302_v8 }
0x1560   : > { %v17020_v19 = vpop.f32.mrb[60].mxu1 }
0x1561   : > { %16847 = vst.msk [vmem:[#allocation3 + $0x41] sm:$0xff] %vm474_vm2, %v16845_v36  ;;  %v21982_v63 = vpop.f32.mrb[61].mxu1  ;;  %21992 = vmatmul.mubr.msk.f32.vlgmr.msra.gmra.mrb[62].mxu1 %vm421_vm8, %v17020_v19 }
0x1562   : > { %22331 = vmatpush3.bf16.msk.msra.mxu1 %vm25858_vm15, %v25532_v7  ;;  %21998 = vmatprep.mubr.msk.f32.mxu1 %vm23003_vm14, %v26402_v37  ;;  %v391_v7 = vld [vmem:[%s26381_s7] sm:$0xff] }
0x1563   : > { %22348 = vmatprep.subr.bf16.mxu1 %v23002_v35  ;;  %v26068_v16 = vrot.slane %v391_v7, %v26405_v1  ;;  %v26075_v3 = vrot.slane %v391_v7, %v26406_v51  ;;  %v26082_v28 = vrot.slane %v391_v7, %v26407_v15  ;;  %v26086_v0 = vrot.slane %v391_v7, %v26408_v39  ;;  %v26136_v39 = vld [vmem:[%s26382_s8] ss:$0 sm:$0xff] }
0x1564   : > { %v26095_v26 = vrot.slane %v391_v7, %v26409_v10  ;;  %v26100_v5 = vrot.slane %v391_v7, %v26410_v50  ;;  %v26109_v20 = vrot.slane %v391_v7, %v26411_v45  ;;  %v26117_v23 = vrot.slane %v391_v7, %v26412_v56  ;;  %v400_v10 = vld [vmem:[%s26383_s9 + $0x18] sm:$0xff]  ;;  %v17858_v50 = vld [vmem:[#allocation3 + $0x8] sm:$0x3] }
0x1565   : > { %21999 = vmatmul.mubr.msk.f32.vlgmr.msra.gmra.mrb[64].mxu1 %vm15934_vm0, %v23306_v12  ;;  %v18126_v6 = vmul.f32 %v26064_v29, %v26068_v16  ;;  %v18127_v40 = vmul.f32 %v18123_v43, %v26068_v16  ;;  %v18135_v17 = vmul.f32 %v26064_v29, %v26075_v3  ;;  %v18136_v60 = vmul.f32 %v18123_v43, %v26075_v3 }
0x1566   : > { %22351 = vmatpush3.bf16.msk.msra.mxu1 %vm25858_vm15, %v22349_v38  ;;  %22034 = vmatprep.mubr.msk.f32.mxu1 %vm23003_vm14, %v26402_v37  ;;  %v18124_v30 = vmul.f32 %v26064_v29, %v26082_v28  ;;  %v18148_v4 = vmul.f32 %v18144_v54, %v26086_v0  ;;  %v18149_v59 = vmul.f32 %v18145_v14, %v26086_v0  ;;  %v26125_v38 = vld [vmem:[%s26381_s7 + $0x8] ss:$0 sm:$0xff] }
0x1567   : > { %22352 = vmatprep.subr.bf16.mxu1 %v23002_v35  ;;  %v18130_v58 = vrot.slane %v18126_v6, 1  ;;  %v18131_v31 = vrot.slane %v18127_v40, 1  ;;  %v18139_v11 = vrot.slane %v18135_v17, 2  ;;  %v18140_v24 = vrot.slane %v18136_v60, 2 }
0x1568   : > { %v18146_v34 = vmul.f32 %v18144_v54, %v26095_v26  ;;  %v18152_v47 = vrot.slane %v18148_v4, 1  ;;  %v18153_v18 = vrot.slane %v18149_v59, 1  ;;  %v18157_v13 = vmul.f32 %v18144_v54, %v26100_v5  ;;  %v26105_v62 = vld [vmem:[#allocation3 + $0x40] sm:$0xff]  ;;  %v18167_v44 = vld [vmem:[#allocation3 + $0x48] sm:$0x3] }
0x1569   : > { %22035 = vmatmul.mubr.msk.f32.vlgmr.msra.gmra.mrb[66].mxu1 %vm15934_vm0, %v23306_v12  ;;  %v18132_v49 = vsel %vm504_vm1, %v18130_v58, %v18131_v31  ;;  %v18141_v53 = vsel %vm706_vm4, %v18139_v11, %v18140_v24  ;;  %v18158_v42 = vmul.f32 %v18145_v14, %v26100_v5  ;;  %v18170_v22 = vmul.f32 %v26105_v62, %v26109_v20 }
0x156a   : > { %22354 = vmatpush3.bf16.msra.mxu1 %v25768_v27  ;;  %22045 = vmatprep.mubr.msk.f32.mxu1 %vm23003_vm14, %v26402_v37  ;;  %v18134_v9 = vadd.f32 %v18132_v49, %v18124_v30  ;;  %v18154_v55 = vsel %vm504_vm1, %v18152_v47, %v18153_v18  ;;  %v18161_v2 = vrot.slane %v18157_v13, 2  ;;  %v18171_v25 = vmul.f32 %v18167_v44, %v26109_v20 }
0x156b   : > { %22355 = vmatprep.subr.bf16.mxu1 %v23002_v35  ;;  %v18162_v46 = vrot.slane %v18158_v42, 2  ;;  %v18168_v19 = vmul.f32 %v26105_v62, %v26117_v23  ;;  %v18174_v61 = vrot.slane %v18170_v22, 1  ;;  %v18179_v1 = vmul.f32 %v26125_v38, %v26105_v62 }
0x156c   : > { %v18143_v52 = vadd.f32 %v18141_v53, %v18134_v9  ;;  %v18175_v63 = vrot.slane %v18171_v25, 1  ;;  %v18180_v8 = vmul.f32 %v26125_v38, %v18167_v44  ;;  %v17870_v47 = vmul.f32 %v26068_v16, %v17858_v50 }
0x156d   : > { %v18163_v48 = vsel %vm706_vm4, %v18161_v2, %v18162_v46  ;;  %v18183_v40 = vrot.slane %v18179_v1, 2  ;;  %v17883_v42 = vmul.f32 %v26075_v3, %v17858_v50  ;;  %v17891_v2 = vld [vmem:[#allocation3 + $0x10] sm:$0xff]  ;;  %v17892_v46 = vld [vmem:[#allocation3 + $0x18] sm:$0x3] }
0x156e   : > { %22357 = vmatpush3.bf16.msra.mxu1 %v25881_v57  ;;  %v18147_v41 = vadd.f32 %v18146_v34, %v18143_v52  ;;  %v18176_v6 = vsel %vm504_vm1, %v18174_v61, %v18175_v63  ;;  %v18184_v51 = vrot.slane %v18180_v8, 2  ;;  %v17857_v34 = vld [vmem:[#allocation3] sm:$0xff]  ;;  %v17874_v52 = vrot.slane %v17870_v47, 1 }
0x156f   : > { %22068 = vmatprep.subr.mxu1 %v26402_v37  ;;  %v17869_v53 = vmul.f32 %v26068_v16, %v17857_v34  ;;  %v17882_v13 = vmul.f32 %v26075_v3, %v17857_v34  ;;  %v17903_v56 = vmul.f32 %v26086_v0, %v17891_v2  ;;  %v17917_v1 = vmul.f32 %v26100_v5, %v17892_v46 }
0x1570   : > { %v18156_v36 = vadd.f32 %v18154_v55, %v18147_v41  ;;  %v18185_v31 = vsel %vm706_vm4, %v18183_v40, %v18184_v51  ;;  %v17863_v41 = vmul.f32 %v26082_v28, %v17857_v34  ;;  %v17887_v55 = vrot.slane %v17883_v42, 2  ;;  %v401_v42 = vld [vmem:[%s26383_s9 + $0x20] sm:$0xff] }
0x1571   : > { %v17873_v18 = vrot.slane %v17869_v53, 1  ;;  %v17886_v45 = vrot.slane %v17882_v13, 2  ;;  %v17907_v61 = vrot.slane %v17903_v56, 1  ;;  %v17921_v51 = vrot.slane %v17917_v1, 2  ;;  %v18337_v56 = vld [vmem:[#allocation3 + $0x48] sm:$0x3] }
0x1572   : > { %v18165_v43 = vadd.f32 %v18163_v48, %v18156_v36  ;;  %v17904_v36 = vmul.f32 %v26086_v0, %v17892_v46  ;;  %v17897_v48 = vmul.f32 %v26095_v26, %v17891_v2 }
0x1573   : > { %v17875_v44 = vsel %vm504_vm1, %v17873_v18, %v17874_v52  ;;  %v17888_v25 = vsel %vm706_vm4, %v17886_v45, %v17887_v55 }
0x1574   : > { %v18169_v7 = vadd.f32 %v18168_v19, %v18165_v43  ;;  %v17877_v22 = vadd.f32 %v17875_v44, %v17863_v41  ;;  %v17908_v63 = vrot.slane %v17904_v36, 1  ;;  %v17916_v43 = vmul.f32 %v26100_v5, %v17891_v2  ;;  %v402_v41 = vld [vmem:[%s26383_s9 + $0x28] sm:$0xff] }
0x1575   : > { %v26228_v45 = vpack.c.bf16 %v402_v41, %v401_v42  ;;  %v18340_v36 = vmul.f32 %v26105_v62, %v26068_v16 }
0x1576   : > { %v18178_v58 = vadd.f32 %v18176_v6, %v18169_v7  ;;  %v17890_v19 = vadd.f32 %v17888_v25, %v17877_v22  ;;  %v17926_v7 = vld [vmem:[#allocation3 + $0x28] sm:$0x3]  ;;  %v17909_v6 = vsel %vm504_vm1, %v17907_v61, %v17908_v63  ;;  %v17920_v40 = vrot.slane %v17916_v43, 2 }
0x1577   : > { %v18349_v63 = vmul.f32 %v26105_v62, %v26075_v3  ;;  %v18350_v43 = vmul.f32 %v18337_v56, %v26075_v3 }
0x1578   : > { %v18187_v60 = vadd.f32 %v18185_v31, %v18178_v58  ;;  %v17898_v8 = vadd.f32 %v17897_v48, %v17890_v19  ;;  %v17937_v58 = vmul.f32 %v26064_v29, %v26109_v20  ;;  %v17938_v31 = vmul.f32 %v26109_v20, %v17926_v7 }
0x1579   : > { %v18341_v19 = vmul.f32 %v18337_v56, %v26068_v16  ;;  %v18344_v48 = vrot.slane %v18340_v36, 1 }
0x157a   : > { %v18188_v30 = vadd.f32 %v26136_v39, %v18187_v60  ;;  %v17931_v60 = vmul.f32 %v26064_v29, %v26117_v23 }
0x157b   : > { %v18345_v61 = vrot.slane %v18341_v19, 1 }
0x157c   : > { %v18189_v4 = vmax.f32 %v18188_v30, 0.0  ;;  %v17950_v30 = vmul.f32 %v26125_v38, %v26064_v29 }
0x1634   : > { %v17093_v17 = vpop.f32.mrb[62].mxu1 }
0x1635   : > { %v17094_v15 = vadd.f32 %v25945_v21, %v17093_v17  ;;  %v21993_v54 = vpop.f32.mrb[63].mxu1  ;;  %v17911_v17 = vadd.f32 %v17909_v6, %v17898_v8  ;;  %v18338_v6 = vmul.f32 %v26105_v62, %v26082_v28 }
0x1636   : > { %v17941_v54 = vrot.slane %v17937_v58, 1 }
0x1637   : > { %v17097_v14 = vmax.f32 %v17094_v15, 0.0  ;;  %v17922_v15 = vsel %vm706_vm4, %v17920_v40, %v17921_v51  ;;  %v18353_v40 = vrot.slane %v18349_v63, 2  ;;  %v18354_v51 = vrot.slane %v18350_v43, 2 }
0x1638   : > { %v17272_v49 = vpop.f32.mrb[64].mxu1 }
0x1639   : > { %17099 = vst.msk [vmem:[#allocation3 + $0x51] sm:$0xff] %vm474_vm2, %v17097_v14  ;;  %v22000_v11 = vpop.f32.mrb[65].mxu1  ;;  %22010 = vmatmul.mubr.msk.f32.vlgmr.msra.gmra.mrb[46].mxu0 %vm421_vm8, %v17272_v49  ;;  %v17942_v14 = vrot.slane %v17938_v31, 1  ;;  %v17924_v49 = vadd.f32 %v17922_v15, %v17911_v17  ;;  %v18355_v15 = vsel %vm706_vm4, %v18353_v40, %v18354_v51 }
0x163a   : > { %22341 = vmatpush3.bf16.msk.msra.mxu0 %vm25858_vm15, %v25819_v33  ;;  %22016 = vmatprep.mubr.msk.f32.mxu0 %vm23003_vm14, %v26402_v37  ;;  %v398_v33 = vld [vmem:[%s26383_s9 + $0x8] sm:$0xff]  ;;  %v17951_v11 = vmul.f32 %v26125_v38, %v17926_v7  ;;  %v18346_v7 = vsel %vm504_vm1, %v18344_v48, %v18345_v61 }
0x163b   : > { %22342 = vmatprep.subr.bf16.mxu0 %v23002_v35  ;;  %v18348_v17 = vadd.f32 %v18346_v7, %v18338_v6 }
0x163c   : > { %v17777_v24 = vpop.f32.mrb[66].mxu1 }
0x163d   : > { %22017 = vmatmul.mubr.msk.f32.vlgmr.msra.gmra.mrb[48].mxu0 %vm15934_vm0, %v23306_v12  ;;  %22046 = vmatmul.mubr.msk.f32.vlgmr.msra.gmra.mrb[68].mxu1 %vm421_vm8, %v17777_v24  ;;  %v22036_v59 = vpop.f32.mrb[67].mxu1  ;;  %v17932_v24 = vadd.f32 %v17931_v60, %v17924_v49  ;;  %v18357_v49 = vadd.f32 %v18355_v15, %v18348_v17 }
0x163e   : > { %22069 = vmatpush3.msra.mxu1 %v18189_v4  ;;  %22344 = vmatpush3.bf16.msra.mxu0 %v25768_v27  ;;  %v397_v27 = vld [vmem:[%s26383_s9] sm:$0xff]  ;;  %v17943_v4 = vsel %vm504_vm1, %v17941_v54, %v17942_v14  ;;  %v17954_v59 = vrot.slane %v17950_v30, 2 }
0x163f   : > { %22345 = vmatprep.subr.bf16.mxu0 %v23002_v35  ;;  %22027 = vmatprep.mubr.msk.f32.mxu0 %vm23003_vm14, %v26402_v37  ;;  %v26169_v32 = vpack.c.bf16 %v398_v33, %v397_v27  ;;  %v17955_v27 = vrot.slane %v17951_v11, 2  ;;  %v17945_v33 = vadd.f32 %v17943_v4, %v17932_v24 }
0x1640   : > { %22070 = vmatprep.mubr.msk.f32.mxu1 %vm23003_vm14, %v26402_v37  ;;  %22367 = vmatprep.subr.bf16.mxu1 %v23002_v35  ;;  %v18358_v1 = vld [vmem:[#allocation3 + $0x50] sm:$0xff]  ;;  %v18359_v8 = vld [vmem:[#allocation3 + $0x58] sm:$0x3] }
0x1641   : > { %22071 = vmatmul.mubr.msk.f32.vlgmr.msra.gmra.mrb[70].mxu1 %vm17967_vm5, %v23306_v12  ;;  %v18362_v58 = vmul.f32 %v18358_v1, %v26086_v0  ;;  %v18363_v31 = vmul.f32 %v18359_v8, %v26086_v0  ;;  %v18360_v60 = vmul.f32 %v18358_v1, %v26095_v26  ;;  %v18371_v30 = vmul.f32 %v18358_v1, %v26100_v5 }
0x1642   : > { %22347 = vmatpush3.bf16.msra.mxu0 %v25881_v57  ;;  %22085 = vmatprep.mubr.msk.f32.mxu1 %vm23003_vm14, %v26402_v37  ;;  %v399_v57 = vld [vmem:[%s26383_s9 + $0x10] sm:$0xff]  ;;  %v18372_v11 = vmul.f32 %v18359_v8, %v26100_v5 }
0x1643   : > { %22048 = vmatprep.subr.mxu0 %v26402_v37  ;;  %22369 = vmatpush3.bf16.msra.mxu1 %v26169_v32  ;;  %v26179_v9 = vpack.c.bf16 %v400_v10, %v399_v57  ;;  %v17956_v57 = vsel %vm706_vm4, %v17954_v59, %v17955_v27  ;;  %v18366_v54 = vrot.slane %v18362_v58, 1  ;;  %v18367_v14 = vrot.slane %v18363_v31, 1 }
0x1644   : > { %22370 = vmatprep.subr.bf16.mxu1 %v23002_v35  ;;  %v17958_v10 = vadd.f32 %v17956_v57, %v17945_v33  ;;  %v18361_v24 = vadd.f32 %v18360_v60, %v18357_v49  ;;  %v18375_v27 = vrot.slane %v18371_v30, 2  ;;  %v18376_v33 = vrot.slane %v18372_v11, 2 }
0x1645   : > { %v18368_v59 = vsel %vm504_vm1, %v18366_v54, %v18367_v14 }
0x1646   : > { %v17965_v50 = vadd.f32 %v26136_v39, %v17958_v10 }
0x1647   : > { %22372 = vmatpush3.bf16.msra.mxu1 %v26179_v9 }
0x1648   : > { %22373 = vmatprep.subr.bf16.mxu1 %v23002_v35  ;;  %v17966_v29 = vmax.f32 %v17965_v50, 0.0 }
0x164b   : > { %22375 = vmatpush3.bf16.msra.mxu1 %v26228_v45 }
0x164c   : > { %22108 = vmatprep.subr.mxu1 %v26402_v37 }
0x170c   : > { %v17345_v34 = vpop.f32.mrb[46].mxu0 }
0x170d   : > { %v17346_v53 = vadd.f32 %v25945_v21, %v17345_v34  ;;  %v22011_v47 = vpop.f32.mrb[47].mxu0  ;;  %v18370_v34 = vadd.f32 %v18368_v59, %v18361_v24 }
0x170f   : > { %v17349_v18 = vmax.f32 %v17346_v53, 0.0  ;;  %v18377_v53 = vsel %vm706_vm4, %v18375_v27, %v18376_v33 }
0x1710   : > { %v17524_v52 = vpop.f32.mrb[48].mxu0  ;;  %v17850_v44 = vpop.f32.mrb[68].mxu1 }
0x1711   : > { %17351 = vst.msk [vmem:[#allocation3 + $0x61] sm:$0xff] %vm474_vm2, %v17349_v18  ;;  %v22018_v13 = vpop.f32.mrb[49].mxu0  ;;  %22028 = vmatmul.mubr.msk.f32.vlgmr.msra.gmra.mrb[50].mxu0 %vm421_vm8, %v17524_v52  ;;  %v17851_v55 = vadd.f32 %v25945_v21, %v17850_v44  ;;  %v22047_v2 = vpop.f32.mrb[69].mxu1  ;;  %v18379_v52 = vadd.f32 %v18377_v53, %v18370_v34 }
0x1712   : > { %22049 = vmatpush3.msra.mxu0 %v17966_v29  ;;  %22050 = vmatprep.mubr.msk.f32.mxu0 %vm23003_vm14, %v26402_v37 }
0x1713   : > { %22358 = vmatprep.subr.bf16.mxu0 %v23002_v35  ;;  %v17854_v22 = vmax.f32 %v17851_v55, 0.0 }
0x1714   : > { %v18256_v46 = vpop.f32.mrb[70].mxu1 }
0x1715   : > { %22051 = vmatmul.mubr.msk.f32.vlgmr.msra.gmra.mrb[52].mxu0 %vm17967_vm5, %v23306_v12  ;;  %v22072_v25 = vpop.f32.mrb[71].mxu1  ;;  %17856 = vst.msk [vmem:[#allocation3 + $0x81] sm:$0xff] %vm474_vm2, %v17854_v22  ;;  %22086 = vmatmul.mubr.msk.f32.vlgmr.msra.gmra.mrb[72].mxu1 %vm474_vm2, %v18256_v46 }
0x1716   : > { %22360 = vmatpush3.bf16.msra.mxu0 %v26169_v32  ;;  %22065 = vmatprep.mubr.msk.f32.mxu0 %vm23003_vm14, %v26402_v37 }
0x1717   : > { %22361 = vmatprep.subr.bf16.mxu0 %v23002_v35  ;;  %22110 = vmatprep.mubr.msk.f32.mxu1 %vm23003_vm14, %v26402_v37 }
0x1718   : > { %v18380_v62 = vld [vmem:[#allocation3 + $0x60] sm:$0xff]  ;;  %v18381_v4 = vld [vmem:[#allocation3 + $0x68] sm:$0x3] }
0x1719   : > { %v18384_v57 = vmul.f32 %v18380_v62, %v26109_v20  ;;  %v18385_v10 = vmul.f32 %v18381_v4, %v26109_v20  ;;  %v18382_v50 = vmul.f32 %v18380_v62, %v26117_v23  ;;  %v18393_v29 = vmul.f32 %v26125_v38, %v18380_v62  ;;  %v18551_v46 = vld [vmem:[#allocation3 + $0x68] sm:$0x3] }
0x171a   : > { %22363 = vmatpush3.bf16.msra.mxu0 %v26179_v9  ;;  %v18394_v13 = vmul.f32 %v26125_v38, %v18381_v4  ;;  %v18554_v56 = vmul.f32 %v18380_v62, %v26068_v16  ;;  %v18555_v36 = vmul.f32 %v18551_v46, %v26068_v16  ;;  %v18563_v7 = vmul.f32 %v18380_v62, %v26075_v3 }
0x171b   : > { %22364 = vmatprep.subr.bf16.mxu0 %v23002_v35  ;;  %v18388_v47 = vrot.slane %v18384_v57, 1  ;;  %v18389_v18 = vrot.slane %v18385_v10, 1  ;;  %v18383_v42 = vadd.f32 %v18382_v50, %v18379_v52  ;;  %v18397_v44 = vrot.slane %v18393_v29, 2 }
0x171c   : > { %v18398_v55 = vrot.slane %v18394_v13, 2  ;;  %v18558_v43 = vrot.slane %v18554_v56, 1  ;;  %v18559_v1 = vrot.slane %v18555_v36, 1  ;;  %v18564_v6 = vmul.f32 %v18551_v46, %v26075_v3  ;;  %v18594_v60 = vld [vmem:[#allocation3 + $0x80] sm:$0xff]  ;;  %v18595_v15 = vld [vmem:[#allocation3 + $0x88] sm:$0x3] }
0x171d   : > { %v18390_v41 = vsel %vm504_vm1, %v18388_v47, %v18389_v18  ;;  %v18567_v31 = vrot.slane %v18563_v7, 2  ;;  %v18598_v30 = vmul.f32 %v18594_v60, %v26109_v20  ;;  %v18599_v11 = vmul.f32 %v18595_v15, %v26109_v20 }
0x171e   : > { %22366 = vmatpush3.bf16.msra.mxu0 %v26228_v45  ;;  %v18392_v2 = vadd.f32 %v18390_v41, %v18383_v42  ;;  %v18399_v22 = vsel %vm706_vm4, %v18397_v44, %v18398_v55  ;;  %v18560_v58 = vsel %vm504_vm1, %v18558_v43, %v18559_v1  ;;  %v18568_v17 = vrot.slane %v18564_v6, 2 }
0x171f   : > { %22088 = vmatprep.subr.mxu0 %v26402_v37  ;;  %v18602_v20 = vrot.slane %v18598_v30, 1  ;;  %v18603_v53 = vrot.slane %v18599_v11, 1  ;;  %v18607_v47 = vmul.f32 %v26125_v38, %v18594_v60 }
0x1720   : > { %v18401_v25 = vadd.f32 %v18399_v22, %v18392_v2 }
0x1721   : > { %v18604_v13 = vsel %vm504_vm1, %v18602_v20, %v18603_v53  ;;  %v18611_v42 = vrot.slane %v18607_v47, 2 }
0x1722   : > { %v18402_v48 = vadd.f32 %v26136_v39, %v18401_v25 }
0x1724   : > { %v18403_v51 = vmax.f32 %v18402_v48, 0.0 }
0x17e4   : > { %v17597_v19 = vpop.f32.mrb[50].mxu0 }
0x17e5   : > { %v17598_v61 = vadd.f32 %v25945_v21, %v17597_v19  ;;  %v22029_v63 = vpop.f32.mrb[51].mxu0  ;;  %v18552_v21 = vmul.f32 %v18380_v62, %v26082_v28  ;;  %v18569_v28 = vsel %vm706_vm4, %v18567_v31, %v18568_v17 }
0x17e7   : > { %v17601_v8 = vmax.f32 %v17598_v61, 0.0  ;;  %v18562_v3 = vadd.f32 %v18560_v58, %v18552_v21 }
0x17e8   : > { %v18036_v40 = vpop.f32.mrb[52].mxu0 }
0x17e9   : > { %17603 = vst.msk [vmem:[#allocation3 + $0x71] sm:$0xff] %vm474_vm2, %v17601_v8  ;;  %22066 = vmatmul.mubr.msk.f32.vlgmr.msra.gmra.mrb[54].mxu0 %vm474_vm2, %v18036_v40  ;;  %v22052_v16 = vpop.f32.mrb[53].mxu0  ;;  %v18571_v54 = vadd.f32 %v18569_v28, %v18562_v3 }
0x17ea   : > { %22089 = vmatpush3.msra.mxu0 %v18403_v51  ;;  %22090 = vmatprep.mubr.msk.f32.mxu0 %vm23003_vm14, %v26402_v37 }
0x17eb   : > { %22376 = vmatprep.subr.bf16.mxu0 %v23002_v35 }
0x17ed   : > { %22091 = vmatmul.mubr.msk.f32.vlgmr.msra.gmra.mrb[56].mxu0 %vm17967_vm5, %v23306_v12 }
0x17ee   : > { %22378 = vmatpush3.bf16.msra.mxu0 %v26169_v32  ;;  %22105 = vmatprep.mubr.msk.f32.mxu0 %vm23003_vm14, %v26402_v37 }
0x17ef   : > { %22379 = vmatprep.subr.bf16.mxu0 %v23002_v35 }
0x17f0   : > { %v18572_v14 = vld [vmem:[#allocation3 + $0x70] sm:$0xff]  ;;  %v18573_v49 = vld [vmem:[#allocation3 + $0x78] sm:$0x3] }
0x17f1   : > { %v18574_v24 = vmul.f32 %v18572_v14, %v26095_v26  ;;  %v18576_v62 = vmul.f32 %v18572_v14, %v26086_v0  ;;  %v18577_v4 = vmul.f32 %v18573_v49, %v26086_v0  ;;  %v18585_v59 = vmul.f32 %v18572_v14, %v26100_v5 }
0x17f2   : > { %v18586_v27 = vmul.f32 %v18573_v49, %v26100_v5  ;;  %22381 = vmatpush3.bf16.msra.mxu0 %v26179_v9  ;;  %v18608_v0 = vmul.f32 %v26125_v38, %v18595_v15  ;;  %v18596_v5 = vmul.f32 %v18594_v60, %v26117_v23  ;;  %v18329_v23 = vpop.f32.mrb[72].mxu1 }
0x17f3   : > { %v18575_v33 = vadd.f32 %v18574_v24, %v18571_v54  ;;  %v18580_v57 = vrot.slane %v18576_v62, 1  ;;  %v18581_v10 = vrot.slane %v18577_v4, 1  ;;  %v18589_v34 = vrot.slane %v18585_v59, 2  ;;  %22382 = vmatprep.subr.bf16.mxu0 %v23002_v35 }
0x17f4   : > { %v18590_v50 = vrot.slane %v18586_v27, 2  ;;  %v18612_v41 = vrot.slane %v18608_v0, 2 }
0x17f5   : > { %v18582_v26 = vsel %vm504_vm1, %v18580_v57, %v18581_v10  ;;  %vm18120_vm1 = vcmask 519168  }
0x17f6   : > { %v18584_v18 = vadd.f32 %v18582_v26, %v18575_v33  ;;  %22384 = vmatpush3.bf16.msra.mxu0 %v26228_v45  ;;  %v18591_v52 = vsel %vm706_vm4, %v18589_v34, %v18590_v50  ;;  %v18613_v2 = vsel %vm706_vm4, %v18611_v42, %v18612_v41 }
0x17f8   : > { %v18593_v29 = vadd.f32 %v18591_v52, %v18584_v18 }
0x17fa   : > { %v18597_v44 = vadd.f32 %v18596_v5, %v18593_v29 }
0x17fc   : > { %v18606_v55 = vadd.f32 %v18604_v13, %v18597_v44 }
0x17fe   : > { %v18615_v46 = vadd.f32 %v18613_v2, %v18606_v55 }
0x1800   : > { %v18616_v38 = vadd.f32 %v26136_v39, %v18615_v46 }
0x1802   : > { %v18617_v22 = vmax.f32 %v18616_v38, 0.0 }
0x1804   : > { %22109 = vmatpush3.msra.mxu1 %v18617_v22 }
0x1805   : > { %22111 = vmatmul.mubr.msk.f32.vlgmr.msra.gmra.mrb[74].mxu1 %vm17967_vm5, %v23306_v12  ;;  %22385 = vmatprep.subr.bf16.mxu1 %v23002_v35  ;;  %v19776_v12 = vld [vmem:[%s26384_s10] ss:$0 sm:$0xff] }
0x1806   : > { %22387 = vmatpush3.bf16.msra.mxu1 %v26169_v32  ;;  %22125 = vmatprep.mubr.msk.f32.mxu1 %vm23003_vm14, %v26402_v37  ;;  %v18330_v39 = vadd.f32 %v19776_v12, %v18329_v23  ;;  %v22087_v32 = vpop.f32.mrb[73].mxu1 }
0x1807   : > { %22388 = vmatprep.subr.bf16.mxu1 %v23002_v35 }
0x1808   : > { %v18333_v37 = vmax.f32 %v18330_v39, 0.0 }
0x180a   : > { %22390 = vmatpush3.bf16.msra.mxu1 %v26179_v9  ;;  %19780 = vst.msk [vmem:[%s379_s16 + $0x4] sm:$0xf] %vm18120_vm1, %v18333_v37 }
0x180b   : > { %22391 = vmatprep.subr.bf16.mxu1 %v23002_v35 }
0x180e   : > { %22393 = vmatpush3.bf16.msra.mxu1 %v26228_v45 }
0x18bc   : > { %v18115_v9 = vpop.f32.mrb[54].mxu0 }
0x18bd   : > { %v18116_v25 = vadd.f32 %v19776_v12, %v18115_v9  ;;  %v22067_v35 = vpop.f32.mrb[55].mxu0 }
0x18bf   : > { %v18119_v45 = vmax.f32 %v18116_v25, 0.0 }
0x18c0   : > { %v18470_v56 = vpop.f32.mrb[56].mxu0 }
0x18c1   : > { %18121 = vst.msk [vmem:[%s379_s16] sm:$0xf] %vm18120_vm1, %v18119_v45  ;;  %v22092_v36 = vpop.f32.mrb[57].mxu0  ;;  %22106 = vmatmul.mubr.msk.f32.vlgmr.msra.gmra.mrb[58].mxu0 %vm474_vm2, %v18470_v56 }
0x18d8   : > { %v18684_v19 = vpop.f32.mrb[74].mxu1 }
0x18d9   : > { %v22112_v48 = vpop.f32.mrb[75].mxu1  ;;  %22126 = vmatmul.mubr.msk.f32.vlgmr.msra.gmra.mrb[76].mxu1 %vm474_vm2, %v18684_v19 }
0x1994   : > { %v18543_v61 = vpop.f32.mrb[58].mxu0 }
0x1995   : > { %v18544_v63 = vadd.f32 %v19776_v12, %v18543_v61  ;;  %v22107_v43 = vpop.f32.mrb[59].mxu0 }
0x1997   : > { %v18547_v1 = vmax.f32 %v18544_v63, 0.0 }
0x1999   : > { %19783 = vst.msk [vmem:[%s379_s16 + $0x8] sm:$0xf] %vm18120_vm1, %v18547_v1 }
0x19ac   : > { %v18757_v8 = vpop.f32.mrb[76].mxu1 }
0x19ad   : > { %v18758_v7 = vadd.f32 %v19776_v12, %v18757_v8  ;;  %v22127_v6 = vpop.f32.mrb[77].mxu1 }
0x19af   : > { %v18761_v40 = vmax.f32 %v18758_v7, 0.0 }
0x19b1   : > { %19786 = vst.msk [vmem:[%s379_s16 + $0xc] sm:$0xf] %vm18120_vm1, %v18761_v40 }
0x19b2   : > { %22949 = shalt.err (!%p22946_p3)
}
0x19b3   : > { %s22950_s12 = scalar_lea.hbm %s26328_s30, 256  ;;  %s22954_s29 = scalar_lea.hbm %s26385_s11, 512 }
0x19b4   : > { %p22951_p4 = scmp.ne.s32.totalorder %s26328_s30, %s22950_s12  ;;  %p22955_p9 = scmp.lt.u32.totalorder %s26328_s30, %s26385_s11 }
0x19b5   : > { %p22956_p10 = scmp.lt.u32.totalorder %s22954_s29, %s22950_s12  ;;  %p22958_p12 = scmp.lt.u32.totalorder %s22950_s12, %s26328_s30 }
0x19b6   : > { %p22952_p7 = pnand %p22951_p4, %p23105_p5 }
0x19b7   : > { %p22957_p11 = por %p22956_p10, %p22955_p9 }
0x19b8   : > { %p22953_p8 = pneg %p22952_p7 }
0x19b9   : > { %p22959_p13 = por %p22958_p12, %p22957_p11 }
0x19bb   : > { %p22960_p0 = pnand %p22959_p13, %p22953_p8 }
0x19bd   : > { %22963 = shalt.err (!%p22960_p0)
}
0x19be   : > { %s23005_s0 = smov 64   ;;  %s23006_s14 = smov 4  }
0x19bf   : > { %22874 = dma.vmem_to_hbm [thread:$0]  (%p23105_p5), %s26323_s22, 256, %s26328_s30, %s26333_s13, %s23005_s0, %s23005_s0, %s23006_s14  }
0x19c0 PF: > { %p22880_p1 = scmp.ge.s32.totalorder %s22998_s20, 2  ;;  %s18793_s15 = sand.u32 1, %s22986_s17  }
0x19c1   : > { %s18794_s12 = scalar_lea.sflag [#allocation5], %s18793_s15 }
0x19c2   : > { %p22877_p2 = pnand %p22880_p1, %p23109_p6 }
0x19c4   : > { %22981 = dma.done.wait (!%p22877_p2), %s18794_s12, 256  }
0x19c5   : > { %22983 = vsyncadd (!%p22877_p2), %s18794_s12, 4294967040  ;;  %p21_p3 = scmp.ge.s32.totalorder %s23092_s23, 4   ;;  %s26413_s17 = smov %s22990_s18 }
0x19c6   : > { %s26414_s18 = smov %s22994_s19  ;;  %s26415_s19 = smov %s23103_s26 }
0x19c7   : > { %s26416_s20 = smov %s23092_s23  ;;  %23 = sbr.rel (!%p21_p3) target bundleno = 5 (0x5), region = 156 }
0x19ce   :  { %18799 = vsyncpa [#allocation5], 1 }
0x19cf   :  { %18801 = vsyncpa [#allocation5 + $0x1], 1 }

</bundles_post_ra>
